<compile_context>
chip_gen: v5e
topology: v5e:2x2
jax: 0.10.0
libtpu: 0.0.40
codegen_flags: <defaults>
</compile_context>

<pallas_src>
import functools

import numpy as np
import jax
import jax.numpy as jnp
from jax.experimental import pallas as pl
from jax.experimental.pallas import tpu as pltpu

EPS = 1e-9          # matches model.py EPS
BN_EPS = 1e-5       # torch.nn.BatchNorm2d default eps
RED_DIM = (-1, 256, 4, 2)
FC_K_PAD = 128      # fc GEMM K (68) zero-padded to one aligned MXU pass

# (H_in, W_in, Cin, Cout) of the four ConvTranspose2d layers given fc out (B,256,4,2).
DECONV_LAYERS = {
    1: (4, 2, 256, 128),
    2: (8, 4, 128, 64),
    3: (16, 8, 64, 32),
    4: (32, 16, 32, 3),
}

_VMEM = pl.BlockSpec(memory_space=pltpu.MemorySpace.VMEM)


# ----------------------------- Pallas kernels ------------------------------

def fc_relu_kernel(z_ref, w_ref, b_ref, o_ref):
    # (B, 128) @ (128, 2048) + bias, ReLU.  fc columns are pre-permuted so the
    # output is already the NHWC-flattened (B,4,2,256) hidden map.
    y = jnp.dot(z_ref[...], w_ref[...], preferred_element_type=jnp.float32)
    o_ref[...] = jnp.maximum(y + b_ref[...], 0.0).astype(o_ref.dtype)


def deconv_bn_relu_kernel(p_ref, w_ref, m_ref, e_ref, g_ref, b_ref, o_ref, *,
                          cout, inv_count):
    # Phase GEMM: (M, 4*Cin) @ (4*Cin, 4*Cout); columns ordered (dr, dc, cout).
    acc = jnp.dot(p_ref[...], w_ref[...], preferred_element_type=jnp.float32)
    # (M, 4) phase-validity mask -> (M, 4*Cout) via a tiny 0/1 expansion matmul.
    mfull = jnp.dot(m_ref[...], e_ref[...], preferred_element_type=jnp.float32)
    am = acc * mfull
    # Single-pass batch stats (sum / sum-of-squares) over valid elements; the
    # 4 phase lane-groups are merged per channel with cyclic lane rolls (XLU).
    s1 = jnp.sum(am, axis=0, keepdims=True)              # (1, 4*Cout)
    s2 = jnp.sum(am * acc, axis=0, keepdims=True)        # masked squares
    s1 = (s1 + pltpu.roll(s1, cout, 1) + pltpu.roll(s1, 2 * cout, 1)
          + pltpu.roll(s1, 3 * cout, 1))
    s2 = (s2 + pltpu.roll(s2, cout, 1) + pltpu.roll(s2, 2 * cout, 1)
          + pltpu.roll(s2, 3 * cout, 1))
    mean = s1 * inv_count
    # TODO(synk): single-pass E[x^2]-E[x]^2 can lose precision if activations
    # drift far from zero; a shifted two-pass form would be safer then.
    var = s2 * inv_count - mean * mean
    scale = jax.lax.rsqrt(var + BN_EPS) * g_ref[...]
    y = (acc - mean) * scale + b_ref[...]
    # Zero the out-of-bounds border phases so the wrapper pixel-shuffle yields
    # the next layer's zero-padded input directly.
    o_ref[...] = (jnp.maximum(y, 0.0) * mfull).astype(o_ref.dtype)


def deconv_sigmoid_bce_kernel(pT_ref, wT_ref, e_ref, mT_ref, xT_ref, selT_ref,
                              xhat_ref, loss_ref):
    # Lane-dense transposed GEMM: (4*Cout, 4*Cin) @ (4*Cin, M) -> (12, M).
    acc = jnp.dot(wT_ref[...], pT_ref[...], preferred_element_type=jnp.float32)
    t = jnp.exp(-acc)                               # shared by sigmoid and BCE
    xh = 1.0 / (1.0 + t)
    xhat_ref[...] = xh
    # Bernoulli reconstruction loss from logits: x*(-log xh)+(1-x)*(-log(1-xh))
    #   = acc*(1-x) + log(1+exp(-acc)).  (Logits are small at init; extreme
    #   negative logits would need the |acc|-stabilised form.)
    nll = acc * (1.0 - xT_ref[...]) + jnp.log(1.0 + t)
    # Mask out-of-bounds border phases: (12,4) 0/1 @ (4, M) mask -> (12, M).
    mfull = jnp.dot(e_ref[...], mT_ref[...], preferred_element_type=jnp.float32)
    nll = nll * mfull
    colsum = jnp.sum(nll, axis=0, keepdims=True)                     # (1, M)
    loss_ref[...] = jnp.dot(colsum, selT_ref[...],
                            preferred_element_type=jnp.float32)      # (1, B)


# ----------------------- one-time parameter preprocessing -------------------

def _phase_weight(w):
    """PyTorch ConvTranspose2d weight (Cin, Cout, 4, 4) -> (4*Cin, 4*Cout) f32.

    Row order (u, v, cin) over the 2x2 input window, column order
    (dr, dc, cout) over the 2x2 output phase.  Tap: kh = 2-2u+dr, kw = 2-2v+dc.
    """
    w = np.asarray(w)
    Cin, Cout = w.shape[0], w.shape[1]
    k = np.array([[2, 3], [0, 1]])                        # k[u_or_v, dr_or_dc]
    w6 = w[:, :, k[:, :, None, None], k[None, None, :, :]]  # (Cin,Cout,u,dr,v,dc)
    return w6.transpose(2, 4, 0, 3, 5, 1).reshape(4 * Cin, 4 * Cout)


def _phase_mask4(B, H, W):
    """(B*(H+1)*(W+1), 4) 0/1 validity of the 4 output phases per grid row."""
    p = np.arange(H + 1)[:, None]
    d = np.arange(2)[None, :]
    row_ok = ~(((p == 0) & (d == 0)) | ((p == H) & (d == 1)))    # (H+1, 2) dr
    q = np.arange(W + 1)[:, None]
    col_ok = ~(((q == 0) & (d == 0)) | ((q == W) & (d == 1)))    # (W+1, 2) dc
    m = row_ok[:, None, :, None] & col_ok[None, :, None, :]      # (H+1,W+1,2,2)
    m = m.reshape((H + 1) * (W + 1), 4).astype(np.float32)
    m = np.broadcast_to(m[None], (B, (H + 1) * (W + 1), 4))
    return np.ascontiguousarray(m.reshape(B * (H + 1) * (W + 1), 4))


def prepare_params(params, B):
    """Hoisted preprocessing: done once, not per forward step."""
    prep = {}
    # Fold the NCHW->NHWC permutation of hiddens.view(-1,256,4,2) into the fc
    # weight/bias column order, and zero-pad K 68 -> 128.
    j = np.arange(2048)
    c, hw = j % 256, j // 256
    perm = c * 8 + hw
    fc_w = np.asarray(params['fc_w'])[:, perm]
    fc_wp = np.zeros((FC_K_PAD, 2048), np.float32)
    fc_wp[:fc_w.shape[0]] = fc_w
    prep['fc_w'] = jnp.asarray(fc_wp, jnp.bfloat16)
    prep['fc_b'] = jnp.asarray(
        np.asarray(params['fc_b'])[perm].reshape(1, -1), jnp.float32)

    for i in (1, 2, 3, 4):
        H, W, Cin, Cout = DECONV_LAYERS[i]
        wp = _phase_weight(params[f'w{i}'])
        m4 = _phase_mask4(B, H, W)
        if i < 4:
            prep[f'w{i}'] = jnp.asarray(wp, jnp.bfloat16)
            prep[f'mask{i}'] = jnp.asarray(m4, jnp.bfloat16)          # (M, 4)
            prep[f'expand{i}'] = jnp.asarray(
                np.kron(np.eye(4, dtype=np.float32),
                        np.ones((1, Cout), np.float32)), jnp.bfloat16)  # (4,4C)
            g = np.asarray(params[f'g{i}'])
            b = np.asarray(params[f'b{i}'])
            prep[f'g{i}'] = jnp.asarray(np.tile(g, 4).reshape(1, 4 * Cout),
                                        jnp.float32)
            prep[f'b{i}'] = jnp.asarray(np.tile(b, 4).reshape(1, 4 * Cout),
                                        jnp.float32)
        else:
            # Lane-dense (transposed) layout for the last layer.
            prep['w4T'] = jnp.asarray(wp.T, jnp.bfloat16)            # (12, 128)
            prep['mask4T'] = jnp.asarray(m4.T, jnp.bfloat16)         # (4, M)
            prep['expand4'] = jnp.asarray(
                np.kron(np.eye(4, dtype=np.float32),
                        np.ones((Cout, 1), np.float32)), jnp.bfloat16)  # (12,4)
            PQ = (H + 1) * (W + 1)
            prep['selT'] = jnp.asarray(
                np.kron(np.eye(B, dtype=np.float32),
                        np.ones((PQ, 1), np.float32)), jnp.float32)     # (M, B)
    return prep


# ------------------------------ JAX-side glue -------------------------------

def _phase_to_padded(y, B, H, W, C):
    """(B*(H+1)*(W+1), 4*C) phase output -> (B, 2H+2, 2W+2, C) padded image.

    Border phases are already zero (masked in-kernel), so this IS the next
    layer's zero-padded NHWC input — no jnp.pad / border slice needed.
    """
    y = y.reshape(B, H + 1, W + 1, 2, 2, C)
    y = y.transpose(0, 1, 3, 2, 4, 5).reshape(B, 2 * H + 2, 2 * W + 2, C)
    return y


def _patches(xpad):
    """Padded image (B, H+2, W+2, C) -> (B*(H+1)*(W+1), 4*C) bf16 patch matrix."""
    B, Hp, Wp, C = xpad.shape
    cols = [xpad[:, u:u + Hp - 1, v:v + Wp - 1, :]
            for u in range(2) for v in range(2)]
    pats = jnp.concatenate(cols, axis=-1)
    return pats.reshape(B * (Hp - 1) * (Wp - 1), 4 * C).astype(jnp.bfloat16)


def _target_phaseT(images_nchw, H, W):
    """Images (B,C,2H,2W) -> (4*C, B*(H+1)*(W+1)) targets in last-layer layout."""
    B, C = images_nchw.shape[0], images_nchw.shape[1]
    xi = jnp.pad(images_nchw.transpose(0, 2, 3, 1),
                 ((0, 0), (1, 1), (1, 1), (0, 0)))
    cols = [xi[:, dr::2, dc::2, :] for dr in range(2) for dc in range(2)]
    t = jnp.concatenate(cols, axis=-1).reshape(B * (H + 1) * (W + 1), 4 * C)
    return t.T.astype(jnp.float32)


def deconv_bn_relu(pats, prep, i, B):
    H, W, _, Cout = DECONV_LAYERS[i]
    M = B * (H + 1) * (W + 1)
    out = pl.pallas_call(
        functools.partial(deconv_bn_relu_kernel, cout=Cout,
                          inv_count=1.0 / (B * 4 * H * W)),
        out_shape=jax.ShapeDtypeStruct((M, 4 * Cout), jnp.bfloat16),
        in_specs=[_VMEM] * 6,
        out_specs=_VMEM,
    )(pats, prep[f'w{i}'], prep[f'mask{i}'], prep[f'expand{i}'],
      prep[f'g{i}'], prep[f'b{i}'])
    return _phase_to_padded(out, B, H, W, Cout)


def deconv_sigmoid_bce(padded3, images_nchw, prep, B):
    H, W, _, Cout = DECONV_LAYERS[4]
    M = B * (H + 1) * (W + 1)
    patsT = _patches(padded3).T                                   # (4*Cin, M)
    xT = _target_phaseT(images_nchw, H, W)                        # (12, M)
    xhatT, loss = pl.pallas_call(
        deconv_sigmoid_bce_kernel,
        out_shape=(jax.ShapeDtypeStruct((4 * Cout, M), jnp.float32),
                   jax.ShapeDtypeStruct((1, B), jnp.float32)),
        in_specs=[_VMEM] * 6,
        out_specs=(_VMEM, _VMEM),
    )(patsT, prep['w4T'], prep['expand4'], prep['mask4T'], xT, prep['selT'])
    # (12, M) = (dr,dc,c) x (b,p,q)  ->  NCHW reconstruction.
    xhat = xhatT.reshape(2, 2, Cout, B, H + 1, W + 1)
    xhat = xhat.transpose(3, 2, 4, 0, 5, 1).reshape(
        B, Cout, 2 * H + 2, 2 * W + 2)
    xhat = xhat[:, :, 1:2 * H + 1, 1:2 * W + 1]
    return xhat, loss[0]


@jax.jit
def decoder_forward(zPrivate, zShared, images_nchw, prep):
    """DecoderB decode path + reconstruction-loss term (forward/forward2)."""
    z = jnp.concatenate([zPrivate, zShared], axis=-1)
    B, K = z.shape
    z = jnp.pad(z, ((0, 0), (0, FC_K_PAD - K))).astype(jnp.bfloat16)
    h = pl.pallas_call(
        fc_relu_kernel,
        out_shape=jax.ShapeDtypeStruct((B, 2048), jnp.bfloat16),
        in_specs=[_VMEM] * 3,
        out_specs=_VMEM,
    )(z, prep['fc_w'], prep['fc_b'])
    # fc columns are pre-permuted -> h is already the NHWC (B,4,2,256) map.
    x = jnp.pad(h.reshape(B, 4, 2, 256), ((0, 0), (1, 1), (1, 1), (0, 0)))
    for i in (1, 2, 3):
        x = deconv_bn_relu(_patches(x), prep, i, B)   # padded (B,2H+2,2W+2,C)
    xhat_nchw, loss = deconv_sigmoid_bce(x, images_nchw, prep, B)
    return xhat_nchw, loss


# --------------------------- pure-JAX reference ------------------------------

def _ref_deconv(x, wt):
    w_hwio = jnp.transpose(wt[:, :, ::-1, ::-1], (2, 3, 0, 1))
    return jax.lax.conv_general_dilated(
        x, w_hwio, window_strides=(1, 1), padding=[(2, 2), (2, 2)],
        lhs_dilation=(2, 2), rhs_dilation=(1, 1),
        dimension_numbers=('NHWC', 'HWIO', 'NHWC'))


def _ref_bn_relu(y, g, b):
    mean = y.mean(axis=(0, 1, 2), keepdims=True)
    var = ((y - mean) ** 2).mean(axis=(0, 1, 2), keepdims=True)
    return jnp.maximum((y - mean) * jax.lax.rsqrt(var + BN_EPS) * g + b, 0.0)


def reference_forward(zPrivate, zShared, images_nchw, params):
    z = jnp.concatenate([zPrivate, zShared], axis=-1)
    B = z.shape[0]
    h = jnp.maximum(z @ params['fc_w'] + params['fc_b'], 0.0)
    h = h.reshape(B, 256, 4, 2).transpose(0, 2, 3, 1)
    for i in (1, 2, 3):
        h = _ref_bn_relu(_ref_deconv(h, params[f'w{i}']),
                         params[f'g{i}'], params[f'b{i}'])
    xhat = jax.nn.sigmoid(_ref_deconv(h, params['w4']))
    xhat_nchw = xhat.transpose(0, 3, 1, 2)
    xf = xhat_nchw.reshape(B, -1)
    imf = images_nchw.reshape(B, -1)
    loss = -(jnp.log(xf + EPS) * imf
             + jnp.log(1.0 - xf + EPS) * (1.0 - imf)).sum(-1)
    return xhat_nchw, loss


# --------------------------------- main --------------------------------------

if __name__ == "__main__":
    key = jax.random.PRNGKey(0)
    keys = jax.random.split(key, 10)
    B, zP, zS = 2, 50, 18     # defaults: zPrivate_dim=50, zShared_dim=18

    def kaiming(k, shape, fan_in):
        return (jax.random.normal(k, shape) * np.sqrt(2.0 / fan_in)).astype(jnp.float32)

    params = {
        # nn.Linear(68, 2048) stored as (in, out); bias zero (kaiming_init)
        'fc_w': kaiming(keys[0], (zP + zS, 2048), zP + zS),
        'fc_b': jnp.zeros((2048,), jnp.float32),
        # ConvTranspose2d weights in PyTorch layout (Cin, Cout, kH, kW), bias=False
        'w1': kaiming(keys[1], (256, 128, 4, 4), 128 * 16),
        'w2': kaiming(keys[2], (128, 64, 4, 4), 64 * 16),
        'w3': kaiming(keys[3], (64, 32, 4, 4), 32 * 16),
        'w4': kaiming(keys[4], (32, 3, 4, 4), 3 * 16),
        # BatchNorm2d affine params (kaiming_init: weight=1, bias=0)
        'g1': jnp.ones((128,), jnp.float32), 'b1': jnp.zeros((128,), jnp.float32),
        'g2': jnp.ones((64,), jnp.float32), 'b2': jnp.zeros((64,), jnp.float32),
        'g3': jnp.ones((32,), jnp.float32), 'b3': jnp.zeros((32,), jnp.float32),
    }
    prep = prepare_params(params, B)

    zPrivate = jax.random.normal(keys[5], (B, zP), jnp.float32)
    zShared = jax.random.normal(keys[6], (B, zS), jnp.float32)
    images = jax.random.uniform(keys[7], (B, 3, 64, 32), dtype=jnp.float32)

    images_mean, loss = decoder_forward(zPrivate, zShared, images, prep)
    jax.block_until_ready((images_mean, loss))

    assert images_mean.shape == (B, 3, 64, 32)
    assert loss.shape == (B,)

    ref_mean, ref_loss = reference_forward(zPrivate, zShared, images, params)
    # bf16 GEMM inputs (f32 accumulation) -> slightly relaxed tolerances.
    np.testing.assert_allclose(np.asarray(images_mean), np.asarray(ref_mean),
                               atol=2e-2, rtol=1e-2)
    np.testing.assert_allclose(np.asarray(loss), np.asarray(ref_loss), rtol=2e-2)

    print("KERNEL_OK")
</pallas_src>

<mosaic_0001>
module attributes {stable_mosaic.version = 11 : i64} {
  func.func @fc_relu_kernel(%arg0: memref<2x128xbf16, #tpu.memory_space<vmem>>, %arg1: memref<128x2048xbf16, #tpu.memory_space<vmem>>, %arg2: memref<1x2048xf32, #tpu.memory_space<vmem>>, %arg3: memref<2x2048xbf16, #tpu.memory_space<vmem>>) attributes {dimension_semantics = [], scalar_prefetch = 0 : i64, scratch_operands = 0 : i64, tpu.core_type = #tpu.core_type<tc>} {
    %c0 = arith.constant 0 : index
    %c0_0 = arith.constant 0 : index
    %0 = vector.load %arg0[%c0, %c0_0] : memref<2x128xbf16, #tpu.memory_space<vmem>>, vector<2x128xbf16>
    %c0_1 = arith.constant 0 : index
    %c0_2 = arith.constant 0 : index
    %1 = vector.load %arg1[%c0_1, %c0_2] : memref<128x2048xbf16, #tpu.memory_space<vmem>>, vector<128x2048xbf16>
    %cst = arith.constant dense<0.000000e+00> : vector<2x2048xf32>
    %2 = tpu.matmul %0, %1, %cst {dimension_numbers = #tpu.dot_dimension_numbers<[1], [0], [0], [1], [0, 0, 1, 1], [], []>} : vector<2x128xbf16>, vector<128x2048xbf16>, vector<2x2048xf32> -> vector<2x2048xf32>
    %c0_3 = arith.constant 0 : index
    %c0_4 = arith.constant 0 : index
    %3 = vector.load %arg2[%c0_3, %c0_4] : memref<1x2048xf32, #tpu.memory_space<vmem>>, vector<1x2048xf32>
    %4 = vector.broadcast %3 : vector<1x2048xf32> to vector<2x2048xf32>
    %5 = arith.addf %2, %4 : vector<2x2048xf32>
    %cst_5 = arith.constant 0.000000e+00 : f32
    %6 = vector.broadcast %cst_5 : f32 to vector<2x2048xf32>
    %7 = arith.maximumf %5, %6 : vector<2x2048xf32>
    %8 = arith.truncf %7 : vector<2x2048xf32> to vector<2x2048xbf16>
    %c0_6 = arith.constant 0 : index
    %c0_7 = arith.constant 0 : index
    %9 = vector.load %arg3[%c0_6, %c0_7] : memref<2x2048xbf16, #tpu.memory_space<vmem>>, vector<2x2048xbf16>
    tpu.vector_store %arg3[%c0_6, %c0_7], %8 {strides = array<i32>} : memref<2x2048xbf16, #tpu.memory_space<vmem>>, vector<2x2048xbf16>,
    return
  }
}

module attributes {stable_mosaic.version = 11 : i64} {
  func.func @deconv_bn_relu_kernel(%arg0: memref<30x1024xbf16, #tpu.memory_space<vmem>>, %arg1: memref<1024x512xbf16, #tpu.memory_space<vmem>>, %arg2: memref<30x4xbf16, #tpu.memory_space<vmem>>, %arg3: memref<4x512xbf16, #tpu.memory_space<vmem>>, %arg4: memref<1x512xf32, #tpu.memory_space<vmem>>, %arg5: memref<1x512xf32, #tpu.memory_space<vmem>>, %arg6: memref<30x512xbf16, #tpu.memory_space<vmem>>) attributes {dimension_semantics = [], scalar_prefetch = 0 : i64, scratch_operands = 0 : i64, tpu.core_type = #tpu.core_type<tc>} {
    %c0 = arith.constant 0 : index
    %c0_0 = arith.constant 0 : index
    %0 = vector.load %arg0[%c0, %c0_0] : memref<30x1024xbf16, #tpu.memory_space<vmem>>, vector<30x1024xbf16>
    %c0_1 = arith.constant 0 : index
    %c0_2 = arith.constant 0 : index
    %1 = vector.load %arg1[%c0_1, %c0_2] : memref<1024x512xbf16, #tpu.memory_space<vmem>>, vector<1024x512xbf16>
    %cst = arith.constant dense<0.000000e+00> : vector<30x512xf32>
    %2 = tpu.matmul %0, %1, %cst {dimension_numbers = #tpu.dot_dimension_numbers<[1], [0], [0], [1], [0, 0, 1, 1], [], []>} : vector<30x1024xbf16>, vector<1024x512xbf16>, vector<30x512xf32> -> vector<30x512xf32>
    %c0_3 = arith.constant 0 : index
    %c0_4 = arith.constant 0 : index
    %3 = vector.load %arg2[%c0_3, %c0_4] : memref<30x4xbf16, #tpu.memory_space<vmem>>, vector<30x4xbf16>
    %c0_5 = arith.constant 0 : index
    %c0_6 = arith.constant 0 : index
    %4 = vector.load %arg3[%c0_5, %c0_6] : memref<4x512xbf16, #tpu.memory_space<vmem>>, vector<4x512xbf16>
    %cst_7 = arith.constant dense<0.000000e+00> : vector<30x512xf32>
    %5 = tpu.matmul %3, %4, %cst_7 {dimension_numbers = #tpu.dot_dimension_numbers<[1], [0], [0], [1], [0, 0, 1, 1], [], []>} : vector<30x4xbf16>, vector<4x512xbf16>, vector<30x512xf32> -> vector<30x512xf32>
    %6 = arith.mulf %2, %5 : vector<30x512xf32>
    %cst_8 = arith.constant dense<0.000000e+00> : vector<512xf32>
    %7 = vector.multi_reduction <add>, %6, %cst_8 [0] : vector<30x512xf32> to vector<512xf32>
    %8 = vector.shape_cast %7 : vector<512xf32> to vector<1x512xf32>
    %9 = arith.mulf %6, %2 : vector<30x512xf32>
    %cst_9 = arith.constant dense<0.000000e+00> : vector<512xf32>
    %10 = vector.multi_reduction <add>, %9, %cst_9 [0] : vector<30x512xf32> to vector<512xf32>
    %11 = vector.shape_cast %10 : vector<512xf32> to vector<1x512xf32>
    %c128_i32 = arith.constant 128 : i32
    %12 = tpu.dynamic_rotate %8 by %c128_i32 dim 1 : vector<1x512xf32>, i32 -> vector<1x512xf32>
    %13 = arith.addf %8, %12 : vector<1x512xf32>
    %c256_i32 = arith.constant 256 : i32
    %14 = tpu.dynamic_rotate %8 by %c256_i32 dim 1 : vector<1x512xf32>, i32 -> vector<1x512xf32>
    %15 = arith.addf %13, %14 : vector<1x512xf32>
    %c384_i32 = arith.constant 384 : i32
    %16 = tpu.dynamic_rotate %8 by %c384_i32 dim 1 : vector<1x512xf32>, i32 -> vector<1x512xf32>
    %17 = arith.addf %15, %16 : vector<1x512xf32>
    %c128_i32_10 = arith.constant 128 : i32
    %18 = tpu.dynamic_rotate %11 by %c128_i32_10 dim 1 : vector<1x512xf32>, i32 -> vector<1x512xf32>
    %19 = arith.addf %11, %18 : vector<1x512xf32>
    %c256_i32_11 = arith.constant 256 : i32
    %20 = tpu.dynamic_rotate %11 by %c256_i32_11 dim 1 : vector<1x512xf32>, i32 -> vector<1x512xf32>
    %21 = arith.addf %19, %20 : vector<1x512xf32>
    %c384_i32_12 = arith.constant 384 : i32
    %22 = tpu.dynamic_rotate %11 by %c384_i32_12 dim 1 : vector<1x512xf32>, i32 -> vector<1x512xf32>
    %23 = arith.addf %21, %22 : vector<1x512xf32>
    %cst_13 = arith.constant 1.562500e-02 : f32
    %24 = vector.broadcast %cst_13 : f32 to vector<1x512xf32>
    %25 = arith.mulf %17, %24 : vector<1x512xf32>
    %cst_14 = arith.constant 1.562500e-02 : f32
    %26 = vector.broadcast %cst_14 : f32 to vector<1x512xf32>
    %27 = arith.mulf %23, %26 : vector<1x512xf32>
    %28 = arith.mulf %25, %25 : vector<1x512xf32>
    %29 = arith.subf %27, %28 : vector<1x512xf32>
    %cst_15 = arith.constant 9.99999974E-6 : f32
    %30 = vector.broadcast %cst_15 : f32 to vector<1x512xf32>
    %31 = arith.addf %29, %30 : vector<1x512xf32>
    %32 = math.rsqrt %31 : vector<1x512xf32>
    %c0_16 = arith.constant 0 : index
    %c0_17 = arith.constant 0 : index
    %33 = vector.load %arg4[%c0_16, %c0_17] : memref<1x512xf32, #tpu.memory_space<vmem>>, vector<1x512xf32>
    %34 = arith.mulf %32, %33 : vector<1x512xf32>
    %35 = vector.broadcast %25 : vector<1x512xf32> to vector<30x512xf32>
    %36 = arith.subf %2, %35 : vector<30x512xf32>
    %37 = vector.broadcast %34 : vector<1x512xf32> to vector<30x512xf32>
    %38 = arith.mulf %36, %37 : vector<30x512xf32>
    %c0_18 = arith.constant 0 : index
    %c0_19 = arith.constant 0 : index
    %39 = vector.load %arg5[%c0_18, %c0_19] : memref<1x512xf32, #tpu.memory_space<vmem>>, vector<1x512xf32>
    %40 = vector.broadcast %39 : vector<1x512xf32> to vector<30x512xf32>
    %41 = arith.addf %38, %40 : vector<30x512xf32>
    %cst_20 = arith.constant 0.000000e+00 : f32
    %42 = vector.broadcast %cst_20 : f32 to vector<30x512xf32>
    %43 = arith.maximumf %41, %42 : vector<30x512xf32>
    %44 = arith.mulf %43, %5 : vector<30x512xf32>
    %45 = arith.truncf %44 : vector<30x512xf32> to vector<30x512xbf16>
    %c0_21 = arith.constant 0 : index
    %c0_22 = arith.constant 0 : index
    %46 = vector.load %arg6[%c0_21, %c0_22] : memref<30x512xbf16, #tpu.memory_space<vmem>>, vector<30x512xbf16>
    tpu.vector_store %arg6[%c0_21, %c0_22], %45 {strides = array<i32>} : memref<30x512xbf16, #tpu.memory_space<vmem>>, vector<30x512xbf16>,
    return
  }
}

module attributes {stable_mosaic.version = 11 : i64} {
  func.func @deconv_bn_relu_kernel(%arg0: memref<90x512xbf16, #tpu.memory_space<vmem>>, %arg1: memref<512x256xbf16, #tpu.memory_space<vmem>>, %arg2: memref<90x4xbf16, #tpu.memory_space<vmem>>, %arg3: memref<4x256xbf16, #tpu.memory_space<vmem>>, %arg4: memref<1x256xf32, #tpu.memory_space<vmem>>, %arg5: memref<1x256xf32, #tpu.memory_space<vmem>>, %arg6: memref<90x256xbf16, #tpu.memory_space<vmem>>) attributes {dimension_semantics = [], scalar_prefetch = 0 : i64, scratch_operands = 0 : i64, tpu.core_type = #tpu.core_type<tc>} {
    %c0 = arith.constant 0 : index
    %c0_0 = arith.constant 0 : index
    %0 = vector.load %arg0[%c0, %c0_0] : memref<90x512xbf16, #tpu.memory_space<vmem>>, vector<90x512xbf16>
    %c0_1 = arith.constant 0 : index
    %c0_2 = arith.constant 0 : index
    %1 = vector.load %arg1[%c0_1, %c0_2] : memref<512x256xbf16, #tpu.memory_space<vmem>>, vector<512x256xbf16>
    %cst = arith.constant dense<0.000000e+00> : vector<90x256xf32>
    %2 = tpu.matmul %0, %1, %cst {dimension_numbers = #tpu.dot_dimension_numbers<[1], [0], [0], [1], [0, 0, 1, 1], [], []>} : vector<90x512xbf16>, vector<512x256xbf16>, vector<90x256xf32> -> vector<90x256xf32>
    %c0_3 = arith.constant 0 : index
    %c0_4 = arith.constant 0 : index
    %3 = vector.load %arg2[%c0_3, %c0_4] : memref<90x4xbf16, #tpu.memory_space<vmem>>, vector<90x4xbf16>
    %c0_5 = arith.constant 0 : index
    %c0_6 = arith.constant 0 : index
    %4 = vector.load %arg3[%c0_5, %c0_6] : memref<4x256xbf16, #tpu.memory_space<vmem>>, vector<4x256xbf16>
    %cst_7 = arith.constant dense<0.000000e+00> : vector<90x256xf32>
    %5 = tpu.matmul %3, %4, %cst_7 {dimension_numbers = #tpu.dot_dimension_numbers<[1], [0], [0], [1], [0, 0, 1, 1], [], []>} : vector<90x4xbf16>, vector<4x256xbf16>, vector<90x256xf32> -> vector<90x256xf32>
    %6 = arith.mulf %2, %5 : vector<90x256xf32>
    %cst_8 = arith.constant dense<0.000000e+00> : vector<256xf32>
    %7 = vector.multi_reduction <add>, %6, %cst_8 [0] : vector<90x256xf32> to vector<256xf32>
    %8 = vector.shape_cast %7 : vector<256xf32> to vector<1x256xf32>
    %9 = arith.mulf %6, %2 : vector<90x256xf32>
    %cst_9 = arith.constant dense<0.000000e+00> : vector<256xf32>
    %10 = vector.multi_reduction <add>, %9, %cst_9 [0] : vector<90x256xf32> to vector<256xf32>
    %11 = vector.shape_cast %10 : vector<256xf32> to vector<1x256xf32>
    %c64_i32 = arith.constant 64 : i32
    %12 = tpu.dynamic_rotate %8 by %c64_i32 dim 1 : vector<1x256xf32>, i32 -> vector<1x256xf32>
    %13 = arith.addf %8, %12 : vector<1x256xf32>
    %c128_i32 = arith.constant 128 : i32
    %14 = tpu.dynamic_rotate %8 by %c128_i32 dim 1 : vector<1x256xf32>, i32 -> vector<1x256xf32>
    %15 = arith.addf %13, %14 : vector<1x256xf32>
    %c192_i32 = arith.constant 192 : i32
    %16 = tpu.dynamic_rotate %8 by %c192_i32 dim 1 : vector<1x256xf32>, i32 -> vector<1x256xf32>
    %17 = arith.addf %15, %16 : vector<1x256xf32>
    %c64_i32_10 = arith.constant 64 : i32
    %18 = tpu.dynamic_rotate %11 by %c64_i32_10 dim 1 : vector<1x256xf32>, i32 -> vector<1x256xf32>
    %19 = arith.addf %11, %18 : vector<1x256xf32>
    %c128_i32_11 = arith.constant 128 : i32
    %20 = tpu.dynamic_rotate %11 by %c128_i32_11 dim 1 : vector<1x256xf32>, i32 -> vector<1x256xf32>
    %21 = arith.addf %19, %20 : vector<1x256xf32>
    %c192_i32_12 = arith.constant 192 : i32
    %22 = tpu.dynamic_rotate %11 by %c192_i32_12 dim 1 : vector<1x256xf32>, i32 -> vector<1x256xf32>
    %23 = arith.addf %21, %22 : vector<1x256xf32>
    %cst_13 = arith.constant 3.906250e-03 : f32
    %24 = vector.broadcast %cst_13 : f32 to vector<1x256xf32>
    %25 = arith.mulf %17, %24 : vector<1x256xf32>
    %cst_14 = arith.constant 3.906250e-03 : f32
    %26 = vector.broadcast %cst_14 : f32 to vector<1x256xf32>
    %27 = arith.mulf %23, %26 : vector<1x256xf32>
    %28 = arith.mulf %25, %25 : vector<1x256xf32>
    %29 = arith.subf %27, %28 : vector<1x256xf32>
    %cst_15 = arith.constant 9.99999974E-6 : f32
    %30 = vector.broadcast %cst_15 : f32 to vector<1x256xf32>
    %31 = arith.addf %29, %30 : vector<1x256xf32>
    %32 = math.rsqrt %31 : vector<1x256xf32>
    %c0_16 = arith.constant 0 : index
    %c0_17 = arith.constant 0 : index
    %33 = vector.load %arg4[%c0_16, %c0_17] : memref<1x256xf32, #tpu.memory_space<vmem>>, vector<1x256xf32>
    %34 = arith.mulf %32, %33 : vector<1x256xf32>
    %35 = vector.broadcast %25 : vector<1x256xf32> to vector<90x256xf32>
    %36 = arith.subf %2, %35 : vector<90x256xf32>
    %37 = vector.broadcast %34 : vector<1x256xf32> to vector<90x256xf32>
    %38 = arith.mulf %36, %37 : vector<90x256xf32>
    %c0_18 = arith.constant 0 : index
    %c0_19 = arith.constant 0 : index
    %39 = vector.load %arg5[%c0_18, %c0_19] : memref<1x256xf32, #tpu.memory_space<vmem>>, vector<1x256xf32>
    %40 = vector.broadcast %39 : vector<1x256xf32> to vector<90x256xf32>
    %41 = arith.addf %38, %40 : vector<90x256xf32>
    %cst_20 = arith.constant 0.000000e+00 : f32
    %42 = vector.broadcast %cst_20 : f32 to vector<90x256xf32>
    %43 = arith.maximumf %41, %42 : vector<90x256xf32>
    %44 = arith.mulf %43, %5 : vector<90x256xf32>
    %45 = arith.truncf %44 : vector<90x256xf32> to vector<90x256xbf16>
    %c0_21 = arith.constant 0 : index
    %c0_22 = arith.constant 0 : index
    %46 = vector.load %arg6[%c0_21, %c0_22] : memref<90x256xbf16, #tpu.memory_space<vmem>>, vector<90x256xbf16>
    tpu.vector_store %arg6[%c0_21, %c0_22], %45 {strides = array<i32>} : memref<90x256xbf16, #tpu.memory_space<vmem>>, vector<90x256xbf16>,
    return
  }
}

module attributes {stable_mosaic.version = 11 : i64} {
  func.func @deconv_bn_relu_kernel(%arg0: memref<306x256xbf16, #tpu.memory_space<vmem>>, %arg1: memref<256x128xbf16, #tpu.memory_space<vmem>>, %arg2: memref<306x4xbf16, #tpu.memory_space<vmem>>, %arg3: memref<4x128xbf16, #tpu.memory_space<vmem>>, %arg4: memref<1x128xf32, #tpu.memory_space<vmem>>, %arg5: memref<1x128xf32, #tpu.memory_space<vmem>>, %arg6: memref<306x128xbf16, #tpu.memory_space<vmem>>) attributes {dimension_semantics = [], scalar_prefetch = 0 : i64, scratch_operands = 0 : i64, tpu.core_type = #tpu.core_type<tc>} {
    %c0 = arith.constant 0 : index
    %c0_0 = arith.constant 0 : index
    %0 = vector.load %arg0[%c0, %c0_0] : memref<306x256xbf16, #tpu.memory_space<vmem>>, vector<306x256xbf16>
    %c0_1 = arith.constant 0 : index
    %c0_2 = arith.constant 0 : index
    %1 = vector.load %arg1[%c0_1, %c0_2] : memref<256x128xbf16, #tpu.memory_space<vmem>>, vector<256x128xbf16>
    %cst = arith.constant dense<0.000000e+00> : vector<306x128xf32>
    %2 = tpu.matmul %0, %1, %cst {dimension_numbers = #tpu.dot_dimension_numbers<[1], [0], [0], [1], [0, 0, 1, 1], [], []>} : vector<306x256xbf16>, vector<256x128xbf16>, vector<306x128xf32> -> vector<306x128xf32>
    %c0_3 = arith.constant 0 : index
    %c0_4 = arith.constant 0 : index
    %3 = vector.load %arg2[%c0_3, %c0_4] : memref<306x4xbf16, #tpu.memory_space<vmem>>, vector<306x4xbf16>
    %c0_5 = arith.constant 0 : index
    %c0_6 = arith.constant 0 : index
    %4 = vector.load %arg3[%c0_5, %c0_6] : memref<4x128xbf16, #tpu.memory_space<vmem>>, vector<4x128xbf16>
    %cst_7 = arith.constant dense<0.000000e+00> : vector<306x128xf32>
    %5 = tpu.matmul %3, %4, %cst_7 {dimension_numbers = #tpu.dot_dimension_numbers<[1], [0], [0], [1], [0, 0, 1, 1], [], []>} : vector<306x4xbf16>, vector<4x128xbf16>, vector<306x128xf32> -> vector<306x128xf32>
    %6 = arith.mulf %2, %5 : vector<306x128xf32>
    %cst_8 = arith.constant dense<0.000000e+00> : vector<128xf32>
    %7 = vector.multi_reduction <add>, %6, %cst_8 [0] : vector<306x128xf32> to vector<128xf32>
    %8 = vector.shape_cast %7 : vector<128xf32> to vector<1x128xf32>
    %9 = arith.mulf %6, %2 : vector<306x128xf32>
    %cst_9 = arith.constant dense<0.000000e+00> : vector<128xf32>
    %10 = vector.multi_reduction <add>, %9, %cst_9 [0] : vector<306x128xf32> to vector<128xf32>
    %11 = vector.shape_cast %10 : vector<128xf32> to vector<1x128xf32>
    %c32_i32 = arith.constant 32 : i32
    %12 = tpu.dynamic_rotate %8 by %c32_i32 dim 1 : vector<1x128xf32>, i32 -> vector<1x128xf32>
    %13 = arith.addf %8, %12 : vector<1x128xf32>
    %c64_i32 = arith.constant 64 : i32
    %14 = tpu.dynamic_rotate %8 by %c64_i32 dim 1 : vector<1x128xf32>, i32 -> vector<1x128xf32>
    %15 = arith.addf %13, %14 : vector<1x128xf32>
    %c96_i32 = arith.constant 96 : i32
    %16 = tpu.dynamic_rotate %8 by %c96_i32 dim 1 : vector<1x128xf32>, i32 -> vector<1x128xf32>
    %17 = arith.addf %15, %16 : vector<1x128xf32>
    %c32_i32_10 = arith.constant 32 : i32
    %18 = tpu.dynamic_rotate %11 by %c32_i32_10 dim 1 : vector<1x128xf32>, i32 -> vector<1x128xf32>
    %19 = arith.addf %11, %18 : vector<1x128xf32>
    %c64_i32_11 = arith.constant 64 : i32
    %20 = tpu.dynamic_rotate %11 by %c64_i32_11 dim 1 : vector<1x128xf32>, i32 -> vector<1x128xf32>
    %21 = arith.addf %19, %20 : vector<1x128xf32>
    %c96_i32_12 = arith.constant 96 : i32
    %22 = tpu.dynamic_rotate %11 by %c96_i32_12 dim 1 : vector<1x128xf32>, i32 -> vector<1x128xf32>
    %23 = arith.addf %21, %22 : vector<1x128xf32>
    %cst_13 = arith.constant 9.765625E-4 : f32
    %24 = vector.broadcast %cst_13 : f32 to vector<1x128xf32>
    %25 = arith.mulf %17, %24 : vector<1x128xf32>
    %cst_14 = arith.constant 9.765625E-4 : f32
    %26 = vector.broadcast %cst_14 : f32 to vector<1x128xf32>
    %27 = arith.mulf %23, %26 : vector<1x128xf32>
    %28 = arith.mulf %25, %25 : vector<1x128xf32>
    %29 = arith.subf %27, %28 : vector<1x128xf32>
    %cst_15 = arith.constant 9.99999974E-6 : f32
    %30 = vector.broadcast %cst_15 : f32 to vector<1x128xf32>
    %31 = arith.addf %29, %30 : vector<1x128xf32>
    %32 = math.rsqrt %31 : vector<1x128xf32>
    %c0_16 = arith.constant 0 : index
    %c0_17 = arith.constant 0 : index
    %33 = vector.load %arg4[%c0_16, %c0_17] : memref<1x128xf32, #tpu.memory_space<vmem>>, vector<1x128xf32>
    %34 = arith.mulf %32, %33 : vector<1x128xf32>
    %35 = vector.broadcast %25 : vector<1x128xf32> to vector<306x128xf32>
    %36 = arith.subf %2, %35 : vector<306x128xf32>
    %37 = vector.broadcast %34 : vector<1x128xf32> to vector<306x128xf32>
    %38 = arith.mulf %36, %37 : vector<306x128xf32>
    %c0_18 = arith.constant 0 : index
    %c0_19 = arith.constant 0 : index
    %39 = vector.load %arg5[%c0_18, %c0_19] : memref<1x128xf32, #tpu.memory_space<vmem>>, vector<1x128xf32>
    %40 = vector.broadcast %39 : vector<1x128xf32> to vector<306x128xf32>
    %41 = arith.addf %38, %40 : vector<306x128xf32>
    %cst_20 = arith.constant 0.000000e+00 : f32
    %42 = vector.broadcast %cst_20 : f32 to vector<306x128xf32>
    %43 = arith.maximumf %41, %42 : vector<306x128xf32>
    %44 = arith.mulf %43, %5 : vector<306x128xf32>
    %45 = arith.truncf %44 : vector<306x128xf32> to vector<306x128xbf16>
    %c0_21 = arith.constant 0 : index
    %c0_22 = arith.constant 0 : index
    %46 = vector.load %arg6[%c0_21, %c0_22] : memref<306x128xbf16, #tpu.memory_space<vmem>>, vector<306x128xbf16>
    tpu.vector_store %arg6[%c0_21, %c0_22], %45 {strides = array<i32>} : memref<306x128xbf16, #tpu.memory_space<vmem>>, vector<306x128xbf16>,
    return
  }
}

module attributes {stable_mosaic.version = 11 : i64} {
  func.func @deconv_sigmoid_bce_kernel(%arg0: memref<128x1122xbf16, #tpu.memory_space<vmem>>, %arg1: memref<12x128xbf16, #tpu.memory_space<vmem>>, %arg2: memref<12x4xbf16, #tpu.memory_space<vmem>>, %arg3: memref<4x1122xbf16, #tpu.memory_space<vmem>>, %arg4: memref<12x1122xf32, #tpu.memory_space<vmem>>, %arg5: memref<1122x2xf32, #tpu.memory_space<vmem>>, %arg6: memref<12x1122xf32, #tpu.memory_space<vmem>>, %arg7: memref<1x2xf32, #tpu.memory_space<vmem>>) attributes {dimension_semantics = [], scalar_prefetch = 0 : i64, scratch_operands = 0 : i64, tpu.core_type = #tpu.core_type<tc>} {
    %c0 = arith.constant 0 : index
    %c0_0 = arith.constant 0 : index
    %0 = vector.load %arg1[%c0, %c0_0] : memref<12x128xbf16, #tpu.memory_space<vmem>>, vector<12x128xbf16>
    %c0_1 = arith.constant 0 : index
    %c0_2 = arith.constant 0 : index
    %1 = vector.load %arg0[%c0_1, %c0_2] : memref<128x1122xbf16, #tpu.memory_space<vmem>>, vector<128x1122xbf16>
    %cst = arith.constant dense<0.000000e+00> : vector<12x1122xf32>
    %2 = tpu.matmul %0, %1, %cst {dimension_numbers = #tpu.dot_dimension_numbers<[1], [0], [0], [1], [0, 0, 1, 1], [], []>} : vector<12x128xbf16>, vector<128x1122xbf16>, vector<12x1122xf32> -> vector<12x1122xf32>
    %cst_3 = arith.constant 0.000000e+00 : f32
    %3 = vector.broadcast %cst_3 : f32 to vector<12x1122xf32>
    %4 = arith.subf %3, %2 : vector<12x1122xf32>
    %5 = math.exp %4 : vector<12x1122xf32>
    %cst_4 = arith.constant 1.000000e+00 : f32
    %6 = vector.broadcast %cst_4 : f32 to vector<12x1122xf32>
    %7 = arith.addf %6, %5 : vector<12x1122xf32>
    %cst_5 = arith.constant 1.000000e+00 : f32
    %8 = vector.broadcast %cst_5 : f32 to vector<12x1122xf32>
    %9 = arith.divf %8, %7 : vector<12x1122xf32>
    %c0_6 = arith.constant 0 : index
    %c0_7 = arith.constant 0 : index
    %10 = vector.load %arg6[%c0_6, %c0_7] : memref<12x1122xf32, #tpu.memory_space<vmem>>, vector<12x1122xf32>
    tpu.vector_store %arg6[%c0_6, %c0_7], %9 {strides = array<i32>} : memref<12x1122xf32, #tpu.memory_space<vmem>>, vector<12x1122xf32>,
    %c0_8 = arith.constant 0 : index
    %c0_9 = arith.constant 0 : index
    %11 = vector.load %arg4[%c0_8, %c0_9] : memref<12x1122xf32, #tpu.memory_space<vmem>>, vector<12x1122xf32>
    %cst_10 = arith.constant 1.000000e+00 : f32
    %12 = vector.broadcast %cst_10 : f32 to vector<12x1122xf32>
    %13 = arith.subf %12, %11 : vector<12x1122xf32>
    %14 = arith.mulf %2, %13 : vector<12x1122xf32>
    %cst_11 = arith.constant 1.000000e+00 : f32
    %15 = vector.broadcast %cst_11 : f32 to vector<12x1122xf32>
    %16 = arith.addf %15, %5 : vector<12x1122xf32>
    %17 = math.log %16 : vector<12x1122xf32>
    %18 = arith.addf %14, %17 : vector<12x1122xf32>
    %c0_12 = arith.constant 0 : index
    %c0_13 = arith.constant 0 : index
    %19 = vector.load %arg2[%c0_12, %c0_13] : memref<12x4xbf16, #tpu.memory_space<vmem>>, vector<12x4xbf16>
    %c0_14 = arith.constant 0 : index
    %c0_15 = arith.constant 0 : index
    %20 = vector.load %arg3[%c0_14, %c0_15] : memref<4x1122xbf16, #tpu.memory_space<vmem>>, vector<4x1122xbf16>
    %cst_16 = arith.constant dense<0.000000e+00> : vector<12x1122xf32>
    %21 = tpu.matmul %19, %20, %cst_16 {dimension_numbers = #tpu.dot_dimension_numbers<[1], [0], [0], [1], [0, 0, 1, 1], [], []>} : vector<12x4xbf16>, vector<4x1122xbf16>, vector<12x1122xf32> -> vector<12x1122xf32>
    %22 = arith.mulf %18, %21 : vector<12x1122xf32>
    %cst_17 = arith.constant dense<0.000000e+00> : vector<1122xf32>
    %23 = vector.multi_reduction <add>, %22, %cst_17 [0] : vector<12x1122xf32> to vector<1122xf32>
    %24 = vector.shape_cast %23 : vector<1122xf32> to vector<1x1122xf32>
    %c0_18 = arith.constant 0 : index
    %c0_19 = arith.constant 0 : index
    %25 = vector.load %arg5[%c0_18, %c0_19] : memref<1122x2xf32, #tpu.memory_space<vmem>>, vector<1122x2xf32>
    %cst_20 = arith.constant dense<0.000000e+00> : vector<1x2xf32>
    %26 = tpu.matmul %24, %25, %cst_20 {dimension_numbers = #tpu.dot_dimension_numbers<[1], [0], [0], [1], [0, 0, 1, 1], [], []>} : vector<1x1122xf32>, vector<1122x2xf32>, vector<1x2xf32> -> vector<1x2xf32>
    %c0_21 = arith.constant 0 : index
    %c0_22 = arith.constant 0 : index
    %27 = vector.load %arg7[%c0_21, %c0_22] : memref<1x2xf32, #tpu.memory_space<vmem>>, vector<1x2xf32>
    tpu.vector_store %arg7[%c0_21, %c0_22], %26 {strides = array<i32>} : memref<1x2xf32, #tpu.memory_space<vmem>>, vector<1x2xf32>,
    return
  }
}

</mosaic_0001>

<bundles_post_ra>
// kernel: decoder_forward.5
= control target key start
LH: loop header
LB: loop body
LE: loop exit
PB: predicated region body
PF: predicated region fallthrough
CT: control target
= control target key end

     0   :  { %8 = vsyncpa [#allocation3], 0  ;;  %s1917_s0 = inlined_call_operand.vmem [shape: bf16[2,128], index: 0, kind: input, shape index: {}]   ;;  %s1918_s1 = inlined_call_operand.hbm [shape: bf16[128,2048], index: 1, kind: input, shape index: {}]   ;;  %s1919_s2 = inlined_call_operand.hbm [shape: f32[1,2048], index: 2, kind: input, shape index: {}]   ;;  %s1920_s3 = inlined_call_operand.vmem [shape: bf16[2,2048], index: 3, kind: output, shape index: {}]  }
   0x1   :  { %s16_s14 = sshll.u32 %s1918_s1, 4  ;;  %s17_s14 = int_to_ptr.hbm [resolvable:$true] %s16_s14 }
   0x2   :  { %9 = vsyncpa [#allocation5], 0  ;;  %s1846_s15 = smov [#allocation2]   ;;  %s30_s19 = sshll.u32 %s1919_s2, 4  ;;  %s31_s19 = int_to_ptr.hbm [resolvable:$true] %s30_s19 }
   0x3   :  { %s18_s16 = sshll.u32 %s1846_s15, 4  ;;  %s1847_s20 = smov 1024   ;;  %s19_s16 = int_to_ptr.vmem [resolvable:$true] %s18_s16 }
   0x4   :  { %s1848_s21 = smov 64   ;;  %s1849_s22 = smov [#allocation4]  }
   0x5   :  { %24 = dma.hbm_to_vmem [thread:$0]  %s17_s14, 16384, %s19_s16, [#allocation3], %s1847_s20, %s1847_s20, %s1848_s21  }
   0x6   :  { %s32_s23 = sshll.u32 %s1849_s22, 4  ;;  %s33_s23 = int_to_ptr.vmem [resolvable:$true] %s32_s23 }
   0x7   :  { %35 = dma.hbm_to_vmem [thread:$0]  %s31_s19, 256, %s33_s23, [#allocation5]  }
   0x8   :  { %1842 = dma.done.wait [#allocation3], 16384  }
   0x9   :  { %1843 = vsyncadd [#allocation3], 4294950912 }
   0xa   :  { %1844 = dma.done.wait [#allocation5], 256  }
   0xb   :  { %1845 = vsyncadd [#allocation5], 4294967040  ;;  %v1600_v0 = vld [vmem:[#allocation2 + $0x380] sm:$0xf]  ;;  %v1774_v2 = vld [vmem:[#allocation2 + $0x384] sm:$0xf] }
   0xc   :  { %v1782_v1 = vld [vmem:[#allocation2 + $0x3bc] sm:$0xf0]  ;;  %v1602_v4 = vld [vmem:[#allocation2 + $0x3c0] sm:$0xf0]  ;;  %v1608_v5 = vld [vmem:[#allocation2 + $0x388] sm:$0xf] }
   0xd   :  { %v1601_v3 = vor.u32 %v1782_v1, %v1600_v0  ;;  %v1783_v6 = vld [vmem:[#allocation2 + $0x3c4] sm:$0xf0]  ;;  %v1605_v7 = vor.u32 %v1774_v2, %v1602_v4  ;;  %v1775_v9 = vld [vmem:[#allocation2 + $0x38c] sm:$0xf]  ;;  %v1536_v11 = vld [vmem:[#allocation2 + $0x300] sm:$0xf] }
   0xe   :  { %v1609_v8 = vor.u32 %v1783_v6, %v1608_v5  ;;  %v1610_v10 = vld [vmem:[#allocation2 + $0x3c8] sm:$0xf0]  ;;  %v1766_v13 = vld [vmem:[#allocation2 + $0x33c] sm:$0xf0]  ;;  %v1758_v14 = vld [vmem:[#allocation2 + $0x304] sm:$0xf] }
   0xf   :  { %849 = vmatpush.bf16.msra.mxu0 %v1601_v3  ;;  %v1613_v12 = vor.u32 %v1775_v9, %v1610_v10  ;;  %v1538_v15 = vld [vmem:[#allocation2 + $0x340] sm:$0xf0]  ;;  %862 = vmatpush.bf16.msra.mxu1 %v1605_v7  ;;  %v1537_v16 = vor.u32 %v1766_v13, %v1536_v11  ;;  %v1544_v18 = vld [vmem:[#allocation2 + $0x308] sm:$0xf]  ;;  %v1759_v20 = vld [vmem:[#allocation2 + $0x30c] sm:$0xf] }
  0x10   :  { %875 = vmatpush.bf16.msra.mxu2 %v1609_v8  ;;  %v1541_v17 = vor.u32 %v1758_v14, %v1538_v15  ;;  %v1767_v19 = vld [vmem:[#allocation2 + $0x344] sm:$0xf0]  ;;  %v1546_v22 = vld [vmem:[#allocation2 + $0x348] sm:$0xf0]  ;;  %v1472_v23 = vld [vmem:[#allocation2 + $0x280] sm:$0xf] }
  0x11   :  { %888 = vmatpush.bf16.msra.mxu3 %v1613_v12  ;;  %v1545_v21 = vor.u32 %v1767_v19, %v1544_v18  ;;  %v1750_v24 = vld [vmem:[#allocation2 + $0x2bc] sm:$0xf0]  ;;  %v1549_v25 = vor.u32 %v1759_v20, %v1546_v22  ;;  %v1742_v26 = vld [vmem:[#allocation2 + $0x284] sm:$0xf]  ;;  %v1480_v28 = vld [vmem:[#allocation2 + $0x288] sm:$0xf] }
  0x12   :  { %v1474_v27 = vld [vmem:[#allocation2 + $0x2c0] sm:$0xf0]  ;;  %v1473_v29 = vor.u32 %v1750_v24, %v1472_v23  ;;  %v1751_v30 = vld [vmem:[#allocation2 + $0x2c4] sm:$0xf0]  ;;  %v1743_v31 = vld [vmem:[#allocation2 + $0x28c] sm:$0xf] }
  0x13   :  { %850 = vmatpush.bf16.msra.mxu0 %v1537_v16  ;;  %v1482_v32 = vld [vmem:[#allocation2 + $0x2c8] sm:$0xf0]  ;;  %863 = vmatpush.bf16.msra.mxu1 %v1541_v17  ;;  %v1477_v33 = vor.u32 %v1742_v26, %v1474_v27  ;;  %v1481_v34 = vor.u32 %v1751_v30, %v1480_v28  ;;  %v1408_v35 = vld [vmem:[#allocation2 + $0x200] sm:$0xf]  ;;  %v1726_v37 = vld [vmem:[#allocation2 + $0x204] sm:$0xf] }
  0x14   :  { %876 = vmatpush.bf16.msra.mxu2 %v1545_v21  ;;  %v1734_v36 = vld [vmem:[#allocation2 + $0x23c] sm:$0xf0]  ;;  %v1485_v38 = vor.u32 %v1743_v31, %v1482_v32  ;;  %v1410_v39 = vld [vmem:[#allocation2 + $0x240] sm:$0xf0]  ;;  %v1416_v40 = vld [vmem:[#allocation2 + $0x208] sm:$0xf] }
  0x15   :  { %889 = vmatpush.bf16.msra.mxu3 %v1549_v25  ;;  %v1735_v41 = vld [vmem:[#allocation2 + $0x244] sm:$0xf0]  ;;  %v1727_v42 = vld [vmem:[#allocation2 + $0x20c] sm:$0xf]  ;;  %v1409_v44 = vor.u32 %v1734_v36, %v1408_v35  ;;  %v1413_v45 = vor.u32 %v1726_v37, %v1410_v39  ;;  %v1344_v47 = vld [vmem:[#allocation2 + $0x180] sm:$0xf] }
  0x16   :  { %v1418_v43 = vld [vmem:[#allocation2 + $0x248] sm:$0xf0]  ;;  %v1417_v46 = vor.u32 %v1735_v41, %v1416_v40  ;;  %v1718_v48 = vld [vmem:[#allocation2 + $0x1bc] sm:$0xf0]  ;;  %v1710_v49 = vld [vmem:[#allocation2 + $0x184] sm:$0xf] }
  0x17   :  { %851 = vmatpush.bf16.msra.mxu0 %v1473_v29  ;;  %864 = vmatpush.bf16.msra.mxu1 %v1477_v33  ;;  %v1421_v50 = vor.u32 %v1727_v42, %v1418_v43  ;;  %v1346_v51 = vld [vmem:[#allocation2 + $0x1c0] sm:$0xf0]  ;;  %v1352_v52 = vld [vmem:[#allocation2 + $0x188] sm:$0xf]  ;;  %v1711_v54 = vld [vmem:[#allocation2 + $0x18c] sm:$0xf]  ;;  %v1345_v56 = vor.u32 %v1718_v48, %v1344_v47 }
  0x18   :  { %877 = vmatpush.bf16.msra.mxu2 %v1481_v34  ;;  %v1719_v53 = vld [vmem:[#allocation2 + $0x1c4] sm:$0xf0]  ;;  %v1354_v55 = vld [vmem:[#allocation2 + $0x1c8] sm:$0xf0]  ;;  %v1349_v57 = vor.u32 %v1710_v49, %v1346_v51  ;;  %v1280_v59 = vld [vmem:[#allocation2 + $0x100] sm:$0xf] }
  0x19   :  { %890 = vmatpush.bf16.msra.mxu3 %v1485_v38  ;;  %v1353_v58 = vor.u32 %v1719_v53, %v1352_v52  ;;  %v1702_v60 = vld [vmem:[#allocation2 + $0x13c] sm:$0xf0]  ;;  %v1694_v61 = vld [vmem:[#allocation2 + $0x104] sm:$0xf]  ;;  %v1357_v62 = vor.u32 %v1711_v54, %v1354_v55  ;;  %v1288_v0 = vld [vmem:[#allocation2 + $0x108] sm:$0xf] }
  0x1a   :  { %v1282_v63 = vld [vmem:[#allocation2 + $0x140] sm:$0xf0]  ;;  %v1703_v1 = vld [vmem:[#allocation2 + $0x144] sm:$0xf0]  ;;  %v1695_v2 = vld [vmem:[#allocation2 + $0x10c] sm:$0xf]  ;;  %v1281_v4 = vor.u32 %v1702_v60, %v1280_v59 }
  0x1b   :  { %852 = vmatpush.bf16.msra.mxu0 %v1409_v44  ;;  %865 = vmatpush.bf16.msra.mxu1 %v1413_v45  ;;  %v1290_v3 = vld [vmem:[#allocation2 + $0x148] sm:$0xf0]  ;;  %v1285_v5 = vor.u32 %v1694_v61, %v1282_v63  ;;  %v1289_v6 = vor.u32 %v1703_v1, %v1288_v0  ;;  %v1216_v7 = vld [vmem:[#allocation2 + $0x80] sm:$0xf]  ;;  %v1678_v9 = vld [vmem:[#allocation2 + $0x84] sm:$0xf] }
  0x1c   :  { %878 = vmatpush.bf16.msra.mxu2 %v1417_v46  ;;  %v1686_v8 = vld [vmem:[#allocation2 + $0xbc] sm:$0xf0]  ;;  %v1293_v10 = vor.u32 %v1695_v2, %v1290_v3  ;;  %v1218_v11 = vld [vmem:[#allocation2 + $0xc0] sm:$0xf0]  ;;  %v1224_v12 = vld [vmem:[#allocation2 + $0x88] sm:$0xf] }
  0x1d   :  { %891 = vmatpush.bf16.msra.mxu3 %v1421_v50  ;;  %v1687_v13 = vld [vmem:[#allocation2 + $0xc4] sm:$0xf0]  ;;  %v1679_v14 = vld [vmem:[#allocation2 + $0x8c] sm:$0xf]  ;;  %v1217_v16 = vor.u32 %v1686_v8, %v1216_v7  ;;  %v1152_v17 = vld [vmem:[#allocation2] sm:$0xf]  ;;  %v1221_v19 = vor.u32 %v1678_v9, %v1218_v11 }
  0x1e   :  { %v1226_v15 = vld [vmem:[#allocation2 + $0xc8] sm:$0xf0]  ;;  %v1670_v18 = vld [vmem:[#allocation2 + $0x3c] sm:$0xf0]  ;;  %v1225_v20 = vor.u32 %v1687_v13, %v1224_v12  ;;  %v1662_v21 = vld [vmem:[#allocation2 + $0x4] sm:$0xf] }
  0x1f   :  { %853 = vmatpush.bf16.msra.mxu0 %v1345_v56  ;;  %866 = vmatpush.bf16.msra.mxu1 %v1349_v57  ;;  %v1154_v22 = vld [vmem:[#allocation2 + $0x40] sm:$0xf0]  ;;  %v1160_v23 = vld [vmem:[#allocation2 + $0x8] sm:$0xf]  ;;  %v1229_v24 = vor.u32 %v1679_v14, %v1226_v15  ;;  %v1663_v26 = vld [vmem:[#allocation2 + $0xc] sm:$0xf]  ;;  %v1153_v31 = vor.u32 %v1670_v18, %v1152_v17 }
  0x20   :  { %879 = vmatpush.bf16.msra.mxu2 %v1353_v58  ;;  %v1671_v25 = vld [vmem:[#allocation2 + $0x44] sm:$0xf0]  ;;  %v1162_v27 = vld [vmem:[#allocation2 + $0x48] sm:$0xf0]  ;;  %v1616_v28 = vld [vmem:[#allocation2 + $0x390] sm:$0xf]  ;;  %v1157_v35 = vor.u32 %v1662_v21, %v1154_v22 }
  0x21   :  { %892 = vmatpush.bf16.msra.mxu3 %v1357_v62  ;;  %v1784_v29 = vld [vmem:[#allocation2 + $0x3cc] sm:$0xf0]  ;;  %v1776_v30 = vld [vmem:[#allocation2 + $0x394] sm:$0xf]  ;;  %v1624_v33 = vld [vmem:[#allocation2 + $0x398] sm:$0xf]  ;;  %v1161_v36 = vor.u32 %v1671_v25, %v1160_v23  ;;  %v1165_v39 = vor.u32 %v1663_v26, %v1162_v27 }
  0x22   :  { %v1618_v32 = vld [vmem:[#allocation2 + $0x3d0] sm:$0xf0]  ;;  %v1785_v34 = vld [vmem:[#allocation2 + $0x3d4] sm:$0xf0]  ;;  %v1777_v37 = vld [vmem:[#allocation2 + $0x39c] sm:$0xf]  ;;  %v1617_v40 = vor.u32 %v1784_v29, %v1616_v28 }
  0x23   :  { %854 = vmatpush.bf16.msra.mxu0 %v1281_v4  ;;  %867 = vmatpush.bf16.msra.mxu1 %v1285_v5  ;;  %v1626_v38 = vld [vmem:[#allocation2 + $0x3d8] sm:$0xf0]  ;;  %v1621_v41 = vor.u32 %v1776_v30, %v1618_v32  ;;  %v1625_v42 = vor.u32 %v1785_v34, %v1624_v33  ;;  %v1552_v43 = vld [vmem:[#allocation2 + $0x310] sm:$0xf]  ;;  %v1760_v45 = vld [vmem:[#allocation2 + $0x314] sm:$0xf] }
  0x24   :  { %880 = vmatpush.bf16.msra.mxu2 %v1289_v6  ;;  %v1768_v44 = vld [vmem:[#allocation2 + $0x34c] sm:$0xf0]  ;;  %v1629_v46 = vor.u32 %v1777_v37, %v1626_v38  ;;  %v1554_v47 = vld [vmem:[#allocation2 + $0x350] sm:$0xf0]  ;;  %v1560_v48 = vld [vmem:[#allocation2 + $0x318] sm:$0xf] }
  0x25   :  { %893 = vmatpush.bf16.msra.mxu3 %v1293_v10  ;;  %v1769_v49 = vld [vmem:[#allocation2 + $0x354] sm:$0xf0]  ;;  %v1761_v50 = vld [vmem:[#allocation2 + $0x31c] sm:$0xf]  ;;  %v1879_v52 = vld [vmem:[%s1917_s0] sm:$0x1]  ;;  %v1553_v53 = vor.u32 %v1768_v44, %v1552_v43  ;;  %v1557_v54 = vor.u32 %v1760_v45, %v1554_v47 }
  0x26   :  { %v1562_v51 = vld [vmem:[#allocation2 + $0x358] sm:$0xf0]  ;;  %v1561_v55 = vor.u32 %v1769_v49, %v1560_v48  ;;  %v1488_v56 = vld [vmem:[#allocation2 + $0x290] sm:$0xf]  ;;  %v1744_v58 = vld [vmem:[#allocation2 + $0x294] sm:$0xf] }
  0x27   :  { %855 = vmatpush.bf16.msra.mxu0 %v1217_v16  ;;  %868 = vmatpush.bf16.msra.mxu1 %v1221_v19  ;;  %v1752_v57 = vld [vmem:[#allocation2 + $0x2cc] sm:$0xf0]  ;;  %v1565_v59 = vor.u32 %v1761_v50, %v1562_v51  ;;  %v1490_v60 = vld [vmem:[#allocation2 + $0x2d0] sm:$0xf0]  ;;  %v1496_v61 = vld [vmem:[#allocation2 + $0x298] sm:$0xf] }
  0x28   :  { %881 = vmatpush.bf16.msra.mxu2 %v1225_v20  ;;  %v1753_v62 = vld [vmem:[#allocation2 + $0x2d4] sm:$0xf0]  ;;  %v1745_v63 = vld [vmem:[#allocation2 + $0x29c] sm:$0xf]  ;;  %v1489_v1 = vor.u32 %v1752_v57, %v1488_v56  ;;  %v1493_v2 = vor.u32 %v1744_v58, %v1490_v60  ;;  %v1424_v4 = vld [vmem:[#allocation2 + $0x210] sm:$0xf] }
  0x29   :  { %894 = vmatpush.bf16.msra.mxu3 %v1229_v24  ;;  %v1498_v0 = vld [vmem:[#allocation2 + $0x2d8] sm:$0xf0]  ;;  %v1497_v3 = vor.u32 %v1753_v62, %v1496_v61  ;;  %v1736_v5 = vld [vmem:[#allocation2 + $0x24c] sm:$0xf0]  ;;  %v1728_v6 = vld [vmem:[#allocation2 + $0x214] sm:$0xf] }
  0x2a   :  { %v1501_v7 = vor.u32 %v1745_v63, %v1498_v0  ;;  %v1426_v8 = vld [vmem:[#allocation2 + $0x250] sm:$0xf0]  ;;  %v1432_v9 = vld [vmem:[#allocation2 + $0x218] sm:$0xf]  ;;  %v1729_v11 = vld [vmem:[#allocation2 + $0x21c] sm:$0xf]  ;;  %v1425_v13 = vor.u32 %v1736_v5, %v1424_v4 }
  0x2b   :  { %856 = vmatpush.bf16.msra.mxu0 %v1153_v31  ;;  %869 = vmatpush.bf16.msra.mxu1 %v1157_v35  ;;  %v1737_v10 = vld [vmem:[#allocation2 + $0x254] sm:$0xf0]  ;;  %v1434_v12 = vld [vmem:[#allocation2 + $0x258] sm:$0xf0]  ;;  %v1429_v14 = vor.u32 %v1728_v6, %v1426_v8  ;;  %v1360_v16 = vld [vmem:[#allocation2 + $0x190] sm:$0xf] }
  0x2c   :  { %882 = vmatpush.bf16.msra.mxu2 %v1161_v36  ;;  %v1433_v15 = vor.u32 %v1737_v10, %v1432_v9  ;;  %v1720_v17 = vld [vmem:[#allocation2 + $0x1cc] sm:$0xf0]  ;;  %v1712_v18 = vld [vmem:[#allocation2 + $0x194] sm:$0xf]  ;;  %v1437_v19 = vor.u32 %v1729_v11, %v1434_v12  ;;  %v1368_v21 = vld [vmem:[#allocation2 + $0x198] sm:$0xf] }
  0x2d   :  { %895 = vmatpush.bf16.msra.mxu3 %v1165_v39  ;;  %v1362_v20 = vld [vmem:[#allocation2 + $0x1d0] sm:$0xf0]  ;;  %v1721_v22 = vld [vmem:[#allocation2 + $0x1d4] sm:$0xf0]  ;;  %v1713_v23 = vld [vmem:[#allocation2 + $0x19c] sm:$0xf]  ;;  %v1361_v25 = vor.u32 %v1720_v17, %v1360_v16 }
  0x2e   :  { %857 = vmatmul.bf16.vlgmr.msra.gmra.mxu0 %v1879_v52  ;;  %870 = vmatmul.bf16.vlgmr.msra.gmra.mxu1 %v1879_v52  ;;  %v1370_v24 = vld [vmem:[#allocation2 + $0x1d8] sm:$0xf0]  ;;  %v1365_v26 = vor.u32 %v1712_v18, %v1362_v20  ;;  %v1369_v27 = vor.u32 %v1721_v22, %v1368_v21  ;;  %v1296_v28 = vld [vmem:[#allocation2 + $0x110] sm:$0xf]  ;;  %v1696_v30 = vld [vmem:[#allocation2 + $0x114] sm:$0xf] }
  0x2f   :  { %901 = vmatpush.bf16.msrb.mxu0 %v1617_v40  ;;  %914 = vmatpush.bf16.msrb.mxu1 %v1621_v41  ;;  %v1704_v29 = vld [vmem:[#allocation2 + $0x14c] sm:$0xf0]  ;;  %v1373_v31 = vor.u32 %v1713_v23, %v1370_v24  ;;  %v1298_v32 = vld [vmem:[#allocation2 + $0x150] sm:$0xf0]  ;;  %v1304_v33 = vld [vmem:[#allocation2 + $0x118] sm:$0xf] }
  0x30   :  { %927 = vmatpush.bf16.msrb.mxu2 %v1625_v42  ;;  %896 = vmatmul.bf16.vlgmr.msra.gmra.mxu3 %v1879_v52  ;;  %v1705_v34 = vld [vmem:[#allocation2 + $0x154] sm:$0xf0]  ;;  %v1697_v35 = vld [vmem:[#allocation2 + $0x11c] sm:$0xf]  ;;  %v1297_v37 = vor.u32 %v1704_v29, %v1296_v28  ;;  %v1301_v38 = vor.u32 %v1696_v30, %v1298_v32  ;;  %v1232_v40 = vld [vmem:[#allocation2 + $0x90] sm:$0xf] }
  0x31   :  { %940 = vmatpush.bf16.msrb.mxu3 %v1629_v46  ;;  %883 = vmatmul.bf16.vlgmr.msra.gmra.mxu2 %v1879_v52  ;;  %v1306_v36 = vld [vmem:[#allocation2 + $0x158] sm:$0xf0]  ;;  %v1305_v39 = vor.u32 %v1705_v34, %v1304_v33  ;;  %v1688_v41 = vld [vmem:[#allocation2 + $0xcc] sm:$0xf0]  ;;  %v1680_v42 = vld [vmem:[#allocation2 + $0x94] sm:$0xf] }
  0x32   :  { %v1309_v43 = vor.u32 %v1697_v35, %v1306_v36  ;;  %v1234_v44 = vld [vmem:[#allocation2 + $0xd0] sm:$0xf0]  ;;  %v1240_v45 = vld [vmem:[#allocation2 + $0x98] sm:$0xf]  ;;  %v1681_v47 = vld [vmem:[#allocation2 + $0x9c] sm:$0xf]  ;;  %v1233_v49 = vor.u32 %v1688_v41, %v1232_v40 }
  0x33   :  { %902 = vmatpush.bf16.msrb.mxu0 %v1553_v53  ;;  %915 = vmatpush.bf16.msrb.mxu1 %v1557_v54  ;;  %v1689_v46 = vld [vmem:[#allocation2 + $0xd4] sm:$0xf0]  ;;  %v1242_v48 = vld [vmem:[#allocation2 + $0xd8] sm:$0xf0]  ;;  %v1168_v50 = vld [vmem:[#allocation2 + $0x10] sm:$0xf]  ;;  %v1237_v53 = vor.u32 %v1680_v42, %v1234_v44 }
  0x34   :  { %928 = vmatpush.bf16.msrb.mxu2 %v1561_v55  ;;  %v1672_v51 = vld [vmem:[#allocation2 + $0x4c] sm:$0xf0]  ;;  %v1241_v54 = vor.u32 %v1689_v46, %v1240_v45  ;;  %v1664_v55 = vld [vmem:[#allocation2 + $0x14] sm:$0xf]  ;;  %v1176_v57 = vld [vmem:[#allocation2 + $0x18] sm:$0xf]  ;;  %v1245_v58 = vor.u32 %v1681_v47, %v1242_v48 }
  0x35   :  { %941 = vmatpush.bf16.msrb.mxu3 %v1565_v59  ;;  %v1170_v56 = vld [vmem:[#allocation2 + $0x50] sm:$0xf0]  ;;  %v1673_v59 = vld [vmem:[#allocation2 + $0x54] sm:$0xf0]  ;;  %v1665_v60 = vld [vmem:[#allocation2 + $0x1c] sm:$0xf] }
  0x36   :  { %v1178_v61 = vld [vmem:[#allocation2 + $0x58] sm:$0xf0]  ;;  %v1632_v62 = vld [vmem:[#allocation2 + $0x3a0] sm:$0xf]  ;;  %v1778_v0 = vld [vmem:[#allocation2 + $0x3a4] sm:$0xf]  ;;  %v1173_v5 = vor.u32 %v1664_v55, %v1170_v56  ;;  %v1177_v6 = vor.u32 %v1673_v59, %v1176_v57 }
  0x37   :  { %903 = vmatpush.bf16.msrb.mxu0 %v1489_v1  ;;  %916 = vmatpush.bf16.msrb.mxu1 %v1493_v2  ;;  %v1786_v63 = vld [vmem:[#allocation2 + $0x3dc] sm:$0xf0]  ;;  %v1169_v1 = vor.u32 %v1672_v51, %v1168_v50  ;;  %v1634_v2 = vld [vmem:[#allocation2 + $0x3e0] sm:$0xf0]  ;;  %v1787_v4 = vld [vmem:[#allocation2 + $0x3e4] sm:$0xf0]  ;;  %v1181_v9 = vor.u32 %v1665_v60, %v1178_v61 }
  0x38   :  { %929 = vmatpush.bf16.msrb.mxu2 %v1497_v3  ;;  %v1640_v3 = vld [vmem:[#allocation2 + $0x3a8] sm:$0xf]  ;;  %v1642_v8 = vld [vmem:[#allocation2 + $0x3e8] sm:$0xf0]  ;;  %v1633_v10 = vor.u32 %v1786_v63, %v1632_v62  ;;  %v1637_v11 = vor.u32 %v1778_v0, %v1634_v2  ;;  %v1570_v17 = vld [vmem:[#allocation2 + $0x360] sm:$0xf0] }
  0x39   :  { %942 = vmatpush.bf16.msrb.mxu3 %v1501_v7  ;;  %v1779_v7 = vld [vmem:[#allocation2 + $0x3ac] sm:$0xf]  ;;  %v1641_v12 = vor.u32 %v1787_v4, %v1640_v3  ;;  %v1576_v18 = vld [vmem:[#allocation2 + $0x328] sm:$0xf]  ;;  %v1506_v29 = vld [vmem:[#allocation2 + $0x2e0] sm:$0xf0] }
  0x3a   :  { %v1645_v16 = vor.u32 %v1779_v7, %v1642_v8  ;;  %v1763_v20 = vld [vmem:[#allocation2 + $0x32c] sm:$0xf]  ;;  %v1512_v30 = vld [vmem:[#allocation2 + $0x2a8] sm:$0xf]  ;;  %v1442_v41 = vld [vmem:[#allocation2 + $0x260] sm:$0xf0] }
  0x3b   :  { %904 = vmatpush.bf16.msrb.mxu0 %v1425_v13  ;;  %917 = vmatpush.bf16.msrb.mxu1 %v1429_v14  ;;  %v1568_v13 = vld [vmem:[#allocation2 + $0x320] sm:$0xf]  ;;  %v1578_v21 = vld [vmem:[#allocation2 + $0x368] sm:$0xf0]  ;;  %v1448_v42 = vld [vmem:[#allocation2 + $0x228] sm:$0xf] }
  0x3c   :  { %930 = vmatpush.bf16.msrb.mxu2 %v1433_v15  ;;  %v1770_v14 = vld [vmem:[#allocation2 + $0x35c] sm:$0xf0]  ;;  %v1762_v15 = vld [vmem:[#allocation2 + $0x324] sm:$0xf]  ;;  %v1581_v28 = vor.u32 %v1763_v20, %v1578_v21  ;;  %v1747_v32 = vld [vmem:[#allocation2 + $0x2ac] sm:$0xf] }
  0x3d   :  { %943 = vmatpush.bf16.msrb.mxu3 %v1437_v19  ;;  %v1771_v19 = vld [vmem:[#allocation2 + $0x364] sm:$0xf0]  ;;  %v1569_v22 = vor.u32 %v1770_v14, %v1568_v13  ;;  %v1573_v23 = vor.u32 %v1762_v15, %v1570_v17  ;;  %v1514_v33 = vld [vmem:[#allocation2 + $0x2e8] sm:$0xf0]  ;;  %v1722_v50 = vld [vmem:[#allocation2 + $0x1dc] sm:$0xf0] }
  0x3e   :  { %v1577_v24 = vor.u32 %v1771_v19, %v1576_v18  ;;  %v1517_v40 = vor.u32 %v1747_v32, %v1514_v33  ;;  %v1731_v44 = vld [vmem:[#allocation2 + $0x22c] sm:$0xf]  ;;  %v1714_v51 = vld [vmem:[#allocation2 + $0x1a4] sm:$0xf]  ;;  %v1384_v55 = vld [vmem:[#allocation2 + $0x1a8] sm:$0xf] }
  0x3f   :  { %905 = vmatpush.bf16.msrb.mxu0 %v1361_v25  ;;  %918 = vmatpush.bf16.msrb.mxu1 %v1365_v26  ;;  %v1504_v25 = vld [vmem:[#allocation2 + $0x2a0] sm:$0xf]  ;;  %v1450_v45 = vld [vmem:[#allocation2 + $0x268] sm:$0xf0]  ;;  %v1723_v56 = vld [vmem:[#allocation2 + $0x1e4] sm:$0xf0] }
  0x40   :  { %931 = vmatpush.bf16.msrb.mxu2 %v1369_v27  ;;  %v1754_v26 = vld [vmem:[#allocation2 + $0x2dc] sm:$0xf0]  ;;  %v1746_v27 = vld [vmem:[#allocation2 + $0x2a4] sm:$0xf]  ;;  %v1715_v57 = vld [vmem:[#allocation2 + $0x1ac] sm:$0xf]  ;;  %v1385_v61 = vor.u32 %v1723_v56, %v1384_v55 }
  0x41   :  { %944 = vmatpush.bf16.msrb.mxu3 %v1373_v31  ;;  %v1755_v31 = vld [vmem:[#allocation2 + $0x2e4] sm:$0xf0]  ;;  %v1505_v34 = vor.u32 %v1754_v26, %v1504_v25  ;;  %v1509_v35 = vor.u32 %v1746_v27, %v1506_v29  ;;  %v1312_v62 = vld [vmem:[#allocation2 + $0x120] sm:$0xf]  ;;  %v1698_v0 = vld [vmem:[#allocation2 + $0x124] sm:$0xf] }
  0x42   :  { %v1513_v36 = vor.u32 %v1755_v31, %v1512_v30  ;;  %v1706_v63 = vld [vmem:[#allocation2 + $0x15c] sm:$0xf0]  ;;  %v1314_v2 = vld [vmem:[#allocation2 + $0x160] sm:$0xf0]  ;;  %v1320_v3 = vld [vmem:[#allocation2 + $0x128] sm:$0xf] }
  0x43   :  { %906 = vmatpush.bf16.msrb.mxu0 %v1297_v37  ;;  %919 = vmatpush.bf16.msrb.mxu1 %v1301_v38  ;;  %v1440_v37 = vld [vmem:[#allocation2 + $0x220] sm:$0xf]  ;;  %v1707_v4 = vld [vmem:[#allocation2 + $0x164] sm:$0xf0]  ;;  %v1313_v7 = vor.u32 %v1706_v63, %v1312_v62  ;;  %v1317_v8 = vor.u32 %v1698_v0, %v1314_v2  ;;  %v1250_v14 = vld [vmem:[#allocation2 + $0xe0] sm:$0xf0] }
  0x44   :  { %932 = vmatpush.bf16.msrb.mxu2 %v1305_v39  ;;  %v1738_v38 = vld [vmem:[#allocation2 + $0x25c] sm:$0xf0]  ;;  %v1730_v39 = vld [vmem:[#allocation2 + $0x224] sm:$0xf]  ;;  %v1256_v15 = vld [vmem:[#allocation2 + $0xa8] sm:$0xf] }
  0x45   :  { %945 = vmatpush.bf16.msrb.mxu3 %v1309_v43  ;;  %v1739_v43 = vld [vmem:[#allocation2 + $0x264] sm:$0xf0]  ;;  %v1441_v46 = vor.u32 %v1738_v38, %v1440_v37  ;;  %v1445_v47 = vor.u32 %v1730_v39, %v1442_v41  ;;  %v1683_v17 = vld [vmem:[#allocation2 + $0xac] sm:$0xf]  ;;  %v1184_v20 = vld [vmem:[#allocation2 + $0x20] sm:$0xf] }
  0x46   :  { %v1449_v48 = vor.u32 %v1739_v43, %v1448_v42  ;;  %v1258_v18 = vld [vmem:[#allocation2 + $0xe8] sm:$0xf0]  ;;  %v1674_v21 = vld [vmem:[#allocation2 + $0x5c] sm:$0xf0]  ;;  %v1186_v25 = vld [vmem:[#allocation2 + $0x60] sm:$0xf0] }
  0x47   :  { %907 = vmatpush.bf16.msrb.mxu0 %v1233_v49  ;;  %920 = vmatpush.bf16.msrb.mxu1 %v1237_v53  ;;  %v1376_v49 = vld [vmem:[#allocation2 + $0x1a0] sm:$0xf]  ;;  %v1453_v53 = vor.u32 %v1731_v44, %v1450_v45  ;;  %v1192_v26 = vld [vmem:[#allocation2 + $0x28] sm:$0xf]  ;;  %v1261_v27 = vor.u32 %v1683_v17, %v1258_v18  ;;  %v1667_v29 = vld [vmem:[#allocation2 + $0x2c] sm:$0xf] }
  0x48   :  { %933 = vmatpush.bf16.msrb.mxu2 %v1241_v54  ;;  %v1378_v54 = vld [vmem:[#allocation2 + $0x1e0] sm:$0xf0]  ;;  %v1377_v59 = vor.u32 %v1722_v50, %v1376_v49  ;;  %v1194_v30 = vld [vmem:[#allocation2 + $0x68] sm:$0xf0]  ;;  %v1648_v31 = vld [vmem:[#allocation2 + $0x3b0] sm:$0xf] }
  0x49   :  { %946 = vmatpush.bf16.msrb.mxu3 %v1245_v58  ;;  %v1386_v58 = vld [vmem:[#allocation2 + $0x1e8] sm:$0xf0]  ;;  %v1381_v60 = vor.u32 %v1714_v51, %v1378_v54  ;;  %v1788_v32 = vld [vmem:[#allocation2 + $0x3ec] sm:$0xf0]  ;;  %v1780_v33 = vld [vmem:[#allocation2 + $0x3b4] sm:$0xf]  ;;  %v1197_v42 = vor.u32 %v1667_v29, %v1194_v30 }
  0x4a   :  { %v1789_v37 = vld [vmem:[#allocation2 + $0x3f4] sm:$0xf0]  ;;  %v1658_v41 = vld [vmem:[#allocation2 + $0x3f8] sm:$0xf0]  ;;  %v1649_v43 = vor.u32 %v1788_v32, %v1648_v31  ;;  %v1586_v50 = vld [vmem:[#allocation2 + $0x370] sm:$0xf0] }
  0x4b   :  { %908 = vmatpush.bf16.msrb.mxu0 %v1169_v1  ;;  %921 = vmatpush.bf16.msrb.mxu1 %v1173_v5  ;;  %v1389_v1 = vor.u32 %v1715_v57, %v1386_v58  ;;  %v1699_v5 = vld [vmem:[#allocation2 + $0x12c] sm:$0xf]  ;;  %v1592_v51 = vld [vmem:[#allocation2 + $0x338] sm:$0xf]  ;;  %v1765_v54 = vld [vmem:[#allocation2 + $0x33c] sm:$0xf] }
  0x4c   :  { %934 = vmatpush.bf16.msrb.mxu2 %v1177_v6  ;;  %v1322_v6 = vld [vmem:[#allocation2 + $0x168] sm:$0xf0]  ;;  %v1594_v55 = vld [vmem:[#allocation2 + $0x378] sm:$0xf0]  ;;  %v1522_v63 = vld [vmem:[#allocation2 + $0x2f0] sm:$0xf0] }
  0x4d   :  { %947 = vmatpush.bf16.msrb.mxu3 %v1181_v9  ;;  %v1321_v9 = vor.u32 %v1707_v4, %v1320_v3  ;;  %v1325_v13 = vor.u32 %v1699_v5, %v1322_v6  ;;  %v1597_v62 = vor.u32 %v1765_v54, %v1594_v55  ;;  %v1528_v0 = vld [vmem:[#allocation2 + $0x2b8] sm:$0xf]  ;;  %v1749_v2 = vld [vmem:[#allocation2 + $0x2bc] sm:$0xf]  ;;  %v1328_v31 = vld [vmem:[#allocation2 + $0x130] sm:$0xf] }
  0x4e   :  { %909 = vmatmul.bf16.vlgmr.msrb.gmra.mxu0 %v1879_v52  ;;  %922 = vmatmul.bf16.vlgmr.msrb.gmra.mxu1 %v1879_v52  ;;  %v1530_v3 = vld [vmem:[#allocation2 + $0x2f8] sm:$0xf0]  ;;  %v1708_v32 = vld [vmem:[#allocation2 + $0x16c] sm:$0xf0]  ;;  %vm1103_vm0 = vcmask 1040384   ;;  %vm1107_vm1 = vcmask 1042434  }
  0x4f   :  { %953 = vmatpush.bf16.msra.mxu0 %v1633_v10  ;;  %966 = vmatpush.bf16.msra.mxu1 %v1637_v11  ;;  %v1248_v10 = vld [vmem:[#allocation2 + $0xa0] sm:$0xf]  ;;  %vm1113_vm2 = vcmask 1044484   ;;  %vm1111_vm3 = vcmask 1041408   ;;  %vm1117_vm4 = vcmask 1046534   ;;  %vm1121_vm5 = vcmask 1045508  }
  0x50   :  { %979 = vmatpush.bf16.msra.mxu2 %v1641_v12  ;;  %948 = vmatmul.bf16.vlgmr.msrb.gmra.mxu3 %v1879_v52  ;;  %v1690_v11 = vld [vmem:[#allocation2 + $0xdc] sm:$0xf0]  ;;  %v1682_v12 = vld [vmem:[#allocation2 + $0xa4] sm:$0xf]  ;;  %vm1123_vm6 = vcmask 1043456  }
  0x51   :  { %992 = vmatpush.bf16.msra.mxu3 %v1645_v16  ;;  %935 = vmatmul.bf16.vlgmr.msrb.gmra.mxu2 %v1879_v52  ;;  %v1691_v16 = vld [vmem:[#allocation2 + $0xe4] sm:$0xf0]  ;;  %v1249_v19 = vor.u32 %v1690_v11, %v1248_v10  ;;  %v1533_v10 = vor.u32 %v1749_v2, %v1530_v3  ;;  %v1458_v11 = vld [vmem:[#allocation2 + $0x270] sm:$0xf0] }
  0x53   :  { %954 = vmatpush.bf16.msra.mxu0 %v1569_v22  ;;  %967 = vmatpush.bf16.msra.mxu1 %v1573_v23  ;;  %v1253_v22 = vor.u32 %v1682_v12, %v1250_v14  ;;  %v1257_v23 = vor.u32 %v1691_v16, %v1256_v15  ;;  %v1464_v12 = vld [vmem:[#allocation2 + $0x238] sm:$0xf]  ;;  %v1733_v14 = vld [vmem:[#allocation2 + $0x23c] sm:$0xf] }
  0x54   :  { %980 = vmatpush.bf16.msra.mxu2 %v1577_v24  ;;  %v1666_v24 = vld [vmem:[#allocation2 + $0x24] sm:$0xf]  ;;  %v1466_v15 = vld [vmem:[#allocation2 + $0x278] sm:$0xf0] }
  0x55   :  { %993 = vmatpush.bf16.msra.mxu3 %v1581_v28  ;;  %v1675_v28 = vld [vmem:[#allocation2 + $0x64] sm:$0xf0]  ;;  %v1189_v38 = vor.u32 %v1666_v24, %v1186_v25  ;;  %v1400_v24 = vld [vmem:[#allocation2 + $0x1b8] sm:$0xf] }
  0x56   :  { %v1193_v39 = vor.u32 %v1675_v28, %v1192_v26  ;;  %v1725_v25 = vld [vmem:[#allocation2 + $0x1f4] sm:$0xf0]  ;;  %v1717_v26 = vld [vmem:[#allocation2 + $0x1bc] sm:$0xf] }
  0x57   :  { %955 = vmatpush.bf16.msra.mxu0 %v1505_v34  ;;  %968 = vmatpush.bf16.msra.mxu1 %v1509_v35  ;;  %v1185_v34 = vor.u32 %v1674_v21, %v1184_v20  ;;  %v1650_v35 = vld [vmem:[#allocation2 + $0x3f0] sm:$0xf0]  ;;  %v1724_v20 = vld [vmem:[#allocation2 + $0x1ec] sm:$0xf0]  ;;  %v1401_v30 = vor.u32 %v1725_v25, %v1400_v24 }
  0x58   :  { %981 = vmatpush.bf16.msra.mxu2 %v1513_v36  ;;  %v1656_v36 = vld [vmem:[#allocation2 + $0x3b8] sm:$0xf]  ;;  %v1653_v44 = vor.u32 %v1780_v33, %v1650_v35  ;;  %v1716_v21 = vld [vmem:[#allocation2 + $0x1b4] sm:$0xf] }
  0x59   :  { %994 = vmatpush.bf16.msra.mxu3 %v1517_v40  ;;  %v1781_v40 = vld [vmem:[#allocation2 + $0x3bc] sm:$0xf]  ;;  %v1657_v45 = vor.u32 %v1789_v37, %v1656_v36  ;;  %v1700_v33 = vld [vmem:[#allocation2 + $0x134] sm:$0xf]  ;;  %v1336_v36 = vld [vmem:[#allocation2 + $0x138] sm:$0xf] }
  0x5a   :  { %v1661_v49 = vor.u32 %v1781_v40, %v1658_v41  ;;  %v1330_v35 = vld [vmem:[#allocation2 + $0x170] sm:$0xf0]  ;;  %v1709_v37 = vld [vmem:[#allocation2 + $0x174] sm:$0xf0]  ;;  %v1329_v40 = vor.u32 %v1708_v32, %v1328_v31 }
  0x5b   :  { %956 = vmatpush.bf16.msra.mxu0 %v1441_v46  ;;  %969 = vmatpush.bf16.msra.mxu1 %v1445_v47  ;;  %v1584_v46 = vld [vmem:[#allocation2 + $0x330] sm:$0xf]  ;;  %v1333_v41 = vor.u32 %v1700_v33, %v1330_v35 }
  0x5c   :  { %982 = vmatpush.bf16.msra.mxu2 %v1449_v48  ;;  %v1772_v47 = vld [vmem:[#allocation2 + $0x36c] sm:$0xf0]  ;;  %v1764_v48 = vld [vmem:[#allocation2 + $0x334] sm:$0xf] }
  0x5d   :  { %995 = vmatpush.bf16.msra.mxu3 %v1453_v53  ;;  %v1773_v53 = vld [vmem:[#allocation2 + $0x374] sm:$0xf0]  ;;  %v1585_v56 = vor.u32 %v1772_v47, %v1584_v46  ;;  %v1589_v57 = vor.u32 %v1764_v48, %v1586_v50  ;;  %v1266_v47 = vld [vmem:[#allocation2 + $0xf0] sm:$0xf0]  ;;  %v1685_v50 = vld [vmem:[#allocation2 + $0xbc] sm:$0xf] }
  0x5e   :  { %v1593_v58 = vor.u32 %v1773_v53, %v1592_v51  ;;  %v1272_v48 = vld [vmem:[#allocation2 + $0xb8] sm:$0xf]  ;;  %v1274_v51 = vld [vmem:[#allocation2 + $0xf8] sm:$0xf0] }
  0x5f   :  { %957 = vmatpush.bf16.msra.mxu0 %v1377_v59  ;;  %970 = vmatpush.bf16.msra.mxu1 %v1381_v60  ;;  %v1520_v59 = vld [vmem:[#allocation2 + $0x2b0] sm:$0xf] }
  0x60   :  { %983 = vmatpush.bf16.msra.mxu2 %v1385_v61  ;;  %v1756_v60 = vld [vmem:[#allocation2 + $0x2ec] sm:$0xf0]  ;;  %v1748_v61 = vld [vmem:[#allocation2 + $0x2b4] sm:$0xf] }
  0x61   :  { %996 = vmatpush.bf16.msra.mxu3 %v1389_v1  ;;  %v1757_v1 = vld [vmem:[#allocation2 + $0x2f4] sm:$0xf0]  ;;  %v1521_v4 = vor.u32 %v1756_v60, %v1520_v59  ;;  %v1525_v5 = vor.u32 %v1748_v61, %v1522_v63  ;;  %v1277_v59 = vor.u32 %v1685_v50, %v1274_v51  ;;  %v1202_v60 = vld [vmem:[#allocation2 + $0x70] sm:$0xf0]  ;;  %v1669_v63 = vld [vmem:[#allocation2 + $0x3c] sm:$0xf] }
  0x62   :  { %v1529_v6 = vor.u32 %v1757_v1, %v1528_v0  ;;  %v1208_v61 = vld [vmem:[#allocation2 + $0x38] sm:$0xf]  ;;  %v1210_v0 = vld [vmem:[#allocation2 + $0x78] sm:$0xf0] }
  0x63   :  { %958 = vmatpush.bf16.msra.mxu0 %v1313_v7  ;;  %971 = vmatpush.bf16.msra.mxu1 %v1317_v8  ;;  %v1456_v7 = vld [vmem:[#allocation2 + $0x230] sm:$0xf] }
  0x64   :  { %984 = vmatpush.bf16.msra.mxu2 %v1321_v9  ;;  %v1740_v8 = vld [vmem:[#allocation2 + $0x26c] sm:$0xf0]  ;;  %v1732_v9 = vld [vmem:[#allocation2 + $0x234] sm:$0xf] }
  0x65   :  { %997 = vmatpush.bf16.msra.mxu3 %v1325_v13  ;;  %v1741_v13 = vld [vmem:[#allocation2 + $0x274] sm:$0xf0]  ;;  %v1457_v16 = vor.u32 %v1740_v8, %v1456_v7  ;;  %v1461_v17 = vor.u32 %v1732_v9, %v1458_v11 }
  0x66   :  { %v1465_v18 = vor.u32 %v1741_v13, %v1464_v12  ;;  %v173_v13 = vld [vmem:[#allocation4] sm:$0xff] }
  0x67   :  { %959 = vmatpush.bf16.msra.mxu0 %v1249_v19  ;;  %972 = vmatpush.bf16.msra.mxu1 %v1253_v22  ;;  %v1392_v19 = vld [vmem:[#allocation2 + $0x1b0] sm:$0xf]  ;;  %v1469_v22 = vor.u32 %v1733_v14, %v1466_v15  ;;  %v177_v14 = vperm.slane %v173_v13, 0  ;;  %v178_v15 = vperm.slane %v173_v13, 1  ;;  %v183_v31 = vperm.slane %v173_v13, 6 }
  0x68   :  { %985 = vmatpush.bf16.msra.mxu2 %v1257_v23  ;;  %v1394_v23 = vld [vmem:[#allocation2 + $0x1f0] sm:$0xf0]  ;;  %v1393_v28 = vor.u32 %v1724_v20, %v1392_v19  ;;  %v184_v33 = vperm.slane %v173_v13, 7 }
  0x69   :  { %998 = vmatpush.bf16.msra.mxu3 %v1261_v27  ;;  %v1402_v27 = vld [vmem:[#allocation2 + $0x1f8] sm:$0xf0]  ;;  %v1397_v29 = vor.u32 %v1716_v21, %v1394_v23  ;;  %v182_v23 = vperm.slane %v173_v13, 5 }
  0x6b   :  { %960 = vmatpush.bf16.msra.mxu0 %v1185_v34  ;;  %973 = vmatpush.bf16.msra.mxu1 %v1189_v38  ;;  %v1405_v34 = vor.u32 %v1717_v26, %v1402_v27  ;;  %v1701_v38 = vld [vmem:[#allocation2 + $0x13c] sm:$0xf] }
  0x6c   :  { %986 = vmatpush.bf16.msra.mxu2 %v1193_v39  ;;  %v1338_v39 = vld [vmem:[#allocation2 + $0x178] sm:$0xf0] }
  0x6d   :  { %999 = vmatpush.bf16.msra.mxu3 %v1197_v42  ;;  %v1337_v42 = vor.u32 %v1709_v37, %v1336_v36  ;;  %v1341_v46 = vor.u32 %v1701_v38, %v1338_v39 }
  0x6e   :  { %961 = vmatmul.bf16.vlgmr.msra.gmra.mxu0 %v1879_v52  ;;  %974 = vmatmul.bf16.vlgmr.msra.gmra.mxu1 %v1879_v52 }
  0x6f   :  { %1005 = vmatpush.bf16.msrb.mxu0 %v1649_v43  ;;  %1018 = vmatpush.bf16.msrb.mxu1 %v1653_v44  ;;  %v1264_v43 = vld [vmem:[#allocation2 + $0xb0] sm:$0xf] }
  0x70   :  { %1031 = vmatpush.bf16.msrb.mxu2 %v1657_v45  ;;  %1000 = vmatmul.bf16.vlgmr.msra.gmra.mxu3 %v1879_v52  ;;  %v1692_v44 = vld [vmem:[#allocation2 + $0xec] sm:$0xf0]  ;;  %v1684_v45 = vld [vmem:[#allocation2 + $0xb4] sm:$0xf] }
  0x71   :  { %1044 = vmatpush.bf16.msrb.mxu3 %v1661_v49  ;;  %987 = vmatmul.bf16.vlgmr.msra.gmra.mxu2 %v1879_v52  ;;  %v1693_v49 = vld [vmem:[#allocation2 + $0xf4] sm:$0xf0]  ;;  %v1265_v53 = vor.u32 %v1692_v44, %v1264_v43  ;;  %v1269_v54 = vor.u32 %v1684_v45, %v1266_v47 }
  0x72   :  { %v1273_v55 = vor.u32 %v1693_v49, %v1272_v48 }
  0x73   :  { %1006 = vmatpush.bf16.msrb.mxu0 %v1585_v56  ;;  %1019 = vmatpush.bf16.msrb.mxu1 %v1589_v57  ;;  %v1200_v56 = vld [vmem:[#allocation2 + $0x30] sm:$0xf] }
  0x74   :  { %1032 = vmatpush.bf16.msrb.mxu2 %v1593_v58  ;;  %v1676_v57 = vld [vmem:[#allocation2 + $0x6c] sm:$0xf0]  ;;  %v1668_v58 = vld [vmem:[#allocation2 + $0x34] sm:$0xf] }
  0x75   :  { %1045 = vmatpush.bf16.msrb.mxu3 %v1597_v62  ;;  %v1677_v62 = vld [vmem:[#allocation2 + $0x74] sm:$0xf0]  ;;  %v1201_v1 = vor.u32 %v1676_v57, %v1200_v56  ;;  %v1205_v2 = vor.u32 %v1668_v58, %v1202_v60 }
  0x76   :  { %v1209_v3 = vor.u32 %v1677_v62, %v1208_v61 }
  0x77   :  { %1007 = vmatpush.bf16.msrb.mxu0 %v1521_v4  ;;  %1020 = vmatpush.bf16.msrb.mxu1 %v1525_v5  ;;  %v1213_v4 = vor.u32 %v1669_v63, %v1210_v0 }
  0x78   :  { %1033 = vmatpush.bf16.msrb.mxu2 %v1529_v6 }
  0x79   :  { %1046 = vmatpush.bf16.msrb.mxu3 %v1533_v10 }
  0x7b   :  { %1008 = vmatpush.bf16.msrb.mxu0 %v1457_v16  ;;  %1021 = vmatpush.bf16.msrb.mxu1 %v1461_v17  ;;  %v179_v16 = vperm.slane %v173_v13, 2  ;;  %v180_v17 = vperm.slane %v173_v13, 3 }
  0x7c   :  { %1034 = vmatpush.bf16.msrb.mxu2 %v1465_v18 }
  0x7d   :  { %1047 = vmatpush.bf16.msrb.mxu3 %v1469_v22  ;;  %v181_v22 = vperm.slane %v173_v13, 4 }
  0x7f   :  { %1009 = vmatpush.bf16.msrb.mxu0 %v1393_v28  ;;  %1022 = vmatpush.bf16.msrb.mxu1 %v1397_v29 }
  0x80   :  { %1035 = vmatpush.bf16.msrb.mxu2 %v1401_v30 }
  0x81   :  { %1048 = vmatpush.bf16.msrb.mxu3 %v1405_v34 }
  0x83   :  { %1010 = vmatpush.bf16.msrb.mxu0 %v1329_v40  ;;  %1023 = vmatpush.bf16.msrb.mxu1 %v1333_v41 }
  0x84   :  { %1036 = vmatpush.bf16.msrb.mxu2 %v1337_v42 }
  0x85   :  { %1049 = vmatpush.bf16.msrb.mxu3 %v1341_v46 }
  0x87   :  { %1011 = vmatpush.bf16.msrb.mxu0 %v1265_v53  ;;  %1024 = vmatpush.bf16.msrb.mxu1 %v1269_v54 }
  0x88   :  { %1037 = vmatpush.bf16.msrb.mxu2 %v1273_v55 }
  0x89   :  { %1050 = vmatpush.bf16.msrb.mxu3 %v1277_v59 }
  0x8b   :  { %1012 = vmatpush.bf16.msrb.mxu0 %v1201_v1  ;;  %1025 = vmatpush.bf16.msrb.mxu1 %v1205_v2 }
  0x8c   :  { %1038 = vmatpush.bf16.msrb.mxu2 %v1209_v3 }
  0x8d   :  { %1051 = vmatpush.bf16.msrb.mxu3 %v1213_v4 }
  0x8e   :  { %1013 = vmatmul.bf16.vlgmr.msrb.gmra.mxu0 %v1879_v52  ;;  %1026 = vmatmul.bf16.vlgmr.msrb.gmra.mxu1 %v1879_v52 }
  0x8f   :  { %1039 = vmatmul.bf16.vlgmr.msrb.gmra.mxu2 %v1879_v52 }
  0x90   :  { %1052 = vmatmul.bf16.vlgmr.msrb.gmra.mxu3 %v1879_v52 }
  0xab   :  { %v858_v5 = vpop.f32.mrf.mxu0  ;;  %v871_v6 = vpop.f32.mrf.mxu1 }
  0xac   :  { %v859_v18 = vadd.f32 %v858_v5, %v177_v14  ;;  %v872_v19 = vadd.f32 %v871_v6, %v178_v15 }
  0xae   :  { %v1057_v52 = vmax.f32 %v859_v18, 0.0  ;;  %v1058_v24 = vmax.f32 %v872_v19, 0.0 }
  0xb0   :  { %v1073_v34 = vpack.c.bf16 %v1058_v24, %v1057_v52 }
  0xb2   :  { %v1089_v42 = vrot.slane %v1073_v34, 3 }
  0xb3   :  { %v897_v8 = vpop.f32.mrf.mxu3  ;;  %v860_v9 = vpop.f32.mrf.mxu0 }
  0xb4   :  { %v884_v7 = vpop.f32.mrf.mxu2  ;;  %v873_v10 = vpop.f32.mrf.mxu1  ;;  %v898_v21 = vadd.f32 %v897_v8, %v180_v17  ;;  %v1106_v53 = vsel %vm1103_vm0, %v1073_v34, %v1089_v42  ;;  %v174_v8 = vld [vmem:[#allocation4 + $0x8] sm:$0xff] }
  0xb5   :  { %v885_v20 = vadd.f32 %v884_v7, %v179_v16  ;;  %v185_v9 = vperm.slane %v174_v8, 0  ;;  %v186_v10 = vperm.slane %v174_v8, 1  ;;  %v189_v14 = vperm.slane %v174_v8, 4 }
  0xb6   :  { %v1060_v26 = vmax.f32 %v898_v21, 0.0  ;;  %v190_v18 = vperm.slane %v174_v8, 5 }
  0xb7   :  { %v1059_v25 = vmax.f32 %v885_v20, 0.0 }
  0xb9   :  { %v1074_v35 = vpack.c.bf16 %v1060_v26, %v1059_v25 }
  0xbb   :  { %v899_v12 = vpop.f32.mrf.mxu3  ;;  %v1090_v43 = vrot.slane %v1074_v35, 6  ;;  %v1091_v46 = vrot.slane %v1074_v35, 1 }
  0xbc   :  { %v886_v11 = vpop.f32.mrf.mxu2  ;;  %v188_v12 = vperm.slane %v174_v8, 3 }
  0xbd   :  { %v1110_v54 = vsel %vm1107_vm1, %v1090_v43, %v1091_v46  ;;  %v187_v11 = vperm.slane %v174_v8, 2 }
  0xbe   :  { %v1112_v61 = vsel %vm1111_vm3, %v1106_v53, %v1110_v54 }
  0xcb   :  { %v910_v27 = vpop.f32.mrf.mxu0  ;;  %v923_v29 = vpop.f32.mrf.mxu1 }
  0xcc   :  { %v911_v28 = vadd.f32 %v910_v27, %v181_v22  ;;  %v924_v30 = vadd.f32 %v923_v29, %v182_v23  ;;  %v192_v29 = vperm.slane %v174_v8, 7 }
  0xce   :  { %v1061_v32 = vmax.f32 %v911_v28, 0.0  ;;  %v1062_v36 = vmax.f32 %v924_v30, 0.0  ;;  %v191_v28 = vperm.slane %v174_v8, 6 }
  0xd0   :  { %v1075_v38 = vpack.c.bf16 %v1062_v36, %v1061_v32 }
  0xd2   :  { %v1092_v47 = vrot.slane %v1075_v38, 4  ;;  %v1093_v48 = vrot.slane %v1075_v38, 7 }
  0xd3   :  { %v949_v40 = vpop.f32.mrf.mxu3  ;;  %v912_v45 = vpop.f32.mrf.mxu0 }
  0xd4   :  { %v936_v37 = vpop.f32.mrf.mxu2  ;;  %v950_v41 = vadd.f32 %v949_v40, %v184_v33  ;;  %v925_v50 = vpop.f32.mrf.mxu1  ;;  %v1116_v55 = vsel %vm1113_vm2, %v1092_v47, %v1093_v48 }
  0xd5   :  { %v937_v39 = vadd.f32 %v936_v37, %v183_v31 }
  0xd6   :  { %v1064_v49 = vmax.f32 %v950_v41, 0.0 }
  0xd7   :  { %v1063_v44 = vmax.f32 %v937_v39, 0.0 }
  0xd9   :  { %v1076_v51 = vpack.c.bf16 %v1064_v49, %v1063_v44 }
  0xdb   :  { %v1094_v56 = vrot.slane %v1076_v51, 2  ;;  %v1095_v57 = vrot.slane %v1076_v51, 5  ;;  %v951_v59 = vpop.f32.mrf.mxu3 }
  0xdc   :  { %v938_v58 = vpop.f32.mrf.mxu2 }
  0xdd   :  { %v1120_v60 = vsel %vm1117_vm4, %v1094_v56, %v1095_v57 }
  0xde   :  { %v1122_v62 = vsel %vm1121_vm5, %v1116_v55, %v1120_v60 }
  0xdf   :  { %v1124_v63 = vsel %vm1123_vm6, %v1112_v61, %v1122_v62 }
  0xe0   :  { %1142 = vst [vmem:[%s1920_s3] sm:$0xff] %v1124_v63 }
  0xeb   :  { %v962_v0 = vpop.f32.mrf.mxu0  ;;  %v975_v1 = vpop.f32.mrf.mxu1 }
  0xec   :  { %v963_v13 = vadd.f32 %v962_v0, %v185_v9  ;;  %v976_v15 = vadd.f32 %v975_v1, %v186_v10 }
  0xee   :  { %v1065_v20 = vmax.f32 %v963_v13, 0.0  ;;  %v1066_v23 = vmax.f32 %v976_v15, 0.0 }
  0xf0   :  { %v1077_v30 = vpack.c.bf16 %v1066_v23, %v1065_v20 }
  0xf2   :  { %v1096_v39 = vrot.slane %v1077_v30, 3 }
  0xf3   :  { %v1001_v3 = vpop.f32.mrf.mxu3  ;;  %v964_v4 = vpop.f32.mrf.mxu0 }
  0xf4   :  { %v988_v2 = vpop.f32.mrf.mxu2  ;;  %v977_v5 = vpop.f32.mrf.mxu1  ;;  %v1002_v17 = vadd.f32 %v1001_v3, %v188_v12  ;;  %v1127_v47 = vsel %vm1103_vm0, %v1077_v30, %v1096_v39 }
  0xf5   :  { %v989_v16 = vadd.f32 %v988_v2, %v187_v11 }
  0xf6   :  { %v1068_v24 = vmax.f32 %v1002_v17, 0.0 }
  0xf7   :  { %v1067_v52 = vmax.f32 %v989_v16, 0.0 }
  0xf9   :  { %v1078_v31 = vpack.c.bf16 %v1068_v24, %v1067_v52 }
  0xfb   :  { %v1003_v7 = vpop.f32.mrf.mxu3  ;;  %v1097_v40 = vrot.slane %v1078_v31, 6  ;;  %v1098_v42 = vrot.slane %v1078_v31, 1 }
  0xfc   :  { %v990_v6 = vpop.f32.mrf.mxu2 }
  0xfd   :  { %v1130_v48 = vsel %vm1107_vm1, %v1097_v40, %v1098_v42 }
  0xfe   :  { %v1131_v56 = vsel %vm1111_vm3, %v1127_v47, %v1130_v48 }
 0x10b   :  { %v1014_v19 = vpop.f32.mrf.mxu0  ;;  %v1027_v22 = vpop.f32.mrf.mxu1 }
 0x10c   :  { %v1015_v21 = vadd.f32 %v1014_v19, %v189_v14  ;;  %v1028_v25 = vadd.f32 %v1027_v22, %v190_v18 }
 0x10e   :  { %v1069_v26 = vmax.f32 %v1015_v21, 0.0  ;;  %v1070_v27 = vmax.f32 %v1028_v25, 0.0 }
 0x110   :  { %v1079_v32 = vpack.c.bf16 %v1070_v27, %v1069_v26 }
 0x112   :  { %v1040_v33 = vpop.f32.mrf.mxu2  ;;  %v1099_v43 = vrot.slane %v1079_v32, 4  ;;  %v1100_v44 = vrot.slane %v1079_v32, 7 }
 0x113   :  { %v1041_v34 = vadd.f32 %v1040_v33, %v191_v28  ;;  %v1053_v35 = vpop.f32.mrf.mxu3  ;;  %v1016_v36 = vpop.f32.mrf.mxu0 }
 0x114   :  { %v1054_v37 = vadd.f32 %v1053_v35, %v192_v29  ;;  %v1029_v38 = vpop.f32.mrf.mxu1  ;;  %v1134_v49 = vsel %vm1113_vm2, %v1099_v43, %v1100_v44 }
 0x115   :  { %v1071_v41 = vmax.f32 %v1041_v34, 0.0 }
 0x116   :  { %v1072_v45 = vmax.f32 %v1054_v37, 0.0 }
 0x118   :  { %v1080_v46 = vpack.c.bf16 %v1072_v45, %v1071_v41 }
 0x11a   :  { %v1101_v50 = vrot.slane %v1080_v46, 2  ;;  %v1102_v51 = vrot.slane %v1080_v46, 5  ;;  %v1042_v53 = vpop.f32.mrf.mxu2 }
 0x11b   :  { %v1055_v54 = vpop.f32.mrf.mxu3 }
 0x11c   :  { %v1137_v55 = vsel %vm1117_vm4, %v1101_v50, %v1102_v51 }
 0x11d   :  { %v1138_v57 = vsel %vm1121_vm5, %v1134_v49, %v1137_v55 }
 0x11e   :  { %v1139_v58 = vsel %vm1123_vm6, %v1131_v56, %v1138_v57 }
 0x11f   :  { %1143 = vst [vmem:[%s1920_s3 + $0x8] sm:$0xff] %v1139_v58 }
 0x120   :  { %1148 = vsyncpa [#allocation3], 1 }
 0x121   :  { %1149 = vsyncpa [#allocation5], 1 }

// kernel: decoder_forward.6
= control target key start
LH: loop header
LB: loop body
LE: loop exit
PB: predicated region body
PF: predicated region fallthrough
CT: control target
= control target key end

     0   :  { %11 = vsyncpa [#allocation3], 0  ;;  %s4795_s0 = inlined_call_operand.vmem [shape: bf16[30,1024], index: 0, kind: input, shape index: {}]   ;;  %s4796_s1 = inlined_call_operand.hbm [shape: bf16[1024,512], index: 1, kind: input, shape index: {}]   ;;  %s4797_s2 = inlined_call_operand.vmem [shape: bf16[30,4], index: 2, kind: input, shape index: {}]   ;;  %s4798_s3 = inlined_call_operand.hbm [shape: bf16[4,512], index: 3, kind: input, shape index: {}]   ;;  %s4799_s4 = inlined_call_operand.hbm [shape: f32[1,512], index: 4, kind: input, shape index: {}]   ;;  %s4800_s5 = inlined_call_operand.hbm [shape: f32[1,512], index: 5, kind: input, shape index: {}]   ;;  %s4801_s6 = inlined_call_operand.vmem [shape: bf16[30,512], index: 6, kind: output, shape index: {}]  }
   0x1   :  { %12 = vsyncpa [#allocation5], 0  ;;  %s36_s23 = sshll.u32 %s4798_s3, 4  ;;  %s37_s23 = int_to_ptr.hbm [resolvable:$true] %s36_s23 }
   0x2   :  { %13 = vsyncpa [#allocation8], 0  ;;  %s4260_s24 = smov [#allocation4]   ;;  %s20_s28 = sshll.u32 %s4796_s1, 4  ;;  %s21_s28 = int_to_ptr.hbm [resolvable:$true] %s20_s28 }
   0x3   :  { %s38_s25 = sshll.u32 %s4260_s24, 4  ;;  %s4261_s29 = smov [#allocation2]   ;;  %s39_s25 = int_to_ptr.vmem [resolvable:$true] %s38_s25 }
   0x4   :  { %41 = dma.hbm_to_vmem [thread:$0]  %s37_s23, 128, %s39_s25, [#allocation5]  }
   0x5   :  { %s22_s30 = sshll.u32 %s4261_s29, 4  ;;  %s4262_s7 = smov 256   ;;  %s23_s30 = int_to_ptr.vmem [resolvable:$true] %s22_s30 }
   0x6   :  { %s4263_s8 = smov 16   ;;  %s47_s3 = sshll.u32 %s4799_s4, 4  ;;  %s48_s3 = int_to_ptr.hbm [resolvable:$true] %s47_s3 }
   0x7   :  { %28 = dma.hbm_to_vmem [thread:$0]  %s21_s28, 32768, %s23_s30, [#allocation3], %s4262_s7, %s4262_s7, %s4263_s8  }
   0x8   :  { %s4264_s11 = smov [#allocation6]   ;;  %s58_s1 = sshll.u32 %s4800_s5, 4  ;;  %s59_s1 = int_to_ptr.hbm [resolvable:$true] %s58_s1 }
   0x9   :  { %s49_s12 = sshll.u32 %s4264_s11, 4  ;;  %s4265_s15 = smov [#allocation7]   ;;  %s50_s12 = int_to_ptr.vmem [resolvable:$true] %s49_s12 }
   0xa   :  { %52 = dma.hbm_to_vmem [thread:$0]  %s48_s3, 64, %s50_s12, [#allocation5]  }
   0xb   :  { %s60_s16 = sshll.u32 %s4265_s15, 4  ;;  %s61_s16 = int_to_ptr.vmem [resolvable:$true] %s60_s16 }
   0xc   :  { %63 = dma.hbm_to_vmem [thread:$0]  %s59_s1, 64, %s61_s16, [#allocation8]  }
   0xd   :  { %4254 = dma.done.wait [#allocation3], 32768  }
   0xe   :  { %4255 = vsyncadd [#allocation3], 4294934528 }
   0xf   :  { %4256 = dma.done.wait [#allocation5], 192  }
  0x10   :  { %4257 = vsyncadd [#allocation5], 4294967104 }
  0x11   :  { %4258 = dma.done.wait [#allocation8], 64  }
  0x12   :  { %4259 = vsyncadd [#allocation8], 4294967232  ;;  %v2944_v0 = vld [vmem:[#allocation2 + $0xe0] sm:$0xf]  ;;  %v3916_v1 = vld [vmem:[#allocation2 + $0xec] sm:$0xf0] }
  0x13   :  { %v3072_v2 = vld [vmem:[#allocation2 + $0x1e0] sm:$0xf]  ;;  %v2945_v3 = vor.u32 %v3916_v1, %v2944_v0  ;;  %v3948_v4 = vld [vmem:[#allocation2 + $0x1ec] sm:$0xf0]  ;;  %vm2349_vm0 = vcmask 1041408   ;;  %vm2342_vm1 = vcmask 31744  }
  0x14   :  { %v3200_v5 = vld [vmem:[#allocation2 + $0x2e0] sm:$0xf]  ;;  %v3980_v6 = vld [vmem:[#allocation2 + $0x2ec] sm:$0xf0]  ;;  %v3073_v7 = vor.u32 %v3948_v4, %v3072_v2  ;;  %vm2452_vm2 = vcmask 1045504  }
  0x15   :  { %v3201_v8 = vor.u32 %v3980_v6, %v3200_v5  ;;  %v3328_v9 = vld [vmem:[#allocation2 + $0x3e0] sm:$0xf]  ;;  %v4012_v10 = vld [vmem:[#allocation2 + $0x3ec] sm:$0xf0]  ;;  %1713 = vmatpush.bf16.msra.mxu0 %v2945_v3 }
  0x16   :  { %v2928_v11 = vld [vmem:[#allocation2 + $0xc0] sm:$0xf]  ;;  %v3329_v12 = vor.u32 %v4012_v10, %v3328_v9  ;;  %v3912_v13 = vld [vmem:[#allocation2 + $0xcc] sm:$0xf0]  ;;  %1732 = vmatpush.bf16.msra.mxu1 %v3073_v7 }
  0x17   :  { %v3056_v14 = vld [vmem:[#allocation2 + $0x1c0] sm:$0xf]  ;;  %v3944_v15 = vld [vmem:[#allocation2 + $0x1cc] sm:$0xf0]  ;;  %1751 = vmatpush.bf16.msra.mxu2 %v3201_v8  ;;  %v2929_v16 = vor.u32 %v3912_v13, %v2928_v11 }
  0x18   :  { %v3057_v17 = vor.u32 %v3944_v15, %v3056_v14  ;;  %v3184_v18 = vld [vmem:[#allocation2 + $0x2c0] sm:$0xf]  ;;  %v3976_v19 = vld [vmem:[#allocation2 + $0x2cc] sm:$0xf0]  ;;  %1770 = vmatpush.bf16.msra.mxu3 %v3329_v12 }
  0x19   :  { %v3312_v20 = vld [vmem:[#allocation2 + $0x3c0] sm:$0xf]  ;;  %v3185_v21 = vor.u32 %v3976_v19, %v3184_v18  ;;  %v4008_v22 = vld [vmem:[#allocation2 + $0x3cc] sm:$0xf0]  ;;  %1714 = vmatpush.bf16.msra.mxu0 %v2929_v16 }
  0x1a   :  { %v2912_v23 = vld [vmem:[#allocation2 + $0xa0] sm:$0xf]  ;;  %v3908_v24 = vld [vmem:[#allocation2 + $0xac] sm:$0xf0]  ;;  %v3313_v25 = vor.u32 %v4008_v22, %v3312_v20  ;;  %1733 = vmatpush.bf16.msra.mxu1 %v3057_v17 }
  0x1b   :  { %v3040_v26 = vld [vmem:[#allocation2 + $0x1a0] sm:$0xf]  ;;  %v3940_v27 = vld [vmem:[#allocation2 + $0x1ac] sm:$0xf0]  ;;  %v2913_v29 = vor.u32 %v3908_v24, %v2912_v23  ;;  %1752 = vmatpush.bf16.msra.mxu2 %v3185_v21 }
  0x1c   :  { %v3168_v28 = vld [vmem:[#allocation2 + $0x2a0] sm:$0xf]  ;;  %v3972_v30 = vld [vmem:[#allocation2 + $0x2ac] sm:$0xf0]  ;;  %v3041_v33 = vor.u32 %v3940_v27, %v3040_v26  ;;  %1771 = vmatpush.bf16.msra.mxu3 %v3313_v25 }
  0x1d   :  { %v3296_v31 = vld [vmem:[#allocation2 + $0x3a0] sm:$0xf]  ;;  %v4004_v32 = vld [vmem:[#allocation2 + $0x3ac] sm:$0xf0]  ;;  %v3169_v34 = vor.u32 %v3972_v30, %v3168_v28  ;;  %1715 = vmatpush.bf16.msra.mxu0 %v2913_v29  ;;  %v2768_v28 = vld [vmem:[%s4795_s0] sm:$0xf] }
  0x1e   :  { %v2896_v35 = vld [vmem:[#allocation2 + $0x80] sm:$0xf]  ;;  %v3904_v36 = vld [vmem:[#allocation2 + $0x8c] sm:$0xf0]  ;;  %v3297_v38 = vor.u32 %v4004_v32, %v3296_v31  ;;  %1734 = vmatpush.bf16.msra.mxu1 %v3041_v33  ;;  %v3874_v29 = vld [vmem:[%s4795_s0 + $0x1c] sm:$0xf0] }
  0x1f   :  { %v3024_v37 = vld [vmem:[#allocation2 + $0x180] sm:$0xf]  ;;  %v3936_v39 = vld [vmem:[#allocation2 + $0x18c] sm:$0xf0]  ;;  %v2897_v44 = vor.u32 %v3904_v36, %v2896_v35  ;;  %1753 = vmatpush.bf16.msra.mxu2 %v3169_v34  ;;  %v3870_v30 = vld [vmem:[%s4795_s0 + $0x4] sm:$0xf] }
  0x20   :  { %v3152_v40 = vld [vmem:[#allocation2 + $0x280] sm:$0xf]  ;;  %v3968_v41 = vld [vmem:[#allocation2 + $0x28c] sm:$0xf0]  ;;  %v3025_v45 = vor.u32 %v3936_v39, %v3024_v37  ;;  %1772 = vmatpush.bf16.msra.mxu3 %v3297_v38  ;;  %v2770_v31 = vld [vmem:[%s4795_s0 + $0x20] sm:$0xf0] }
  0x21   :  { %v3280_v42 = vld [vmem:[#allocation2 + $0x380] sm:$0xf]  ;;  %v4000_v43 = vld [vmem:[#allocation2 + $0x38c] sm:$0xf0]  ;;  %v3153_v46 = vor.u32 %v3968_v41, %v3152_v40  ;;  %1716 = vmatpush.bf16.msra.mxu0 %v2897_v44  ;;  %v3871_v41 = vld [vmem:[%s4795_s0 + $0xc] sm:$0xf] }
  0x22   :  { %v2880_v47 = vld [vmem:[#allocation2 + $0x60] sm:$0xf]  ;;  %v3900_v48 = vld [vmem:[#allocation2 + $0x6c] sm:$0xf0]  ;;  %v3281_v50 = vor.u32 %v4000_v43, %v3280_v42  ;;  %1735 = vmatpush.bf16.msra.mxu1 %v3025_v45  ;;  %v2778_v42 = vld [vmem:[%s4795_s0 + $0x28] sm:$0xf0] }
  0x23   :  { %v3008_v49 = vld [vmem:[#allocation2 + $0x160] sm:$0xf]  ;;  %v3932_v51 = vld [vmem:[#allocation2 + $0x16c] sm:$0xf0]  ;;  %v2881_v56 = vor.u32 %v3900_v48, %v2880_v47  ;;  %1754 = vmatpush.bf16.msra.mxu2 %v3153_v46  ;;  %v4337_v48 = vor.u32 %v3874_v29, %v2768_v28  ;;  %v3878_v28 = vld [vmem:[%s4795_s0 + $0x44] sm:$0xf] }
  0x24   :  { %v3136_v52 = vld [vmem:[#allocation2 + $0x260] sm:$0xf]  ;;  %v3964_v53 = vld [vmem:[#allocation2 + $0x26c] sm:$0xf0]  ;;  %v3009_v57 = vor.u32 %v3932_v51, %v3008_v49  ;;  %1773 = vmatpush.bf16.msra.mxu3 %v3281_v50  ;;  %v2802_v29 = vld [vmem:[%s4795_s0 + $0x60] sm:$0x70] }
  0x25   :  { %v3264_v54 = vld [vmem:[#allocation2 + $0x360] sm:$0xf]  ;;  %v3996_v55 = vld [vmem:[#allocation2 + $0x36c] sm:$0xf0]  ;;  %v3137_v58 = vor.u32 %v3964_v53, %v3136_v52  ;;  %1717 = vmatpush.bf16.msra.mxu0 %v2881_v56  ;;  %v4339_v53 = vor.u32 %v3870_v30, %v2770_v31 }
  0x26   :  { %v2864_v59 = vld [vmem:[#allocation2 + $0x40] sm:$0xf]  ;;  %v3896_v60 = vld [vmem:[#allocation2 + $0x4c] sm:$0xf0]  ;;  %v3265_v62 = vor.u32 %v3996_v55, %v3264_v54  ;;  %1736 = vmatpush.bf16.msra.mxu1 %v3009_v57  ;;  %v4343_v57 = vor.u32 %v3871_v41, %v2778_v42 }
  0x27   :  { %v2992_v61 = vld [vmem:[#allocation2 + $0x140] sm:$0xf]  ;;  %v3928_v63 = vld [vmem:[#allocation2 + $0x14c] sm:$0xf0]  ;;  %v2865_v4 = vor.u32 %v3896_v60, %v2864_v59  ;;  %1755 = vmatpush.bf16.msra.mxu2 %v3137_v58 }
  0x28   :  { %v3120_v0 = vld [vmem:[#allocation2 + $0x240] sm:$0xf]  ;;  %v3960_v1 = vld [vmem:[#allocation2 + $0x24c] sm:$0xf0]  ;;  %v2993_v5 = vor.u32 %v3928_v63, %v2992_v61  ;;  %1774 = vmatpush.bf16.msra.mxu3 %v3265_v62 }
  0x29   :  { %v3248_v2 = vld [vmem:[#allocation2 + $0x340] sm:$0xf]  ;;  %v3992_v3 = vld [vmem:[#allocation2 + $0x34c] sm:$0xf0]  ;;  %v3121_v6 = vor.u32 %v3960_v1, %v3120_v0  ;;  %1718 = vmatpush.bf16.msra.mxu0 %v2865_v4 }
  0x2a   :  { %v2848_v7 = vld [vmem:[#allocation2 + $0x20] sm:$0xf]  ;;  %v3892_v8 = vld [vmem:[#allocation2 + $0x2c] sm:$0xf0]  ;;  %v3249_v10 = vor.u32 %v3992_v3, %v3248_v2  ;;  %1737 = vmatpush.bf16.msra.mxu1 %v2993_v5 }
  0x2b   :  { %v2976_v9 = vld [vmem:[#allocation2 + $0x120] sm:$0xf]  ;;  %v3924_v11 = vld [vmem:[#allocation2 + $0x12c] sm:$0xf0]  ;;  %v2849_v17 = vor.u32 %v3892_v8, %v2848_v7  ;;  %1756 = vmatpush.bf16.msra.mxu2 %v3121_v6 }
  0x2c   :  { %v3104_v12 = vld [vmem:[#allocation2 + $0x220] sm:$0xf]  ;;  %v3956_v13 = vld [vmem:[#allocation2 + $0x22c] sm:$0xf0]  ;;  %v2977_v21 = vor.u32 %v3924_v11, %v2976_v9  ;;  %1775 = vmatpush.bf16.msra.mxu3 %v3249_v10 }
  0x2d   :  { %v3232_v14 = vld [vmem:[#allocation2 + $0x320] sm:$0xf]  ;;  %v3988_v15 = vld [vmem:[#allocation2 + $0x32c] sm:$0xf0]  ;;  %v3105_v22 = vor.u32 %v3956_v13, %v3104_v12  ;;  %1719 = vmatpush.bf16.msra.mxu0 %v2849_v17 }
  0x2e   :  { %v2832_v16 = vld [vmem:[#allocation2] sm:$0xf]  ;;  %v3888_v18 = vld [vmem:[#allocation2 + $0xc] sm:$0xf0]  ;;  %v3233_v26 = vor.u32 %v3988_v15, %v3232_v14  ;;  %1738 = vmatpush.bf16.msra.mxu1 %v2977_v21 }
  0x2f   :  { %v2960_v19 = vld [vmem:[#allocation2 + $0x100] sm:$0xf]  ;;  %v3920_v20 = vld [vmem:[#allocation2 + $0x10c] sm:$0xf0]  ;;  %v2833_v34 = vor.u32 %v3888_v18, %v2832_v16  ;;  %1757 = vmatpush.bf16.msra.mxu2 %v3105_v22 }
  0x30   :  { %v3088_v23 = vld [vmem:[#allocation2 + $0x200] sm:$0xf]  ;;  %v3952_v24 = vld [vmem:[#allocation2 + $0x20c] sm:$0xf0]  ;;  %v2961_v38 = vor.u32 %v3920_v20, %v2960_v19  ;;  %1776 = vmatpush.bf16.msra.mxu3 %v3233_v26  ;;  %v3882_v26 = vld [vmem:[%s4795_s0 + $0x5c] sm:$0x70] }
  0x31   :  { %v3216_v25 = vld [vmem:[#allocation2 + $0x300] sm:$0xf]  ;;  %v3984_v27 = vld [vmem:[#allocation2 + $0x30c] sm:$0xf0]  ;;  %v3089_v39 = vor.u32 %v3952_v24, %v3088_v23  ;;  %1720 = vmatpush.bf16.msra.mxu0 %v2833_v34 }
  0x32   :  { %v3712_v32 = vld [vmem:[#allocation2 + $0x6e0] sm:$0xf]  ;;  %v4108_v33 = vld [vmem:[#allocation2 + $0x6ec] sm:$0xf0]  ;;  %v3217_v43 = vor.u32 %v3984_v27, %v3216_v25  ;;  %1739 = vmatpush.bf16.msra.mxu1 %v2961_v38  ;;  %v2800_v25 = vld [vmem:[%s4795_s0 + $0x40] sm:$0xf] }
  0x33   :  { %v2776_v35 = vld [vmem:[%s4795_s0 + $0x8] sm:$0xf]  ;;  %v4140_v37 = vld [vmem:[#allocation2 + $0x7ec] sm:$0xf0]  ;;  %v3713_v44 = vor.u32 %v4108_v33, %v3712_v32  ;;  %1758 = vmatpush.bf16.msra.mxu2 %v3089_v39  ;;  %v2810_v38 = vld [vmem:[%s4795_s0 + $0x68] sm:$0x70] }
  0x34   :  { %v3840_v36 = vld [vmem:[#allocation2 + $0x7e0] sm:$0xf]  ;;  %v4044_v46 = vld [vmem:[#allocation2 + $0x4ec] sm:$0xf0]  ;;  %1777 = vmatpush.bf16.msra.mxu3 %v3217_v43  ;;  %1721 = vmatmul.bf16.vlgmr.msra.gmra.mxu0 %v4337_v48 }
  0x35   :  { %v3875_v40 = vld [vmem:[%s4795_s0 + $0x24] sm:$0xf0]  ;;  %v3841_v49 = vor.u32 %v4140_v37, %v3840_v36  ;;  %v4076_v50 = vld [vmem:[#allocation2 + $0x5ec] sm:$0xf0]  ;;  %1740 = vmatmul.bf16.vlgmr.msra.gmra.mxu1 %v4339_v53  ;;  %v3879_v37 = vld [vmem:[%s4795_s0 + $0x4c] sm:$0xf] }
  0x36   :  { %v3456_v45 = vld [vmem:[#allocation2 + $0x4e0] sm:$0xf]  ;;  %v4104_v52 = vld [vmem:[#allocation2 + $0x6cc] sm:$0xf0]  ;;  %v4341_v54 = vor.u32 %v3875_v40, %v2776_v35 }
  0x37   :  { %v3584_v47 = vld [vmem:[#allocation2 + $0x5e0] sm:$0xf]  ;;  %v4136_v56 = vld [vmem:[#allocation2 + $0x7cc] sm:$0xf0]  ;;  %v3457_v58 = vor.u32 %v4044_v46, %v3456_v45  ;;  %1827 = vmatpush.bf16.msrb.mxu2 %v3713_v44  ;;  %1778 = vmatmul.bf16.vlgmr.msra.gmra.mxu3 %v4343_v57  ;;  %v4373_v44 = vor.u32 %v3882_v26, %v2800_v25 }
  0x38   :  { %v3696_v51 = vld [vmem:[#allocation2 + $0x6c0] sm:$0xf]  ;;  %v3585_v59 = vor.u32 %v4076_v50, %v3584_v47  ;;  %v4040_v62 = vld [vmem:[#allocation2 + $0x4cc] sm:$0xf0]  ;;  %1846 = vmatpush.bf16.msrb.mxu3 %v3841_v49  ;;  %1759 = vmatmul.bf16.vlgmr.msra.gmra.mxu2 %v4341_v54  ;;  %v4375_v50 = vor.u32 %v3878_v28, %v2802_v29 }
  0x39   :  { %v3824_v55 = vld [vmem:[#allocation2 + $0x7c0] sm:$0xf]  ;;  %v3697_v60 = vor.u32 %v4104_v52, %v3696_v51  ;;  %v4072_v1 = vld [vmem:[#allocation2 + $0x5cc] sm:$0xf0]  ;;  %1789 = vmatpush.bf16.msrb.mxu0 %v3457_v58 }
  0x3a   :  { %v3440_v61 = vld [vmem:[#allocation2 + $0x4c0] sm:$0xf]  ;;  %v3825_v0 = vor.u32 %v4136_v56, %v3824_v55  ;;  %v4100_v3 = vld [vmem:[#allocation2 + $0x6ac] sm:$0xf0]  ;;  %1808 = vmatpush.bf16.msrb.mxu1 %v3585_v59  ;;  %v4379_v56 = vor.u32 %v3879_v37, %v2810_v38  ;;  %v2786_v37 = vld [vmem:[%s4795_s0 + $0x30] sm:$0xf0] }
  0x3b   :  { %v3568_v63 = vld [vmem:[#allocation2 + $0x5c0] sm:$0xf]  ;;  %v4132_v5 = vld [vmem:[#allocation2 + $0x7ac] sm:$0xf0]  ;;  %v3441_v6 = vor.u32 %v4040_v62, %v3440_v61  ;;  %1828 = vmatpush.bf16.msrb.mxu2 %v3697_v60 }
  0x3c   :  { %v3680_v2 = vld [vmem:[#allocation2 + $0x6a0] sm:$0xf]  ;;  %v3569_v7 = vor.u32 %v4072_v1, %v3568_v63  ;;  %v4036_v10 = vld [vmem:[#allocation2 + $0x4ac] sm:$0xf0]  ;;  %1847 = vmatpush.bf16.msrb.mxu3 %v3825_v0 }
  0x3d   :  { %v3808_v4 = vld [vmem:[#allocation2 + $0x7a0] sm:$0xf]  ;;  %v3681_v8 = vor.u32 %v4100_v3, %v3680_v2  ;;  %v4068_v13 = vld [vmem:[#allocation2 + $0x5ac] sm:$0xf0]  ;;  %1790 = vmatpush.bf16.msrb.mxu0 %v3441_v6 }
  0x3e   :  { %v3424_v9 = vld [vmem:[#allocation2 + $0x4a0] sm:$0xf]  ;;  %v3809_v12 = vor.u32 %v4132_v5, %v3808_v4  ;;  %v4096_v15 = vld [vmem:[#allocation2 + $0x68c] sm:$0xf0]  ;;  %1809 = vmatpush.bf16.msrb.mxu1 %v3569_v7 }
  0x3f   :  { %v3552_v11 = vld [vmem:[#allocation2 + $0x5a0] sm:$0xf]  ;;  %v4128_v17 = vld [vmem:[#allocation2 + $0x78c] sm:$0xf0]  ;;  %v3425_v18 = vor.u32 %v4036_v10, %v3424_v9  ;;  %1829 = vmatpush.bf16.msrb.mxu2 %v3681_v8 }
  0x40   :  { %v3664_v14 = vld [vmem:[#allocation2 + $0x680] sm:$0xf]  ;;  %v4032_v20 = vld [vmem:[#allocation2 + $0x48c] sm:$0xf0]  ;;  %v3553_v22 = vor.u32 %v4068_v13, %v3552_v11  ;;  %1848 = vmatpush.bf16.msrb.mxu3 %v3809_v12 }
  0x41   :  { %v3792_v16 = vld [vmem:[#allocation2 + $0x780] sm:$0xf]  ;;  %v3665_v23 = vor.u32 %v4096_v15, %v3664_v14  ;;  %v4064_v24 = vld [vmem:[#allocation2 + $0x58c] sm:$0xf0]  ;;  %1791 = vmatpush.bf16.msrb.mxu0 %v3425_v18  ;;  %v3978_v18 = vld [vmem:[#allocation2 + $0x2e4] sm:$0xf] }
  0x42   :  { %v3408_v19 = vld [vmem:[#allocation2 + $0x480] sm:$0xf]  ;;  %v3793_v27 = vor.u32 %v4128_v17, %v3792_v16  ;;  %v4092_v31 = vld [vmem:[#allocation2 + $0x66c] sm:$0xf0]  ;;  %1810 = vmatpush.bf16.msrb.mxu1 %v3553_v22  ;;  %v4010_v22 = vld [vmem:[#allocation2 + $0x3e4] sm:$0xf] }
  0x43   :  { %v3536_v21 = vld [vmem:[#allocation2 + $0x580] sm:$0xf]  ;;  %v4124_v34 = vld [vmem:[#allocation2 + $0x76c] sm:$0xf0]  ;;  %v3409_v35 = vor.u32 %v4032_v20, %v3408_v19  ;;  %1830 = vmatpush.bf16.msrb.mxu2 %v3665_v23  ;;  %v3202_v19 = vld [vmem:[#allocation2 + $0x2f0] sm:$0xf0] }
  0x44   :  { %v3648_v30 = vld [vmem:[#allocation2 + $0x660] sm:$0xf]  ;;  %v3537_v39 = vor.u32 %v4064_v24, %v3536_v21  ;;  %v4028_v42 = vld [vmem:[#allocation2 + $0x46c] sm:$0xf0]  ;;  %1849 = vmatpush.bf16.msrb.mxu3 %v3793_v27  ;;  %1726 = vmatmul.bf16.gmra.mxu0 %v4373_v44  ;;  %v3330_v23 = vld [vmem:[#allocation2 + $0x3f0] sm:$0xf0] }
  0x45   :  { %v2808_v32 = vld [vmem:[%s4795_s0 + $0x48] sm:$0xf]  ;;  %v3649_v40 = vor.u32 %v4092_v31, %v3648_v30  ;;  %v4060_v46 = vld [vmem:[#allocation2 + $0x56c] sm:$0xf0]  ;;  %1792 = vmatpush.bf16.msrb.mxu0 %v3409_v35  ;;  %1745 = vmatmul.bf16.gmra.mxu1 %v4375_v50  ;;  %v2784_v30 = vld [vmem:[%s4795_s0 + $0x10] sm:$0xf]  ;;  %v3333_v38 = vor.u32 %v4010_v22, %v3330_v23 }
  0x46   :  { %v3776_v33 = vld [vmem:[#allocation2 + $0x760] sm:$0xf]  ;;  %v4088_v49 = vld [vmem:[#allocation2 + $0x64c] sm:$0xf0]  ;;  %1811 = vmatpush.bf16.msrb.mxu1 %v3537_v39  ;;  %v3876_v31 = vld [vmem:[%s4795_s0 + $0x2c] sm:$0xf0] }
  0x47   :  { %v3883_v36 = vld [vmem:[%s4795_s0 + $0x64] sm:$0x70]  ;;  %v3777_v45 = vor.u32 %v4124_v34, %v3776_v33  ;;  %v4120_v55 = vld [vmem:[#allocation2 + $0x74c] sm:$0xf0]  ;;  %1831 = vmatpush.bf16.msrb.mxu2 %v3649_v40  ;;  %1783 = vmatmul.bf16.gmra.mxu3 %v4379_v56  ;;  %v3914_v33 = vld [vmem:[#allocation2 + $0xe4] sm:$0xf] }
  0x48   :  { %v3392_v41 = vld [vmem:[#allocation2 + $0x460] sm:$0xf]  ;;  %v4377_v51 = vor.u32 %v3883_v36, %v2808_v32  ;;  %v4024_v62 = vld [vmem:[#allocation2 + $0x44c] sm:$0xf0]  ;;  %v3205_v32 = vor.u32 %v3978_v18, %v3202_v19  ;;  %v2946_v34 = vld [vmem:[#allocation2 + $0xf0] sm:$0xf0] }
  0x49   :  { %v3520_v43 = vld [vmem:[#allocation2 + $0x560] sm:$0xf]  ;;  %v3393_v58 = vor.u32 %v4028_v42, %v3392_v41  ;;  %1850 = vmatpush.bf16.msrb.mxu3 %v3777_v45  ;;  %v4056_v1 = vld [vmem:[#allocation2 + $0x54c] sm:$0xf0]  ;;  %v3946_v35 = vld [vmem:[#allocation2 + $0x1e4] sm:$0xf] }
  0x4a   :  { %v3632_v47 = vld [vmem:[#allocation2 + $0x640] sm:$0xf]  ;;  %v3521_v59 = vor.u32 %v4060_v46, %v3520_v43  ;;  %v4084_v3 = vld [vmem:[#allocation2 + $0x62c] sm:$0xf0]  ;;  %1764 = vmatmul.bf16.gmra.mxu2 %v4377_v51  ;;  %v3872_v36 = vld [vmem:[%s4795_s0 + $0x14] sm:$0xf] }
  0x4b   :  { %v3760_v52 = vld [vmem:[#allocation2 + $0x740] sm:$0xf]  ;;  %v3633_v60 = vor.u32 %v4088_v49, %v3632_v47  ;;  %v4116_v5 = vld [vmem:[#allocation2 + $0x72c] sm:$0xf0]  ;;  %1793 = vmatpush.bf16.msrb.mxu0 %v3393_v58  ;;  %v3074_v39 = vld [vmem:[#allocation2 + $0x1f0] sm:$0xf0] }
  0x4c   :  { %v3376_v61 = vld [vmem:[#allocation2 + $0x440] sm:$0xf]  ;;  %v3761_v0 = vor.u32 %v4120_v55, %v3760_v52  ;;  %1812 = vmatpush.bf16.msrb.mxu1 %v3521_v59  ;;  %v4020_v10 = vld [vmem:[#allocation2 + $0x42c] sm:$0xf0]  ;;  %v3974_v40 = vld [vmem:[#allocation2 + $0x2c4] sm:$0xf]  ;;  %v2949_v52 = vor.u32 %v3914_v33, %v2946_v34  ;;  %v3077_v59 = vor.u32 %v3946_v35, %v3074_v39 }
  0x4d   :  { %v3504_v63 = vld [vmem:[#allocation2 + $0x540] sm:$0xf]  ;;  %v3377_v6 = vor.u32 %v4024_v62, %v3376_v61  ;;  %1832 = vmatpush.bf16.msrb.mxu2 %v3633_v60  ;;  %v4052_v12 = vld [vmem:[#allocation2 + $0x52c] sm:$0xf0]  ;;  %v3186_v41 = vld [vmem:[#allocation2 + $0x2d0] sm:$0xf0] }
  0x4e   :  { %v3616_v2 = vld [vmem:[#allocation2 + $0x620] sm:$0xf]  ;;  %v3505_v8 = vor.u32 %v4056_v1, %v3504_v63  ;;  %1851 = vmatpush.bf16.msrb.mxu3 %v3761_v0  ;;  %v4080_v15 = vld [vmem:[#allocation2 + $0x60c] sm:$0xf0]  ;;  %v3873_v46 = vld [vmem:[%s4795_s0 + $0x1c] sm:$0xf]  ;;  %v3189_v60 = vor.u32 %v3974_v40, %v3186_v41  ;;  %v4409_v0 = vor.u32 %v3876_v31, %v2784_v30 }
  0x4f   :  { %v3744_v4 = vld [vmem:[#allocation2 + $0x720] sm:$0xf]  ;;  %v3617_v9 = vor.u32 %v4084_v3, %v3616_v2  ;;  %v4112_v17 = vld [vmem:[#allocation2 + $0x70c] sm:$0xf0]  ;;  %1794 = vmatpush.bf16.msrb.mxu0 %v3377_v6  ;;  %v2794_v49 = vld [vmem:[%s4795_s0 + $0x38] sm:$0xf0] }
  0x50   :  { %v3360_v7 = vld [vmem:[#allocation2 + $0x420] sm:$0xf]  ;;  %v3745_v13 = vor.u32 %v4116_v5, %v3744_v4  ;;  %1813 = vmatpush.bf16.msrb.mxu1 %v3505_v8  ;;  %v4016_v26 = vld [vmem:[#allocation2 + $0x40c] sm:$0xf0]  ;;  %v4006_v55 = vld [vmem:[#allocation2 + $0x3c4] sm:$0xf]  ;;  %v4413_v5 = vor.u32 %v3872_v36, %v2786_v37  ;;  %v4415_v6 = vor.u32 %v3873_v46, %v2794_v49 }
  0x51   :  { %v3488_v11 = vld [vmem:[#allocation2 + $0x520] sm:$0xf]  ;;  %v3361_v20 = vor.u32 %v4020_v10, %v3360_v7  ;;  %1833 = vmatpush.bf16.msrb.mxu2 %v3617_v9  ;;  %v4048_v28 = vld [vmem:[#allocation2 + $0x50c] sm:$0xf0]  ;;  %v3314_v58 = vld [vmem:[#allocation2 + $0x3d0] sm:$0xf0] }
  0x52   :  { %v3600_v14 = vld [vmem:[#allocation2 + $0x600] sm:$0xf]  ;;  %v3489_v24 = vor.u32 %v4052_v12, %v3488_v11  ;;  %1852 = vmatpush.bf16.msrb.mxu3 %v3745_v13  ;;  %v2792_v43 = vld [vmem:[%s4795_s0 + $0x18] sm:$0xf]  ;;  %v3910_v61 = vld [vmem:[#allocation2 + $0xc4] sm:$0xf]  ;;  %v3317_v7 = vor.u32 %v4006_v55, %v3314_v58 }
  0x53   :  { %v3728_v16 = vld [vmem:[#allocation2 + $0x700] sm:$0xf]  ;;  %v3601_v25 = vor.u32 %v4080_v15, %v3600_v14  ;;  %1795 = vmatpush.bf16.msrb.mxu0 %v3361_v20  ;;  %v3877_v45 = vld [vmem:[%s4795_s0 + $0x34] sm:$0xf0]  ;;  %v2930_v62 = vld [vmem:[#allocation2 + $0xd0] sm:$0xf0] }
  0x54   :  { %v3344_v21 = vld [vmem:[#allocation2 + $0x400] sm:$0xf]  ;;  %v3729_v29 = vor.u32 %v4112_v17, %v3728_v16  ;;  %1814 = vmatpush.bf16.msrb.mxu1 %v3489_v24  ;;  %v3942_v63 = vld [vmem:[#allocation2 + $0x1c4] sm:$0xf]  ;;  %v4411_v1 = vor.u32 %v3877_v45, %v2792_v43  ;;  %v3058_v2 = vld [vmem:[#allocation2 + $0x1d0] sm:$0xf0]  ;;  %v2933_v8 = vor.u32 %v3910_v61, %v2930_v62 }
  0x55   :  { %v3472_v27 = vld [vmem:[#allocation2 + $0x500] sm:$0xf]  ;;  %v3345_v42 = vor.u32 %v4016_v26, %v3344_v21  ;;  %1834 = vmatpush.bf16.msrb.mxu2 %v3601_v25  ;;  %v3970_v3 = vld [vmem:[#allocation2 + $0x2a4] sm:$0xf]  ;;  %v3170_v4 = vld [vmem:[#allocation2 + $0x2b0] sm:$0xf0]  ;;  %v3061_v11 = vor.u32 %v3942_v63, %v3058_v2 }
  0x56   :  { %v3473_v47 = vor.u32 %v4048_v28, %v3472_v27  ;;  %1853 = vmatpush.bf16.msrb.mxu3 %v3729_v29  ;;  %v4002_v9 = vld [vmem:[#allocation2 + $0x3a4] sm:$0xf]  ;;  %v3298_v10 = vld [vmem:[#allocation2 + $0x3b0] sm:$0xf0]  ;;  %v3173_v12 = vor.u32 %v3970_v3, %v3170_v4  ;;  %v2816_v36 = vld [vmem:[%s4795_s0 + $0x50] sm:$0xf] }
  0x57   :  { %1796 = vmatpush.bf16.msrb.mxu0 %v3345_v42  ;;  %v3906_v13 = vld [vmem:[#allocation2 + $0xa4] sm:$0xf]  ;;  %v2914_v14 = vld [vmem:[#allocation2 + $0xb0] sm:$0xf0]  ;;  %v3301_v19 = vor.u32 %v4002_v9, %v3298_v10  ;;  %v3884_v37 = vld [vmem:[%s4795_s0 + $0x6c] sm:$0x70] }
  0x58   :  { %1815 = vmatpush.bf16.msrb.mxu1 %v3473_v47  ;;  %v3938_v15 = vld [vmem:[#allocation2 + $0x1a4] sm:$0xf]  ;;  %v3042_v16 = vld [vmem:[#allocation2 + $0x1b0] sm:$0xf0]  ;;  %v2917_v20 = vor.u32 %v3906_v13, %v2914_v14  ;;  %v3880_v42 = vld [vmem:[%s4795_s0 + $0x54] sm:$0xf] }
  0x59   :  { %1903 = vmatpush.bf16.msra.mxu2 %v3205_v32  ;;  %v3966_v17 = vld [vmem:[#allocation2 + $0x284] sm:$0xf]  ;;  %v3154_v18 = vld [vmem:[#allocation2 + $0x290] sm:$0xf0]  ;;  %1854 = vmatmul.bf16.vlgmr.msrb.gmra.mxu3 %v4415_v6  ;;  %v3045_v23 = vor.u32 %v3938_v15, %v3042_v16  ;;  %v2818_v43 = vld [vmem:[%s4795_s0 + $0x70] sm:$0x70] }
  0x5a   :  { %1922 = vmatpush.bf16.msra.mxu3 %v3333_v38  ;;  %1797 = vmatmul.bf16.vlgmr.msrb.gmra.mxu0 %v4409_v0  ;;  %v3998_v21 = vld [vmem:[#allocation2 + $0x384] sm:$0xf]  ;;  %v3282_v22 = vld [vmem:[#allocation2 + $0x390] sm:$0xf0]  ;;  %v3157_v24 = vor.u32 %v3966_v17, %v3154_v18  ;;  %v2824_v49 = vld [vmem:[%s4795_s0 + $0x58] sm:$0xf]  ;;  %v4449_v13 = vor.u32 %v3880_v42, %v2818_v43 }
  0x5b   :  { %1865 = vmatpush.bf16.msra.mxu0 %v2949_v52  ;;  %1835 = vmatmul.bf16.vlgmr.msrb.gmra.mxu2 %v4411_v1  ;;  %v3902_v25 = vld [vmem:[#allocation2 + $0x84] sm:$0xf]  ;;  %v2898_v26 = vld [vmem:[#allocation2 + $0x90] sm:$0xf0]  ;;  %v3285_v31 = vor.u32 %v3998_v21, %v3282_v22  ;;  %v3885_v52 = vld [vmem:[%s4795_s0 + $0x74] sm:$0x70] }
  0x5c   :  { %1884 = vmatpush.bf16.msra.mxu1 %v3077_v59  ;;  %v3934_v27 = vld [vmem:[#allocation2 + $0x184] sm:$0xf]  ;;  %v3026_v28 = vld [vmem:[#allocation2 + $0x190] sm:$0xf0]  ;;  %v2901_v32 = vor.u32 %v3902_v25, %v2898_v26  ;;  %v4447_v9 = vor.u32 %v3885_v52, %v2824_v49 }
  0x5d   :  { %1904 = vmatpush.bf16.msra.mxu2 %v3189_v60  ;;  %1816 = vmatmul.bf16.vlgmr.msrb.gmra.mxu1 %v4413_v5  ;;  %v3962_v29 = vld [vmem:[#allocation2 + $0x264] sm:$0xf]  ;;  %v3138_v30 = vld [vmem:[#allocation2 + $0x270] sm:$0xf0]  ;;  %v3029_v35 = vor.u32 %v3934_v27, %v3026_v28 }
  0x5e   :  { %1923 = vmatpush.bf16.msra.mxu3 %v3317_v7  ;;  %v3994_v33 = vld [vmem:[#allocation2 + $0x364] sm:$0xf]  ;;  %v3266_v34 = vld [vmem:[#allocation2 + $0x370] sm:$0xf0]  ;;  %v3141_v38 = vor.u32 %v3962_v29, %v3138_v30 }
  0x5f   :  { %1866 = vmatpush.bf16.msra.mxu0 %v2933_v8  ;;  %v3898_v39 = vld [vmem:[#allocation2 + $0x64] sm:$0xf]  ;;  %v2882_v40 = vld [vmem:[#allocation2 + $0x70] sm:$0xf0]  ;;  %v3269_v59 = vor.u32 %v3994_v33, %v3266_v34  ;;  %v4445_v8 = vor.u32 %v3884_v37, %v2816_v36 }
  0x60   :  { %1885 = vmatpush.bf16.msra.mxu1 %v3061_v11  ;;  %v3930_v41 = vld [vmem:[#allocation2 + $0x164] sm:$0xf]  ;;  %v3010_v45 = vld [vmem:[#allocation2 + $0x170] sm:$0xf0]  ;;  %v2885_v60 = vor.u32 %v3898_v39, %v2882_v40 }
  0x61   :  { %1905 = vmatpush.bf16.msra.mxu2 %v3173_v12  ;;  %v3958_v46 = vld [vmem:[#allocation2 + $0x244] sm:$0xf]  ;;  %v3122_v47 = vld [vmem:[#allocation2 + $0x250] sm:$0xf0]  ;;  %v3013_v63 = vor.u32 %v3930_v41, %v3010_v45 }
  0x62   :  { %1924 = vmatpush.bf16.msra.mxu3 %v3301_v19  ;;  %v3881_v55 = vld [vmem:[%s4795_s0 + $0x5c] sm:$0xf]  ;;  %v3990_v61 = vld [vmem:[#allocation2 + $0x344] sm:$0xf]  ;;  %v3125_v2 = vor.u32 %v3958_v46, %v3122_v47 }
  0x63   :  { %1867 = vmatpush.bf16.msra.mxu0 %v2917_v20  ;;  %v2826_v58 = vld [vmem:[%s4795_s0 + $0x78] sm:$0x70]  ;;  %v3894_v3 = vld [vmem:[#allocation2 + $0x44] sm:$0xf] }
  0x64   :  { %1886 = vmatpush.bf16.msra.mxu1 %v3045_v23  ;;  %v3250_v62 = vld [vmem:[#allocation2 + $0x350] sm:$0xf0]  ;;  %v3926_v7 = vld [vmem:[#allocation2 + $0x144] sm:$0xf]  ;;  %v4451_v14 = vor.u32 %v3881_v55, %v2826_v58 }
  0x65   :  { %1906 = vmatpush.bf16.msra.mxu2 %v3157_v24  ;;  %v2866_v4 = vld [vmem:[#allocation2 + $0x50] sm:$0xf0]  ;;  %v3954_v11 = vld [vmem:[#allocation2 + $0x224] sm:$0xf]  ;;  %v3253_v15 = vor.u32 %v3990_v61, %v3250_v62 }
  0x66   :  { %1925 = vmatpush.bf16.msra.mxu3 %v3285_v31  ;;  %v2994_v10 = vld [vmem:[#allocation2 + $0x150] sm:$0xf0]  ;;  %v2869_v16 = vor.u32 %v3894_v3, %v2866_v4  ;;  %v3986_v17 = vld [vmem:[#allocation2 + $0x324] sm:$0xf] }
  0x67   :  { %1868 = vmatpush.bf16.msra.mxu0 %v2901_v32  ;;  %v3106_v12 = vld [vmem:[#allocation2 + $0x230] sm:$0xf0]  ;;  %v2997_v19 = vor.u32 %v3926_v7, %v2994_v10  ;;  %v3890_v21 = vld [vmem:[#allocation2 + $0x24] sm:$0xf] }
  0x68   :  { %1887 = vmatpush.bf16.msra.mxu1 %v3029_v35  ;;  %v3234_v18 = vld [vmem:[#allocation2 + $0x330] sm:$0xf0]  ;;  %v3109_v20 = vor.u32 %v3954_v11, %v3106_v12  ;;  %v3922_v23 = vld [vmem:[#allocation2 + $0x124] sm:$0xf] }
  0x69   :  { %1907 = vmatpush.bf16.msra.mxu2 %v3141_v38  ;;  %v2850_v22 = vld [vmem:[#allocation2 + $0x30] sm:$0xf0]  ;;  %v3950_v25 = vld [vmem:[#allocation2 + $0x204] sm:$0xf]  ;;  %1859 = vmatmul.bf16.gmra.mxu3 %v4451_v14  ;;  %v3237_v29 = vor.u32 %v3986_v17, %v3234_v18 }
  0x6a   :  { %1926 = vmatpush.bf16.msra.mxu3 %v3269_v59  ;;  %1802 = vmatmul.bf16.gmra.mxu0 %v4445_v8  ;;  %v2978_v24 = vld [vmem:[#allocation2 + $0x130] sm:$0xf0]  ;;  %v4106_v27 = vld [vmem:[#allocation2 + $0x6e4] sm:$0xf]  ;;  %v2853_v30 = vor.u32 %v3890_v21, %v2850_v22 }
  0x6b   :  { %1869 = vmatpush.bf16.msra.mxu0 %v2885_v60  ;;  %1840 = vmatmul.bf16.gmra.mxu2 %v4447_v9  ;;  %v3090_v26 = vld [vmem:[#allocation2 + $0x210] sm:$0xf0]  ;;  %v3982_v31 = vld [vmem:[#allocation2 + $0x304] sm:$0xf]  ;;  %v2981_v34 = vor.u32 %v3922_v23, %v2978_v24 }
  0x6c   :  { %1888 = vmatpush.bf16.msra.mxu1 %v3013_v63  ;;  %v3714_v28 = vld [vmem:[#allocation2 + $0x6f0] sm:$0xf0]  ;;  %v3886_v33 = vld [vmem:[#allocation2 + $0x4] sm:$0xf]  ;;  %v3093_v35 = vor.u32 %v3950_v25, %v3090_v26 }
  0x6d   :  { %1908 = vmatpush.bf16.msra.mxu2 %v3125_v2  ;;  %1821 = vmatmul.bf16.gmra.mxu1 %v4449_v13  ;;  %v3218_v32 = vld [vmem:[#allocation2 + $0x310] sm:$0xf0]  ;;  %v3918_v37 = vld [vmem:[#allocation2 + $0x104] sm:$0xf]  ;;  %v3717_v39 = vor.u32 %v4106_v27, %v3714_v28 }
  0x6e   :  { %1927 = vmatpush.bf16.msra.mxu3 %v3253_v15  ;;  %v2834_v36 = vld [vmem:[#allocation2 + $0x10] sm:$0xf0]  ;;  %v4138_v40 = vld [vmem:[#allocation2 + $0x7e4] sm:$0xf]  ;;  %v3221_v47 = vor.u32 %v3982_v31, %v3218_v32 }
  0x6f   :  { %1870 = vmatpush.bf16.msra.mxu0 %v2869_v16  ;;  %v2962_v38 = vld [vmem:[#allocation2 + $0x110] sm:$0xf0]  ;;  %v4042_v42 = vld [vmem:[#allocation2 + $0x4e4] sm:$0xf]  ;;  %v2837_v49 = vor.u32 %v3886_v33, %v2834_v36 }
  0x70   :  { %1889 = vmatpush.bf16.msra.mxu1 %v2997_v19  ;;  %v3842_v41 = vld [vmem:[#allocation2 + $0x7f0] sm:$0xf0]  ;;  %v4074_v45 = vld [vmem:[#allocation2 + $0x5e4] sm:$0xf]  ;;  %v2965_v58 = vor.u32 %v3918_v37, %v2962_v38 }
  0x71   :  { %1909 = vmatpush.bf16.msra.mxu2 %v3109_v20  ;;  %v3458_v43 = vld [vmem:[#allocation2 + $0x4f0] sm:$0xf0]  ;;  %v4102_v52 = vld [vmem:[#allocation2 + $0x6c4] sm:$0xf]  ;;  %v3845_v59 = vor.u32 %v4138_v40, %v3842_v41 }
  0x72   :  { %v3586_v46 = vld [vmem:[#allocation2 + $0x5f0] sm:$0xf0]  ;;  %1928 = vmatpush.bf16.msra.mxu3 %v3237_v29  ;;  %v3461_v60 = vor.u32 %v4042_v42, %v3458_v43  ;;  %v4134_v62 = vld [vmem:[#allocation2 + $0x7c4] sm:$0xf] }
  0x73   :  { %1871 = vmatpush.bf16.msra.mxu0 %v2853_v30  ;;  %v3698_v55 = vld [vmem:[#allocation2 + $0x6d0] sm:$0xf0]  ;;  %v3589_v61 = vor.u32 %v4074_v45, %v3586_v46  ;;  %v4038_v3 = vld [vmem:[#allocation2 + $0x4c4] sm:$0xf] }
  0x74   :  { %1890 = vmatpush.bf16.msra.mxu1 %v2981_v34  ;;  %v3826_v63 = vld [vmem:[#allocation2 + $0x7d0] sm:$0xf0]  ;;  %v3701_v2 = vor.u32 %v4102_v52, %v3698_v55  ;;  %v4070_v10 = vld [vmem:[#allocation2 + $0x5c4] sm:$0xf] }
  0x75   :  { %1910 = vmatpush.bf16.msra.mxu2 %v3093_v35  ;;  %v3442_v4 = vld [vmem:[#allocation2 + $0x4d0] sm:$0xf0]  ;;  %v3829_v7 = vor.u32 %v4134_v62, %v3826_v63  ;;  %v4098_v12 = vld [vmem:[#allocation2 + $0x6a4] sm:$0xf] }
  0x76   :  { %1929 = vmatpush.bf16.msra.mxu3 %v3221_v47  ;;  %v3570_v11 = vld [vmem:[#allocation2 + $0x5d0] sm:$0xf0]  ;;  %v4130_v16 = vld [vmem:[#allocation2 + $0x7a4] sm:$0xf]  ;;  %v3445_v18 = vor.u32 %v4038_v3, %v3442_v4 }
  0x77   :  { %1872 = vmatpush.bf16.msra.mxu0 %v2837_v49  ;;  %v3682_v15 = vld [vmem:[#allocation2 + $0x6b0] sm:$0xf0]  ;;  %v3573_v19 = vor.u32 %v4070_v10, %v3570_v11  ;;  %v4034_v20 = vld [vmem:[#allocation2 + $0x4a4] sm:$0xf] }
  0x78   :  { %1891 = vmatpush.bf16.msra.mxu1 %v2965_v58  ;;  %v3810_v17 = vld [vmem:[#allocation2 + $0x7b0] sm:$0xf0]  ;;  %v3685_v22 = vor.u32 %v4098_v12, %v3682_v15  ;;  %v4066_v24 = vld [vmem:[#allocation2 + $0x5a4] sm:$0xf] }
  0x79   :  { %1979 = vmatpush.bf16.msrb.mxu2 %v3717_v39  ;;  %v3426_v21 = vld [vmem:[#allocation2 + $0x4b0] sm:$0xf0]  ;;  %v3813_v23 = vor.u32 %v4130_v16, %v3810_v17  ;;  %v4094_v26 = vld [vmem:[#allocation2 + $0x684] sm:$0xf]  ;;  %1930 = vmatmul.bf16.vlgmr.msra.gmra.mxu3 %v4343_v57 }
  0x7a   :  { %1998 = vmatpush.bf16.msrb.mxu3 %v3845_v59  ;;  %v3554_v25 = vld [vmem:[#allocation2 + $0x5b0] sm:$0xf0]  ;;  %1873 = vmatmul.bf16.vlgmr.msra.gmra.mxu0 %v4337_v48  ;;  %v4126_v28 = vld [vmem:[#allocation2 + $0x784] sm:$0xf]  ;;  %v3429_v30 = vor.u32 %v4034_v20, %v3426_v21 }
  0x7b   :  { %1941 = vmatpush.bf16.msrb.mxu0 %v3461_v60  ;;  %1911 = vmatmul.bf16.vlgmr.msra.gmra.mxu2 %v4341_v54  ;;  %v3666_v27 = vld [vmem:[#allocation2 + $0x690] sm:$0xf0]  ;;  %v3557_v31 = vor.u32 %v4066_v24, %v3554_v25  ;;  %v4030_v32 = vld [vmem:[#allocation2 + $0x484] sm:$0xf] }
  0x7c   :  { %1960 = vmatpush.bf16.msrb.mxu1 %v3589_v61  ;;  %v3794_v29 = vld [vmem:[#allocation2 + $0x790] sm:$0xf0]  ;;  %v3669_v34 = vor.u32 %v4094_v26, %v3666_v27  ;;  %v4062_v36 = vld [vmem:[#allocation2 + $0x584] sm:$0xf] }
  0x7d   :  { %1980 = vmatpush.bf16.msrb.mxu2 %v3701_v2  ;;  %1892 = vmatmul.bf16.vlgmr.msra.gmra.mxu1 %v4339_v53  ;;  %v3410_v33 = vld [vmem:[#allocation2 + $0x490] sm:$0xf0]  ;;  %v3797_v35 = vor.u32 %v4126_v28, %v3794_v29  ;;  %v4090_v38 = vld [vmem:[#allocation2 + $0x664] sm:$0xf] }
  0x7e   :  { %1999 = vmatpush.bf16.msrb.mxu3 %v3829_v7  ;;  %v3538_v37 = vld [vmem:[#allocation2 + $0x590] sm:$0xf0]  ;;  %v4122_v40 = vld [vmem:[#allocation2 + $0x764] sm:$0xf]  ;;  %v3413_v42 = vor.u32 %v4030_v32, %v3410_v33  ;;  %v3336_v32 = vld [vmem:[#allocation2 + $0x3e8] sm:$0xf] }
  0x7f   :  { %1942 = vmatpush.bf16.msrb.mxu0 %v3445_v18  ;;  %v3650_v39 = vld [vmem:[#allocation2 + $0x670] sm:$0xf0]  ;;  %v3541_v43 = vor.u32 %v4062_v36, %v3538_v37  ;;  %v4026_v45 = vld [vmem:[#allocation2 + $0x464] sm:$0xf]  ;;  %v4013_v33 = vld [vmem:[#allocation2 + $0x3f4] sm:$0xf0] }
  0x80   :  { %1961 = vmatpush.bf16.msrb.mxu1 %v3573_v19  ;;  %v3778_v41 = vld [vmem:[#allocation2 + $0x770] sm:$0xf0]  ;;  %v3653_v47 = vor.u32 %v4090_v38, %v3650_v39  ;;  %v4058_v52 = vld [vmem:[#allocation2 + $0x564] sm:$0xf] }
  0x81   :  { %1981 = vmatpush.bf16.msrb.mxu2 %v3685_v22  ;;  %v3394_v46 = vld [vmem:[#allocation2 + $0x470] sm:$0xf0]  ;;  %v3781_v49 = vor.u32 %v4122_v40, %v3778_v41  ;;  %v4086_v58 = vld [vmem:[#allocation2 + $0x644] sm:$0xf] }
  0x82   :  { %2000 = vmatpush.bf16.msrb.mxu3 %v3813_v23  ;;  %v3522_v55 = vld [vmem:[#allocation2 + $0x570] sm:$0xf0]  ;;  %v4118_v60 = vld [vmem:[#allocation2 + $0x744] sm:$0xf]  ;;  %v3397_v62 = vor.u32 %v4026_v45, %v3394_v46  ;;  %v3337_v46 = vor.u32 %v4013_v33, %v3336_v32  ;;  %v2904_v32 = vld [vmem:[#allocation2 + $0x88] sm:$0xf] }
  0x83   :  { %1943 = vmatpush.bf16.msrb.mxu0 %v3429_v30  ;;  %v3634_v59 = vld [vmem:[#allocation2 + $0x650] sm:$0xf0]  ;;  %v3525_v63 = vor.u32 %v4058_v52, %v3522_v55  ;;  %v4022_v2 = vld [vmem:[#allocation2 + $0x444] sm:$0xf]  ;;  %v3208_v30 = vld [vmem:[#allocation2 + $0x2e8] sm:$0xf] }
  0x84   :  { %1962 = vmatpush.bf16.msrb.mxu1 %v3557_v31  ;;  %v3762_v61 = vld [vmem:[#allocation2 + $0x750] sm:$0xf0]  ;;  %v3637_v4 = vor.u32 %v4086_v58, %v3634_v59  ;;  %v4054_v10 = vld [vmem:[#allocation2 + $0x544] sm:$0xf]  ;;  %v3981_v31 = vld [vmem:[#allocation2 + $0x2f4] sm:$0xf0] }
  0x85   :  { %1982 = vmatpush.bf16.msrb.mxu2 %v3669_v34  ;;  %v3378_v3 = vld [vmem:[#allocation2 + $0x450] sm:$0xf0]  ;;  %v3765_v7 = vor.u32 %v4118_v60, %v3762_v61  ;;  %v4082_v12 = vld [vmem:[#allocation2 + $0x624] sm:$0xf]  ;;  %v3209_v45 = vor.u32 %v3981_v31, %v3208_v30  ;;  %v3192_v52 = vld [vmem:[#allocation2 + $0x2c8] sm:$0xf] }
  0x86   :  { %2001 = vmatpush.bf16.msrb.mxu3 %v3797_v35  ;;  %v3506_v11 = vld [vmem:[#allocation2 + $0x550] sm:$0xf0]  ;;  %v4114_v16 = vld [vmem:[#allocation2 + $0x724] sm:$0xf]  ;;  %v3381_v18 = vor.u32 %v4022_v2, %v3378_v3  ;;  %v3977_v55 = vld [vmem:[#allocation2 + $0x2d4] sm:$0xf0] }
  0x87   :  { %1944 = vmatpush.bf16.msrb.mxu0 %v3413_v42  ;;  %v3618_v15 = vld [vmem:[#allocation2 + $0x630] sm:$0xf0]  ;;  %v3509_v19 = vor.u32 %v4054_v10, %v3506_v11  ;;  %v4018_v20 = vld [vmem:[#allocation2 + $0x424] sm:$0xf]  ;;  %v2952_v42 = vld [vmem:[#allocation2 + $0xe8] sm:$0xf]  ;;  %v3193_v3 = vor.u32 %v3977_v55, %v3192_v52 }
  0x88   :  { %1963 = vmatpush.bf16.msrb.mxu1 %v3541_v43  ;;  %v3746_v17 = vld [vmem:[#allocation2 + $0x730] sm:$0xf0]  ;;  %v4050_v22 = vld [vmem:[#allocation2 + $0x524] sm:$0xf]  ;;  %v3621_v23 = vor.u32 %v4082_v12, %v3618_v15  ;;  %v3917_v43 = vld [vmem:[#allocation2 + $0xf4] sm:$0xf0] }
  0x89   :  { %1983 = vmatpush.bf16.msrb.mxu2 %v3653_v47  ;;  %v3362_v21 = vld [vmem:[#allocation2 + $0x430] sm:$0xf0]  ;;  %v3749_v24 = vor.u32 %v4114_v16, %v3746_v17  ;;  %v4078_v26 = vld [vmem:[#allocation2 + $0x604] sm:$0xf]  ;;  %1935 = vmatmul.bf16.gmra.mxu3 %v4379_v56  ;;  %v3080_v47 = vld [vmem:[#allocation2 + $0x1e8] sm:$0xf] }
  0x8a   :  { %2002 = vmatpush.bf16.msrb.mxu3 %v3781_v49  ;;  %v3490_v25 = vld [vmem:[#allocation2 + $0x530] sm:$0xf0]  ;;  %1878 = vmatmul.bf16.gmra.mxu0 %v4373_v44  ;;  %v4110_v28 = vld [vmem:[#allocation2 + $0x704] sm:$0xf]  ;;  %v3365_v34 = vor.u32 %v4018_v20, %v3362_v21  ;;  %v3949_v49 = vld [vmem:[#allocation2 + $0x1f4] sm:$0xf0] }
  0x8b   :  { %1945 = vmatpush.bf16.msrb.mxu0 %v3397_v62  ;;  %v3602_v27 = vld [vmem:[#allocation2 + $0x610] sm:$0xf0]  ;;  %1916 = vmatmul.bf16.gmra.mxu2 %v4377_v51  ;;  %v3493_v35 = vor.u32 %v4050_v22, %v3490_v25  ;;  %v4014_v36 = vld [vmem:[#allocation2 + $0x404] sm:$0xf]  ;;  %v3320_v58 = vld [vmem:[#allocation2 + $0x3c8] sm:$0xf]  ;;  %v2953_v62 = vor.u32 %v3917_v43, %v2952_v42 }
  0x8c   :  { %1964 = vmatpush.bf16.msrb.mxu1 %v3525_v63  ;;  %v3730_v29 = vld [vmem:[#allocation2 + $0x710] sm:$0xf0]  ;;  %v4046_v38 = vld [vmem:[#allocation2 + $0x504] sm:$0xf]  ;;  %v3605_v39 = vor.u32 %v4078_v26, %v3602_v27  ;;  %v4009_v59 = vld [vmem:[#allocation2 + $0x3d4] sm:$0xf0]  ;;  %v3081_v63 = vor.u32 %v3949_v49, %v3080_v47 }
  0x8d   :  { %1984 = vmatpush.bf16.msrb.mxu2 %v3637_v4  ;;  %1897 = vmatmul.bf16.gmra.mxu1 %v4375_v50  ;;  %v3346_v37 = vld [vmem:[#allocation2 + $0x410] sm:$0xf0]  ;;  %v3733_v40 = vor.u32 %v4110_v28, %v3730_v29  ;;  %v2936_v2 = vld [vmem:[#allocation2 + $0xc8] sm:$0xf]  ;;  %v3321_v4 = vor.u32 %v4009_v59, %v3320_v58  ;;  %v3945_v11 = vld [vmem:[#allocation2 + $0x1d4] sm:$0xf0] }
  0x8e   :  { %2003 = vmatpush.bf16.msrb.mxu3 %v3765_v7  ;;  %v3474_v41 = vld [vmem:[#allocation2 + $0x510] sm:$0xf0]  ;;  %v3349_v60 = vor.u32 %v4014_v36, %v3346_v37  ;;  %v3913_v7 = vld [vmem:[#allocation2 + $0xd4] sm:$0xf0]  ;;  %v3064_v10 = vld [vmem:[#allocation2 + $0x1c8] sm:$0xf] }
  0x8f   :  { %1946 = vmatpush.bf16.msrb.mxu0 %v3381_v18  ;;  %v3477_v61 = vor.u32 %v4046_v38, %v3474_v41  ;;  %v3176_v12 = vld [vmem:[#allocation2 + $0x2a8] sm:$0xf]  ;;  %v3973_v15 = vld [vmem:[#allocation2 + $0x2b4] sm:$0xf0]  ;;  %v2937_v16 = vor.u32 %v3913_v7, %v2936_v2  ;;  %v3065_v17 = vor.u32 %v3945_v11, %v3064_v10 }
  0x90   :  { %1965 = vmatpush.bf16.msrb.mxu1 %v3509_v19  ;;  %v3304_v18 = vld [vmem:[#allocation2 + $0x3a8] sm:$0xf]  ;;  %v4005_v19 = vld [vmem:[#allocation2 + $0x3b4] sm:$0xf0] }
  0x91   :  { %1985 = vmatpush.bf16.msrb.mxu2 %v3621_v23  ;;  %v2920_v20 = vld [vmem:[#allocation2 + $0xa8] sm:$0xf]  ;;  %v3909_v21 = vld [vmem:[#allocation2 + $0xb4] sm:$0xf0]  ;;  %v3305_v25 = vor.u32 %v4005_v19, %v3304_v18 }
  0x92   :  { %2004 = vmatpush.bf16.msrb.mxu3 %v3749_v24  ;;  %v3048_v22 = vld [vmem:[#allocation2 + $0x1a8] sm:$0xf]  ;;  %v3941_v23 = vld [vmem:[#allocation2 + $0x1b4] sm:$0xf0]  ;;  %v3177_v24 = vor.u32 %v3973_v15, %v3176_v12  ;;  %v2921_v28 = vor.u32 %v3909_v21, %v2920_v20 }
  0x93   :  { %1947 = vmatpush.bf16.msrb.mxu0 %v3365_v34  ;;  %v3160_v26 = vld [vmem:[#allocation2 + $0x288] sm:$0xf]  ;;  %v3969_v27 = vld [vmem:[#allocation2 + $0x294] sm:$0xf0]  ;;  %v3049_v29 = vor.u32 %v3941_v23, %v3048_v22 }
  0x94   :  { %1966 = vmatpush.bf16.msrb.mxu1 %v3493_v35  ;;  %v3288_v30 = vld [vmem:[#allocation2 + $0x388] sm:$0xf]  ;;  %v4001_v31 = vld [vmem:[#allocation2 + $0x394] sm:$0xf0]  ;;  %v3161_v36 = vor.u32 %v3969_v27, %v3160_v26 }
  0x95   :  { %1986 = vmatpush.bf16.msrb.mxu2 %v3605_v39  ;;  %v3905_v33 = vld [vmem:[#allocation2 + $0x94] sm:$0xf0]  ;;  %v3032_v34 = vld [vmem:[#allocation2 + $0x188] sm:$0xf]  ;;  %v3289_v37 = vor.u32 %v4001_v31, %v3288_v30 }
  0x96   :  { %2005 = vmatpush.bf16.msrb.mxu3 %v3733_v40  ;;  %v3937_v35 = vld [vmem:[#allocation2 + $0x194] sm:$0xf0]  ;;  %v3144_v38 = vld [vmem:[#allocation2 + $0x268] sm:$0xf]  ;;  %v2905_v40 = vor.u32 %v3905_v33, %v2904_v32 }
  0x97   :  { %1948 = vmatpush.bf16.msrb.mxu0 %v3349_v60  ;;  %v3965_v39 = vld [vmem:[#allocation2 + $0x274] sm:$0xf0]  ;;  %v3033_v41 = vor.u32 %v3937_v35, %v3032_v34  ;;  %v3272_v42 = vld [vmem:[#allocation2 + $0x368] sm:$0xf] }
  0x98   :  { %1967 = vmatpush.bf16.msrb.mxu1 %v3477_v61  ;;  %v3997_v43 = vld [vmem:[#allocation2 + $0x374] sm:$0xf0]  ;;  %v3016_v47 = vld [vmem:[#allocation2 + $0x168] sm:$0xf]  ;;  %v3145_v52 = vor.u32 %v3965_v39, %v3144_v38 }
  0x99   :  { %2055 = vmatpush.bf16.msra.mxu2 %v3209_v45  ;;  %2006 = vmatmul.bf16.vlgmr.msrb.gmra.mxu3 %v4415_v6  ;;  %v2888_v45 = vld [vmem:[#allocation2 + $0x68] sm:$0xf]  ;;  %v3933_v49 = vld [vmem:[#allocation2 + $0x174] sm:$0xf0]  ;;  %v3273_v55 = vor.u32 %v3997_v43, %v3272_v42 }
  0x9a   :  { %2074 = vmatpush.bf16.msra.mxu3 %v3337_v46  ;;  %1949 = vmatmul.bf16.vlgmr.msrb.gmra.mxu0 %v4409_v0  ;;  %v3901_v46 = vld [vmem:[#allocation2 + $0x74] sm:$0xf0]  ;;  %v3128_v58 = vld [vmem:[#allocation2 + $0x248] sm:$0xf]  ;;  %v3017_v61 = vor.u32 %v3933_v49, %v3016_v47 }
  0x9b   :  { %2017 = vmatpush.bf16.msra.mxu0 %v2953_v62  ;;  %1987 = vmatmul.bf16.vlgmr.msrb.gmra.mxu2 %v4411_v1  ;;  %v3961_v59 = vld [vmem:[#allocation2 + $0x254] sm:$0xf0]  ;;  %v2889_v60 = vor.u32 %v3901_v46, %v2888_v45  ;;  %v3256_v62 = vld [vmem:[#allocation2 + $0x348] sm:$0xf] }
  0x9c   :  { %2036 = vmatpush.bf16.msra.mxu1 %v3081_v63  ;;  %v3993_v63 = vld [vmem:[#allocation2 + $0x354] sm:$0xf0]  ;;  %v2872_v2 = vld [vmem:[#allocation2 + $0x48] sm:$0xf]  ;;  %v3129_v10 = vor.u32 %v3961_v59, %v3128_v58 }
  0x9d   :  { %2056 = vmatpush.bf16.msra.mxu2 %v3193_v3  ;;  %1968 = vmatmul.bf16.vlgmr.msrb.gmra.mxu1 %v4413_v5  ;;  %v3897_v3 = vld [vmem:[#allocation2 + $0x54] sm:$0xf0]  ;;  %v3257_v11 = vor.u32 %v3993_v63, %v3256_v62  ;;  %v3112_v12 = vld [vmem:[#allocation2 + $0x228] sm:$0xf] }
  0x9e   :  { %2075 = vmatpush.bf16.msra.mxu3 %v3321_v4  ;;  %v3000_v4 = vld [vmem:[#allocation2 + $0x148] sm:$0xf]  ;;  %v3929_v7 = vld [vmem:[#allocation2 + $0x154] sm:$0xf0] }
  0x9f   :  { %2018 = vmatpush.bf16.msra.mxu0 %v2937_v16  ;;  %v3957_v15 = vld [vmem:[#allocation2 + $0x234] sm:$0xf0]  ;;  %v2873_v16 = vor.u32 %v3897_v3, %v2872_v2  ;;  %v3240_v18 = vld [vmem:[#allocation2 + $0x328] sm:$0xf] }
  0xa0   :  { %2037 = vmatpush.bf16.msra.mxu1 %v3065_v17  ;;  %v3001_v17 = vor.u32 %v3929_v7, %v3000_v4  ;;  %v3989_v19 = vld [vmem:[#allocation2 + $0x334] sm:$0xf0]  ;;  %v2856_v20 = vld [vmem:[#allocation2 + $0x28] sm:$0xf] }
  0xa1   :  { %2057 = vmatpush.bf16.msra.mxu2 %v3177_v24  ;;  %v3893_v21 = vld [vmem:[#allocation2 + $0x34] sm:$0xf0]  ;;  %v2984_v22 = vld [vmem:[#allocation2 + $0x128] sm:$0xf]  ;;  %v3241_v26 = vor.u32 %v3989_v19, %v3240_v18 }
  0xa2   :  { %2076 = vmatpush.bf16.msra.mxu3 %v3305_v25  ;;  %v3925_v23 = vld [vmem:[#allocation2 + $0x134] sm:$0xf0]  ;;  %v3096_v24 = vld [vmem:[#allocation2 + $0x208] sm:$0xf]  ;;  %v3113_v25 = vor.u32 %v3957_v15, %v3112_v12  ;;  %v2857_v30 = vor.u32 %v3893_v21, %v2856_v20 }
  0xa3   :  { %2019 = vmatpush.bf16.msra.mxu0 %v2921_v28  ;;  %v3953_v27 = vld [vmem:[#allocation2 + $0x214] sm:$0xf0]  ;;  %v3224_v28 = vld [vmem:[#allocation2 + $0x308] sm:$0xf]  ;;  %v2985_v31 = vor.u32 %v3925_v23, %v2984_v22 }
  0xa4   :  { %2038 = vmatpush.bf16.msra.mxu1 %v3049_v29  ;;  %v3985_v29 = vld [vmem:[#allocation2 + $0x314] sm:$0xf0]  ;;  %v2840_v32 = vld [vmem:[#allocation2 + $0x8] sm:$0xf] }
  0xa5   :  { %2058 = vmatpush.bf16.msra.mxu2 %v3161_v36  ;;  %v3889_v33 = vld [vmem:[#allocation2 + $0x14] sm:$0xf0]  ;;  %v2968_v34 = vld [vmem:[#allocation2 + $0x108] sm:$0xf]  ;;  %v3225_v42 = vor.u32 %v3985_v29, %v3224_v28 }
  0xa6   :  { %2077 = vmatpush.bf16.msra.mxu3 %v3289_v37  ;;  %v3921_v35 = vld [vmem:[#allocation2 + $0x114] sm:$0xf0]  ;;  %v3720_v36 = vld [vmem:[#allocation2 + $0x6e8] sm:$0xf]  ;;  %v2841_v47 = vor.u32 %v3889_v33, %v2840_v32 }
  0xa7   :  { %2020 = vmatpush.bf16.msra.mxu0 %v2905_v40  ;;  %v4109_v37 = vld [vmem:[#allocation2 + $0x6f4] sm:$0xf0]  ;;  %v3848_v38 = vld [vmem:[#allocation2 + $0x7e8] sm:$0xf]  ;;  %v2969_v49 = vor.u32 %v3921_v35, %v2968_v34 }
  0xa8   :  { %2039 = vmatpush.bf16.msra.mxu1 %v3033_v41  ;;  %v4141_v39 = vld [vmem:[#allocation2 + $0x7f4] sm:$0xf0]  ;;  %v3464_v40 = vld [vmem:[#allocation2 + $0x4e8] sm:$0xf]  ;;  %v3097_v41 = vor.u32 %v3953_v27, %v3096_v24 }
  0xa9   :  { %2059 = vmatpush.bf16.msra.mxu2 %v3145_v52  ;;  %2011 = vmatmul.bf16.gmra.mxu3 %v4451_v14  ;;  %v4045_v43 = vld [vmem:[#allocation2 + $0x4f4] sm:$0xf0]  ;;  %v3592_v45 = vld [vmem:[#allocation2 + $0x5e8] sm:$0xf]  ;;  %v3721_v52 = vor.u32 %v4109_v37, %v3720_v36 }
  0xaa   :  { %2078 = vmatpush.bf16.msra.mxu3 %v3273_v55  ;;  %1954 = vmatmul.bf16.gmra.mxu0 %v4445_v8  ;;  %v4077_v46 = vld [vmem:[#allocation2 + $0x5f4] sm:$0xf0]  ;;  %v3849_v55 = vor.u32 %v4141_v39, %v3848_v38  ;;  %v3704_v58 = vld [vmem:[#allocation2 + $0x6c8] sm:$0xf] }
  0xab   :  { %2021 = vmatpush.bf16.msra.mxu0 %v2889_v60  ;;  %1992 = vmatmul.bf16.gmra.mxu2 %v4447_v9  ;;  %v4105_v59 = vld [vmem:[#allocation2 + $0x6d4] sm:$0xf0]  ;;  %v3465_v60 = vor.u32 %v4045_v43, %v3464_v40  ;;  %v3832_v62 = vld [vmem:[#allocation2 + $0x7c8] sm:$0xf] }
  0xac   :  { %2040 = vmatpush.bf16.msra.mxu1 %v3017_v61  ;;  %v3593_v61 = vor.u32 %v4077_v46, %v3592_v45  ;;  %v4137_v63 = vld [vmem:[#allocation2 + $0x7d4] sm:$0xf0]  ;;  %v3448_v2 = vld [vmem:[#allocation2 + $0x4c8] sm:$0xf] }
  0xad   :  { %2060 = vmatpush.bf16.msra.mxu2 %v3129_v10  ;;  %1973 = vmatmul.bf16.gmra.mxu1 %v4449_v13  ;;  %v4041_v3 = vld [vmem:[#allocation2 + $0x4d4] sm:$0xf0]  ;;  %v3576_v4 = vld [vmem:[#allocation2 + $0x5c8] sm:$0xf]  ;;  %v3705_v10 = vor.u32 %v4105_v59, %v3704_v58 }
  0xae   :  { %2079 = vmatpush.bf16.msra.mxu3 %v3257_v11  ;;  %v4073_v7 = vld [vmem:[#allocation2 + $0x5d4] sm:$0xf0]  ;;  %v3833_v11 = vor.u32 %v4137_v63, %v3832_v62  ;;  %v3449_v12 = vor.u32 %v4041_v3, %v3448_v2  ;;  %v3816_v18 = vld [vmem:[#allocation2 + $0x7a8] sm:$0xf] }
  0xaf   :  { %2022 = vmatpush.bf16.msra.mxu0 %v2873_v16  ;;  %v3577_v15 = vor.u32 %v4073_v7, %v3576_v4  ;;  %v3688_v16 = vld [vmem:[#allocation2 + $0x6a8] sm:$0xf]  ;;  %v4133_v19 = vld [vmem:[#allocation2 + $0x7b4] sm:$0xf0] }
  0xb0   :  { %2041 = vmatpush.bf16.msra.mxu1 %v3001_v17  ;;  %v4101_v17 = vld [vmem:[#allocation2 + $0x6b4] sm:$0xf0]  ;;  %v3432_v20 = vld [vmem:[#allocation2 + $0x4a8] sm:$0xf]  ;;  %v3817_v28 = vor.u32 %v4133_v19, %v3816_v18 }
  0xb1   :  { %2061 = vmatpush.bf16.msra.mxu2 %v3113_v25  ;;  %v1722_v21 = vpop.f32.mrf.mxu0  ;;  %v4037_v22 = vld [vmem:[#allocation2 + $0x4b4] sm:$0xf0]  ;;  %v3560_v23 = vld [vmem:[#allocation2 + $0x5a8] sm:$0xf]  ;;  %v3689_v27 = vor.u32 %v4101_v17, %v3688_v16 }
  0xb2   :  { %2080 = vmatpush.bf16.msra.mxu3 %v3241_v26  ;;  %v4069_v24 = vld [vmem:[#allocation2 + $0x5b4] sm:$0xf0]  ;;  %v1741_v25 = vpop.f32.mrf.mxu1  ;;  %v3672_v29 = vld [vmem:[#allocation2 + $0x688] sm:$0xf] }
  0xb3   :  { %2023 = vmatpush.bf16.msra.mxu0 %v2857_v30  ;;  %v1742_v26 = vadd.f32 %v1741_v25, %v1722_v21  ;;  %v4097_v30 = vld [vmem:[#allocation2 + $0x694] sm:$0xf0]  ;;  %v3561_v32 = vor.u32 %v4069_v24, %v3560_v23  ;;  %v3800_v33 = vld [vmem:[#allocation2 + $0x788] sm:$0xf] }
  0xb4   :  { %2042 = vmatpush.bf16.msra.mxu1 %v2985_v31  ;;  %v3433_v31 = vor.u32 %v4037_v22, %v3432_v20  ;;  %v4129_v34 = vld [vmem:[#allocation2 + $0x794] sm:$0xf0]  ;;  %v3416_v35 = vld [vmem:[#allocation2 + $0x488] sm:$0xf]  ;;  %v3673_v39 = vor.u32 %v4097_v30, %v3672_v29 }
  0xb5   :  { %2062 = vmatpush.bf16.msra.mxu2 %v3097_v41  ;;  %v4033_v36 = vld [vmem:[#allocation2 + $0x494] sm:$0xf0]  ;;  %v3544_v37 = vld [vmem:[#allocation2 + $0x588] sm:$0xf]  ;;  %v3801_v40 = vor.u32 %v4129_v34, %v3800_v33 }
  0xb6   :  { %2081 = vmatpush.bf16.msra.mxu3 %v3225_v42  ;;  %v4065_v38 = vld [vmem:[#allocation2 + $0x594] sm:$0xf0]  ;;  %v3656_v41 = vld [vmem:[#allocation2 + $0x668] sm:$0xf]  ;;  %v3417_v45 = vor.u32 %v4033_v36, %v3416_v35 }
  0xb7   :  { %2024 = vmatpush.bf16.msra.mxu0 %v2841_v47  ;;  %v4093_v42 = vld [vmem:[#allocation2 + $0x674] sm:$0xf0]  ;;  %v3545_v46 = vor.u32 %v4065_v38, %v3544_v37  ;;  %v3784_v47 = vld [vmem:[#allocation2 + $0x768] sm:$0xf] }
  0xb8   :  { %2043 = vmatpush.bf16.msra.mxu1 %v2969_v49  ;;  %v4125_v49 = vld [vmem:[#allocation2 + $0x774] sm:$0xf0]  ;;  %v3657_v2 = vor.u32 %v4093_v42, %v3656_v41  ;;  %v3768_v16 = vld [vmem:[#allocation2 + $0x748] sm:$0xf] }
  0xb9   :  { %2131 = vmatpush.bf16.msrb.mxu2 %v3721_v52  ;;  %2082 = vmatmul.bf16.vlgmr.msra.gmra.mxu3 %v4343_v57  ;;  %v3400_v52 = vld [vmem:[#allocation2 + $0x468] sm:$0xf]  ;;  %v1724_v59 = vpop.f32.mrf.mxu0  ;;  %v4061_v62 = vld [vmem:[#allocation2 + $0x574] sm:$0xf0]  ;;  %v3785_v7 = vor.u32 %v4125_v49, %v3784_v47 }
  0xba   :  { %2150 = vmatpush.bf16.msrb.mxu3 %v3849_v55  ;;  %2025 = vmatmul.bf16.vlgmr.msra.gmra.mxu0 %v4337_v48  ;;  %v1779_v58 = vpop.f32.mrf.mxu3  ;;  %v1743_v63 = vpop.f32.mrf.mxu1  ;;  %v4121_v17 = vld [vmem:[#allocation2 + $0x754] sm:$0xf0]  ;;  %v3384_v18 = vld [vmem:[#allocation2 + $0x448] sm:$0xf] }
  0xbb   :  { %2093 = vmatpush.bf16.msrb.mxu0 %v3465_v60  ;;  %2063 = vmatmul.bf16.vlgmr.msra.gmra.mxu2 %v4341_v54  ;;  %v1760_v43 = vpop.f32.mrf.mxu2  ;;  %v4029_v60 = vld [vmem:[#allocation2 + $0x474] sm:$0xf0]  ;;  %v1744_v4 = vadd.f32 %v1743_v63, %v1724_v59  ;;  %v3512_v20 = vld [vmem:[#allocation2 + $0x548] sm:$0xf]  ;;  %v3769_v23 = vor.u32 %v4121_v17, %v3768_v16  ;;  %v4011_v63 = vld [vmem:[#allocation2 + $0x3ec] sm:$0xf] }
  0xbc   :  { %2112 = vmatpush.bf16.msrb.mxu1 %v3593_v61  ;;  %v1761_v55 = vadd.f32 %v1760_v43, %v1742_v26  ;;  %v3528_v61 = vld [vmem:[#allocation2 + $0x568] sm:$0xf]  ;;  %v4025_v19 = vld [vmem:[#allocation2 + $0x454] sm:$0xf0] }
  0xbd   :  { %2132 = vmatpush.bf16.msrb.mxu2 %v3705_v10  ;;  %2044 = vmatmul.bf16.vlgmr.msra.gmra.mxu1 %v4339_v53  ;;  %v3640_v10 = vld [vmem:[#allocation2 + $0x648] sm:$0xf]  ;;  %v4057_v21 = vld [vmem:[#allocation2 + $0x554] sm:$0xf0] }
  0xbe   :  { %2151 = vmatpush.bf16.msrb.mxu3 %v3833_v11  ;;  %v4477_v3 = vadd.f32 %v1779_v58, %v1761_v55  ;;  %v4089_v11 = vld [vmem:[#allocation2 + $0x654] sm:$0xf0]  ;;  %v3624_v24 = vld [vmem:[#allocation2 + $0x628] sm:$0xf] }
  0xbf   :  { %2094 = vmatpush.bf16.msrb.mxu0 %v3449_v12  ;;  %v3401_v12 = vor.u32 %v4029_v60, %v3400_v52  ;;  %v3641_v22 = vor.u32 %v4089_v11, %v3640_v10  ;;  %v4085_v25 = vld [vmem:[#allocation2 + $0x634] sm:$0xf0]  ;;  %v3752_v29 = vld [vmem:[#allocation2 + $0x728] sm:$0xf]  ;;  %v2954_v11 = vld [vmem:[#allocation2 + $0xf8] sm:$0xf0] }
  0xc0   :  { %2113 = vmatpush.bf16.msrb.mxu1 %v3577_v15  ;;  %v3529_v15 = vor.u32 %v4061_v62, %v3528_v61  ;;  %v4117_v30 = vld [vmem:[#allocation2 + $0x734] sm:$0xf0]  ;;  %v3496_v36 = vld [vmem:[#allocation2 + $0x528] sm:$0xf]  ;;  %v3979_v61 = vld [vmem:[#allocation2 + $0x2ec] sm:$0xf] }
  0xc1   :  { %2133 = vmatpush.bf16.msrb.mxu2 %v3689_v27  ;;  %v3385_v27 = vor.u32 %v4025_v19, %v3384_v18  ;;  %v1727_v34 = vpop.f32.mrf.mxu0  ;;  %v4021_v35 = vld [vmem:[#allocation2 + $0x434] sm:$0xf0]  ;;  %v3753_v43 = vor.u32 %v4117_v30, %v3752_v29  ;;  %v3352_v55 = vld [vmem:[#allocation2 + $0x408] sm:$0xf]  ;;  %v3210_v62 = vld [vmem:[#allocation2 + $0x2f8] sm:$0xf0] }
  0xc2   :  { %2152 = vmatpush.bf16.msrb.mxu3 %v3817_v28  ;;  %v3513_v28 = vor.u32 %v4057_v21, %v3512_v20  ;;  %v1781_v33 = vpop.f32.mrf.mxu3  ;;  %v4053_v37 = vld [vmem:[#allocation2 + $0x534] sm:$0xf0]  ;;  %v1746_v38 = vpop.f32.mrf.mxu1  ;;  %v3480_v59 = vld [vmem:[#allocation2 + $0x508] sm:$0xf]  ;;  %v4007_v29 = vld [vmem:[#allocation2 + $0x3cc] sm:$0xf] }
  0xc3   :  { %2095 = vmatpush.bf16.msrb.mxu0 %v3433_v31  ;;  %v1762_v26 = vpop.f32.mrf.mxu2  ;;  %v3368_v31 = vld [vmem:[#allocation2 + $0x428] sm:$0xf]  ;;  %v1747_v42 = vadd.f32 %v1746_v38, %v1727_v34  ;;  %v4113_v47 = vld [vmem:[#allocation2 + $0x714] sm:$0xf0]  ;;  %v3497_v52 = vor.u32 %v4053_v37, %v3496_v36  ;;  %v3322_v30 = vld [vmem:[#allocation2 + $0x3d8] sm:$0xf0] }
  0xc4   :  { %2114 = vmatpush.bf16.msrb.mxu1 %v3561_v32  ;;  %v1763_v32 = vadd.f32 %v1762_v26, %v1744_v4  ;;  %v3369_v49 = vor.u32 %v4021_v35, %v3368_v31  ;;  %v4017_v58 = vld [vmem:[#allocation2 + $0x414] sm:$0xf0]  ;;  %v3915_v4 = vld [vmem:[#allocation2 + $0xec] sm:$0xf]  ;;  %v2938_v34 = vld [vmem:[#allocation2 + $0xd8] sm:$0xf0]  ;;  %v3325_v38 = vor.u32 %v4007_v29, %v3322_v30 }
  0xc5   :  { %2134 = vmatpush.bf16.msrb.mxu2 %v3673_v39  ;;  %v3625_v39 = vor.u32 %v4085_v25, %v3624_v24  ;;  %v4049_v60 = vld [vmem:[#allocation2 + $0x514] sm:$0xf0]  ;;  %v3353_v17 = vor.u32 %v4017_v58, %v3352_v55  ;;  %v3975_v24 = vld [vmem:[#allocation2 + $0x2cc] sm:$0xf]  ;;  %v3194_v25 = vld [vmem:[#allocation2 + $0x2d8] sm:$0xf0] }
  0xc6   :  { %2153 = vmatpush.bf16.msrb.mxu3 %v3801_v40  ;;  %v3608_v40 = vld [vmem:[#allocation2 + $0x608] sm:$0xf]  ;;  %v4479_v41 = vadd.f32 %v1781_v33, %v1763_v32  ;;  %v3481_v18 = vor.u32 %v4049_v60, %v3480_v59  ;;  %v3911_v31 = vld [vmem:[#allocation2 + $0xcc] sm:$0xf]  ;;  %v3066_v36 = vld [vmem:[#allocation2 + $0x1d8] sm:$0xf0]  ;;  %v3197_v37 = vor.u32 %v3975_v24, %v3194_v25 }
  0xc7   :  { %2096 = vmatpush.bf16.msrb.mxu0 %v3417_v45  ;;  %v4081_v45 = vld [vmem:[#allocation2 + $0x614] sm:$0xf0]  ;;  %v3943_v35 = vld [vmem:[#allocation2 + $0x1cc] sm:$0xf]  ;;  %v2922_v58 = vld [vmem:[#allocation2 + $0xb8] sm:$0xf0] }
  0xc8   :  { %2115 = vmatpush.bf16.msrb.mxu1 %v3545_v46  ;;  %v3736_v46 = vld [vmem:[#allocation2 + $0x708] sm:$0xf]  ;;  %v3939_v59 = vld [vmem:[#allocation2 + $0x1ac] sm:$0xf]  ;;  %v3050_v60 = vld [vmem:[#allocation2 + $0x1b8] sm:$0xf0] }
  0xc9   :  { %2135 = vmatpush.bf16.msrb.mxu2 %v3657_v2  ;;  %2087 = vmatmul.bf16.gmra.mxu3 %v4379_v56  ;;  %v3338_v2 = vld [vmem:[#allocation2 + $0x3f8] sm:$0xf0]  ;;  %v3737_v10 = vor.u32 %v4113_v47, %v3736_v46  ;;  %v1729_v21 = vpop.f32.mrf.mxu0  ;;  %v4003_v46 = vld [vmem:[#allocation2 + $0x3ac] sm:$0xf] }
  0xca   :  { %2154 = vmatpush.bf16.msrb.mxu3 %v3785_v7  ;;  %2030 = vmatmul.bf16.gmra.mxu0 %v4373_v44  ;;  %v3609_v7 = vor.u32 %v4081_v45, %v3608_v40  ;;  %v1784_v20 = vpop.f32.mrf.mxu3  ;;  %v1748_v26 = vpop.f32.mrf.mxu1  ;;  %v3069_v40 = vor.u32 %v3943_v35, %v3066_v36  ;;  %v3306_v47 = vld [vmem:[#allocation2 + $0x3b8] sm:$0xf0]  ;;  %v3963_v24 = vld [vmem:[#allocation2 + $0x26c] sm:$0xf] }
  0xcb   :  { %2097 = vmatpush.bf16.msrb.mxu0 %v3401_v12  ;;  %2068 = vmatmul.bf16.gmra.mxu2 %v4377_v51  ;;  %v3947_v12 = vld [vmem:[#allocation2 + $0x1ec] sm:$0xf]  ;;  %v1749_v33 = vadd.f32 %v1748_v26, %v1729_v21  ;;  %v3146_v25 = vld [vmem:[#allocation2 + $0x278] sm:$0xf0] }
  0xcc   :  { %2116 = vmatpush.bf16.msrb.mxu1 %v3529_v15  ;;  %v3082_v15 = vld [vmem:[#allocation2 + $0x1f8] sm:$0xf0]  ;;  %v3935_v21 = vld [vmem:[#allocation2 + $0x18c] sm:$0xf] }
  0xcd   :  { %2136 = vmatpush.bf16.msrb.mxu2 %v3641_v22  ;;  %2049 = vmatmul.bf16.gmra.mxu1 %v4375_v50  ;;  %v1765_v16 = vpop.f32.mrf.mxu2  ;;  %v3213_v22 = vor.u32 %v3979_v61, %v3210_v62  ;;  %v3995_v29 = vld [vmem:[#allocation2 + $0x36c] sm:$0xf]  ;;  %v3274_v30 = vld [vmem:[#allocation2 + $0x378] sm:$0xf0] }
  0xce   :  { %2155 = vmatpush.bf16.msrb.mxu3 %v3769_v23  ;;  %v1766_v19 = vadd.f32 %v1765_v16, %v1747_v42  ;;  %v3341_v23 = vor.u32 %v4011_v63, %v3338_v2  ;;  %v3971_v42 = vld [vmem:[#allocation2 + $0x2ac] sm:$0xf]  ;;  %v2890_v35 = vld [vmem:[#allocation2 + $0x78] sm:$0xf0] }
  0xcf   :  { %2098 = vmatpush.bf16.msrb.mxu0 %v3385_v27  ;;  %v2957_v27 = vor.u32 %v3915_v4, %v2954_v11  ;;  %v3162_v11 = vld [vmem:[#allocation2 + $0x298] sm:$0xf0]  ;;  %v3999_v16 = vld [vmem:[#allocation2 + $0x38c] sm:$0xf] }
  0xd0   :  { %2117 = vmatpush.bf16.msrb.mxu1 %v3513_v28  ;;  %v3085_v28 = vor.u32 %v3947_v12, %v3082_v15  ;;  %v4485_v32 = vadd.f32 %v1784_v20, %v1766_v19  ;;  %v3053_v15 = vor.u32 %v3939_v59, %v3050_v60  ;;  %v2906_v20 = vld [vmem:[#allocation2 + $0x98] sm:$0xf0]  ;;  %v3931_v36 = vld [vmem:[#allocation2 + $0x16c] sm:$0xf] }
  0xd1   :  { %2137 = vmatpush.bf16.msrb.mxu2 %v3625_v39  ;;  %v2941_v39 = vor.u32 %v3911_v31, %v2938_v34  ;;  %v3899_v31 = vld [vmem:[#allocation2 + $0x6c] sm:$0xf] }
  0xd2   :  { %2156 = vmatpush.bf16.msrb.mxu3 %v3753_v43  ;;  %v3178_v43 = vld [vmem:[#allocation2 + $0x2b8] sm:$0xf0]  ;;  %v1786_v55 = vpop.f32.mrf.mxu3  ;;  %v3895_v59 = vld [vmem:[#allocation2 + $0x4c] sm:$0xf] }
  0xd3   :  { %2099 = vmatpush.bf16.msrb.mxu0 %v3369_v49  ;;  %v3907_v49 = vld [vmem:[#allocation2 + $0xac] sm:$0xf]  ;;  %v3181_v4 = vor.u32 %v3971_v42, %v3178_v43 }
  0xd4   :  { %2118 = vmatpush.bf16.msrb.mxu1 %v3497_v52  ;;  %v2925_v12 = vor.u32 %v3907_v49, %v2922_v58  ;;  %v2893_v49 = vor.u32 %v3899_v31, %v2890_v35  ;;  %v3258_v58 = vld [vmem:[#allocation2 + $0x358] sm:$0xf0]  ;;  %v3983_v31 = vld [vmem:[#allocation2 + $0x30c] sm:$0xf] }
  0xd5   :  { %2138 = vmatpush.bf16.msrb.mxu2 %v3609_v7  ;;  %v1767_v45 = vpop.f32.mrf.mxu2  ;;  %v3309_v7 = vor.u32 %v4003_v46, %v3306_v47  ;;  %v3959_v46 = vld [vmem:[#allocation2 + $0x24c] sm:$0xf]  ;;  %v3130_v47 = vld [vmem:[#allocation2 + $0x258] sm:$0xf0] }
  0xd6   :  { %2157 = vmatpush.bf16.msrb.mxu3 %v3737_v10  ;;  %v1768_v52 = vadd.f32 %v1767_v45, %v1749_v33  ;;  %v3967_v10 = vld [vmem:[#allocation2 + $0x28c] sm:$0xf]  ;;  %v3277_v45 = vor.u32 %v3995_v29, %v3274_v30  ;;  %v3098_v30 = vld [vmem:[#allocation2 + $0x218] sm:$0xf0] }
  0xd7   :  { %2100 = vmatpush.bf16.msrb.mxu0 %v3353_v17  ;;  %v1798_v61 = vpop.f32.mrf.mxu0  ;;  %v3290_v17 = vld [vmem:[#allocation2 + $0x398] sm:$0xf0] }
  0xd8   :  { %2119 = vmatpush.bf16.msrb.mxu1 %v3481_v18  ;;  %v4487_v62 = vadd.f32 %v1786_v55, %v1768_v52  ;;  %v1799_v63 = vadd.f32 %v1798_v61, %v4477_v3  ;;  %v3903_v18 = vld [vmem:[#allocation2 + $0x8c] sm:$0xf]  ;;  %v3165_v3 = vor.u32 %v3967_v10, %v3162_v11  ;;  %v2874_v61 = vld [vmem:[#allocation2 + $0x58] sm:$0xf0] }
  0xd9   :  { %2207 = vmatpush.bf16.msra.mxu2 %v3213_v22  ;;  %v3034_v22 = vld [vmem:[#allocation2 + $0x198] sm:$0xf0]  ;;  %2158 = vmatmul.bf16.vlgmr.msrb.gmra.mxu3 %v4415_v6  ;;  %v3991_v55 = vld [vmem:[#allocation2 + $0x34c] sm:$0xf] }
  0xda   :  { %2226 = vmatpush.bf16.msra.mxu3 %v3341_v23  ;;  %v1817_v2 = vpop.f32.mrf.mxu1  ;;  %2101 = vmatmul.bf16.vlgmr.msrb.gmra.mxu0 %v4409_v0  ;;  %v3293_v23 = vor.u32 %v3999_v16, %v3290_v17  ;;  %v3114_v10 = vld [vmem:[#allocation2 + $0x238] sm:$0xf0]  ;;  %v3987_v16 = vld [vmem:[#allocation2 + $0x32c] sm:$0xf] }
  0xdb   :  { %2169 = vmatpush.bf16.msra.mxu0 %v2957_v27  ;;  %v1818_v19 = vadd.f32 %v1817_v2, %v1799_v63  ;;  %2139 = vmatmul.bf16.vlgmr.msrb.gmra.mxu2 %v4411_v1  ;;  %v2909_v27 = vor.u32 %v3903_v18, %v2906_v20  ;;  %v3927_v63 = vld [vmem:[#allocation2 + $0x14c] sm:$0xf]  ;;  %v3002_v2 = vld [vmem:[#allocation2 + $0x158] sm:$0xf0] }
  0xdc   :  { %2188 = vmatpush.bf16.msra.mxu1 %v3085_v28  ;;  %v3037_v28 = vor.u32 %v3935_v21, %v3034_v22  ;;  %v1855_v34 = vpop.f32.mrf.mxu3  ;;  %v3242_v17 = vld [vmem:[#allocation2 + $0x338] sm:$0xf0]  ;;  %v3891_v18 = vld [vmem:[#allocation2 + $0x2c] sm:$0xf] }
  0xdd   :  { %2208 = vmatpush.bf16.msra.mxu2 %v3197_v37  ;;  %2120 = vmatmul.bf16.vlgmr.msrb.gmra.mxu1 %v4413_v5  ;;  %v3018_v37 = vld [vmem:[#allocation2 + $0x178] sm:$0xf0]  ;;  %v3923_v22 = vld [vmem:[#allocation2 + $0x12c] sm:$0xf]  ;;  %v3245_v29 = vor.u32 %v3987_v16, %v3242_v17 }
  0xde   :  { %2227 = vmatpush.bf16.msra.mxu3 %v3325_v38  ;;  %v1836_v26 = vpop.f32.mrf.mxu2  ;;  %v3021_v52 = vor.u32 %v3931_v36, %v3018_v37  ;;  %v2858_v21 = vld [vmem:[#allocation2 + $0x38] sm:$0xf0]  ;;  %v3887_v36 = vld [vmem:[#allocation2 + $0xc] sm:$0xf] }
  0xdf   :  { %2170 = vmatpush.bf16.msra.mxu0 %v2941_v39  ;;  %v1837_v33 = vadd.f32 %v1836_v26, %v1818_v19  ;;  %v1800_v38 = vpop.f32.mrf.mxu0  ;;  %v3149_v39 = vor.u32 %v3963_v24, %v3146_v25  ;;  %v3951_v25 = vld [vmem:[#allocation2 + $0x20c] sm:$0xf]  ;;  %v2842_v37 = vld [vmem:[#allocation2 + $0x18] sm:$0xf0] }
  0xe0   :  { %2189 = vmatpush.bf16.msra.mxu1 %v3069_v40  ;;  %v1801_v42 = vadd.f32 %v1800_v38, %v4479_v41  ;;  %v3133_v41 = vor.u32 %v3959_v46, %v3130_v47  ;;  %v3919_v38 = vld [vmem:[#allocation2 + $0x10c] sm:$0xf]  ;;  %v3850_v46 = vld [vmem:[#allocation2 + $0x7f8] sm:$0xf0] }
  0xe1   :  { %2209 = vmatpush.bf16.msra.mxu2 %v3181_v4  ;;  %v4494_v40 = vadd.f32 %v1855_v34, %v1837_v33  ;;  %v3261_v4 = vor.u32 %v3991_v55, %v3258_v58  ;;  %v3226_v33 = vld [vmem:[#allocation2 + $0x318] sm:$0xf0]  ;;  %v2861_v34 = vor.u32 %v3891_v18, %v2858_v21  ;;  %v4043_v47 = vld [vmem:[#allocation2 + $0x4ec] sm:$0xf] }
  0xe2   :  { %2228 = vmatpush.bf16.msra.mxu3 %v3309_v7  ;;  %v1819_v43 = vpop.f32.mrf.mxu1  ;;  %v3955_v7 = vld [vmem:[#allocation2 + $0x22c] sm:$0xf]  ;;  %v3466_v55 = vld [vmem:[#allocation2 + $0x4f8] sm:$0xf0] }
  0xe3   :  { %2171 = vmatpush.bf16.msra.mxu0 %v2925_v12  ;;  %v1820_v60 = vadd.f32 %v1819_v43, %v1801_v42  ;;  %v2877_v12 = vor.u32 %v3895_v59, %v2874_v61  ;;  %v3117_v24 = vor.u32 %v3955_v7, %v3114_v10  ;;  %v4107_v42 = vld [vmem:[#allocation2 + $0x6ec] sm:$0xf]  ;;  %v3722_v43 = vld [vmem:[#allocation2 + $0x6f8] sm:$0xf0]  ;;  %v2845_v61 = vor.u32 %v3887_v36, %v2842_v37 }
  0xe4   :  { %2190 = vmatpush.bf16.msra.mxu1 %v3053_v15  ;;  %v3005_v15 = vor.u32 %v3927_v63, %v3002_v2  ;;  %v1857_v20 = vpop.f32.mrf.mxu3  ;;  %v4075_v58 = vld [vmem:[#allocation2 + $0x5ec] sm:$0xf]  ;;  %v3594_v59 = vld [vmem:[#allocation2 + $0x5f8] sm:$0xf0] }
  0xe5   :  { %2210 = vmatpush.bf16.msra.mxu2 %v3165_v3  ;;  %v2986_v3 = vld [vmem:[#allocation2 + $0x138] sm:$0xf0]  ;;  %v4103_v10 = vld [vmem:[#allocation2 + $0x6cc] sm:$0xf]  ;;  %v3597_v16 = vor.u32 %v4075_v58, %v3594_v59 }
  0xe6   :  { %2229 = vmatpush.bf16.msra.mxu3 %v3293_v23  ;;  %v1838_v11 = vpop.f32.mrf.mxu2  ;;  %v2989_v35 = vor.u32 %v3923_v22, %v2986_v3  ;;  %v4135_v17 = vld [vmem:[#allocation2 + $0x7cc] sm:$0xf]  ;;  %v3834_v18 = vld [vmem:[#allocation2 + $0x7d8] sm:$0xf0] }
  0xe7   :  { %2172 = vmatpush.bf16.msra.mxu0 %v2909_v27  ;;  %v1839_v19 = vadd.f32 %v1838_v11, %v1820_v60  ;;  %v1803_v23 = vpop.f32.mrf.mxu0  ;;  %v3706_v11 = vld [vmem:[#allocation2 + $0x6d8] sm:$0xf0]  ;;  %v4035_v36 = vld [vmem:[#allocation2 + $0x4ac] sm:$0xf] }
  0xe8   :  { %2191 = vmatpush.bf16.msra.mxu1 %v3037_v28  ;;  %v1804_v27 = vadd.f32 %v1803_v23, %v4485_v32  ;;  %v2970_v32 = vld [vmem:[#allocation2 + $0x118] sm:$0xf0]  ;;  %v4071_v23 = vld [vmem:[#allocation2 + $0x5cc] sm:$0xf] }
  0xe9   :  { %2211 = vmatpush.bf16.msra.mxu2 %v3149_v39  ;;  %v4497_v26 = vadd.f32 %v1857_v20, %v1839_v19  ;;  %2163 = vmatmul.bf16.gmra.mxu3 %v4451_v14  ;;  %v2973_v63 = vor.u32 %v3919_v38, %v2970_v32  ;;  %v4039_v19 = vld [vmem:[#allocation2 + $0x4cc] sm:$0xf]  ;;  %v3450_v3 = vld [vmem:[#allocation2 + $0x4d8] sm:$0xf0] }
  0xea   :  { %2230 = vmatpush.bf16.msra.mxu3 %v3277_v45  ;;  %v1822_v28 = vpop.f32.mrf.mxu1  ;;  %2106 = vmatmul.bf16.gmra.mxu0 %v4445_v8  ;;  %v4139_v45 = vld [vmem:[#allocation2 + $0x7ec] sm:$0xf] }
  0xeb   :  { %2173 = vmatpush.bf16.msra.mxu0 %v2893_v49  ;;  %v1823_v39 = vadd.f32 %v1822_v28, %v1804_v27  ;;  %2144 = vmatmul.bf16.gmra.mxu2 %v4447_v9  ;;  %v3101_v49 = vor.u32 %v3951_v25, %v3098_v30  ;;  %v3853_v7 = vor.u32 %v4139_v45, %v3850_v46  ;;  %v4067_v32 = vld [vmem:[#allocation2 + $0x5ac] sm:$0xf] }
  0xec   :  { %2192 = vmatpush.bf16.msra.mxu1 %v3021_v52  ;;  %v3229_v52 = vor.u32 %v3983_v31, %v3226_v33  ;;  %v3709_v27 = vor.u32 %v4103_v10, %v3706_v11  ;;  %v3837_v28 = vor.u32 %v4135_v17, %v3834_v18  ;;  %v4099_v31 = vld [vmem:[#allocation2 + $0x6ac] sm:$0xf]  ;;  %v3690_v33 = vld [vmem:[#allocation2 + $0x6b8] sm:$0xf0]  ;;  %v2325_v10 = vld [vmem:[#allocation4] sm:$0xff] }
  0xed   :  { %2212 = vmatpush.bf16.msra.mxu2 %v3133_v41  ;;  %2125 = vmatmul.bf16.gmra.mxu1 %v4449_v13  ;;  %v1860_v41 = vpop.f32.mrf.mxu3  ;;  %2337 = vst [vmem:[#allocation1] ss:$4 sm:$0xff] %v2325_v10  ;;  %v4123_v18 = vld [vmem:[#allocation2 + $0x76c] sm:$0xf] }
  0xee   :  { %2231 = vmatpush.bf16.msra.mxu3 %v3261_v4  ;;  %v1841_v60 = vpop.f32.mrf.mxu2  ;;  %v3725_v4 = vor.u32 %v4107_v42, %v3722_v43  ;;  %v3562_v42 = vld [vmem:[#allocation2 + $0x5b8] sm:$0xf0] }
  0xef   :  { %2174 = vmatpush.bf16.msra.mxu0 %v2877_v12  ;;  %v1842_v2 = vadd.f32 %v1841_v60, %v1823_v39  ;;  %v1805_v12 = vpop.f32.mrf.mxu0  ;;  %v3434_v39 = vld [vmem:[#allocation2 + $0x4b8] sm:$0xf0]  ;;  %v3565_v60 = vor.u32 %v4067_v32, %v3562_v42 }
  0xf0   :  { %2193 = vmatpush.bf16.msra.mxu1 %v3005_v15  ;;  %v3469_v15 = vor.u32 %v4043_v47, %v3466_v55  ;;  %v1806_v21 = vadd.f32 %v1805_v12, %v4487_v62  ;;  %v3693_v47 = vor.u32 %v4099_v31, %v3690_v33  ;;  %v3674_v55 = vld [vmem:[#allocation2 + $0x698] sm:$0xf0]  ;;  %v3437_v59 = vor.u32 %v4035_v36, %v3434_v39  ;;  %v4055_v39 = vld [vmem:[#allocation2 + $0x54c] sm:$0xf] }
  0xf1   :  { %2213 = vmatpush.bf16.msra.mxu2 %v3117_v24  ;;  %v4504_v20 = vadd.f32 %v1860_v41, %v1842_v2  ;;  %v3578_v24 = vld [vmem:[#allocation2 + $0x5d8] sm:$0xf0]  ;;  %v4031_v2 = vld [vmem:[#allocation2 + $0x48c] sm:$0xf] }
  0xf2   :  { %2232 = vmatpush.bf16.msra.mxu3 %v3245_v29  ;;  %v1824_v22 = vpop.f32.mrf.mxu1  ;;  %v3453_v29 = vor.u32 %v4039_v19, %v3450_v3  ;;  %v3581_v30 = vor.u32 %v4071_v23, %v3578_v24  ;;  %v3418_v41 = vld [vmem:[#allocation2 + $0x498] sm:$0xf0] }
  0xf3   :  { %2175 = vmatpush.bf16.msra.mxu0 %v2861_v34  ;;  %v1825_v25 = vadd.f32 %v1824_v22, %v1806_v21  ;;  %v4131_v34 = vld [vmem:[#allocation2 + $0x7ac] sm:$0xf]  ;;  %v3786_v19 = vld [vmem:[#allocation2 + $0x778] sm:$0xf0] }
  0xf4   :  { %2194 = vmatpush.bf16.msra.mxu1 %v2989_v35  ;;  %v3818_v35 = vld [vmem:[#allocation2 + $0x7b8] sm:$0xf0]  ;;  %v4027_v21 = vld [vmem:[#allocation2 + $0x46c] sm:$0xf] }
  0xf5   :  { %2214 = vmatpush.bf16.msra.mxu2 %v3101_v49  ;;  %v1862_v38 = vpop.f32.mrf.mxu3  ;;  %v3821_v49 = vor.u32 %v4131_v34, %v3818_v35  ;;  %v3402_v3 = vld [vmem:[#allocation2 + $0x478] sm:$0xf0]  ;;  %v4119_v35 = vld [vmem:[#allocation2 + $0x74c] sm:$0xf] }
  0xf6   :  { %2233 = vmatpush.bf16.msra.mxu3 %v3229_v52  ;;  %v1843_v62 = vpop.f32.mrf.mxu2  ;;  %v4095_v52 = vld [vmem:[#allocation2 + $0x68c] sm:$0xf]  ;;  %v3530_v23 = vld [vmem:[#allocation2 + $0x578] sm:$0xf0] }
  0xf7   :  { %2176 = vmatpush.bf16.msra.mxu0 %v2845_v61  ;;  %v1844_v37 = vadd.f32 %v1843_v62, %v1825_v25  ;;  %v1874_v43 = vpop.f32.mrf.mxu0  ;;  %v4127_v61 = vld [vmem:[#allocation2 + $0x78c] sm:$0xf]  ;;  %v3677_v11 = vor.u32 %v4095_v52, %v3674_v55  ;;  %v3642_v31 = vld [vmem:[#allocation2 + $0x658] sm:$0xf0]  ;;  %v3405_v62 = vor.u32 %v4027_v21, %v3402_v3 }
  0xf8   :  { %2195 = vmatpush.bf16.msra.mxu1 %v2973_v63  ;;  %v3802_v63 = vld [vmem:[#allocation2 + $0x798] sm:$0xf0]  ;;  %v4047_v3 = vld [vmem:[#allocation2 + $0x50c] sm:$0xf] }
  0xf9   :  { %2283 = vmatpush.bf16.msrb.mxu2 %v3725_v4  ;;  %v4507_v45 = vadd.f32 %v1862_v38, %v1844_v37  ;;  %v4063_v4 = vld [vmem:[#allocation2 + $0x58c] sm:$0xf]  ;;  %2234 = vmatmul.bf16.vlgmr.msra.gmra.mxu3 %v4343_v57  ;;  %v3805_v12 = vor.u32 %v4127_v61, %v3802_v63  ;;  %v3770_v36 = vld [vmem:[#allocation2 + $0x758] sm:$0xf0] }
  0xfa   :  { %2302 = vmatpush.bf16.msrb.mxu3 %v3853_v7  ;;  %v1893_v46 = vpop.f32.mrf.mxu1  ;;  %2177 = vmatmul.bf16.vlgmr.msra.gmra.mxu0 %v4337_v48  ;;  %v3546_v7 = vld [vmem:[#allocation2 + $0x598] sm:$0xf0]  ;;  %v3421_v48 = vor.u32 %v4031_v2, %v3418_v41  ;;  %v4059_v57 = vld [vmem:[#allocation2 + $0x56c] sm:$0xf] }
  0xfb   :  { %2245 = vmatpush.bf16.msrb.mxu0 %v3469_v15  ;;  %v1894_v58 = vadd.f32 %v1893_v46, %v1874_v43  ;;  %2215 = vmatmul.bf16.vlgmr.msra.gmra.mxu2 %v4341_v54  ;;  %v4091_v15 = vld [vmem:[#allocation2 + $0x66c] sm:$0xf]  ;;  %v3549_v54 = vor.u32 %v4063_v4, %v3546_v7  ;;  %v3533_v34 = vor.u32 %v4059_v57, %v3530_v23  ;;  %v3386_v38 = vld [vmem:[#allocation2 + $0x458] sm:$0xf0] }
  0xfc   :  { %2264 = vmatpush.bf16.msrb.mxu1 %v3597_v16  ;;  %v3658_v16 = vld [vmem:[#allocation2 + $0x678] sm:$0xf0]  ;;  %v4023_v37 = vld [vmem:[#allocation2 + $0x44c] sm:$0xf]  ;;  %v3773_v43 = vor.u32 %v4119_v35, %v3770_v36 }
  0xfd   :  { %2284 = vmatpush.bf16.msrb.mxu2 %v3709_v27  ;;  %2196 = vmatmul.bf16.vlgmr.msra.gmra.mxu1 %v4339_v53  ;;  %v1931_v53 = vpop.f32.mrf.mxu3  ;;  %v3514_v32 = vld [vmem:[#allocation2 + $0x558] sm:$0xf0]  ;;  %v4083_v46 = vld [vmem:[#allocation2 + $0x62c] sm:$0xf]  ;;  %v3389_v52 = vor.u32 %v4023_v37, %v3386_v38 }
  0xfe   :  { %2303 = vmatpush.bf16.msrb.mxu3 %v3837_v28  ;;  %v1912_v17 = vpop.f32.mrf.mxu2  ;;  %v3661_v28 = vor.u32 %v4091_v15, %v3658_v16  ;;  %v3517_v55 = vor.u32 %v4055_v39, %v3514_v32  ;;  %v3370_v2 = vld [vmem:[#allocation2 + $0x438] sm:$0xf0]  ;;  %v4051_v41 = vld [vmem:[#allocation2 + $0x52c] sm:$0xf] }
  0xff   :  { %2246 = vmatpush.bf16.msrb.mxu0 %v3453_v29  ;;  %v1913_v22 = vadd.f32 %v1912_v17, %v1894_v58  ;;  %v1876_v24 = vpop.f32.mrf.mxu0  ;;  %v3789_v29 = vor.u32 %v4123_v18, %v3786_v19  ;;  %v4115_v58 = vld [vmem:[#allocation2 + $0x72c] sm:$0xf]  ;;  %v3498_v4 = vld [vmem:[#allocation2 + $0x538] sm:$0xf0] }
 0x100   :  { %2265 = vmatpush.bf16.msrb.mxu1 %v3581_v30  ;;  %v4087_v30 = vld [vmem:[#allocation2 + $0x64c] sm:$0xf]  ;;  %v3610_v17 = vld [vmem:[#allocation2 + $0x618] sm:$0xf0]  ;;  %v3501_v18 = vor.u32 %v4051_v41, %v3498_v4 }
 0x101   :  { %2285 = vmatpush.bf16.msrb.mxu2 %v3693_v47  ;;  %v4513_v25 = vadd.f32 %v1931_v53, %v1913_v22  ;;  %v3645_v42 = vor.u32 %v4087_v30, %v3642_v31  ;;  %v3626_v47 = vld [vmem:[#allocation2 + $0x638] sm:$0xf0]  ;;  %v4079_v16 = vld [vmem:[#allocation2 + $0x60c] sm:$0xf] }
 0x102   :  { %2304 = vmatpush.bf16.msrb.mxu3 %v3821_v49  ;;  %v1895_v27 = vpop.f32.mrf.mxu1  ;;  %v4111_v19 = vld [vmem:[#allocation2 + $0x70c] sm:$0xf]  ;;  %v3738_v21 = vld [vmem:[#allocation2 + $0x718] sm:$0xf0]  ;;  %v3613_v23 = vor.u32 %v4079_v16, %v3610_v17 }
 0x103   :  { %2247 = vmatpush.bf16.msrb.mxu0 %v3437_v59  ;;  %v1896_v33 = vadd.f32 %v1895_v27, %v1876_v24  ;;  %v3754_v59 = vld [vmem:[#allocation2 + $0x738] sm:$0xf0]  ;;  %v4015_v22 = vld [vmem:[#allocation2 + $0x40c] sm:$0xf]  ;;  %v3741_v24 = vor.u32 %v4111_v19, %v3738_v21 }
 0x104   :  { %2266 = vmatpush.bf16.msrb.mxu1 %v3565_v60  ;;  %v4019_v60 = vld [vmem:[#allocation2 + $0x42c] sm:$0xf]  ;;  %v3757_v15 = vor.u32 %v4115_v58, %v3754_v59  ;;  %v3354_v53 = vld [vmem:[#allocation2 + $0x418] sm:$0xf0] }
 0x105   :  { %2286 = vmatpush.bf16.msrb.mxu2 %v3677_v11  ;;  %v1933_v63 = vpop.f32.mrf.mxu3  ;;  %v3482_v57 = vld [vmem:[#allocation2 + $0x518] sm:$0xf0]  ;;  %v2340_v27 = vld.sshfl [vmem:[#allocation1 + $0x10] sm:$0xff pattern:$0x73625140] }
 0x106   :  { %2305 = vmatpush.bf16.msrb.mxu3 %v3805_v12  ;;  %v1914_v49 = vpop.f32.mrf.mxu2  ;;  %v3629_v12 = vor.u32 %v4083_v46, %v3626_v47  ;;  %v3485_v30 = vor.u32 %v4047_v3, %v3482_v57  ;;  %v2339_v31 = vld.sshfl [vmem:[#allocation1 + $0x8] sm:$0xff pattern:$0x73625140] }
 0x107   :  { %2248 = vmatpush.bf16.msrb.mxu0 %v3421_v48  ;;  %v1915_v61 = vadd.f32 %v1914_v49, %v1896_v33  ;;  %v1879_v7 = vpop.f32.mrf.mxu0  ;;  %v2352_v38 = vsel %vm2349_vm0, %v2339_v31, 0 }
 0x108   :  { %2267 = vmatpush.bf16.msrb.mxu1 %v3549_v54  ;;  %v3373_v54 = vor.u32 %v4019_v60, %v3370_v2 }
 0x109   :  { %2287 = vmatpush.bf16.msrb.mxu2 %v3661_v28  ;;  %v4515_v10 = vadd.f32 %v1933_v63, %v1915_v61  ;;  %2239 = vmatmul.bf16.gmra.mxu3 %v4379_v56  ;;  %v2341_v28 = vld.sshfl [vmem:[#allocation1 + $0x18] sm:$0xff pattern:$0x73625140] }
 0x10a   :  { %2306 = vmatpush.bf16.msrb.mxu3 %v3789_v29  ;;  %v1898_v11 = vpop.f32.mrf.mxu1  ;;  %2182 = vmatmul.bf16.gmra.mxu0 %v4373_v44  ;;  %v3357_v44 = vor.u32 %v4015_v22, %v3354_v53  ;;  %v2356_v56 = vsel %vm2349_vm0, %v2341_v28, 0 }
 0x10b   :  { %2249 = vmatpush.bf16.msrb.mxu0 %v3405_v62  ;;  %v1899_v48 = vadd.f32 %v1898_v11, %v1879_v7  ;;  %2220 = vmatmul.bf16.gmra.mxu2 %v4377_v51  ;;  %v2338_v51 = vld.sshfl [vmem:[#allocation1] sm:$0xff pattern:$0x73625140] }
 0x10c   :  { %2268 = vmatpush.bf16.msrb.mxu1 %v3533_v34  ;;  %v2350_v37 = vsel %vm2349_vm0, %v2338_v51, 0  ;;  %v4143_v51 = vld [vmem:[%s4797_s2 + $0x8] sm:$0x70] }
 0x10d   :  { %2288 = vmatpush.bf16.msrb.mxu2 %v3645_v42  ;;  %2201 = vmatmul.bf16.gmra.mxu1 %v4375_v50  ;;  %v1936_v62 = vpop.f32.mrf.mxu3  ;;  %v2354_v50 = vsel %vm2349_vm0, %v2340_v27, 0 }
 0x10e   :  { %2307 = vmatpush.bf16.msrb.mxu3 %v3773_v43  ;;  %v1917_v29 = vpop.f32.mrf.mxu2 }
 0x10f   :  { %2250 = vmatpush.bf16.msrb.mxu0 %v3389_v52  ;;  %v1918_v33 = vadd.f32 %v1917_v29, %v1899_v48  ;;  %v1881_v34 = vpop.f32.mrf.mxu0 }
 0x110   :  { %2269 = vmatpush.bf16.msrb.mxu1 %v3517_v55 }
 0x111   :  { %2289 = vmatpush.bf16.msrb.mxu2 %v3629_v12  ;;  %v1937_v35 = vadd.f32 %v1936_v62, %v1918_v33 }
 0x112   :  { %2308 = vmatpush.bf16.msrb.mxu3 %v3757_v15  ;;  %v1900_v36 = vpop.f32.mrf.mxu1 }
 0x113   :  { %2251 = vmatpush.bf16.msrb.mxu0 %v3373_v54  ;;  %v1901_v39 = vadd.f32 %v1900_v36, %v1881_v34 }
 0x114   :  { %2270 = vmatpush.bf16.msrb.mxu1 %v3501_v18 }
 0x115   :  { %2290 = vmatpush.bf16.msrb.mxu2 %v3613_v23  ;;  %v1938_v43 = vpop.f32.mrf.mxu3 }
 0x116   :  { %2309 = vmatpush.bf16.msrb.mxu3 %v3741_v24  ;;  %v1919_v32 = vpop.f32.mrf.mxu2 }
 0x117   :  { %2252 = vmatpush.bf16.msrb.mxu0 %v3357_v44  ;;  %v1920_v42 = vadd.f32 %v1919_v32, %v1901_v39  ;;  %v1950_v46 = vpop.f32.mrf.mxu0 }
 0x118   :  { %2271 = vmatpush.bf16.msrb.mxu1 %v3485_v30  ;;  %v1951_v49 = vadd.f32 %v1950_v46, %v4513_v25  ;;  %v3860_v30 = vld [vmem:[%s4797_s2 + $0x8] sm:$0xf] }
 0x119   :  { %2403 = vmatpush.bf16.msra.mxu2 %v2354_v50  ;;  %v1939_v47 = vadd.f32 %v1938_v43, %v1920_v42  ;;  %2310 = vmatmul.bf16.vlgmr.msrb.gmra.mxu3 %v4415_v6  ;;  %v3861_v34 = vor.u32 %v4143_v51, %v3860_v30 }
 0x11a   :  { %2422 = vmatpush.bf16.msra.mxu3 %v2356_v56  ;;  %v1969_v52 = vpop.f32.mrf.mxu1  ;;  %2253 = vmatmul.bf16.vlgmr.msrb.gmra.mxu0 %v4409_v0 }
 0x11b   :  { %2365 = vmatpush.bf16.msra.mxu0 %v2350_v37  ;;  %v1970_v55 = vadd.f32 %v1969_v52, %v1951_v49  ;;  %2291 = vmatmul.bf16.vlgmr.msrb.gmra.mxu2 %v4411_v1 }
 0x11c   :  { %2384 = vmatpush.bf16.msra.mxu1 %v2352_v38 }
 0x11d   :  { %2272 = vmatmul.bf16.vlgmr.msrb.gmra.mxu1 %v4413_v5  ;;  %v2007_v60 = vpop.f32.mrf.mxu3 }
 0x11e   :  { %v1988_v58 = vpop.f32.mrf.mxu2 }
 0x11f   :  { %v1989_v59 = vadd.f32 %v1988_v58, %v1970_v55  ;;  %v1952_v61 = vpop.f32.mrf.mxu0 }
 0x120   :  { %v1953_v2 = vadd.f32 %v1952_v61, %v4515_v10 }
 0x121   :  { %v4530_v63 = vadd.f32 %v2007_v60, %v1989_v59 }
 0x122   :  { %v1971_v41 = vpop.f32.mrf.mxu1 }
 0x123   :  { %v1972_v25 = vadd.f32 %v1971_v41, %v1953_v2 }
 0x125   :  { %v2009_v11 = vpop.f32.mrf.mxu3 }
 0x126   :  { %v1990_v4 = vpop.f32.mrf.mxu2 }
 0x127   :  { %v1991_v7 = vadd.f32 %v1990_v4, %v1972_v25  ;;  %v1955_v0 = vpop.f32.mrf.mxu0 }
 0x128   :  { %v1956_v1 = vadd.f32 %v1955_v0, %v1937_v35 }
 0x129   :  { %v4533_v12 = vadd.f32 %v2009_v11, %v1991_v7  ;;  %2315 = vmatmul.bf16.gmra.mxu3 %v4451_v14 }
 0x12a   :  { %v1974_v5 = vpop.f32.mrf.mxu1  ;;  %2258 = vmatmul.bf16.gmra.mxu0 %v4445_v8  ;;  %v4142_v8 = vld [vmem:[%s4797_s2] sm:$0xff] }
 0x12b   :  { %v1975_v15 = vadd.f32 %v1974_v5, %v1956_v1  ;;  %2296 = vmatmul.bf16.gmra.mxu2 %v4447_v9 }
 0x12d   :  { %2277 = vmatmul.bf16.gmra.mxu1 %v4449_v13  ;;  %v2012_v16 = vpop.f32.mrf.mxu3 }
 0x12e   :  { %v1993_v6 = vpop.f32.mrf.mxu2 }
 0x12f   :  { %v1994_v10 = vadd.f32 %v1993_v6, %v1975_v15  ;;  %v1957_v17 = vpop.f32.mrf.mxu0 }
 0x130   :  { %v1958_v54 = vadd.f32 %v1957_v17, %v1939_v47 }
 0x131   :  { %v4539_v48 = vadd.f32 %v2012_v16, %v1994_v10 }
 0x132   :  { %v1976_v18 = vpop.f32.mrf.mxu1 }
 0x133   :  { %v1977_v19 = vadd.f32 %v1976_v18, %v1958_v54 }
 0x135   :  { %v2014_v53 = vpop.f32.mrf.mxu3 }
 0x136   :  { %v1995_v21 = vpop.f32.mrf.mxu2 }
 0x137   :  { %v1996_v22 = vadd.f32 %v1995_v21, %v1977_v19  ;;  %v2026_v9 = vpop.f32.mrf.mxu0 }
 0x139   :  { %v4544_v13 = vadd.f32 %v2014_v53, %v1996_v22  ;;  %3868 = vmatmul.msk.bf16.vlgmr.msra.gmra.mxu3 %vm2342_vm1, %v4142_v8 }
 0x13a   :  { %v2045_v14 = vpop.f32.mrf.mxu1  ;;  %3862 = vmatmul.msk.bf16.vlgmr.msra.gmra.mxu0 %vm2342_vm1, %v4142_v8 }
 0x13b   :  { %v2046_v3 = vadd.f32 %v2045_v14, %v2026_v9  ;;  %3866 = vmatmul.msk.bf16.vlgmr.msra.gmra.mxu2 %vm2342_vm1, %v4142_v8 }
 0x13d   :  { %3864 = vmatmul.msk.bf16.vlgmr.msra.gmra.mxu1 %vm2342_vm1, %v4142_v8  ;;  %v2083_v24 = vpop.f32.mrf.mxu3 }
 0x13e   :  { %v2064_v57 = vpop.f32.mrf.mxu2 }
 0x13f   :  { %v2065_v23 = vadd.f32 %v2064_v57, %v2046_v3  ;;  %v2028_v27 = vpop.f32.mrf.mxu0 }
 0x141   :  { %v2084_v28 = vadd.f32 %v2083_v24, %v2065_v23 }
 0x142   :  { %v2047_v29 = vpop.f32.mrf.mxu1 }
 0x143   :  { %v2048_v44 = vadd.f32 %v2047_v29, %v2028_v27 }
 0x145   :  { %v2085_v62 = vpop.f32.mrf.mxu3 }
 0x146   :  { %v2066_v31 = vpop.f32.mrf.mxu2 }
 0x147   :  { %v2067_v33 = vadd.f32 %v2066_v31, %v2048_v44  ;;  %v2031_v50 = vpop.f32.mrf.mxu0 }
 0x149   :  { %v2086_v56 = vadd.f32 %v2085_v62, %v2067_v33  ;;  %3869 = vmatmul.msk.bf16.gmra.mxu3 %vm2342_vm1, %v3861_v34 }
 0x14a   :  { %v2050_v35 = vpop.f32.mrf.mxu1  ;;  %3863 = vmatmul.msk.bf16.gmra.mxu0 %vm2342_vm1, %v3861_v34 }
 0x14b   :  { %v2051_v36 = vadd.f32 %v2050_v35, %v2031_v50  ;;  %3867 = vmatmul.msk.bf16.gmra.mxu2 %vm2342_vm1, %v3861_v34 }
 0x14d   :  { %3865 = vmatmul.msk.bf16.gmra.mxu1 %vm2342_vm1, %v3861_v34  ;;  %v2088_v39 = vpop.f32.mrf.mxu3 }
 0x14e   :  { %v2069_v37 = vpop.f32.mrf.mxu2 }
 0x14f   :  { %v2070_v38 = vadd.f32 %v2069_v37, %v2051_v36  ;;  %v2033_v32 = vpop.f32.mrf.mxu0 }
 0x151   :  { %v2089_v42 = vadd.f32 %v2088_v39, %v2070_v38 }
 0x152   :  { %v2052_v43 = vpop.f32.mrf.mxu1 }
 0x153   :  { %v2053_v46 = vadd.f32 %v2052_v43, %v2033_v32 }
 0x155   :  { %v2090_v52 = vpop.f32.mrf.mxu3 }
 0x156   :  { %v2071_v47 = vpop.f32.mrf.mxu2 }
 0x157   :  { %v2072_v49 = vadd.f32 %v2071_v47, %v2053_v46  ;;  %v2102_v55 = vpop.f32.mrf.mxu0 }
 0x158   :  { %v2103_v59 = vadd.f32 %v2102_v55, %v2084_v28 }
 0x159   :  { %v2091_v58 = vadd.f32 %v2090_v52, %v2072_v49 }
 0x15a   :  { %v2121_v60 = vpop.f32.mrf.mxu1 }
 0x15b   :  { %v2122_v61 = vadd.f32 %v2121_v60, %v2103_v59 }
 0x15d   :  { %v2159_v25 = vpop.f32.mrf.mxu3 }
 0x15e   :  { %v2140_v2 = vpop.f32.mrf.mxu2 }
 0x15f   :  { %v2141_v41 = vadd.f32 %v2140_v2, %v2122_v61  ;;  %v2104_v4 = vpop.f32.mrf.mxu0 }
 0x160   :  { %v2105_v11 = vadd.f32 %v2104_v4, %v2086_v56 }
 0x161   :  { %v4560_v7 = vadd.f32 %v2159_v25, %v2141_v41 }
 0x162   :  { %v2123_v0 = vpop.f32.mrf.mxu1 }
 0x163   :  { %v2124_v1 = vadd.f32 %v2123_v0, %v2105_v11 }
 0x165   :  { %v2161_v6 = vpop.f32.mrf.mxu3 }
 0x166   :  { %v2142_v5 = vpop.f32.mrf.mxu2 }
 0x167   :  { %v2143_v15 = vadd.f32 %v2142_v5, %v2124_v1  ;;  %v2107_v10 = vpop.f32.mrf.mxu0 }
 0x168   :  { %v2108_v17 = vadd.f32 %v2107_v10, %v2089_v42 }
 0x169   :  { %v4562_v16 = vadd.f32 %v2161_v6, %v2143_v15 }
 0x16a   :  { %v2126_v54 = vpop.f32.mrf.mxu1 }
 0x16b   :  { %v2127_v18 = vadd.f32 %v2126_v54, %v2108_v17 }
 0x16d   :  { %v2164_v22 = vpop.f32.mrf.mxu3 }
 0x16e   :  { %v2145_v19 = vpop.f32.mrf.mxu2 }
 0x16f   :  { %v2146_v21 = vadd.f32 %v2145_v19, %v2127_v18  ;;  %v2109_v53 = vpop.f32.mrf.mxu0 }
 0x170   :  { %v2110_v9 = vadd.f32 %v2109_v53, %v2091_v58 }
 0x171   :  { %v4564_v8 = vadd.f32 %v2164_v22, %v2146_v21 }
 0x172   :  { %v2128_v14 = vpop.f32.mrf.mxu1 }
 0x173   :  { %v2129_v3 = vadd.f32 %v2128_v14, %v2110_v9 }
 0x175   :  { %v2166_v24 = vpop.f32.mrf.mxu3 }
 0x176   :  { %v2147_v57 = vpop.f32.mrf.mxu2 }
 0x177   :  { %v2148_v23 = vadd.f32 %v2147_v57, %v2129_v3  ;;  %v2178_v27 = vpop.f32.mrf.mxu0 }
 0x179   :  { %v4566_v28 = vadd.f32 %v2166_v24, %v2148_v23 }
 0x17a   :  { %v2197_v29 = vpop.f32.mrf.mxu1 }
 0x17b   :  { %v2198_v44 = vadd.f32 %v2197_v29, %v2178_v27 }
 0x17d   :  { %v2235_v31 = vpop.f32.mrf.mxu3 }
 0x17e   :  { %v2216_v30 = vpop.f32.mrf.mxu2 }
 0x17f   :  { %v2217_v51 = vadd.f32 %v2216_v30, %v2198_v44  ;;  %v2180_v33 = vpop.f32.mrf.mxu0 }
 0x181   :  { %v2236_v62 = vadd.f32 %v2235_v31, %v2217_v51 }
 0x182   :  { %v2199_v34 = vpop.f32.mrf.mxu1 }
 0x183   :  { %v2200_v50 = vadd.f32 %v2199_v34, %v2180_v33 }
 0x185   :  { %v2237_v36 = vpop.f32.mrf.mxu3 }
 0x186   :  { %v2218_v56 = vpop.f32.mrf.mxu2 }
 0x187   :  { %v2219_v35 = vadd.f32 %v2218_v56, %v2200_v50  ;;  %v2183_v37 = vpop.f32.mrf.mxu0 }
 0x189   :  { %v2238_v38 = vadd.f32 %v2237_v36, %v2219_v35 }
 0x18a   :  { %v2202_v39 = vpop.f32.mrf.mxu1 }
 0x18b   :  { %v2203_v10 = vadd.f32 %v2202_v39, %v2183_v37 }
 0x18d   :  { %v2240_v42 = vpop.f32.mrf.mxu3 }
 0x18e   :  { %v2221_v32 = vpop.f32.mrf.mxu2 }
 0x18f   :  { %v2185_v43 = vpop.f32.mrf.mxu0  ;;  %v2222_v19 = vadd.f32 %v2221_v32, %v2203_v10 }
 0x191   :  { %v2241_v3 = vadd.f32 %v2240_v42, %v2222_v19 }
 0x192   :  { %v2204_v46 = vpop.f32.mrf.mxu1 }
 0x193   :  { %v2205_v29 = vadd.f32 %v2204_v46, %v2185_v43 }
 0x195   :  { %v2242_v49 = vpop.f32.mrf.mxu3 }
 0x196   :  { %v2223_v47 = vpop.f32.mrf.mxu2 }
 0x197   :  { %v2254_v52 = vpop.f32.mrf.mxu0 }
 0x198   :  { %v2255_v18 = vadd.f32 %v2254_v52, %v2236_v62  ;;  %v2224_v62 = vadd.f32 %v2223_v47, %v2205_v29 }
 0x19a   :  { %v2273_v55 = vpop.f32.mrf.mxu1 }
 0x19b   :  { %v2274_v22 = vadd.f32 %v2273_v55, %v2255_v18 }
 0x19d   :  { %v2311_v59 = vpop.f32.mrf.mxu3 }
 0x19e   :  { %v2292_v58 = vpop.f32.mrf.mxu2 }
 0x19f   :  { %v2256_v60 = vpop.f32.mrf.mxu0  ;;  %v2293_v57 = vadd.f32 %v2292_v58, %v2274_v22 }
 0x1a0   :  { %v2257_v21 = vadd.f32 %v2256_v60, %v2238_v38 }
 0x1a1   :  { %v4598_v35 = vadd.f32 %v2311_v59, %v2293_v57  ;;  %v2243_v59 = vadd.f32 %v2242_v49, %v2224_v62 }
 0x1a2   :  { %v2275_v61 = vpop.f32.mrf.mxu1 }
 0x1a3   :  { %v2276_v23 = vadd.f32 %v2275_v61, %v2257_v21 }
 0x1a5   :  { %v2313_v41 = vpop.f32.mrf.mxu3 }
 0x1a6   :  { %v2294_v2 = vpop.f32.mrf.mxu2 }
 0x1a7   :  { %v2259_v25 = vpop.f32.mrf.mxu0  ;;  %v2295_v51 = vadd.f32 %v2294_v2, %v2276_v23 }
 0x1a8   :  { %v2260_v31 = vadd.f32 %v2259_v25, %v2241_v3 }
 0x1a9   :  { %v4604_v42 = vadd.f32 %v2313_v41, %v2295_v51 }
 0x1aa   :  { %v2278_v4 = vpop.f32.mrf.mxu1 }
 0x1ab   :  { %v2279_v43 = vadd.f32 %v2278_v4, %v2260_v31 }
 0x1ad   :  { %v4568_v0 = vpop.f32.mrf.mxu3 }
 0x1ae   :  { %v2297_v11 = vpop.f32.mrf.mxu2 }
 0x1af   :  { %v2261_v1 = vpop.f32.mrf.mxu0  ;;  %v2298_v60 = vadd.f32 %v2297_v11, %v2279_v43 }
 0x1b0   :  { %v2262_v57 = vadd.f32 %v2261_v1, %v2243_v59 }
 0x1b1   :  { %v4631_v51 = vadd.f32 %v4568_v0, %v2298_v60 }
 0x1b2   :  { %v4570_v5 = vpop.f32.mrf.mxu1 }
 0x1b5   :  { %v4574_v6 = vpop.f32.mrf.mxu3 }
 0x1b6   :  { %v4572_v15 = vpop.f32.mrf.mxu2 }
 0x1b7   :  { %v4576_v17 = vpop.f32.mrf.mxu0 }
 0x1b8   :  { %v2434_v9 = vmul.f32 %v4576_v17, %v4494_v40 }
 0x1ba   :  { %v4578_v54 = vpop.f32.mrf.mxu1  ;;  %v2491_v34 = vmul.f32 %v2434_v9, %v4494_v40 }
 0x1bb   :  { %v2435_v24 = vmul.f32 %v4578_v54, %v4530_v63 }
 0x1bd   :  { %v4584_v14 = vpop.f32.mrf.mxu3  ;;  %v2492_v36 = vmul.f32 %v2435_v24, %v4530_v63 }
 0x1be   :  { %v4580_v53 = vpop.f32.mrf.mxu2  ;;  %v2437_v46 = vmul.f32 %v4584_v14, %v4598_v35 }
 0x1bf   :  { %v4588_v27 = vpop.f32.mrf.mxu0  ;;  %v2436_v39 = vmul.f32 %v4580_v53, %v4560_v7 }
 0x1c0   :  { %v2438_v44 = vmul.f32 %v4588_v27, %v4497_v26  ;;  %v2494_v19 = vmul.f32 %v2437_v46, %v4598_v35 }
 0x1c1   :  { %v2493_v41 = vmul.f32 %v2436_v39, %v4560_v7 }
 0x1c2   :  { %v4592_v30 = vpop.f32.mrf.mxu1  ;;  %v2450_v50 = vadd.f32 %v2438_v44, %v2434_v9  ;;  %v2495_v56 = vmul.f32 %v2438_v44, %v4497_v26 }
 0x1c3   :  { %v2439_v33 = vmul.f32 %v4592_v30, %v4533_v12 }
 0x1c4   :  { %v2507_v32 = vadd.f32 %v2495_v56, %v2491_v34 }
 0x1c5   :  { %v2461_v37 = vadd.f32 %v2439_v33, %v2435_v24  ;;  %v2496_v38 = vmul.f32 %v2439_v33, %v4533_v12  ;;  %v4612_v58 = vpop.f32.mrf.mxu3 }
 0x1c6   :  { %v4608_v52 = vpop.f32.mrf.mxu2  ;;  %v2441_v61 = vmul.f32 %v4612_v58, %v4604_v42 }
 0x1c7   :  { %v2517_v47 = vadd.f32 %v2496_v38, %v2492_v36  ;;  %v2440_v55 = vmul.f32 %v4608_v52, %v4562_v16  ;;  %v4616_v2 = vpop.f32.mrf.mxu0 }
 0x1c8   :  { %v2442_v10 = vmul.f32 %v4616_v2, %v4504_v20  ;;  %v2481_v21 = vadd.f32 %v2441_v61, %v2437_v46  ;;  %v2498_v49 = vmul.f32 %v2441_v61, %v4604_v42 }
 0x1c9   :  { %v2471_v25 = vadd.f32 %v2440_v55, %v2436_v39  ;;  %v2497_v4 = vmul.f32 %v2440_v55, %v4562_v16 }
 0x1ca   :  { %v4622_v18 = vpop.f32.mrf.mxu1  ;;  %v2451_v9 = vadd.f32 %v2450_v50, %v2442_v10  ;;  %v2499_v3 = vmul.f32 %v2442_v10, %v4504_v20  ;;  %v2537_v23 = vadd.f32 %v2498_v49, %v2494_v19  ;;  %v2281_v50 = vadd.f32 %v4570_v5, %v2262_v57 }
 0x1cb   :  { %v2443_v11 = vmul.f32 %v4622_v18, %v4539_v48  ;;  %v2527_v22 = vadd.f32 %v2497_v4, %v2493_v41 }
 0x1cc   :  { %v2508_v44 = vadd.f32 %v2507_v32, %v2499_v3  ;;  %v2300_v39 = vadd.f32 %v4572_v15, %v2281_v50 }
 0x1cd   :  { %v2462_v24 = vadd.f32 %v2461_v37, %v2443_v11  ;;  %v2500_v29 = vmul.f32 %v2443_v11, %v4539_v48  ;;  %v4637_v34 = vpop.f32.mrf.mxu3 }
 0x1ce   :  { %v4633_v33 = vpop.f32.mrf.mxu2  ;;  %v2445_v1 = vmul.f32 %v4637_v34, %v4631_v51  ;;  %v4659_v15 = vadd.f32 %v4574_v6, %v2300_v39 }
 0x1cf   :  { %v2518_v31 = vadd.f32 %v2517_v47, %v2500_v29  ;;  %v2444_v62 = vmul.f32 %v4633_v33, %v4564_v8  ;;  %v4642_v56 = vpop.f32.mrf.mxu0 }
 0x1d0   :  { %v2446_v37 = vmul.f32 %v4642_v56, %v4507_v45  ;;  %v2502_v47 = vmul.f32 %v2445_v1, %v4631_v51  ;;  %v2482_v49 = vadd.f32 %v2481_v21, %v2445_v1 }
 0x1d1   :  { %v2472_v36 = vadd.f32 %v2471_v25, %v2444_v62  ;;  %v2501_v0 = vmul.f32 %v2444_v62, %v4564_v8 }
 0x1d2   :  { %v4647_v38 = vpop.f32.mrf.mxu1  ;;  %v2453_v43 = vsel %vm2452_vm2, %v2446_v37, 0.0  ;;  %v2503_v46 = vmul.f32 %v2446_v37, %v4507_v45  ;;  %v2538_v57 = vadd.f32 %v2537_v23, %v2502_v47 }
 0x1d3   :  { %4805 = vst [vmem:[#allocation12_spill] sm:$0xff] %v4647_v38  ;;  %v2447_v32 = vmul.f32 %v4647_v38, %v4544_v13  ;;  %v2528_v5 = vadd.f32 %v2527_v22, %v2501_v0  ;;  %v2454_v55 = vadd.f32 %v2453_v43, %v2451_v9 }
 0x1d4   :  { %v2509_v61 = vsel %vm2452_vm2, %v2503_v46, 0.0 }
 0x1d5   :  { %v2463_v59 = vsel %vm2452_vm2, %v2447_v32, 0.0  ;;  %v2504_v60 = vmul.f32 %v2447_v32, %v4544_v13  ;;  %v2455_v25 = vrot.slane %v2454_v55, 4  ;;  %v2510_v4 = vadd.f32 %v2509_v61, %v2508_v44  ;;  %v4666_v3 = vpop.f32.mrf.mxu3 }
 0x1d6   :  { %v2464_v41 = vadd.f32 %v2463_v59, %v2462_v24  ;;  %v4662_v19 = vpop.f32.mrf.mxu2  ;;  %4807 = vst [vmem:[#allocation14_spill] sm:$0xff] %v4666_v3  ;;  %v2449_v6 = vmul.f32 %v4666_v3, %v4659_v15 }
 0x1d7   :  { %v2519_v10 = vsel %vm2452_vm2, %v2504_v60, 0.0  ;;  %4806 = vst [vmem:[#allocation13_spill] sm:$0xff] %v4662_v19  ;;  %v2448_v9 = vmul.f32 %v4662_v19, %v4566_v28  ;;  %v2456_v29 = vadd.f32 %v2455_v25, %v2454_v55  ;;  %v2511_v24 = vrot.slane %v2510_v4, 4 }
 0x1d8   :  { %v2465_v11 = vrot.slane %v2464_v41, 4  ;;  %v2520_v22 = vadd.f32 %v2519_v10, %v2518_v31  ;;  %v2483_v37 = vsel %vm2452_vm2, %v2449_v6, 0.0  ;;  %v2506_v25 = vmul.f32 %v2449_v6, %v4659_v15 }
 0x1d9   :  { %v2473_v50 = vsel %vm2452_vm2, %v2448_v9, 0.0  ;;  %v2505_v0 = vmul.f32 %v2448_v9, %v4566_v28  ;;  %v2457_v21 = vrot.slane %v2456_v29, 2  ;;  %v2512_v1 = vadd.f32 %v2511_v24, %v2510_v4 }
 0x1da   :  { %v2466_v62 = vadd.f32 %v2465_v11, %v2464_v41  ;;  %v2521_v44 = vrot.slane %v2520_v22, 4  ;;  %v2474_v31 = vadd.f32 %v2473_v50, %v2472_v36  ;;  %v2484_v43 = vadd.f32 %v2483_v37, %v2482_v49 }
 0x1db   :  { %v2529_v23 = vsel %vm2452_vm2, %v2505_v0, 0.0  ;;  %v2458_v46 = vadd.f32 %v2457_v21, %v2456_v29  ;;  %v2513_v47 = vrot.slane %v2512_v1, 2 }
 0x1dc   :  { %v2467_v39 = vrot.slane %v2466_v62, 2  ;;  %v2522_v32 = vadd.f32 %v2521_v44, %v2520_v22  ;;  %v2475_v55 = vrot.slane %v2474_v31, 4  ;;  %v2530_v59 = vadd.f32 %v2529_v23, %v2528_v5 }
 0x1dd   :  { %v2485_v41 = vrot.slane %v2484_v43, 4  ;;  %v2459_v10 = vrot.slane %v2458_v46, 1  ;;  %v2514_v11 = vadd.f32 %v2513_v47, %v2512_v1  ;;  %v2539_v22 = vsel %vm2452_vm2, %v2506_v25, 0.0 }
 0x1de   :  { %v2468_v60 = vadd.f32 %v2467_v39, %v2466_v62  ;;  %v2523_v61 = vrot.slane %v2522_v32, 2  ;;  %v2476_v4 = vadd.f32 %v2475_v55, %v2474_v31  ;;  %v2531_v36 = vrot.slane %v2530_v59, 4 }
 0x1df   :  { %v2486_v50 = vadd.f32 %v2485_v41, %v2484_v43  ;;  %v2460_v44 = vadd.f32 %v2459_v10, %v2458_v46  ;;  %v2515_v49 = vrot.slane %v2514_v11, 1  ;;  %v2540_v37 = vadd.f32 %v2539_v22, %v2538_v57 }
 0x1e0   :  { %v2469_v9 = vrot.slane %v2468_v60, 1  ;;  %v2524_v24 = vadd.f32 %v2523_v61, %v2522_v32  ;;  %v2477_v29 = vrot.slane %v2476_v4, 2  ;;  %v2532_v0 = vadd.f32 %v2531_v36, %v2530_v59 }
 0x1e1   :  { %v2487_v62 = vrot.slane %v2486_v50, 2  ;;  %v2516_v39 = vadd.f32 %v2515_v49, %v2514_v11  ;;  %v2541_v47 = vrot.slane %v2540_v37, 4 }
 0x1e2   :  { %v2470_v21 = vadd.f32 %v2469_v9, %v2468_v60  ;;  %v2525_v5 = vrot.slane %v2524_v24, 1  ;;  %v2478_v23 = vadd.f32 %v2477_v29, %v2476_v4  ;;  %v2533_v6 = vrot.slane %v2532_v0, 2 }
 0x1e3   :  { %v2488_v31 = vadd.f32 %v2487_v62, %v2486_v50  ;;  %v2542_v41 = vadd.f32 %v2541_v47, %v2540_v37 }
 0x1e4   :  { %v2526_v3 = vadd.f32 %v2525_v5, %v2524_v24  ;;  %v2548_v1 = vadd.f32 %v2470_v21, %v2460_v44  ;;  %v2479_v55 = vrot.slane %v2478_v23, 1  ;;  %v2534_v32 = vadd.f32 %v2533_v6, %v2532_v0 }
 0x1e5   :  { %v2489_v61 = vrot.slane %v2488_v31, 1  ;;  %v2543_v59 = vrot.slane %v2542_v41, 2 }
 0x1e6   :  { %v2560_v43 = vadd.f32 %v2526_v3, %v2516_v39  ;;  %v2480_v46 = vadd.f32 %v2479_v55, %v2478_v23  ;;  %v2535_v25 = vrot.slane %v2534_v32, 1 }
 0x1e7   :  { %v2490_v10 = vadd.f32 %v2489_v61, %v2488_v31  ;;  %v2544_v9 = vadd.f32 %v2543_v59, %v2542_v41 }
 0x1e8   :  { %v2536_v60 = vadd.f32 %v2535_v25, %v2534_v32  ;;  %v2549_v36 = vadd.f32 %v2480_v46, %v2470_v21 }
 0x1e9   :  { %v2547_v57 = vadd.f32 %v2490_v10, %v2460_v44  ;;  %v2550_v11 = vadd.f32 %v2490_v10, %v2480_v46  ;;  %v2552_v4 = vadd.f32 %v2548_v1, %v2490_v10  ;;  %v2545_v49 = vrot.slane %v2544_v9, 1 }
 0x1ea   :  { %v2561_v22 = vadd.f32 %v2536_v60, %v2526_v3  ;;  %v2553_v24 = vadd.f32 %v2549_v36, %v2460_v44 }
 0x1eb   :  { %v2551_v50 = vadd.f32 %v2547_v57, %v2480_v46  ;;  %v2554_v29 = vadd.f32 %v2550_v11, %v2470_v21  ;;  %v2556_v5 = vadd.f32 %v2552_v4, %v2480_v46  ;;  %v2546_v6 = vadd.f32 %v2545_v49, %v2544_v9 }
 0x1ec   :  { %v2557_v0 = vadd.f32 %v2553_v24, %v2490_v10  ;;  %v2565_v62 = vadd.f32 %v2561_v22, %v2516_v39 }
 0x1ed   :  { %v2555_v37 = vadd.f32 %v2551_v50, %v2470_v21  ;;  %v2558_v23 = vadd.f32 %v2554_v29, %v2460_v44  ;;  %v2572_v47 = vmul.f32 0.015625, %v2556_v5  ;;  %v2559_v55 = vadd.f32 %v2546_v6, %v2516_v39 }
 0x1ee   :  { %v2573_v31 = vmul.f32 0.015625, %v2557_v0  ;;  %v2562_v32 = vadd.f32 %v2546_v6, %v2536_v60  ;;  %v2564_v61 = vadd.f32 %v2560_v43, %v2546_v6  ;;  %v2569_v41 = vadd.f32 %v2565_v62, %v2546_v6 }
 0x1ef   :  { %v2571_v25 = vmul.f32 0.015625, %v2555_v37  ;;  %v2574_v59 = vmul.f32 0.015625, %v2558_v23  ;;  %v2580_v1 = vmul.f32 %v2572_v47, %v2572_v47  ;;  %v2563_v36 = vadd.f32 %v2559_v55, %v2536_v60 }
 0x1f0   :  { %v2581_v19 = vmul.f32 %v2573_v31, %v2573_v31  ;;  %v2566_v38 = vadd.f32 %v2562_v32, %v2526_v3  ;;  %v2568_v57 = vadd.f32 %v2564_v61, %v2536_v60  ;;  %v2577_v11 = vmul.f32 0.015625, %v2569_v41 }
 0x1f1   :  { %v2579_v46 = vmul.f32 %v2571_v25, %v2571_v25  ;;  %v2582_v10 = vmul.f32 %v2574_v59, %v2574_v59  ;;  %v4676_v4 = vperm.slane %v2571_v25, 0  ;;  %v4678_v21 = vperm.slane %v2572_v47, 0 }
 0x1f2   :  { %v2567_v44 = vadd.f32 %v2563_v36, %v2526_v3  ;;  %v2570_v9 = vadd.f32 %v2566_v38, %v2516_v39  ;;  %v2576_v22 = vmul.f32 0.015625, %v2568_v57  ;;  %v2585_v24 = vsub.f32 %v2577_v11, %v2581_v19 }
 0x1f3   :  { %v4680_v43 = vperm.slane %v2573_v31, 0  ;;  %v4682_v49 = vperm.slane %v2574_v59, 0  ;;  %v2650_v60 = vsub.f32 %v4530_v63, %v4678_v21 }
 0x1f4   :  { %v2575_v29 = vmul.f32 0.015625, %v2567_v44  ;;  %v2578_v5 = vmul.f32 0.015625, %v2570_v9  ;;  %v2584_v0 = vsub.f32 %v2576_v22, %v2580_v1  ;;  %v2589_v62 = vadd.f32 1e-05, %v2585_v24  ;;  %v2631_v9 = vld [vmem:[#allocation6] sm:$0xf] }
 0x1f5   :  { %v2651_v3 = vsub.f32 %v4560_v7, %v4680_v43  ;;  %v2655_v47 = vsub.f32 %v4562_v16, %v4680_v43  ;;  %v2659_v25 = vsub.f32 %v4564_v8, %v4680_v43  ;;  %v2663_v36 = vsub.f32 %v4566_v28, %v4680_v43 }
 0x1f6   :  { %v2583_v6 = vsub.f32 %v2575_v29, %v2579_v46  ;;  %v2586_v37 = vsub.f32 %v2578_v5, %v2582_v10  ;;  %v2588_v23 = vadd.f32 1e-05, %v2584_v0  ;;  %4150 = vrsqrt.f32 %v2589_v62 }
 0x1f7   :  { %vm2617_vm4 = vweird.f32 %v2589_v62  ;;  %v2633_v28 = vperm.slane %v2631_v9, 0  ;;  %v2635_v19 = vperm.slane %v2631_v9, 2  ;;  %v2636_v39 = vperm.slane %v2631_v9, 3 }
 0x1f8   :  { %v2587_v32 = vadd.f32 1e-05, %v2583_v6  ;;  %v2590_v61 = vadd.f32 1e-05, %v2586_v37  ;;  %4152 = vrsqrt.f32 %v2588_v23  ;;  %v2634_v37 = vperm.slane %v2631_v9, 1 }
 0x1f9   :  { %vm2607_vm6 = vweird.f32 %v2588_v23 }
 0x1fa   :  { %4154 = vrsqrt.f32 %v2587_v32  ;;  %vm2597_vm9 = vweird.f32 %v2587_v32  ;;  %vm2627_vm12 = vweird.f32 %v2590_v61 }
 0x1fb   :  { %4156 = vrsqrt.f32 %v2590_v61 }
 0x1fc   :  { %v4151_v57 = vpop.eup %4150 }
 0x1fd   :  { %v2612_v11 = vmul.f32 %v4151_v57, %v2589_v62  ;;  %vm2618_vm3 = vweird.f32 %v4151_v57 }
 0x1fe   :  { %v4153_v46 = vpop.eup %4152  ;;  %vm2619_vm7 = vmor %vm2617_vm4, %vm2618_vm3 }
 0x1ff   :  { %v2602_v10 = vmul.f32 %v4153_v46, %v2588_v23  ;;  %v2613_v44 = vmul.f32 %v4151_v57, %v2612_v11  ;;  %vm2608_vm5 = vweird.f32 %v4153_v46  ;;  %v2664_v23 = vsub.f32 %v4659_v15, %v4682_v49 }
 0x200   :  { %v4155_v22 = vpop.eup %4154  ;;  %vm2609_vm10 = vmor %vm2607_vm6, %vm2608_vm5 }
 0x201   :  { %v4157_v24 = vpop.eup %4156  ;;  %v2592_v29 = vmul.f32 %v4155_v22, %v2587_v32  ;;  %v2603_v5 = vmul.f32 %v4153_v46, %v2602_v10  ;;  %v2614_v0 = vmul.f32 0.5, %v2613_v44  ;;  %v2660_v10 = vsub.f32 %v4631_v51, %v4682_v49 }
 0x202   :  { %v2622_v6 = vmul.f32 %v4157_v24, %v2590_v61  ;;  %vm2598_vm8 = vweird.f32 %v4155_v22  ;;  %vm2628_vm11 = vweird.f32 %v4157_v24 }
 0x203   :  { %v2593_v31 = vmul.f32 %v4155_v22, %v2592_v29  ;;  %v2604_v38 = vmul.f32 0.5, %v2603_v5  ;;  %v2615_v59 = vsub.f32 1.5, %v2614_v0  ;;  %vm2599_vm13 = vmor %vm2597_vm9, %vm2598_vm8 }
 0x204   :  { %v2623_v55 = vmul.f32 %v4157_v24, %v2622_v6  ;;  %vm2629_vm14 = vmor %vm2627_vm12, %vm2628_vm11 }
 0x205   :  { %v2594_v50 = vmul.f32 0.5, %v2593_v31  ;;  %v2605_v1 = vsub.f32 1.5, %v2604_v38  ;;  %v2616_v11 = vmul.f32 %v4151_v57, %v2615_v59  ;;  %v2685_v31 = vld [vmem:[#allocation7] sm:$0xf] }
 0x206   :  { %v2624_v41 = vmul.f32 0.5, %v2623_v55  ;;  %v2689_v32 = vperm.slane %v2685_v31, 2 }
 0x207   :  { %v2595_v44 = vsub.f32 1.5, %v2594_v50  ;;  %v2606_v29 = vmul.f32 %v4153_v46, %v2605_v1  ;;  %v2620_v5 = vsel %vm2619_vm7, %v4151_v57, %v2616_v11  ;;  %v2687_v50 = vperm.slane %v2685_v31, 0 }
 0x208   :  { %v2625_v62 = vsub.f32 1.5, %v2624_v41  ;;  %v2643_v0 = vmul.f32 %v2635_v19, %v2620_v5  ;;  %v2688_v1 = vperm.slane %v2685_v31, 1  ;;  %v2690_v57 = vperm.slane %v2685_v31, 3 }
 0x209   :  { %v2596_v38 = vmul.f32 %v4155_v22, %v2595_v44  ;;  %v2610_v6 = vsel %vm2609_vm10, %v4153_v46, %v2606_v29  ;;  %v4813_v29 = vsub.f32 %v4504_v20, %v4676_v4  ;;  %v4814_v5 = vsub.f32 %v4507_v45, %v4676_v4 }
 0x20a   :  { %v2626_v55 = vmul.f32 %v4157_v24, %v2625_v62  ;;  %v2642_v59 = vmul.f32 %v2634_v37, %v2610_v6  ;;  %v2667_v51 = vperm.slane %v2643_v0, 0 }
 0x20b   :  { %v2600_v9 = vsel %vm2599_vm13, %v4155_v22, %v2596_v38 }
 0x20c   :  { %v2630_v41 = vsel %vm2629_vm14, %v4157_v24, %v2626_v55  ;;  %v2641_v11 = vmul.f32 %v2633_v28, %v2600_v9  ;;  %v2666_v19 = vperm.slane %v2642_v59, 0  ;;  %v2671_v61 = vmul.f32 %v2667_v51, %v2651_v3 }
 0x20d   :  { %v2644_v46 = vmul.f32 %v2636_v39, %v2630_v41  ;;  %v2675_v15 = vmul.f32 %v2667_v51, %v2655_v47  ;;  %v2679_v22 = vmul.f32 %v2667_v51, %v2659_v25  ;;  %v2683_v37 = vmul.f32 %v2667_v51, %v2663_v36 }
 0x20e   :  { %v2665_v44 = vperm.slane %v2641_v11, 0  ;;  %v2670_v24 = vmul.f32 %v2666_v19, %v2650_v60  ;;  %v4808_v28 = vsub.f32 %v4533_v12, %v4678_v21  ;;  %v4809_v3 = vsub.f32 %v4539_v48, %v4678_v21 }
 0x20f   :  { %v2668_v16 = vperm.slane %v2644_v46, 0  ;;  %v4810_v47 = vsub.f32 %v4544_v13, %v4678_v21  ;;  %v2697_v43 = vadd.f32 %v2689_v32, %v2671_v61  ;;  %v2701_v25 = vadd.f32 %v2689_v32, %v2675_v15 }
 0x210   :  { %v2674_v7 = vmul.f32 %v2666_v19, %v4808_v28  ;;  %v2678_v39 = vmul.f32 %v2666_v19, %v4809_v3  ;;  %v4811_v36 = vsub.f32 %v4494_v40, %v4676_v4  ;;  %v4812_v60 = vsub.f32 %v4497_v26, %v4676_v4 }
 0x211   :  { %v2682_v8 = vmul.f32 %v2666_v19, %v4810_v47  ;;  %v2677_v48 = vmul.f32 %v2665_v44, %v4813_v29  ;;  %v2681_v62 = vmul.f32 %v2665_v44, %v4814_v5  ;;  %v4815_v13 = vsub.f32 %v4598_v35, %v4682_v49  ;;  %v4818_v29 = vld [vmem:[#allocation13_spill] sm:$0xff] }
 0x212   :  { %v2669_v63 = vmul.f32 %v2665_v44, %v4811_v36  ;;  %v2673_v12 = vmul.f32 %v2665_v44, %v4812_v60  ;;  %v4816_v40 = vsub.f32 %v4604_v42, %v4682_v49  ;;  %v2680_v31 = vmul.f32 %v2668_v16, %v2660_v10 }
 0x213   :  { %v2672_v21 = vmul.f32 %v2668_v16, %v4815_v13  ;;  %v2684_v38 = vmul.f32 %v2668_v16, %v2664_v23  ;;  %v2696_v6 = vadd.f32 %v2688_v1, %v2670_v24  ;;  %v2700_v59 = vadd.f32 %v2688_v1, %v2674_v7 }
 0x214   :  { %v2676_v0 = vmul.f32 %v2668_v16, %v4816_v40  ;;  %v2695_v26 = vadd.f32 %v2687_v50, %v2669_v63  ;;  %v2699_v55 = vadd.f32 %v2687_v50, %v2673_v12  ;;  %v2703_v9 = vadd.f32 %v2687_v50, %v2677_v48  ;;  %v4817_v12 = vld [vmem:[#allocation12_spill] sm:$0xff]  ;;  %v4819_v48 = vld [vmem:[#allocation14_spill] sm:$0xff] }
 0x215   :  { %v2698_v20 = vadd.f32 %v2690_v57, %v2672_v21  ;;  %v2704_v41 = vadd.f32 %v2688_v1, %v2678_v39  ;;  %v2705_v45 = vadd.f32 %v2689_v32, %v2679_v22  ;;  %v2706_v4 = vadd.f32 %v2690_v57, %v2680_v31 }
 0x216   :  { %v2702_v51 = vadd.f32 %v2690_v57, %v2676_v0  ;;  %v2707_v11 = vadd.f32 %v2687_v50, %v2681_v62  ;;  %v2708_v19 = vadd.f32 %v2688_v1, %v2682_v8  ;;  %v2709_v35 = vadd.f32 %v2689_v32, %v2683_v37 }
 0x217   :  { %v2710_v61 = vadd.f32 %v2690_v57, %v2684_v38  ;;  %v2711_v46 = vmax.f32 %v2695_v26, 0.0  ;;  %v2712_v15 = vmax.f32 %v2696_v6, 0.0  ;;  %v2713_v42 = vmax.f32 %v2697_v43, 0.0 }
 0x218   :  { %v2714_v49 = vmax.f32 %v2698_v20, 0.0  ;;  %v2715_v10 = vmax.f32 %v2699_v55, 0.0  ;;  %v2716_v23 = vmax.f32 %v2700_v59, 0.0  ;;  %v2717_v44 = vmax.f32 %v2701_v25, 0.0 }
 0x219   :  { %v2718_v24 = vmax.f32 %v2702_v51, 0.0  ;;  %v2719_v28 = vmax.f32 %v2703_v9, 0.0  ;;  %v2720_v7 = vmax.f32 %v2704_v41, 0.0  ;;  %v2721_v3 = vmax.f32 %v2705_v45, 0.0 }
 0x21a   :  { %v2722_v16 = vmax.f32 %v2706_v4, 0.0  ;;  %v2723_v47 = vmax.f32 %v2707_v11, 0.0  ;;  %v2724_v39 = vmax.f32 %v2708_v19, 0.0  ;;  %v2725_v22 = vmax.f32 %v2709_v35, 0.0 }
 0x21b   :  { %v2726_v36 = vmax.f32 %v2710_v61, 0.0  ;;  %v2727_v50 = vmul.f32 %v2711_v46, %v4576_v17  ;;  %v2728_v1 = vmul.f32 %v2712_v15, %v4578_v54  ;;  %v2729_v32 = vmul.f32 %v2713_v42, %v4580_v53 }
 0x21c   :  { %v2730_v57 = vmul.f32 %v2714_v49, %v4584_v14  ;;  %v2731_v37 = vmul.f32 %v2715_v10, %v4588_v27  ;;  %v2732_v8 = vmul.f32 %v2716_v23, %v4592_v30  ;;  %v2733_v43 = vmul.f32 %v2717_v44, %v4608_v52 }
 0x21d   :  { %v2734_v25 = vmul.f32 %v2718_v24, %v4612_v58  ;;  %v2735_v63 = vmul.f32 %v2719_v28, %v4616_v2  ;;  %v2736_v60 = vmul.f32 %v2720_v7, %v4622_v18  ;;  %v2737_v17 = vmul.f32 %v2721_v3, %v4633_v33 }
 0x21e   :  { %v2738_v54 = vmul.f32 %v2722_v16, %v4637_v34  ;;  %v2739_v53 = vmul.f32 %v2723_v47, %v4642_v56  ;;  %v2740_v14 = vmul.f32 %v2724_v39, %v4817_v12  ;;  %v2741_v27 = vmul.f32 %v2725_v22, %v4818_v29 }
 0x21f   :  { %v2742_v30 = vmul.f32 %v2726_v36, %v4819_v48  ;;  %v2743_v5 = vpack.c.bf16 %v2728_v1, %v2727_v50  ;;  %v2744_v52 = vpack.c.bf16 %v2730_v57, %v2729_v32  ;;  %v2745_v62 = vpack.c.bf16 %v2732_v8, %v2731_v37 }
 0x220   :  { %v2746_v58 = vpack.c.bf16 %v2734_v25, %v2733_v43  ;;  %v2747_v13 = vpack.c.bf16 %v2736_v60, %v2735_v63  ;;  %v2748_v2 = vpack.c.bf16 %v2738_v54, %v2737_v17  ;;  %v2749_v21 = vpack.c.bf16 %v2740_v14, %v2739_v53 }
 0x221   :  { %v2750_v18 = vpack.c.bf16 %v2742_v30, %v2741_v27  ;;  %2751 = vst [vmem:[%s4801_s6] sm:$0xff] %v2743_v5 }
 0x222   :  { %2752 = vst [vmem:[%s4801_s6 + $0x8] sm:$0xff] %v2744_v52 }
 0x223   :  { %2753 = vst [vmem:[%s4801_s6 + $0x10] sm:$0xff] %v2745_v62 }
 0x224   :  { %2754 = vst [vmem:[%s4801_s6 + $0x18] sm:$0xff] %v2746_v58 }
 0x225   :  { %2755 = vst [vmem:[%s4801_s6 + $0x20] sm:$0xff] %v2747_v13 }
 0x226   :  { %2756 = vst [vmem:[%s4801_s6 + $0x28] sm:$0xff] %v2748_v2 }
 0x227   :  { %2757 = vst [vmem:[%s4801_s6 + $0x30] sm:$0x77] %v2749_v21 }
 0x228   :  { %2758 = vst [vmem:[%s4801_s6 + $0x38] sm:$0x77] %v2750_v18 }
 0x229   :  { %2763 = vsyncpa [#allocation3], 1 }
 0x22a   :  { %2764 = vsyncpa [#allocation5], 1 }
 0x22b   :  { %2765 = vsyncpa [#allocation8], 1 }

// kernel: decoder_forward.7
= control target key start
LH: loop header
LB: loop body
LE: loop exit
PB: predicated region body
PF: predicated region fallthrough
CT: control target
= control target key end

     0   :  { %11 = vsyncpa [#allocation3], 0  ;;  %s2728_s0 = inlined_call_operand.vmem [shape: bf16[90,512], index: 0, kind: input, shape index: {}]   ;;  %s2729_s1 = inlined_call_operand.hbm [shape: bf16[512,256], index: 1, kind: input, shape index: {}]   ;;  %s2730_s2 = inlined_call_operand.vmem [shape: bf16[90,4], index: 2, kind: input, shape index: {}]   ;;  %s2731_s3 = inlined_call_operand.hbm [shape: bf16[4,256], index: 3, kind: input, shape index: {}]   ;;  %s2732_s4 = inlined_call_operand.hbm [shape: f32[1,256], index: 4, kind: input, shape index: {}]   ;;  %s2733_s5 = inlined_call_operand.hbm [shape: f32[1,256], index: 5, kind: input, shape index: {}]   ;;  %s2734_s6 = inlined_call_operand.vmem [shape: bf16[90,256], index: 6, kind: output, shape index: {}]  }
   0x1   :  { %12 = vsyncpa [#allocation5], 0  ;;  %s36_s23 = sshll.u32 %s2731_s3, 4  ;;  %s37_s23 = int_to_ptr.hbm [resolvable:$true] %s36_s23 }
   0x2   :  { %13 = vsyncpa [#allocation8], 0  ;;  %s2027_s24 = smov [#allocation4]   ;;  %s20_s28 = sshll.u32 %s2729_s1, 4  ;;  %s21_s28 = int_to_ptr.hbm [resolvable:$true] %s20_s28 }
   0x3   :  { %s38_s25 = sshll.u32 %s2027_s24, 4  ;;  %s2028_s29 = smov [#allocation2]   ;;  %s39_s25 = int_to_ptr.vmem [resolvable:$true] %s38_s25 }
   0x4   :  { %41 = dma.hbm_to_vmem [thread:$0]  %s37_s23, 64, %s39_s25, [#allocation5]  }
   0x5   :  { %s22_s30 = sshll.u32 %s2028_s29, 4  ;;  %s2029_s7 = smov 128   ;;  %s23_s30 = int_to_ptr.vmem [resolvable:$true] %s22_s30 }
   0x6   :  { %s2030_s8 = smov 8   ;;  %s47_s3 = sshll.u32 %s2732_s4, 4  ;;  %s48_s3 = int_to_ptr.hbm [resolvable:$true] %s47_s3 }
   0x7   :  { %28 = dma.hbm_to_vmem [thread:$0]  %s21_s28, 8192, %s23_s30, [#allocation3], %s2029_s7, %s2029_s7, %s2030_s8  }
   0x8   :  { %s2031_s11 = smov [#allocation6]   ;;  %s58_s1 = sshll.u32 %s2733_s5, 4  ;;  %s59_s1 = int_to_ptr.hbm [resolvable:$true] %s58_s1 }
   0x9   :  { %s49_s12 = sshll.u32 %s2031_s11, 4  ;;  %s2032_s15 = smov [#allocation7]   ;;  %s50_s12 = int_to_ptr.vmem [resolvable:$true] %s49_s12 }
   0xa   :  { %52 = dma.hbm_to_vmem [thread:$0]  %s48_s3, 32, %s50_s12, [#allocation5]  }
   0xb   :  { %s60_s16 = sshll.u32 %s2032_s15, 4  ;;  %s61_s16 = int_to_ptr.vmem [resolvable:$true] %s60_s16 }
   0xc   :  { %63 = dma.hbm_to_vmem [thread:$0]  %s59_s1, 32, %s61_s16, [#allocation8]  }
   0xd   :  { %2021 = dma.done.wait [#allocation3], 8192  }
   0xe   :  { %2022 = vsyncadd [#allocation3], 4294959104 }
   0xf   :  { %2023 = dma.done.wait [#allocation5], 96  }
  0x10   :  { %2024 = vsyncadd [#allocation5], 4294967200 }
  0x11   :  { %2025 = dma.done.wait [#allocation8], 32  }
  0x12   :  { %2026 = vsyncadd [#allocation8], 4294967264  ;;  %v1570_v0 = vld [vmem:[#allocation2 + $0x70] sm:$0xf]  ;;  %v1843_v1 = vld [vmem:[#allocation2 + $0x74] sm:$0xf0] }
  0x13   :  { %v1634_v2 = vld [vmem:[#allocation2 + $0xf0] sm:$0xf]  ;;  %v1571_v3 = vor.u32 %v1843_v1, %v1570_v0  ;;  %v1859_v4 = vld [vmem:[#allocation2 + $0xf4] sm:$0xf0]  ;;  %v1562_v5 = vld [vmem:[#allocation2 + $0x60] sm:$0xf] }
  0x14   :  { %v1841_v6 = vld [vmem:[#allocation2 + $0x64] sm:$0xf0]  ;;  %v1635_v7 = vor.u32 %v1859_v4, %v1634_v2  ;;  %v1626_v8 = vld [vmem:[#allocation2 + $0xe0] sm:$0xf]  ;;  %v1554_v12 = vld [vmem:[#allocation2 + $0x50] sm:$0xf] }
  0x15   :  { %v1857_v9 = vld [vmem:[#allocation2 + $0xe4] sm:$0xf0]  ;;  %609 = vmatpush.bf16.msra.mxu0 %v1571_v3  ;;  %1898 = vmatpush.bf16.msra.mxu2 %v1571_v3  ;;  %v1563_v10 = vor.u32 %v1841_v6, %v1562_v5  ;;  %v1839_v13 = vld [vmem:[#allocation2 + $0x54] sm:$0xf0]  ;;  %v1618_v14 = vld [vmem:[#allocation2 + $0xd0] sm:$0xf] }
  0x16   :  { %648 = vmatpush.bf16.msra.mxu1 %v1635_v7  ;;  %1906 = vmatpush.bf16.msra.mxu3 %v1635_v7  ;;  %v1627_v11 = vor.u32 %v1857_v9, %v1626_v8  ;;  %v1855_v15 = vld [vmem:[#allocation2 + $0xd4] sm:$0xf0]  ;;  %v1555_v16 = vor.u32 %v1839_v13, %v1554_v12  ;;  %v1546_v18 = vld [vmem:[#allocation2 + $0x40] sm:$0xf]  ;;  %v1837_v19 = vld [vmem:[#allocation2 + $0x44] sm:$0xf0] }
  0x17   :  { %v1619_v17 = vor.u32 %v1855_v15, %v1618_v14  ;;  %v1610_v20 = vld [vmem:[#allocation2 + $0xc0] sm:$0xf]  ;;  %v1853_v21 = vld [vmem:[#allocation2 + $0xc4] sm:$0xf0]  ;;  %v1547_v22 = vor.u32 %v1837_v19, %v1546_v18  ;;  %v1538_v24 = vld [vmem:[#allocation2 + $0x30] sm:$0xf] }
  0x18   :  { %v1611_v23 = vor.u32 %v1853_v21, %v1610_v20  ;;  %v1835_v25 = vld [vmem:[#allocation2 + $0x34] sm:$0xf0]  ;;  %v1602_v26 = vld [vmem:[#allocation2 + $0xb0] sm:$0xf]  ;;  %v1530_v30 = vld [vmem:[#allocation2 + $0x20] sm:$0xf] }
  0x19   :  { %610 = vmatpush.bf16.msra.mxu0 %v1563_v10  ;;  %1899 = vmatpush.bf16.msra.mxu2 %v1563_v10  ;;  %v1851_v27 = vld [vmem:[#allocation2 + $0xb4] sm:$0xf0]  ;;  %v1539_v28 = vor.u32 %v1835_v25, %v1538_v24  ;;  %v1833_v31 = vld [vmem:[#allocation2 + $0x24] sm:$0xf0]  ;;  %v1594_v32 = vld [vmem:[#allocation2 + $0xa0] sm:$0xf] }
  0x1a   :  { %649 = vmatpush.bf16.msra.mxu1 %v1627_v11  ;;  %1907 = vmatpush.bf16.msra.mxu3 %v1627_v11  ;;  %v1603_v29 = vor.u32 %v1851_v27, %v1602_v26  ;;  %v1849_v33 = vld [vmem:[#allocation2 + $0xa4] sm:$0xf0]  ;;  %v1531_v34 = vor.u32 %v1833_v31, %v1530_v30  ;;  %v1522_v36 = vld [vmem:[#allocation2 + $0x10] sm:$0xf]  ;;  %v1831_v37 = vld [vmem:[#allocation2 + $0x14] sm:$0xf0] }
  0x1b   :  { %v1595_v35 = vor.u32 %v1849_v33, %v1594_v32  ;;  %v1586_v38 = vld [vmem:[#allocation2 + $0x90] sm:$0xf]  ;;  %v1847_v39 = vld [vmem:[#allocation2 + $0x94] sm:$0xf0]  ;;  %v1523_v40 = vor.u32 %v1831_v37, %v1522_v36  ;;  %v1514_v41 = vld [vmem:[#allocation2] sm:$0xf] }
  0x1c   :  { %v1587_v42 = vor.u32 %v1847_v39, %v1586_v38  ;;  %v1829_v43 = vld [vmem:[#allocation2 + $0x4] sm:$0xf0]  ;;  %v1578_v44 = vld [vmem:[#allocation2 + $0x80] sm:$0xf]  ;;  %v1418_v46 = vld [vmem:[%s2728_s0] sm:$0xf] }
  0x1d   :  { %611 = vmatpush.bf16.msra.mxu0 %v1555_v16  ;;  %1900 = vmatpush.bf16.msra.mxu2 %v1555_v16  ;;  %v1845_v45 = vld [vmem:[#allocation2 + $0x84] sm:$0xf0]  ;;  %v1466_v48 = vld [vmem:[%s2728_s0 + $0x60] sm:$0xf]  ;;  %v1698_v50 = vld [vmem:[#allocation2 + $0x170] sm:$0xf]  ;;  %v1515_v54 = vor.u32 %v1829_v43, %v1514_v41 }
  0x1e   :  { %650 = vmatpush.bf16.msra.mxu1 %v1619_v17  ;;  %1908 = vmatpush.bf16.msra.mxu3 %v1619_v17  ;;  %v1806_v47 = vld [vmem:[%s2728_s0 + $0xc] sm:$0xf0]  ;;  %v1875_v51 = vld [vmem:[#allocation2 + $0x174] sm:$0xf0]  ;;  %v1762_v52 = vld [vmem:[#allocation2 + $0x1f0] sm:$0xf]  ;;  %v1579_v58 = vor.u32 %v1845_v45, %v1578_v44 }
  0x1f   :  { %v1818_v49 = vld [vmem:[%s2728_s0 + $0x6c] sm:$0xf0]  ;;  %v1891_v53 = vld [vmem:[#allocation2 + $0x1f4] sm:$0xf0]  ;;  %v1804_v55 = vld [vmem:[%s2728_s0 + $0x4] sm:$0xf]  ;;  %v1699_v62 = vor.u32 %v1875_v51, %v1698_v50  ;;  %v2105_v3 = vor.u32 %v1806_v47, %v1418_v46 }
  0x20   :  { %v1420_v56 = vld [vmem:[%s2728_s0 + $0x10] sm:$0xf0]  ;;  %v1816_v57 = vld [vmem:[%s2728_s0 + $0x64] sm:$0xf]  ;;  %v1842_v60 = vld [vmem:[#allocation2 + $0x74] sm:$0xf]  ;;  %v1763_v63 = vor.u32 %v1891_v53, %v1762_v52  ;;  %v2107_v4 = vor.u32 %v1818_v49, %v1466_v48 }
  0x21   :  { %612 = vmatpush.bf16.msra.mxu0 %v1547_v22  ;;  %1901 = vmatpush.bf16.msra.mxu2 %v1547_v22  ;;  %v1468_v59 = vld [vmem:[%s2728_s0 + $0x70] sm:$0xf0]  ;;  %v1572_v61 = vld [vmem:[#allocation2 + $0x78] sm:$0xf0]  ;;  %v1690_v0 = vld [vmem:[#allocation2 + $0x160] sm:$0xf]  ;;  %v2109_v8 = vor.u32 %v1804_v55, %v1420_v56 }
  0x22   :  { %651 = vmatpush.bf16.msra.mxu1 %v1611_v23  ;;  %1909 = vmatpush.bf16.msra.mxu3 %v1611_v23  ;;  %v1858_v1 = vld [vmem:[#allocation2 + $0xf4] sm:$0xf]  ;;  %v1636_v2 = vld [vmem:[#allocation2 + $0xf8] sm:$0xf0]  ;;  %v1873_v5 = vld [vmem:[#allocation2 + $0x164] sm:$0xf0]  ;;  %v2111_v9 = vor.u32 %v1816_v57, %v1468_v59  ;;  %v1575_v10 = vor.u32 %v1842_v60, %v1572_v61 }
  0x23   :  { %v1754_v6 = vld [vmem:[#allocation2 + $0x1e0] sm:$0xf]  ;;  %v1889_v7 = vld [vmem:[#allocation2 + $0x1e4] sm:$0xf0]  ;;  %v1840_v11 = vld [vmem:[#allocation2 + $0x64] sm:$0xf]  ;;  %v1639_v13 = vor.u32 %v1858_v1, %v1636_v2  ;;  %v1691_v14 = vor.u32 %v1873_v5, %v1690_v0 }
  0x24   :  { %v1564_v12 = vld [vmem:[#allocation2 + $0x68] sm:$0xf0]  ;;  %v1755_v15 = vor.u32 %v1889_v7, %v1754_v6  ;;  %v1682_v16 = vld [vmem:[#allocation2 + $0x150] sm:$0xf]  ;;  %v1856_v17 = vld [vmem:[#allocation2 + $0xe4] sm:$0xf] }
  0x25   :  { %613 = vmatpush.bf16.msra.mxu0 %v1539_v28  ;;  %1902 = vmatpush.bf16.msra.mxu2 %v1539_v28  ;;  %v1628_v18 = vld [vmem:[#allocation2 + $0xe8] sm:$0xf0]  ;;  %v1871_v19 = vld [vmem:[#allocation2 + $0x154] sm:$0xf0]  ;;  %v1746_v20 = vld [vmem:[#allocation2 + $0x1d0] sm:$0xf]  ;;  %v1567_v22 = vor.u32 %v1840_v11, %v1564_v12 }
  0x26   :  { %652 = vmatpush.bf16.msra.mxu1 %v1603_v29  ;;  %1910 = vmatpush.bf16.msra.mxu3 %v1603_v29  ;;  %v1887_v21 = vld [vmem:[#allocation2 + $0x1d4] sm:$0xf0]  ;;  %v1838_v23 = vld [vmem:[#allocation2 + $0x54] sm:$0xf]  ;;  %v1556_v24 = vld [vmem:[#allocation2 + $0x58] sm:$0xf0]  ;;  %v1631_v25 = vor.u32 %v1856_v17, %v1628_v18  ;;  %v1683_v26 = vor.u32 %v1871_v19, %v1682_v16 }
  0x27   :  { %v1747_v27 = vor.u32 %v1887_v21, %v1746_v20  ;;  %v1674_v28 = vld [vmem:[#allocation2 + $0x140] sm:$0xf]  ;;  %v1854_v29 = vld [vmem:[#allocation2 + $0xd4] sm:$0xf]  ;;  %v1620_v30 = vld [vmem:[#allocation2 + $0xd8] sm:$0xf0] }
  0x28   :  { %v1869_v31 = vld [vmem:[#allocation2 + $0x144] sm:$0xf0]  ;;  %v1738_v32 = vld [vmem:[#allocation2 + $0x1c0] sm:$0xf]  ;;  %v1548_v36 = vld [vmem:[#allocation2 + $0x48] sm:$0xf0]  ;;  %v1623_v37 = vor.u32 %v1854_v29, %v1620_v30 }
  0x29   :  { %614 = vmatpush.bf16.msra.mxu0 %v1531_v34  ;;  %1903 = vmatpush.bf16.msra.mxu2 %v1531_v34  ;;  %v1885_v33 = vld [vmem:[#allocation2 + $0x1c4] sm:$0xf0]  ;;  %v1559_v34 = vor.u32 %v1838_v23, %v1556_v24  ;;  %v1434_v38 = vld [vmem:[%s2728_s0 + $0x20] sm:$0xf]  ;;  %v1666_v44 = vld [vmem:[#allocation2 + $0x130] sm:$0xf] }
  0x2a   :  { %653 = vmatpush.bf16.msra.mxu1 %v1595_v35  ;;  %1911 = vmatpush.bf16.msra.mxu3 %v1595_v35  ;;  %v1836_v35 = vld [vmem:[#allocation2 + $0x44] sm:$0xf]  ;;  %v1810_v39 = vld [vmem:[%s2728_s0 + $0x2c] sm:$0xf0]  ;;  %v1739_v43 = vor.u32 %v1885_v33, %v1738_v32  ;;  %v1612_v46 = vld [vmem:[#allocation2 + $0xc8] sm:$0xf0] }
  0x2b   :  { %v1822_v41 = vld [vmem:[%s2728_s0 + $0x8c] sm:$0xf0]  ;;  %v1852_v45 = vld [vmem:[#allocation2 + $0xc4] sm:$0xf]  ;;  %v1867_v47 = vld [vmem:[#allocation2 + $0x134] sm:$0xf0] }
  0x2c   :  { %v1730_v48 = vld [vmem:[#allocation2 + $0x1b0] sm:$0xf]  ;;  %v1883_v49 = vld [vmem:[#allocation2 + $0x1b4] sm:$0xf0]  ;;  %v1808_v50 = vld [vmem:[%s2728_s0 + $0x24] sm:$0xf]  ;;  %v1615_v57 = vor.u32 %v1852_v45, %v1612_v46 }
  0x2d   :  { %615 = vmatpush.bf16.msra.mxu0 %v1523_v40  ;;  %1904 = vmatpush.bf16.msra.mxu2 %v1523_v40  ;;  %v1482_v40 = vld [vmem:[%s2728_s0 + $0x80] sm:$0xf]  ;;  %v1436_v51 = vld [vmem:[%s2728_s0 + $0x30] sm:$0xf0]  ;;  %v1820_v52 = vld [vmem:[%s2728_s0 + $0x84] sm:$0xf]  ;;  %v1731_v59 = vor.u32 %v1883_v49, %v1730_v48 }
  0x2e   :  { %654 = vmatpush.bf16.msra.mxu1 %v1587_v42  ;;  %1912 = vmatpush.bf16.msra.mxu3 %v1587_v42  ;;  %v1675_v42 = vor.u32 %v1869_v31, %v1674_v28  ;;  %v1484_v53 = vld [vmem:[%s2728_s0 + $0x90] sm:$0xf0]  ;;  %v1834_v55 = vld [vmem:[#allocation2 + $0x34] sm:$0xf]  ;;  %v1540_v56 = vld [vmem:[#allocation2 + $0x38] sm:$0xf0]  ;;  %v2143_v0 = vor.u32 %v1822_v41, %v1482_v40  ;;  %v2145_v6 = vor.u32 %v1808_v50, %v1436_v51 }
  0x2f   :  { %v1658_v60 = vld [vmem:[#allocation2 + $0x120] sm:$0xf]  ;;  %v1850_v61 = vld [vmem:[#allocation2 + $0xb4] sm:$0xf]  ;;  %v1865_v1 = vld [vmem:[#allocation2 + $0x124] sm:$0xf0]  ;;  %v2147_v7 = vor.u32 %v1820_v52, %v1484_v53 }
  0x30   :  { %v1722_v2 = vld [vmem:[#allocation2 + $0x1a0] sm:$0xf]  ;;  %v1881_v5 = vld [vmem:[#allocation2 + $0x1a4] sm:$0xf0]  ;;  %v1832_v11 = vld [vmem:[#allocation2 + $0x24] sm:$0xf] }
  0x31   :  { %616 = vmatpush.bf16.msra.mxu0 %v1515_v54  ;;  %1905 = vmatpush.bf16.msra.mxu2 %v1515_v54  ;;  %v1551_v54 = vor.u32 %v1836_v35, %v1548_v36  ;;  %v1532_v12 = vld [vmem:[#allocation2 + $0x28] sm:$0xf0]  ;;  %v1650_v16 = vld [vmem:[#allocation2 + $0x110] sm:$0xf]  ;;  %v1848_v17 = vld [vmem:[#allocation2 + $0xa4] sm:$0xf] }
  0x32   :  { %655 = vmatpush.bf16.msra.mxu1 %v1579_v58  ;;  %1913 = vmatpush.bf16.msra.mxu3 %v1579_v58  ;;  %v1667_v58 = vor.u32 %v1867_v47, %v1666_v44  ;;  %v1596_v18 = vld [vmem:[#allocation2 + $0xa8] sm:$0xf0]  ;;  %v1863_v19 = vld [vmem:[#allocation2 + $0x114] sm:$0xf0]  ;;  %v1714_v20 = vld [vmem:[#allocation2 + $0x190] sm:$0xf]  ;;  %v1535_v24 = vor.u32 %v1832_v11, %v1532_v12 }
  0x33   :  { %v1879_v21 = vld [vmem:[#allocation2 + $0x194] sm:$0xf0]  ;;  %v1524_v23 = vld [vmem:[#allocation2 + $0x18] sm:$0xf0]  ;;  %v933_v28 = vld [vmem:[#allocation4] sm:$0xf]  ;;  %v1651_v29 = vor.u32 %v1863_v19, %v1650_v16 }
  0x34   :  { %617 = vmatmul.bf16.vlgmr.msra.gmra.mxu0 %v2105_v3  ;;  %632 = vmatmul.bf16.vlgmr.msra.gmra.mxu2 %v2107_v4  ;;  %v1715_v30 = vor.u32 %v1879_v21, %v1714_v20  ;;  %v1642_v31 = vld [vmem:[#allocation2 + $0x100] sm:$0xf]  ;;  %v1861_v32 = vld [vmem:[#allocation2 + $0x104] sm:$0xf0]  ;;  %965 = vst [vmem:[#allocation1] ss:$4 sm:$0xff] %v933_v28 }
  0x35   :  { %687 = vmatpush.bf16.msrb.mxu2 %v1699_v62  ;;  %656 = vmatmul.bf16.vlgmr.msra.gmra.mxu1 %v2109_v8  ;;  %v1604_v62 = vld [vmem:[#allocation2 + $0xb8] sm:$0xf0]  ;;  %v1706_v33 = vld [vmem:[#allocation2 + $0x180] sm:$0xf]  ;;  %v1874_v35 = vld [vmem:[#allocation2 + $0x174] sm:$0xf]  ;;  %v1643_v46 = vor.u32 %v1861_v32, %v1642_v31 }
  0x36   :  { %726 = vmatpush.bf16.msrb.mxu3 %v1763_v63  ;;  %765 = vmatpush.bf16.msrb.mxu0 %v1575_v10  ;;  %v2141_v63 = vor.u32 %v1810_v39, %v1434_v38  ;;  %v1543_v10 = vor.u32 %v1834_v55, %v1540_v56  ;;  %v1700_v36 = vld [vmem:[#allocation2 + $0x178] sm:$0xf0]  ;;  %v1828_v41 = vld [vmem:[#allocation2 + $0x4] sm:$0xf]  ;;  %v1498_v44 = vld [vmem:[%s2728_s0 + $0xa0] sm:$0xf] }
  0x37   :  { %671 = vmatmul.bf16.vlgmr.msra.gmra.mxu3 %v2111_v9  ;;  %804 = vmatpush.bf16.msrb.mxu1 %v1639_v13  ;;  %v1607_v13 = vor.u32 %v1850_v61, %v1604_v62  ;;  %v1764_v38 = vld [vmem:[#allocation2 + $0x1f8] sm:$0xf0]  ;;  %v1826_v45 = vld [vmem:[%s2728_s0 + $0xac] sm:$0x10]  ;;  %v1516_v48 = vld [vmem:[#allocation2 + $0x8] sm:$0xf0] }
  0x38   :  { %v1844_v49 = vld [vmem:[#allocation2 + $0x84] sm:$0xf]  ;;  %v1580_v50 = vld [vmem:[#allocation2 + $0x88] sm:$0xf0]  ;;  %v1812_v51 = vld [vmem:[%s2728_s0 + $0x44] sm:$0xf] }
  0x39   :  { %688 = vmatpush.bf16.msrb.mxu2 %v1691_v14  ;;  %v1659_v14 = vor.u32 %v1865_v1, %v1658_v60  ;;  %v1452_v52 = vld [vmem:[%s2728_s0 + $0x50] sm:$0xf0]  ;;  %v1824_v53 = vld [vmem:[%s2728_s0 + $0xa4] sm:$0xf]  ;;  %vm987_vm0 = vcmask 1041408   ;;  %vm968_vm1 = vcmask 31744  }
  0x3a   :  { %727 = vmatpush.bf16.msrb.mxu3 %v1755_v15  ;;  %766 = vmatpush.bf16.msrb.mxu0 %v1567_v22  ;;  %v1723_v15 = vor.u32 %v1881_v5, %v1722_v2  ;;  %v1830_v22 = vld [vmem:[#allocation2 + $0x14] sm:$0xf]  ;;  %v1500_v56 = vld [vmem:[%s2728_s0 + $0xb0] sm:$0x10]  ;;  %v1888_v1 = vld [vmem:[#allocation2 + $0x1e4] sm:$0xf] }
  0x3b   :  { %805 = vmatpush.bf16.msrb.mxu1 %v1631_v25  ;;  %v1599_v25 = vor.u32 %v1848_v17, %v1596_v18  ;;  %v1527_v39 = vor.u32 %v1830_v22, %v1524_v23  ;;  %v966_v60 = vld.sshfl [vmem:[#allocation1] sm:$0xff pattern:$0x73625140]  ;;  %v967_v61 = vld.sshfl [vmem:[#allocation1 + $0x8] sm:$0xff pattern:$0x73625140] }
  0x3c   :  { %v1692_v62 = vld [vmem:[#allocation2 + $0x168] sm:$0xf0]  ;;  %v988_v11 = vsel %vm987_vm0, %v966_v60, 0  ;;  %v990_v12 = vsel %vm987_vm0, %v967_v61, 0  ;;  %v1870_v17 = vld [vmem:[#allocation2 + $0x154] sm:$0xf] }
  0x3d   :  { %689 = vmatpush.bf16.msrb.mxu2 %v1683_v26  ;;  %v1846_v26 = vld [vmem:[#allocation2 + $0x94] sm:$0xf]  ;;  %v1756_v2 = vld [vmem:[#allocation2 + $0x1e8] sm:$0xf0]  ;;  %v1684_v18 = vld [vmem:[#allocation2 + $0x158] sm:$0xf0] }
  0x3e   :  { %728 = vmatpush.bf16.msrb.mxu3 %v1747_v27  ;;  %767 = vmatpush.bf16.msrb.mxu0 %v1559_v34  ;;  %v1588_v27 = vld [vmem:[#allocation2 + $0x98] sm:$0xf0]  ;;  %v1877_v34 = vld [vmem:[#allocation2 + $0x184] sm:$0xf0]  ;;  %v1759_v16 = vor.u32 %v1888_v1, %v1756_v2  ;;  %v1886_v19 = vld [vmem:[#allocation2 + $0x1d4] sm:$0xf]  ;;  %v1687_v20 = vor.u32 %v1870_v17, %v1684_v18 }
  0x3f   :  { %806 = vmatpush.bf16.msrb.mxu1 %v1623_v37  ;;  %v1890_v37 = vld [vmem:[#allocation2 + $0x1f4] sm:$0xf]  ;;  %v1591_v40 = vor.u32 %v1846_v26, %v1588_v27  ;;  %v1707_v47 = vor.u32 %v1877_v34, %v1706_v33  ;;  %v1748_v21 = vld [vmem:[#allocation2 + $0x1d8] sm:$0xf0]  ;;  %v1426_v23 = vld [vmem:[%s2728_s0 + $0x8] sm:$0xf] }
  0x40   :  { %v1767_v55 = vor.u32 %v1890_v37, %v1764_v38  ;;  %v1751_v22 = vor.u32 %v1886_v19, %v1748_v21  ;;  %v1428_v26 = vld [vmem:[%s2728_s0 + $0x18] sm:$0xf0]  ;;  %v1884_v31 = vld [vmem:[#allocation2 + $0x1c4] sm:$0xf]  ;;  %v1740_v33 = vld [vmem:[#allocation2 + $0x1c8] sm:$0xf0] }
  0x41   :  { %690 = vmatpush.bf16.msrb.mxu2 %v1675_v42  ;;  %v1450_v42 = vld [vmem:[%s2728_s0 + $0x40] sm:$0xf]  ;;  %v1743_v34 = vor.u32 %v1884_v31, %v1740_v33  ;;  %v1474_v61 = vld [vmem:[%s2728_s0 + $0x68] sm:$0xf]  ;;  %v1817_v1 = vld [vmem:[%s2728_s0 + $0x6c] sm:$0xf] }
  0x42   :  { %729 = vmatpush.bf16.msrb.mxu3 %v1739_v43  ;;  %768 = vmatpush.bf16.msrb.mxu0 %v1551_v54  ;;  %v1814_v43 = vld [vmem:[%s2728_s0 + $0x4c] sm:$0xf0]  ;;  %v1703_v54 = vor.u32 %v1874_v35, %v1700_v36  ;;  %v1442_v35 = vld [vmem:[%s2728_s0 + $0x28] sm:$0xf]  ;;  %v1444_v36 = vld [vmem:[%s2728_s0 + $0x38] sm:$0xf0] }
  0x43   :  { %807 = vmatpush.bf16.msrb.mxu1 %v1615_v57  ;;  %v1872_v57 = vld [vmem:[#allocation2 + $0x164] sm:$0xf]  ;;  %v2177_v5 = vor.u32 %v1814_v43, %v1450_v42  ;;  %v1732_v43 = vld [vmem:[#allocation2 + $0x1b8] sm:$0xf0]  ;;  %v1476_v2 = vld [vmem:[%s2728_s0 + $0x78] sm:$0xf0] }
  0x44   :  { %622 = vmatmul.bf16.gmra.mxu0 %v2141_v63  ;;  %637 = vmatmul.bf16.gmra.mxu2 %v2143_v0  ;;  %v1708_v17 = vld [vmem:[#allocation2 + $0x188] sm:$0xf0]  ;;  %v1490_v19 = vld [vmem:[%s2728_s0 + $0x88] sm:$0xf] }
  0x45   :  { %691 = vmatpush.bf16.msrb.mxu2 %v1667_v58  ;;  %661 = vmatmul.bf16.gmra.mxu1 %v2145_v6  ;;  %v1519_v58 = vor.u32 %v1828_v41, %v1516_v48  ;;  %v1882_v41 = vld [vmem:[#allocation2 + $0x1b4] sm:$0xf]  ;;  %v1724_v48 = vld [vmem:[#allocation2 + $0x1a8] sm:$0xf0] }
  0x46   :  { %730 = vmatpush.bf16.msrb.mxu3 %v1731_v59  ;;  %769 = vmatpush.bf16.msrb.mxu0 %v1543_v10  ;;  %v1583_v59 = vor.u32 %v1844_v49, %v1580_v50  ;;  %v2179_v10 = vor.u32 %v1826_v45, %v1498_v44  ;;  %v1864_v44 = vld [vmem:[#allocation2 + $0x124] sm:$0xf]  ;;  %v1660_v45 = vld [vmem:[#allocation2 + $0x128] sm:$0xf0] }
  0x47   :  { %676 = vmatmul.bf16.gmra.mxu3 %v2147_v7  ;;  %808 = vmatpush.bf16.msrb.mxu1 %v1607_v13  ;;  %v2183_v13 = vor.u32 %v1812_v51, %v1452_v52  ;;  %v1663_v49 = vor.u32 %v1864_v44, %v1660_v45  ;;  %v1813_v51 = vld [vmem:[%s2728_s0 + $0x4c] sm:$0xf]  ;;  %v1460_v52 = vld [vmem:[%s2728_s0 + $0x58] sm:$0xf0] }
  0x49   :  { %692 = vmatpush.bf16.msrb.mxu2 %v1659_v14  ;;  %v2185_v14 = vor.u32 %v1824_v53, %v1500_v56  ;;  %v1652_v56 = vld [vmem:[#allocation2 + $0x118] sm:$0xf0] }
  0x4a   :  { %731 = vmatpush.bf16.msrb.mxu3 %v1723_v15  ;;  %770 = vmatpush.bf16.msrb.mxu0 %v1535_v24  ;;  %v1695_v15 = vor.u32 %v1872_v57, %v1692_v62  ;;  %v1807_v24 = vld [vmem:[%s2728_s0 + $0x14] sm:$0xf0]  ;;  %v1878_v57 = vld [vmem:[#allocation2 + $0x194] sm:$0xf] }
  0x4b   :  { %809 = vmatpush.bf16.msrb.mxu1 %v1599_v25  ;;  %v1805_v25 = vld [vmem:[%s2728_s0 + $0xc] sm:$0xf]  ;;  %v2203_v27 = vor.u32 %v1807_v24, %v1426_v23  ;;  %v1819_v62 = vld [vmem:[%s2728_s0 + $0x74] sm:$0xf0]  ;;  %v1506_v23 = vld [vmem:[%s2728_s0 + $0xa8] sm:$0xf] }
  0x4c   :  { %v2205_v28 = vor.u32 %v1805_v25, %v1428_v26  ;;  %v1827_v24 = vld [vmem:[%s2728_s0 + $0xb4] sm:$0x10]  ;;  %v1825_v25 = vld [vmem:[%s2728_s0 + $0xac] sm:$0xf] }
  0x4d   :  { %693 = vmatpush.bf16.msrb.mxu2 %v1651_v29  ;;  %v1868_v29 = vld [vmem:[#allocation2 + $0x144] sm:$0xf]  ;;  %v2303_v26 = vor.u32 %v1827_v24, %v1506_v23 }
  0x4e   :  { %732 = vmatpush.bf16.msrb.mxu3 %v1715_v30  ;;  %771 = vmatpush.bf16.msrb.mxu0 %v1527_v39  ;;  %v1676_v30 = vld [vmem:[#allocation2 + $0x148] sm:$0xf0]  ;;  %v1866_v39 = vld [vmem:[#allocation2 + $0x134] sm:$0xf] }
  0x4f   :  { %810 = vmatpush.bf16.msrb.mxu1 %v1591_v40  ;;  %v1679_v32 = vor.u32 %v1868_v29, %v1676_v30  ;;  %v1668_v40 = vld [vmem:[#allocation2 + $0x138] sm:$0xf0] }
  0x50   :  { %v1671_v42 = vor.u32 %v1866_v39, %v1668_v40  ;;  %v1892_v40 = vld [vmem:[%s2730_s2] sm:$0xff] }
  0x51   :  { %694 = vmatpush.bf16.msrb.mxu2 %v1643_v46  ;;  %v1735_v46 = vor.u32 %v1882_v41, %v1732_v43 }
  0x52   :  { %733 = vmatpush.bf16.msrb.mxu3 %v1707_v47  ;;  %772 = vmatpush.bf16.msrb.mxu0 %v1519_v58  ;;  %v1880_v47 = vld [vmem:[#allocation2 + $0x1a4] sm:$0xf] }
  0x53   :  { %811 = vmatpush.bf16.msrb.mxu1 %v1583_v59  ;;  %v1727_v50 = vor.u32 %v1880_v47, %v1724_v48  ;;  %v1716_v59 = vld [vmem:[#allocation2 + $0x198] sm:$0xf0] }
  0x54   :  { %627 = vmatmul.bf16.gmra.mxu0 %v2177_v5  ;;  %642 = vmatmul.bf16.gmra.mxu2 %v2179_v10  ;;  %v1719_v60 = vor.u32 %v1878_v57, %v1716_v59 }
  0x55   :  { %843 = vmatpush.bf16.msra.mxu2 %v1703_v54  ;;  %666 = vmatmul.bf16.gmra.mxu1 %v2183_v13  ;;  %v2245_v54 = vor.u32 %v1813_v51, %v1460_v52 }
  0x56   :  { %882 = vmatpush.bf16.msra.mxu3 %v1767_v55  ;;  %999 = vmatpush.bf16.msra.mxu0 %v988_v11  ;;  %v1862_v55 = vld [vmem:[#allocation2 + $0x114] sm:$0xf]  ;;  %v2265_v11 = vor.u32 %v1817_v1, %v1476_v2 }
  0x57   :  { %1038 = vmatpush.bf16.msra.mxu1 %v990_v12  ;;  %681 = vmatmul.bf16.gmra.mxu3 %v2185_v14  ;;  %v1655_v58 = vor.u32 %v1862_v55, %v1652_v56  ;;  %v1860_v12 = vld [vmem:[#allocation2 + $0x104] sm:$0xf] }
  0x59   :  { %844 = vmatpush.bf16.msra.mxu2 %v1695_v15 }
  0x5a   :  { %883 = vmatpush.bf16.msra.mxu3 %v1759_v16  ;;  %v1876_v16 = vld [vmem:[#allocation2 + $0x184] sm:$0xf] }
  0x5b   :  { %v1711_v18 = vor.u32 %v1876_v16, %v1708_v17 }
  0x5d   :  { %845 = vmatpush.bf16.msra.mxu2 %v1687_v20  ;;  %v1823_v20 = vld [vmem:[%s2728_s0 + $0x94] sm:$0xf0] }
  0x5e   :  { %884 = vmatpush.bf16.msra.mxu3 %v1751_v22  ;;  %v2283_v21 = vor.u32 %v1823_v20, %v1490_v19 }
  0x61   :  { %846 = vmatpush.bf16.msra.mxu2 %v1679_v32 }
  0x62   :  { %885 = vmatpush.bf16.msra.mxu3 %v1743_v34 }
  0x64   :  { %695 = vmatmul.bf16.vlgmr.msrb.gmra.mxu2 %v2203_v27  ;;  %773 = vmatmul.bf16.vlgmr.msrb.gmra.mxu0 %v2105_v3  ;;  %v1811_v3 = vld [vmem:[%s2728_s0 + $0x34] sm:$0xf0] }
  0x65   :  { %812 = vmatmul.bf16.vlgmr.msrb.gmra.mxu1 %v2109_v8  ;;  %v1809_v8 = vld [vmem:[%s2728_s0 + $0x2c] sm:$0xf]  ;;  %v2223_v37 = vor.u32 %v1811_v3, %v1442_v35  ;;  %847 = vmatpush.bf16.msra.mxu2 %v1671_v42 }
  0x66   :  { %v2225_v38 = vor.u32 %v1809_v8, %v1444_v36  ;;  %886 = vmatpush.bf16.msra.mxu3 %v1735_v46 }
  0x67   :  { %734 = vmatmul.bf16.vlgmr.msrb.gmra.mxu3 %v2205_v28 }
  0x69   :  { %848 = vmatpush.bf16.msra.mxu2 %v1663_v49 }
  0x6a   :  { %887 = vmatpush.bf16.msra.mxu3 %v1727_v50 }
  0x6d   :  { %849 = vmatpush.bf16.msra.mxu2 %v1655_v58 }
  0x6e   :  { %888 = vmatpush.bf16.msra.mxu3 %v1719_v60 }
  0x72   :  { %889 = vmatpush.bf16.msra.mxu3 %v1711_v18 }
  0x74   :  { %700 = vmatmul.bf16.gmra.mxu2 %v2223_v37  ;;  %778 = vmatmul.bf16.gmra.mxu0 %v2141_v63  ;;  %v1458_v63 = vld [vmem:[%s2728_s0 + $0x48] sm:$0xf] }
  0x75   :  { %817 = vmatmul.bf16.gmra.mxu1 %v2145_v6  ;;  %v1815_v6 = vld [vmem:[%s2728_s0 + $0x54] sm:$0xf0] }
  0x76   :  { %v2243_v53 = vor.u32 %v1815_v6, %v1458_v63  ;;  %v1893_v63 = vld [vmem:[%s2730_s2 + $0x8] sm:$0xff] }
  0x77   :  { %739 = vmatmul.bf16.gmra.mxu3 %v2225_v38 }
  0x84   :  { %705 = vmatmul.bf16.gmra.mxu2 %v2243_v53  ;;  %783 = vmatmul.bf16.gmra.mxu0 %v2177_v5  ;;  %v2263_v5 = vor.u32 %v1819_v62, %v1474_v61  ;;  %v1894_v62 = vld [vmem:[%s2730_s2 + $0x10] sm:$0xff] }
  0x85   :  { %822 = vmatmul.bf16.gmra.mxu1 %v2183_v13  ;;  %v1644_v13 = vld [vmem:[#allocation2 + $0x108] sm:$0xf0] }
  0x86   :  { %v1647_v15 = vor.u32 %v1860_v12, %v1644_v13 }
  0x87   :  { %744 = vmatmul.bf16.gmra.mxu3 %v2245_v54 }
  0x88   :  { %850 = vmatpush.bf16.msra.mxu2 %v1647_v15 }
  0x94   :  { %710 = vmatmul.bf16.gmra.mxu2 %v2263_v5  ;;  %788 = vmatmul.bf16.gmra.mxu0 %v2107_v4  ;;  %v1821_v4 = vld [vmem:[%s2728_s0 + $0x8c] sm:$0xf] }
  0x95   :  { %827 = vmatmul.bf16.gmra.mxu1 %v2111_v9  ;;  %v1492_v9 = vld [vmem:[%s2728_s0 + $0x98] sm:$0xf0] }
  0x96   :  { %v2285_v22 = vor.u32 %v1821_v4, %v1492_v9 }
  0x97   :  { %749 = vmatmul.bf16.gmra.mxu3 %v2265_v11 }
  0xa4   :  { %715 = vmatmul.bf16.gmra.mxu2 %v2283_v21  ;;  %793 = vmatmul.bf16.gmra.mxu0 %v2143_v0  ;;  %v1508_v0 = vld [vmem:[%s2728_s0 + $0xb8] sm:$0x10] }
  0xa5   :  { %832 = vmatmul.bf16.gmra.mxu1 %v2147_v7  ;;  %v2305_v7 = vor.u32 %v1825_v25, %v1508_v0 }
  0xa7   :  { %754 = vmatmul.bf16.gmra.mxu3 %v2285_v22 }
  0xb1   :  { %v618_v29 = vpop.f32.mrf.mxu0 }
  0xb2   :  { %v657_v30 = vpop.f32.mrf.mxu1 }
  0xb3   :  { %v658_v31 = vadd.f32 %v657_v30, %v618_v29 }
  0xb4   :  { %720 = vmatmul.bf16.gmra.mxu2 %v2303_v26  ;;  %798 = vmatmul.bf16.gmra.mxu0 %v2179_v10 }
  0xb5   :  { %837 = vmatmul.bf16.gmra.mxu1 %v2185_v14 }
  0xb7   :  { %759 = vmatmul.bf16.gmra.mxu3 %v2305_v7  ;;  %v633_v32 = vpop.f32.mrf.mxu2 }
  0xb9   :  { %v620_v35 = vpop.f32.mrf.mxu0 }
  0xba   :  { %v672_v33 = vpop.f32.mrf.mxu3  ;;  %v659_v3 = vpop.f32.mrf.mxu1 }
  0xbb   :  { %v2311_v34 = vadd.f32 %v672_v33, %v633_v32  ;;  %v660_v8 = vadd.f32 %v659_v3, %v620_v35 }
  0xbf   :  { %v635_v36 = vpop.f32.mrf.mxu2 }
  0xc1   :  { %v623_v10 = vpop.f32.mrf.mxu0 }
  0xc2   :  { %v674_v39 = vpop.f32.mrf.mxu3  ;;  %v662_v42 = vpop.f32.mrf.mxu1 }
  0xc3   :  { %v2316_v41 = vadd.f32 %v674_v39, %v635_v36  ;;  %v663_v43 = vadd.f32 %v662_v42, %v623_v10 }
  0xc4   :  { %851 = vmatmul.bf16.vlgmr.msra.gmra.mxu2 %v2203_v27  ;;  %1792 = vmatmul.msk.bf16.vlgmr.msra.gmra.mxu0 %vm968_vm1, %v1892_v40 }
  0xc5   :  { %1798 = vmatmul.msk.bf16.vlgmr.msra.gmra.mxu1 %vm968_vm1, %v1892_v40 }
  0xc7   :  { %890 = vmatmul.bf16.vlgmr.msra.gmra.mxu3 %v2205_v28  ;;  %v638_v14 = vpop.f32.mrf.mxu2 }
  0xc9   :  { %v625_v46 = vpop.f32.mrf.mxu0 }
  0xca   :  { %v677_v44 = vpop.f32.mrf.mxu3  ;;  %v664_v47 = vpop.f32.mrf.mxu1 }
  0xcb   :  { %v2322_v45 = vadd.f32 %v677_v44, %v638_v14  ;;  %v665_v48 = vadd.f32 %v664_v47, %v625_v46 }
  0xcf   :  { %v640_v49 = vpop.f32.mrf.mxu2 }
  0xd1   :  { %v628_v6 = vpop.f32.mrf.mxu0 }
  0xd2   :  { %v679_v50 = vpop.f32.mrf.mxu3  ;;  %v667_v51 = vpop.f32.mrf.mxu1 }
  0xd3   :  { %v2327_v27 = vadd.f32 %v679_v50, %v640_v49  ;;  %v668_v28 = vadd.f32 %v667_v51, %v628_v6  ;;  %v1790_v49 = vld [vmem:[%s2730_s2 + $0x28] sm:$0xf] }
  0xd4   :  { %856 = vmatmul.bf16.gmra.mxu2 %v2223_v37  ;;  %1793 = vmatmul.msk.bf16.gmra.mxu0 %vm968_vm1, %v1893_v63 }
  0xd5   :  { %1799 = vmatmul.msk.bf16.gmra.mxu1 %vm968_vm1, %v1893_v63 }
  0xd7   :  { %895 = vmatmul.bf16.gmra.mxu3 %v2225_v38  ;;  %v643_v52 = vpop.f32.mrf.mxu2 }
  0xd9   :  { %v630_v57 = vpop.f32.mrf.mxu0 }
  0xda   :  { %v682_v55 = vpop.f32.mrf.mxu3  ;;  %v669_v58 = vpop.f32.mrf.mxu1 }
  0xdb   :  { %v2333_v56 = vadd.f32 %v682_v55, %v643_v52  ;;  %v670_v59 = vadd.f32 %v669_v58, %v630_v57 }
  0xdf   :  { %v645_v60 = vpop.f32.mrf.mxu2 }
  0xe1   :  { %v774_v1 = vpop.f32.mrf.mxu0 }
  0xe2   :  { %v684_v61 = vpop.f32.mrf.mxu3  ;;  %v813_v2 = vpop.f32.mrf.mxu1 }
  0xe3   :  { %v2338_v37 = vadd.f32 %v684_v61, %v645_v60  ;;  %v2340_v38 = vadd.f32 %v813_v2, %v774_v1 }
  0xe4   :  { %861 = vmatmul.bf16.gmra.mxu2 %v2243_v53  ;;  %1794 = vmatmul.msk.bf16.gmra.mxu0 %vm968_vm1, %v1894_v62  ;;  %v1895_v53 = vld [vmem:[%s2730_s2 + $0x18] sm:$0xff] }
  0xe5   :  { %1800 = vmatmul.msk.bf16.gmra.mxu1 %vm968_vm1, %v1894_v62 }
  0xe7   :  { %900 = vmatmul.bf16.gmra.mxu3 %v2245_v54  ;;  %v696_v12 = vpop.f32.mrf.mxu2 }
  0xe8   :  { %v697_v13 = vadd.f32 %v696_v12, %v658_v31 }
  0xe9   :  { %v776_v16 = vpop.f32.mrf.mxu0 }
  0xea   :  { %v735_v15 = vpop.f32.mrf.mxu3  ;;  %v815_v18 = vpop.f32.mrf.mxu1 }
  0xeb   :  { %v2346_v17 = vadd.f32 %v735_v15, %v697_v13  ;;  %v2348_v19 = vadd.f32 %v815_v18, %v776_v16 }
  0xed   :  { %2750 = vst [vmem:[#allocation12_spill] sm:$0xff] %v2346_v17 }
  0xef   :  { %v698_v20 = vpop.f32.mrf.mxu2 }
  0xf0   :  { %v699_v4 = vadd.f32 %v698_v20, %v660_v8 }
  0xf1   :  { %v779_v23 = vpop.f32.mrf.mxu0 }
  0xf2   :  { %v737_v9 = vpop.f32.mrf.mxu3  ;;  %v818_v24 = vpop.f32.mrf.mxu1 }
  0xf3   :  { %v2353_v54 = vadd.f32 %v737_v9, %v699_v4  ;;  %v2355_v25 = vadd.f32 %v818_v24, %v779_v23 }
  0xf4   :  { %866 = vmatmul.bf16.gmra.mxu2 %v2263_v5  ;;  %1795 = vmatmul.msk.bf16.gmra.mxu0 %vm968_vm1, %v1895_v53  ;;  %v1896_v5 = vld [vmem:[%s2730_s2 + $0x20] sm:$0xff] }
  0xf5   :  { %2751 = vst [vmem:[#allocation13_spill] sm:$0xff] %v2353_v54  ;;  %1801 = vmatmul.msk.bf16.gmra.mxu1 %vm968_vm1, %v1895_v53 }
  0xf7   :  { %905 = vmatmul.bf16.gmra.mxu3 %v2265_v11  ;;  %v701_v0 = vpop.f32.mrf.mxu2 }
  0xf8   :  { %v702_v29 = vadd.f32 %v701_v0, %v663_v43 }
  0xf9   :  { %v781_v31 = vpop.f32.mrf.mxu0 }
  0xfa   :  { %v740_v30 = vpop.f32.mrf.mxu3  ;;  %v820_v33 = vpop.f32.mrf.mxu1 }
  0xfb   :  { %v2361_v32 = vadd.f32 %v740_v30, %v702_v29  ;;  %v2363_v35 = vadd.f32 %v820_v33, %v781_v31 }
  0xfd   :  { %2752 = vst [vmem:[#allocation14_spill] sm:$0xff] %v2361_v32 }
  0xff   :  { %v703_v3 = vpop.f32.mrf.mxu2 }
 0x100   :  { %v704_v8 = vadd.f32 %v703_v3, %v665_v48 }
 0x101   :  { %v784_v39 = vpop.f32.mrf.mxu0 }
 0x102   :  { %v742_v36 = vpop.f32.mrf.mxu3  ;;  %v823_v40 = vpop.f32.mrf.mxu1 }
 0x103   :  { %v2368_v11 = vadd.f32 %v742_v36, %v704_v8  ;;  %v2370_v10 = vadd.f32 %v823_v40, %v784_v39 }
 0x104   :  { %871 = vmatmul.bf16.gmra.mxu2 %v2283_v21  ;;  %1796 = vmatmul.msk.bf16.gmra.mxu0 %vm968_vm1, %v1896_v5  ;;  %v1897_v21 = vld [vmem:[%s2730_s2 + $0x28] sm:$0x10]  ;;  %s2033_s2 = smov 64  }
 0x105   :  { %1802 = vmatmul.msk.bf16.gmra.mxu1 %vm968_vm1, %v1896_v5  ;;  %v1791_v6 = vor.u32 %v1897_v21, %v1790_v49 }
 0x107   :  { %910 = vmatmul.bf16.gmra.mxu3 %v2285_v22  ;;  %v706_v42 = vpop.f32.mrf.mxu2 }
 0x108   :  { %v707_v43 = vadd.f32 %v706_v42, %v668_v28 }
 0x109   :  { %v786_v44 = vpop.f32.mrf.mxu0 }
 0x10a   :  { %v745_v14 = vpop.f32.mrf.mxu3  ;;  %v825_v47 = vpop.f32.mrf.mxu1 }
 0x10b   :  { %v2376_v46 = vadd.f32 %v745_v14, %v707_v43  ;;  %v2378_v48 = vadd.f32 %v825_v47, %v786_v44 }
 0x10f   :  { %v708_v22 = vpop.f32.mrf.mxu2 }
 0x110   :  { %v709_v50 = vadd.f32 %v708_v22, %v670_v59 }
 0x111   :  { %v789_v51 = vpop.f32.mrf.mxu0 }
 0x112   :  { %v747_v63 = vpop.f32.mrf.mxu3  ;;  %v828_v52 = vpop.f32.mrf.mxu1 }
 0x113   :  { %v2386_v28 = vadd.f32 %v747_v63, %v709_v50  ;;  %v2388_v55 = vadd.f32 %v828_v52, %v789_v51 }
 0x114   :  { %876 = vmatmul.bf16.gmra.mxu2 %v2303_v26  ;;  %1797 = vmatmul.msk.bf16.gmra.mxu0 %vm968_vm1, %v1791_v6 }
 0x115   :  { %1803 = vmatmul.msk.bf16.gmra.mxu1 %vm968_vm1, %v1791_v6 }
 0x117   :  { %915 = vmatmul.bf16.gmra.mxu3 %v2305_v7  ;;  %v711_v57 = vpop.f32.mrf.mxu2 }
 0x118   :  { %v712_v58 = vadd.f32 %v711_v57, %v2311_v34 }
 0x119   :  { %v791_v60 = vpop.f32.mrf.mxu0 }
 0x11a   :  { %v750_v59 = vpop.f32.mrf.mxu3  ;;  %v830_v62 = vpop.f32.mrf.mxu1 }
 0x11b   :  { %v2395_v61 = vadd.f32 %v750_v59, %v712_v58  ;;  %v2397_v1 = vadd.f32 %v830_v62, %v791_v60 }
 0x11f   :  { %v713_v2 = vpop.f32.mrf.mxu2 }
 0x120   :  { %v714_v12 = vadd.f32 %v713_v2, %v2316_v41 }
 0x121   :  { %v794_v13 = vpop.f32.mrf.mxu0 }
 0x122   :  { %v752_v26 = vpop.f32.mrf.mxu3  ;;  %v833_v7 = vpop.f32.mrf.mxu1 }
 0x123   :  { %v2400_v15 = vadd.f32 %v752_v26, %v714_v12  ;;  %v2402_v16 = vadd.f32 %v833_v7, %v794_v13 }
 0x127   :  { %v716_v18 = vpop.f32.mrf.mxu2 }
 0x128   :  { %v717_v34 = vadd.f32 %v716_v18, %v2322_v45 }
 0x129   :  { %v796_v4 = vpop.f32.mrf.mxu0 }
 0x12a   :  { %v755_v20 = vpop.f32.mrf.mxu3  ;;  %v835_v53 = vpop.f32.mrf.mxu1 }
 0x12b   :  { %v2405_v9 = vadd.f32 %v755_v20, %v717_v34  ;;  %v2407_v23 = vadd.f32 %v835_v53, %v796_v4 }
 0x12f   :  { %v718_v24 = vpop.f32.mrf.mxu2 }
 0x130   :  { %v719_v41 = vadd.f32 %v718_v24, %v2327_v27 }
 0x131   :  { %v799_v29 = vpop.f32.mrf.mxu0 }
 0x132   :  { %v757_v0 = vpop.f32.mrf.mxu3  ;;  %v838_v31 = vpop.f32.mrf.mxu1 }
 0x133   :  { %v2410_v30 = vadd.f32 %v757_v0, %v719_v41  ;;  %v2412_v33 = vadd.f32 %v838_v31, %v799_v29 }
 0x137   :  { %v721_v3 = vpop.f32.mrf.mxu2 }
 0x138   :  { %v722_v45 = vadd.f32 %v721_v3, %v2333_v56 }
 0x139   :  { %v801_v36 = vpop.f32.mrf.mxu0 }
 0x13a   :  { %v760_v8 = vpop.f32.mrf.mxu3  ;;  %v840_v39 = vpop.f32.mrf.mxu1 }
 0x13b   :  { %v2415_v5 = vadd.f32 %v760_v8, %v722_v45  ;;  %v2417_v40 = vadd.f32 %v840_v39, %v801_v36 }
 0x13f   :  { %v723_v42 = vpop.f32.mrf.mxu2 }
 0x140   :  { %v724_v27 = vadd.f32 %v723_v42, %v2338_v37 }
 0x141   :  { %v2420_v14 = vpop.f32.mrf.mxu0 }
 0x142   :  { %v762_v43 = vpop.f32.mrf.mxu3  ;;  %2753 = vst [vmem:[#allocation15_spill] sm:$0xff] %v2420_v14  ;;  %v2424_v47 = vpop.f32.mrf.mxu1  ;;  %v1070_v42 = vmul.f32 %v2420_v14, %v2346_v17 }
 0x143   :  { %v2422_v44 = vadd.f32 %v762_v43, %v724_v27 }
 0x147   :  { %v852_v49 = vpop.f32.mrf.mxu2 }
 0x148   :  { %v853_v56 = vadd.f32 %v852_v49, %v2340_v38 }
 0x149   :  { %v2427_v22 = vpop.f32.mrf.mxu0 }
 0x14a   :  { %v891_v21 = vpop.f32.mrf.mxu3  ;;  %2754 = vst [vmem:[#allocation16_spill] sm:$0xff] %v2427_v22  ;;  %v2431_v63 = vpop.f32.mrf.mxu1  ;;  %v1072_v36 = vmul.f32 %v2427_v22, %v2353_v54 }
 0x14b   :  { %v2429_v50 = vadd.f32 %v891_v21, %v853_v56  ;;  %2755 = vst [vmem:[#allocation17_spill] sm:$0xff] %v2431_v63 }
 0x14c   :  { %v1132_v56 = vmul.f32 %v1072_v36, %v2353_v54  ;;  %v1094_v14 = vadd.f32 %v1072_v36, %v1070_v42 }
 0x14f   :  { %v854_v6 = vpop.f32.mrf.mxu2 }
 0x150   :  { %v855_v45 = vadd.f32 %v854_v6, %v2348_v19 }
 0x151   :  { %v2433_v37 = vpop.f32.mrf.mxu0 }
 0x152   :  { %v893_v51 = vpop.f32.mrf.mxu3  ;;  %2756 = vst [vmem:[#allocation18_spill] sm:$0xff] %v2433_v37  ;;  %v2435_v52 = vpop.f32.mrf.mxu1  ;;  %v1074_v27 = vmul.f32 %v2433_v37, %v2361_v32  ;;  %v1071_v37 = vmul.f32 %v2424_v47, %v2429_v50 }
 0x153   :  { %v2471_v43 = vadd.f32 %v893_v51, %v855_v45 }
 0x154   :  { %v1134_v22 = vmul.f32 %v1074_v27, %v2361_v32  ;;  %v1095_v54 = vadd.f32 %v1094_v14, %v1074_v27 }
 0x157   :  { %v857_v57 = vpop.f32.mrf.mxu2 }
 0x158   :  { %v858_v39 = vadd.f32 %v857_v57, %v2355_v25  ;;  %v1130_v57 = vmul.f32 %v1070_v42, %v2346_v17 }
 0x159   :  { %v2437_v59 = vpop.f32.mrf.mxu0 }
 0x15a   :  { %v896_v58 = vpop.f32.mrf.mxu3  ;;  %2757 = vst [vmem:[#allocation19_spill] sm:$0xff] %v2437_v59  ;;  %v2439_v60 = vpop.f32.mrf.mxu1  ;;  %v1076_v19 = vmul.f32 %v2437_v59, %v2368_v11  ;;  %v1073_v59 = vmul.f32 %v2431_v63, %v2471_v43 }
 0x15b   :  { %v2478_v21 = vadd.f32 %v896_v58, %v858_v39  ;;  %v1154_v39 = vadd.f32 %v1132_v56, %v1130_v57  ;;  %v1131_v57 = vmul.f32 %v1071_v37, %v2429_v50 }
 0x15d   :  { %v1155_v36 = vadd.f32 %v1154_v39, %v1134_v22 }
 0x15f   :  { %v859_v38 = vpop.f32.mrf.mxu2 }
 0x160   :  { %v860_v6 = vadd.f32 %v859_v38, %v2363_v35  ;;  %v1136_v35 = vmul.f32 %v1076_v19, %v2368_v11 }
 0x161   :  { %v2441_v2 = vpop.f32.mrf.mxu0 }
 0x162   :  { %v898_v62 = vpop.f32.mrf.mxu3  ;;  %2758 = vst [vmem:[#allocation20_spill] sm:$0xff] %v2441_v2  ;;  %v2443_v12 = vpop.f32.mrf.mxu1  ;;  %v1078_v51 = vmul.f32 %v2441_v2, %v2376_v46  ;;  %v1075_v2 = vmul.f32 %v2435_v52, %v2478_v21  ;;  %v1156_v14 = vadd.f32 %v1155_v36, %v1136_v35 }
 0x163   :  { %v2497_v17 = vadd.f32 %v898_v62, %v860_v6 }
 0x164   :  { %v1138_v42 = vmul.f32 %v1078_v51, %v2376_v46  ;;  %v1135_v6 = vmul.f32 %v1075_v2, %v2478_v21 }
 0x167   :  { %v862_v26 = vpop.f32.mrf.mxu2 }
 0x168   :  { %v863_v38 = vadd.f32 %v862_v26, %v2370_v10  ;;  %v1112_v10 = vadd.f32 %v1073_v59, %v1071_v37  ;;  %v1133_v26 = vmul.f32 %v1073_v59, %v2471_v43 }
 0x169   :  { %v2445_v7 = vpop.f32.mrf.mxu0 }
 0x16a   :  { %v901_v13 = vpop.f32.mrf.mxu3  ;;  %2759 = vst [vmem:[#allocation21_spill] sm:$0xff] %v2445_v7  ;;  %v2447_v18 = vpop.f32.mrf.mxu1  ;;  %v1080_v32 = vmul.f32 %v2445_v7, %v2386_v28  ;;  %v1096_v7 = vadd.f32 %v1095_v54, %v1076_v19  ;;  %v1157_v54 = vadd.f32 %v1156_v14, %v1138_v42 }
 0x16b   :  { %v2505_v27 = vadd.f32 %v901_v13, %v863_v38  ;;  %v1113_v38 = vadd.f32 %v1112_v10, %v1075_v2 }
 0x16c   :  { %v1140_v62 = vmul.f32 %v1080_v32, %v2386_v28 }
 0x16f   :  { %v864_v34 = vpop.f32.mrf.mxu2 }
 0x170   :  { %v865_v63 = vadd.f32 %v864_v34, %v2378_v48  ;;  %v1077_v48 = vmul.f32 %v2439_v60, %v2497_v17  ;;  %v1097_v34 = vadd.f32 %v1096_v7, %v1078_v51 }
 0x171   :  { %v2449_v4 = vpop.f32.mrf.mxu0 }
 0x172   :  { %v903_v20 = vpop.f32.mrf.mxu3  ;;  %2760 = vst [vmem:[#allocation22_spill] sm:$0xff] %v2449_v4  ;;  %v2451_v53 = vpop.f32.mrf.mxu1  ;;  %v1082_v56 = vmul.f32 %v2449_v4, %v2395_v61  ;;  %v1098_v36 = vadd.f32 %v1097_v34, %v1080_v32  ;;  %v1158_v4 = vadd.f32 %v1157_v54, %v1140_v62 }
 0x173   :  { %v2516_v19 = vadd.f32 %v903_v20, %v865_v63 }
 0x174   :  { %v1142_v13 = vmul.f32 %v1082_v56, %v2395_v61 }
 0x176   :  { %v1159_v10 = vadd.f32 %v1158_v4, %v1142_v13 }
 0x177   :  { %v867_v24 = vpop.f32.mrf.mxu2 }
 0x178   :  { %v868_v22 = vadd.f32 %v867_v24, %v2388_v55  ;;  %v1172_v24 = vadd.f32 %v1133_v26, %v1131_v57  ;;  %v1081_v57 = vmul.f32 %v2447_v18, %v2516_v19 }
 0x179   :  { %v2455_v0 = vpop.f32.mrf.mxu0 }
 0x17a   :  { %v2453_v41 = vpop.f32.mrf.mxu3  ;;  %2761 = vst [vmem:[#allocation23_spill] sm:$0xff] %v2455_v0  ;;  %v2457_v29 = vpop.f32.mrf.mxu1  ;;  %v1084_v39 = vmul.f32 %v2455_v0, %v2400_v15  ;;  %v1079_v0 = vmul.f32 %v2443_v12, %v2505_v27  ;;  %v1173_v42 = vadd.f32 %v1172_v24, %v1135_v6 }
 0x17b   :  { %v2527_v63 = vadd.f32 %v2453_v41, %v868_v22 }
 0x17c   :  { %v1144_v2 = vmul.f32 %v1084_v39, %v2400_v15  ;;  %v1139_v62 = vmul.f32 %v1079_v0, %v2505_v27 }
 0x17d   :  { %v1083_v22 = vmul.f32 %v2451_v53, %v2527_v63 }
 0x17e   :  { %v1160_v34 = vadd.f32 %v1159_v10, %v1144_v2 }
 0x17f   :  { %v869_v31 = vpop.f32.mrf.mxu2 }
 0x180   :  { %v870_v35 = vadd.f32 %v869_v31, %v2397_v1  ;;  %v1137_v1 = vmul.f32 %v1077_v48, %v2497_v17  ;;  %v1099_v31 = vadd.f32 %v1098_v36, %v1082_v56  ;;  %v1114_v56 = vadd.f32 %v1113_v38, %v1077_v48 }
 0x181   :  { %v2462_v8 = vpop.f32.mrf.mxu0 }
 0x182   :  { %v2459_v3 = vpop.f32.mrf.mxu3  ;;  %v2473_v49 = vpop.f32.mrf.mxu1  ;;  %v1086_v7 = vmul.f32 %v2462_v8, %v2405_v9  ;;  %v1100_v41 = vadd.f32 %v1099_v31, %v1084_v39  ;;  %v1174_v4 = vadd.f32 %v1173_v42, %v1137_v1  ;;  %v1115_v13 = vadd.f32 %v1114_v56, %v1079_v0 }
 0x183   :  { %v2537_v26 = vadd.f32 %v2459_v3, %v870_v35  ;;  %v1143_v0 = vmul.f32 %v1083_v22, %v2527_v63 }
 0x184   :  { %v1146_v14 = vmul.f32 %v1086_v7, %v2405_v9  ;;  %v1101_v3 = vadd.f32 %v1100_v41, %v1086_v7  ;;  %v1175_v1 = vadd.f32 %v1174_v4, %v1139_v62  ;;  %v1116_v2 = vadd.f32 %v1115_v13, %v1081_v57 }
 0x186   :  { %v1161_v24 = vadd.f32 %v1160_v34, %v1146_v14  ;;  %v1117_v56 = vadd.f32 %v1116_v2, %v1083_v22 }
 0x187   :  { %v872_v25 = vpop.f32.mrf.mxu2 }
 0x188   :  { %v873_v20 = vadd.f32 %v872_v25, %v2402_v16 }
 0x189   :  { %v2489_v58 = vpop.f32.mrf.mxu0 }
 0x18a   :  { %v911_v45 = vpop.f32.mrf.mxu3  ;;  %v2514_v37 = vpop.f32.mrf.mxu1  ;;  %v1088_v32 = vmul.f32 %v2489_v58, %v2410_v30 }
 0x18b   :  { %v2546_v6 = vadd.f32 %v911_v45, %v873_v20 }
 0x18c   :  { %v1148_v39 = vmul.f32 %v1088_v32, %v2410_v30  ;;  %v1102_v38 = vadd.f32 %v1101_v3, %v1088_v32 }
 0x18d   :  { %v1087_v31 = vmul.f32 %v2473_v49, %v2546_v6 }
 0x18e   :  { %v1162_v42 = vadd.f32 %v1161_v24, %v1148_v39 }
 0x18f   :  { %v874_v59 = vpop.f32.mrf.mxu2 }
 0x190   :  { %v875_v16 = vadd.f32 %v874_v59, %v2407_v23  ;;  %v1141_v23 = vmul.f32 %v1081_v57, %v2516_v19  ;;  %v1085_v59 = vmul.f32 %v2457_v29, %v2537_v26  ;;  %v1147_v57 = vmul.f32 %v1087_v31, %v2546_v6 }
 0x191   :  { %v2522_v51 = vpop.f32.mrf.mxu0 }
 0x192   :  { %v913_v55 = vpop.f32.mrf.mxu3  ;;  %v1090_v25 = vmul.f32 %v2522_v51, %v2415_v5  ;;  %v2556_v20 = vpop.f32.mrf.mxu1  ;;  %v1176_v10 = vadd.f32 %v1175_v1, %v1141_v23  ;;  %v1145_v41 = vmul.f32 %v1085_v59, %v2537_v26  ;;  %v1118_v39 = vadd.f32 %v1117_v56, %v1085_v59 }
 0x193   :  { %v2553_v36 = vadd.f32 %v913_v55, %v875_v16  ;;  %2762 = vst [vmem:[#allocation24_spill] sm:$0xff] %v2556_v20 }
 0x194   :  { %v1150_v45 = vmul.f32 %v1090_v25, %v2415_v5  ;;  %v1103_v32 = vadd.f32 %v1102_v38, %v1090_v25  ;;  %v1177_v3 = vadd.f32 %v1176_v10, %v1143_v0  ;;  %v1119_v24 = vadd.f32 %v1118_v39, %v1087_v31 }
 0x195   :  { %v1089_v62 = vmul.f32 %v2514_v37, %v2553_v36 }
 0x196   :  { %v1163_v4 = vadd.f32 %v1162_v42, %v1150_v45 }
 0x197   :  { %v877_v54 = vpop.f32.mrf.mxu2  ;;  %v1149_v38 = vmul.f32 %v1089_v62, %v2553_v36  ;;  %v1120_v42 = vadd.f32 %v1119_v24, %v1089_v62 }
 0x198   :  { %v878_v48 = vadd.f32 %v877_v54, %v2412_v33 }
 0x199   :  { %v2558_v7 = vpop.f32.mrf.mxu0 }
 0x19a   :  { %v916_v35 = vpop.f32.mrf.mxu3  ;;  %2763 = vst [vmem:[#allocation25_spill] sm:$0xff] %v2558_v7  ;;  %v1092_v33 = vmul.f32 %v2558_v7, %v2422_v44 }
 0x19b   :  { %v2565_v55 = vadd.f32 %v916_v35, %v878_v48  ;;  %v1178_v35 = vadd.f32 %v1177_v3, %v1145_v41 }
 0x19c   :  { %v1104_v14 = vsel %vm987_vm0, %v1092_v33, 0.0  ;;  %v1152_v16 = vmul.f32 %v1092_v33, %v2422_v44 }
 0x19d   :  { %v1105_v34 = vadd.f32 %v1104_v14, %v1103_v32  ;;  %v1091_v54 = vmul.f32 %v2556_v20, %v2565_v55  ;;  %v1179_v33 = vadd.f32 %v1178_v35, %v1147_v57  ;;  %v2581_v14 = vpop.f32.mrf.mxu1 }
 0x19e   :  { %v1164_v25 = vsel %vm987_vm0, %v1152_v16, 0.0  ;;  %2764 = vst [vmem:[#allocation26_spill] sm:$0xff] %v2581_v14 }
 0x19f   :  { %v1106_v13 = vrot.slane %v1105_v34, 4  ;;  %v1165_v23 = vadd.f32 %v1164_v25, %v1163_v4  ;;  %v879_v48 = vpop.f32.mrf.mxu2  ;;  %v1151_v59 = vmul.f32 %v1091_v54, %v2565_v55  ;;  %v1121_v31 = vadd.f32 %v1120_v42, %v1091_v54 }
 0x1a0   :  { %v880_v22 = vadd.f32 %v879_v48, %v2417_v40  ;;  %v1180_v40 = vadd.f32 %v1179_v33, %v1149_v38 }
 0x1a1   :  { %v1107_v45 = vadd.f32 %v1106_v13, %v1105_v34  ;;  %v1166_v1 = vrot.slane %v1165_v23, 4 }
 0x1a2   :  { %v918_v0 = vpop.f32.mrf.mxu3  ;;  %v1181_v3 = vadd.f32 %v1180_v40, %v1151_v59 }
 0x1a3   :  { %v2578_v2 = vadd.f32 %v918_v0, %v880_v22  ;;  %v1108_v32 = vrot.slane %v1107_v45, 2  ;;  %v1167_v10 = vadd.f32 %v1166_v1, %v1165_v23 }
 0x1a5   :  { %v1093_v41 = vmul.f32 %v2581_v14, %v2578_v2  ;;  %v1109_v16 = vadd.f32 %v1108_v32, %v1107_v45  ;;  %v1168_v56 = vrot.slane %v1167_v10, 2 }
 0x1a7   :  { %v1122_v4 = vsel %vm987_vm0, %v1093_v41, 0.0  ;;  %v1153_v34 = vmul.f32 %v1093_v41, %v2578_v2  ;;  %v1110_v62 = vrot.slane %v1109_v16, 1  ;;  %v1169_v25 = vadd.f32 %v1168_v56, %v1167_v10 }
 0x1a8   :  { %v1123_v57 = vadd.f32 %v1122_v4, %v1121_v31  ;;  %v1194_v41 = vlaneseq }
 0x1a9   :  { %v1182_v39 = vsel %vm987_vm0, %v1153_v34, 0.0  ;;  %v1111_v23 = vadd.f32 %v1110_v62, %v1109_v16  ;;  %v1170_v48 = vrot.slane %v1169_v25, 1 }
 0x1aa   :  { %v1183_v13 = vadd.f32 %v1182_v39, %v1181_v3  ;;  %v1124_v35 = vrot.slane %v1123_v57, 4  ;;  %v1195_v16 = vand.u32 127, %v1194_v41 }
 0x1ab   :  { %1190 = vrot.lane.b32.xlu0 %v1111_v23, %s2033_s2  ;;  %v1171_v22 = vadd.f32 %v1170_v48, %v1169_v25 }
 0x1ac   :  { %v1125_v54 = vadd.f32 %v1124_v35, %v1123_v57  ;;  %v1184_v24 = vrot.slane %v1183_v13, 4  ;;  %vm1196_vm2 = vcmp.lt.s32.totalorder %v1195_v16, 64 }
 0x1ad   :  { %1205 = vrot.lane.b32.xlu1 %v1171_v22, %s2033_s2 }
 0x1ae   :  { %v1126_v38 = vrot.slane %v1125_v54, 2  ;;  %v1185_v45 = vadd.f32 %v1184_v24, %v1183_v13 }
 0x1b0   :  { %v1127_v1 = vadd.f32 %v1126_v38, %v1125_v54  ;;  %v1186_v0 = vrot.slane %v1185_v45, 2 }
 0x1b2   :  { %v1128_v33 = vrot.slane %v1127_v1, 1  ;;  %v1187_v42 = vadd.f32 %v1186_v0, %v1185_v45 }
 0x1b4   :  { %v1129_v59 = vadd.f32 %v1128_v33, %v1127_v1  ;;  %v1188_v32 = vrot.slane %v1187_v42, 1 }
 0x1b6   :  { %1192 = vrot.lane.b32.xlu0 %v1129_v59, %s2033_s2  ;;  %v1189_v10 = vadd.f32 %v1188_v32, %v1187_v42 }
 0x1b8   :  { %1207 = vrot.lane.b32.xlu1 %v1189_v10, %s2033_s2 }
 0x21d   :  { %v1191_v40 = vpop.permute.xlu0 %1190 }
 0x21f   :  { %v1206_v31 = vpop.permute.xlu1 %1205 }
 0x228   :  { %v1193_v56 = vpop.permute.xlu0 %1192 }
 0x229   :  { %v1197_v4 = vsel %vm1196_vm2, %v1191_v40, %v1193_v56  ;;  %v1198_v34 = vsel %vm1196_vm2, %v1193_v56, %v1191_v40 }
 0x22a   :  { %v1199_v3 = vadd.f32 %v1198_v34, %v1111_v23  ;;  %v1200_v57 = vadd.f32 %v1197_v4, %v1129_v59  ;;  %v1208_v62 = vpop.permute.xlu1 %1207 }
 0x22b   :  { %v1209_v25 = vsel %vm1196_vm2, %v1206_v31, %v1208_v62  ;;  %v1210_v39 = vsel %vm1196_vm2, %v1208_v62, %v1206_v31 }
 0x22c   :  { %v1201_v13 = vadd.f32 %v1199_v3, %v1129_v59  ;;  %v1202_v48 = vadd.f32 %v1200_v57, %v1111_v23  ;;  %v1211_v35 = vadd.f32 %v1210_v39, %v1171_v22  ;;  %v1212_v54 = vadd.f32 %v1209_v25, %v1189_v10  ;;  %v1247_v3 = vld [vmem:[#allocation6] sm:$0x3] }
 0x22e   :  { %v1203_v24 = vadd.f32 %v1201_v13, %v1197_v4  ;;  %v1204_v38 = vadd.f32 %v1202_v48, %v1198_v34  ;;  %v1213_v45 = vadd.f32 %v1211_v35, %v1189_v10  ;;  %v1214_v1 = vadd.f32 %v1212_v54, %v1171_v22 }
 0x22f   :  { %v1249_v48 = vperm.slane %v1247_v3, 0  ;;  %v1250_v35 = vperm.slane %v1247_v3, 1 }
 0x230   :  { %v1217_v0 = vmul.f32 0.00390625, %v1203_v24  ;;  %v1218_v33 = vmul.f32 0.00390625, %v1204_v38  ;;  %v1215_v42 = vadd.f32 %v1213_v45, %v1209_v25  ;;  %v1216_v32 = vadd.f32 %v1214_v1, %v1210_v39  ;;  %v2765_v38 = vld [vmem:[#allocation12_spill] sm:$0xff] }
 0x232   :  { %v1221_v41 = vmul.f32 %v1217_v0, %v1217_v0  ;;  %v1222_v16 = vmul.f32 %v1218_v33, %v1218_v33  ;;  %v1219_v40 = vmul.f32 0.00390625, %v1215_v42  ;;  %v1220_v56 = vmul.f32 0.00390625, %v1216_v32  ;;  %v2766_v32 = vld [vmem:[#allocation13_spill] sm:$0xff] }
 0x233   :  { %v2588_v25 = vperm.slane %v1217_v0, 0  ;;  %v2590_v13 = vperm.slane %v1218_v33, 0 }
 0x234   :  { %v1223_v14 = vsub.f32 %v1219_v40, %v1221_v41  ;;  %v1224_v7 = vsub.f32 %v1220_v56, %v1222_v16  ;;  %v2767_v56 = vld [vmem:[#allocation14_spill] sm:$0xff] }
 0x235   :  { %v1257_v45 = vsub.f32 %v2765_v38, %v2588_v25  ;;  %v1258_v33 = vsub.f32 %v2429_v50, %v2590_v13  ;;  %v1259_v41 = vsub.f32 %v2766_v32, %v2588_v25  ;;  %v1260_v40 = vsub.f32 %v2471_v43, %v2590_v13 }
 0x236   :  { %v1225_v20 = vadd.f32 1e-05, %v1223_v14  ;;  %v1226_v31 = vadd.f32 1e-05, %v1224_v7  ;;  %v1307_v14 = vld [vmem:[#allocation7] sm:$0x3]  ;;  %v1264_v50 = vsub.f32 %v2497_v17, %v2590_v13  ;;  %v1267_v43 = vsub.f32 %v2386_v28, %v2588_v25 }
 0x237   :  { %v2594_v1 = vperm.slane %v1307_v14, 0  ;;  %v2596_v0 = vperm.slane %v1307_v14, 1  ;;  %v1271_v17 = vsub.f32 %v2400_v15, %v2588_v25  ;;  %v1273_v28 = vsub.f32 %v2405_v9, %v2588_v25 }
 0x238   :  { %1921 = vrsqrt.f32 %v1225_v20  ;;  %vm1233_vm5 = vweird.f32 %v1225_v20  ;;  %vm1243_vm7 = vweird.f32 %v1226_v31  ;;  %v1278_v15 = vsub.f32 %v2565_v55, %v2590_v13 }
 0x239   :  { %1923 = vrsqrt.f32 %v1226_v31  ;;  %v1280_v9 = vsub.f32 %v2578_v2, %v2590_v13 }
 0x23e   :  { %v1922_v23 = vpop.eup %1921 }
 0x23f   :  { %v1924_v59 = vpop.eup %1923  ;;  %v1228_v4 = vmul.f32 %v1922_v23, %v1225_v20  ;;  %vm1234_vm3 = vweird.f32 %v1922_v23 }
 0x240   :  { %v1238_v34 = vmul.f32 %v1924_v59, %v1226_v31  ;;  %vm1244_vm4 = vweird.f32 %v1924_v59  ;;  %vm1235_vm6 = vmor %vm1233_vm5, %vm1234_vm3  ;;  %v1261_v31 = vsub.f32 %v2767_v56, %v2588_v25 }
 0x241   :  { %v1229_v10 = vmul.f32 %v1922_v23, %v1228_v4  ;;  %vm1245_vm8 = vmor %vm1243_vm7, %vm1244_vm4  ;;  %v1262_v4 = vsub.f32 %v2478_v21, %v2590_v13  ;;  %v1269_v21 = vsub.f32 %v2395_v61, %v2588_v25  ;;  %v1275_v61 = vsub.f32 %v2410_v30, %v2588_v25 }
 0x242   :  { %v1239_v22 = vmul.f32 %v1924_v59, %v1238_v34 }
 0x243   :  { %v1230_v57 = vmul.f32 0.5, %v1229_v10  ;;  %v1266_v10 = vsub.f32 %v2505_v27, %v2590_v13 }
 0x244   :  { %v1240_v62 = vmul.f32 0.5, %v1239_v22  ;;  %v1268_v22 = vsub.f32 %v2516_v19, %v2590_v13  ;;  %v1274_v19 = vsub.f32 %v2546_v6, %v2590_v13 }
 0x245   :  { %v1231_v39 = vsub.f32 1.5, %v1230_v57  ;;  %v1276_v57 = vsub.f32 %v2553_v36, %v2590_v13 }
 0x246   :  { %v1241_v7 = vsub.f32 1.5, %v1240_v62 }
 0x247   :  { %v1232_v54 = vmul.f32 %v1922_v23, %v1231_v39 }
 0x248   :  { %v1242_v24 = vmul.f32 %v1924_v59, %v1241_v7 }
 0x249   :  { %v1236_v42 = vsel %vm1235_vm6, %v1922_v23, %v1232_v54  ;;  %v1263_v23 = vsub.f32 %v2368_v11, %v2588_v25  ;;  %v1270_v11 = vsub.f32 %v2527_v63, %v2590_v13  ;;  %v1277_v63 = vsub.f32 %v2415_v5, %v2588_v25 }
 0x24a   :  { %v1246_v16 = vsel %vm1245_vm8, %v1924_v59, %v1242_v24  ;;  %v1253_v20 = vmul.f32 %v1249_v48, %v1236_v42  ;;  %v1265_v59 = vsub.f32 %v2376_v46, %v2588_v25  ;;  %v1272_v46 = vsub.f32 %v2537_v26, %v2590_v13 }
 0x24b   :  { %v1254_v34 = vmul.f32 %v1250_v35, %v1246_v16  ;;  %v1279_v26 = vsub.f32 %v2422_v44, %v2588_v25 }
 0x24c   :  { %v1281_v3 = vperm.slane %v1253_v20, 0 }
 0x24d   :  { %v1282_v27 = vperm.slane %v1254_v34, 0 }
 0x24e   :  { %v1283_v62 = vmul.f32 %v1281_v3, %v1257_v45  ;;  %v1285_v6 = vmul.f32 %v1281_v3, %v1259_v41  ;;  %v1287_v39 = vmul.f32 %v1281_v3, %v1261_v31  ;;  %v1289_v48 = vmul.f32 %v1281_v3, %v1263_v23 }
 0x24f   :  { %v1284_v30 = vmul.f32 %v1282_v27, %v1258_v33  ;;  %v1286_v14 = vmul.f32 %v1282_v27, %v1260_v40  ;;  %v1288_v7 = vmul.f32 %v1282_v27, %v1262_v4  ;;  %v1290_v36 = vmul.f32 %v1282_v27, %v1264_v50 }
 0x250   :  { %v1291_v35 = vmul.f32 %v1281_v3, %v1265_v59  ;;  %v1292_v54 = vmul.f32 %v1282_v27, %v1266_v10  ;;  %v1293_v5 = vmul.f32 %v1281_v3, %v1267_v43  ;;  %v1294_v24 = vmul.f32 %v1282_v27, %v1268_v22 }
 0x251   :  { %v1295_v38 = vmul.f32 %v1281_v3, %v1269_v21  ;;  %v1296_v55 = vmul.f32 %v1282_v27, %v1270_v11  ;;  %v1297_v42 = vmul.f32 %v1281_v3, %v1271_v17  ;;  %v1298_v32 = vmul.f32 %v1282_v27, %v1272_v46 }
 0x252   :  { %v1299_v44 = vmul.f32 %v1281_v3, %v1273_v28  ;;  %v1300_v25 = vmul.f32 %v1282_v27, %v1274_v19  ;;  %v1301_v16 = vmul.f32 %v1281_v3, %v1275_v61  ;;  %v1302_v2 = vmul.f32 %v1282_v27, %v1276_v57 }
 0x253   :  { %v1303_v13 = vmul.f32 %v1281_v3, %v1277_v63  ;;  %v1304_v45 = vmul.f32 %v1282_v27, %v1278_v15  ;;  %v1305_v41 = vmul.f32 %v1281_v3, %v1279_v26  ;;  %v1306_v20 = vmul.f32 %v1282_v27, %v1280_v9 }
 0x254   :  { %v1313_v33 = vadd.f32 %v2594_v1, %v1283_v62  ;;  %v1314_v40 = vadd.f32 %v2596_v0, %v1284_v30  ;;  %v1315_v56 = vadd.f32 %v2594_v1, %v1285_v6  ;;  %v1316_v31 = vadd.f32 %v2596_v0, %v1286_v14 }
 0x255   :  { %v1317_v4 = vadd.f32 %v2594_v1, %v1287_v39  ;;  %v1318_v34 = vadd.f32 %v2596_v0, %v1288_v7  ;;  %v1319_v23 = vadd.f32 %v2594_v1, %v1289_v48  ;;  %v1320_v50 = vadd.f32 %v2596_v0, %v1290_v36 }
 0x256   :  { %v1321_v59 = vadd.f32 %v2594_v1, %v1291_v35  ;;  %v1322_v10 = vadd.f32 %v2596_v0, %v1292_v54  ;;  %v1323_v43 = vadd.f32 %v2594_v1, %v1293_v5  ;;  %v1324_v22 = vadd.f32 %v2596_v0, %v1294_v24 }
 0x257   :  { %v1325_v21 = vadd.f32 %v2594_v1, %v1295_v38  ;;  %v1326_v3 = vadd.f32 %v2596_v0, %v1296_v55  ;;  %v1327_v11 = vadd.f32 %v2594_v1, %v1297_v42  ;;  %v1328_v17 = vadd.f32 %v2596_v0, %v1298_v32  ;;  %v2768_v32 = vld [vmem:[#allocation15_spill] sm:$0xff] }
 0x258   :  { %v1329_v46 = vadd.f32 %v2594_v1, %v1299_v44  ;;  %v1330_v27 = vadd.f32 %v2596_v0, %v1300_v25  ;;  %v1331_v28 = vadd.f32 %v2594_v1, %v1301_v16  ;;  %v1332_v19 = vadd.f32 %v2596_v0, %v1302_v2  ;;  %v2769_v25 = vld [vmem:[#allocation16_spill] sm:$0xff]  ;;  %v2770_v2 = vld [vmem:[#allocation17_spill] sm:$0xff] }
 0x259   :  { %v1333_v61 = vadd.f32 %v2594_v1, %v1303_v13  ;;  %v1334_v57 = vadd.f32 %v2596_v0, %v1304_v45  ;;  %v1335_v63 = vadd.f32 %v2594_v1, %v1305_v41  ;;  %v1336_v15 = vadd.f32 %v2596_v0, %v1306_v20  ;;  %v2771_v45 = vld [vmem:[#allocation18_spill] sm:$0xff] }
 0x25a   :  { %v1337_v26 = vmax.f32 %v1313_v33, 0.0  ;;  %v1338_v9 = vmax.f32 %v1314_v40, 0.0  ;;  %v1339_v62 = vmax.f32 %v1315_v56, 0.0  ;;  %v1340_v6 = vmax.f32 %v1316_v31, 0.0  ;;  %v2772_v56 = vld [vmem:[#allocation19_spill] sm:$0xff] }
 0x25b   :  { %v1341_v39 = vmax.f32 %v1317_v4, 0.0  ;;  %v1342_v48 = vmax.f32 %v1318_v34, 0.0  ;;  %v1343_v30 = vmax.f32 %v1319_v23, 0.0  ;;  %v1344_v14 = vmax.f32 %v1320_v50, 0.0  ;;  %v2773_v50 = vld [vmem:[#allocation20_spill] sm:$0xff] }
 0x25c   :  { %v1345_v7 = vmax.f32 %v1321_v59, 0.0  ;;  %v1346_v36 = vmax.f32 %v1322_v10, 0.0  ;;  %v1347_v35 = vmax.f32 %v1323_v43, 0.0  ;;  %v1348_v54 = vmax.f32 %v1324_v22, 0.0  ;;  %v2774_v43 = vld [vmem:[#allocation21_spill] sm:$0xff] }
 0x25d   :  { %v1349_v5 = vmax.f32 %v1325_v21, 0.0  ;;  %v1350_v24 = vmax.f32 %v1326_v3, 0.0  ;;  %v1351_v38 = vmax.f32 %v1327_v11, 0.0  ;;  %v1352_v55 = vmax.f32 %v1328_v17, 0.0  ;;  %v2775_v3 = vld [vmem:[#allocation22_spill] sm:$0xff] }
 0x25e   :  { %v1353_v42 = vmax.f32 %v1329_v46, 0.0  ;;  %v1354_v1 = vmax.f32 %v1330_v27, 0.0  ;;  %v1361_v0 = vmul.f32 %v1337_v26, %v2768_v32  ;;  %v1362_v44 = vmul.f32 %v1338_v9, %v2424_v47 }
 0x25f   :  { %v1363_v16 = vmul.f32 %v1339_v62, %v2769_v25  ;;  %v1364_v13 = vmul.f32 %v1340_v6, %v2770_v2  ;;  %v1365_v41 = vmul.f32 %v1341_v39, %v2771_v45  ;;  %v1366_v20 = vmul.f32 %v1342_v48, %v2435_v52  ;;  %v2779_v39 = vld [vmem:[#allocation26_spill] sm:$0xff] }
 0x260   :  { %v1355_v33 = vmax.f32 %v1331_v28, 0.0  ;;  %v1356_v40 = vmax.f32 %v1332_v19, 0.0  ;;  %v1367_v31 = vmul.f32 %v1343_v30, %v2772_v56  ;;  %v1368_v4 = vmul.f32 %v1344_v14, %v2439_v60  ;;  %v2776_v60 = vld [vmem:[#allocation23_spill] sm:$0xff] }
 0x261   :  { %v1357_v34 = vmax.f32 %v1333_v61, 0.0  ;;  %v1358_v23 = vmax.f32 %v1334_v57, 0.0  ;;  %v1369_v59 = vmul.f32 %v1345_v7, %v2773_v50  ;;  %v1370_v47 = vmul.f32 %v1346_v36, %v2443_v12 }
 0x262   :  { %v1359_v10 = vmax.f32 %v1335_v63, 0.0  ;;  %v1371_v22 = vmul.f32 %v1347_v35, %v2774_v43  ;;  %v1372_v21 = vmul.f32 %v1348_v54, %v2447_v18  ;;  %v1373_v11 = vmul.f32 %v1349_v5, %v2775_v3 }
 0x263   :  { %v1374_v52 = vmul.f32 %v1350_v24, %v2451_v53  ;;  %v1385_v17 = vpack.c.bf16 %v1362_v44, %v1361_v0  ;;  %v1386_v46 = vpack.c.bf16 %v1364_v13, %v1363_v16  ;;  %v1387_v27 = vpack.c.bf16 %v1366_v20, %v1365_v41 }
 0x264   :  { %v1360_v28 = vmax.f32 %v1336_v15, 0.0  ;;  %v1375_v19 = vmul.f32 %v1351_v38, %v2776_v60  ;;  %v1376_v61 = vmul.f32 %v1352_v55, %v2457_v29  ;;  %v1388_v57 = vpack.c.bf16 %v1368_v4, %v1367_v31  ;;  %v2777_v15 = vld [vmem:[#allocation24_spill] sm:$0xff] }
 0x265   :  { %v1377_v12 = vmul.f32 %v1353_v42, %v2462_v8  ;;  %v1378_v63 = vmul.f32 %v1354_v1, %v2473_v49  ;;  %v1389_v26 = vpack.c.bf16 %v1370_v47, %v1369_v59  ;;  %1397 = vst [vmem:[%s2734_s6] sm:$0xff] %v1385_v17  ;;  %v1379_v18 = vmul.f32 %v1355_v33, %v2489_v58  ;;  %v2778_v49 = vld [vmem:[#allocation25_spill] sm:$0xff] }
 0x266   :  { %v1380_v53 = vmul.f32 %v1356_v40, %v2514_v37  ;;  %v1390_v9 = vpack.c.bf16 %v1372_v21, %v1371_v22  ;;  %1398 = vst [vmem:[%s2734_s6 + $0x8] sm:$0xff] %v1386_v46  ;;  %v1381_v29 = vmul.f32 %v1357_v34, %v2522_v51  ;;  %v1382_v8 = vmul.f32 %v1358_v23, %v2777_v15 }
 0x267   :  { %v1391_v62 = vpack.c.bf16 %v1374_v52, %v1373_v11  ;;  %1399 = vst [vmem:[%s2734_s6 + $0x10] sm:$0xff] %v1387_v27  ;;  %v1383_v6 = vmul.f32 %v1359_v10, %v2778_v49  ;;  %v1384_v58 = vmul.f32 %v1360_v28, %v2779_v39  ;;  %v1392_v48 = vpack.c.bf16 %v1376_v61, %v1375_v19 }
 0x268   :  { %1400 = vst [vmem:[%s2734_s6 + $0x18] sm:$0xff] %v1388_v57  ;;  %v1393_v37 = vpack.c.bf16 %v1378_v63, %v1377_v12  ;;  %v1394_v51 = vpack.c.bf16 %v1380_v53, %v1379_v18  ;;  %v1395_v30 = vpack.c.bf16 %v1382_v8, %v1381_v29 }
 0x269   :  { %1401 = vst [vmem:[%s2734_s6 + $0x20] sm:$0xff] %v1389_v26  ;;  %v1396_v14 = vpack.c.bf16 %v1384_v58, %v1383_v6 }
 0x26a   :  { %1402 = vst [vmem:[%s2734_s6 + $0x28] sm:$0xff] %v1390_v9 }
 0x26b   :  { %1403 = vst [vmem:[%s2734_s6 + $0x30] sm:$0xff] %v1391_v62 }
 0x26c   :  { %1404 = vst [vmem:[%s2734_s6 + $0x38] sm:$0xff] %v1392_v48 }
 0x26d   :  { %1405 = vst [vmem:[%s2734_s6 + $0x40] sm:$0xff] %v1393_v37 }
 0x26e   :  { %1406 = vst [vmem:[%s2734_s6 + $0x48] sm:$0xff] %v1394_v51 }
 0x26f   :  { %1407 = vst [vmem:[%s2734_s6 + $0x50] sm:$0xff] %v1395_v30 }
 0x270   :  { %1408 = vst [vmem:[%s2734_s6 + $0x58] sm:$0x11] %v1396_v14 }
 0x271   :  { %1413 = vsyncpa [#allocation3], 1 }
 0x272   :  { %1414 = vsyncpa [#allocation5], 1 }
 0x273   :  { %1415 = vsyncpa [#allocation8], 1 }

// kernel: decoder_forward.8
= control target key start
LH: loop header
LB: loop body
LE: loop exit
PB: predicated region body
PF: predicated region fallthrough
CT: control target
= control target key end

     0   :  { %vm803_vm0 = vcmask 1041408   ;;  %vm742_vm1 = vcmask 31744   ;;  %s2998_s3 = inlined_call_operand.vmem [shape: bf16[4,128], index: 3, kind: input, shape index: {}]   ;;  %s2999_s1 = inlined_call_operand.vmem [shape: bf16[256,128], index: 1, kind: input, shape index: {}]   ;;  %s3000_s2 = inlined_call_operand.vmem [shape: bf16[306,4], index: 2, kind: input, shape index: {}]   ;;  %s3001_s0 = inlined_call_operand.vmem [shape: bf16[306,256], index: 0, kind: input, shape index: {}]   ;;  %s3002_s5 = inlined_call_operand.vmem [shape: f32[1,128], index: 5, kind: input, shape index: {}]   ;;  %s3003_s4 = inlined_call_operand.vmem [shape: f32[1,128], index: 4, kind: input, shape index: {}]   ;;  %s3004_s6 = inlined_call_operand.vmem [shape: bf16[306,128], index: 6, kind: output, shape index: {}]  }
   0x1   :  { %v643_v0 = vld [vmem:[%s2998_s3] sm:$0x3]  ;;  %v1758_v1 = vld [vmem:[%s2999_s1 + $0x38] sm:$0xff]  ;;  %v1757_v5 = vld [vmem:[%s2999_s1 + $0x30] sm:$0xff] }
   0x2   :  { %v1766_v2 = vld [vmem:[%s2999_s1 + $0x78] sm:$0xff]  ;;  %v1970_v3 = vsel %vm803_vm0, %v643_v0, 0  ;;  %v1767_v4 = vld [vmem:[%s3000_s2] sm:$0xff]  ;;  %388 = vmatpush.bf16.msra.mxu0 %v1758_v1  ;;  %1899 = vmatpush.bf16.msra.mxu3 %v1758_v1  ;;  %v1765_v6 = vld [vmem:[%s2999_s1 + $0x70] sm:$0xff] }
   0x3   :  { %814 = vmatpush.bf16.msra.mxu2 %v1970_v3  ;;  %496 = vmatpush.bf16.msra.mxu1 %v1766_v2  ;;  %v1756_v7 = vld [vmem:[%s2999_s1 + $0x28] sm:$0xff]  ;;  %v1755_v9 = vld [vmem:[%s2999_s1 + $0x20] sm:$0xff]  ;;  %v1754_v11 = vld [vmem:[%s2999_s1 + $0x18] sm:$0xff] }
   0x4   :  { %v1764_v8 = vld [vmem:[%s2999_s1 + $0x68] sm:$0xff]  ;;  %v1763_v10 = vld [vmem:[%s2999_s1 + $0x60] sm:$0xff]  ;;  %v1762_v12 = vld [vmem:[%s2999_s1 + $0x58] sm:$0xff] }
   0x5   :  { %v1768_v13 = vld [vmem:[%s3000_s2 + $0x8] sm:$0xff]  ;;  %v1753_v14 = vld [vmem:[%s2999_s1 + $0x10] sm:$0xff]  ;;  %v1751_v18 = vld [vmem:[%s2999_s1] sm:$0xff] }
   0x6   :  { %1693 = vmatmul.msk.bf16.vlgmr.msra.gmra.mxu2 %vm742_vm1, %v1767_v4  ;;  %389 = vmatpush.bf16.msra.mxu0 %v1757_v5  ;;  %v1761_v15 = vld [vmem:[%s2999_s1 + $0x50] sm:$0xff]  ;;  %v1752_v16 = vld [vmem:[%s2999_s1 + $0x8] sm:$0xff]  ;;  %v1759_v19 = vld [vmem:[%s2999_s1 + $0x40] sm:$0xff] }
   0x7   :  { %1900 = vmatpush.bf16.msra.mxu3 %v1757_v5  ;;  %497 = vmatpush.bf16.msra.mxu1 %v1765_v6  ;;  %v1760_v17 = vld [vmem:[%s2999_s1 + $0x48] sm:$0xff]  ;;  %v1403_v20 = vld [vmem:[%s3001_s0] sm:$0xf]  ;;  %v1523_v22 = vld [vmem:[%s3001_s0 + $0xf0] sm:$0xf]  ;;  %s1924_s1 = smov 96  }
   0x8   :  { %v1714_v21 = vld [vmem:[%s3001_s0 + $0x4] sm:$0xf0]  ;;  %v1744_v23 = vld [vmem:[%s3001_s0 + $0xf4] sm:$0xf0]  ;;  %v1713_v24 = vld [vmem:[%s3001_s0 + $0x4] sm:$0xf] }
   0x9   :  { %v1405_v25 = vld [vmem:[%s3001_s0 + $0x8] sm:$0xf0]  ;;  %v1404_v26 = vor.u32 %v1714_v21, %v1403_v20  ;;  %v1524_v27 = vor.u32 %v1744_v23, %v1523_v22  ;;  %v1769_v29 = vld [vmem:[%s3000_s2 + $0x10] sm:$0xff]  ;;  %v1716_v31 = vld [vmem:[%s3001_s0 + $0x14] sm:$0xf0] }
   0xa   :  { %390 = vmatpush.bf16.msra.mxu0 %v1756_v7  ;;  %v1408_v28 = vor.u32 %v1713_v24, %v1405_v25  ;;  %v1411_v30 = vld [vmem:[%s3001_s0 + $0x10] sm:$0xf]  ;;  %v1531_v32 = vld [vmem:[%s3001_s0 + $0x100] sm:$0xf]  ;;  %v1746_v33 = vld [vmem:[%s3001_s0 + $0x104] sm:$0xf0] }
   0xb   :  { %1901 = vmatpush.bf16.msra.mxu3 %v1756_v7  ;;  %498 = vmatpush.bf16.msra.mxu1 %v1764_v8  ;;  %v1715_v34 = vld [vmem:[%s3001_s0 + $0x14] sm:$0xf]  ;;  %v1413_v35 = vld [vmem:[%s3001_s0 + $0x18] sm:$0xf0]  ;;  %v1412_v36 = vor.u32 %v1716_v31, %v1411_v30  ;;  %v1532_v37 = vor.u32 %v1746_v33, %v1531_v32  ;;  %v1419_v40 = vld [vmem:[%s3001_s0 + $0x20] sm:$0xf] }
   0xc   :  { %v1416_v38 = vor.u32 %v1715_v34, %v1413_v35  ;;  %v1770_v39 = vld [vmem:[%s3000_s2 + $0x18] sm:$0xff]  ;;  %v1718_v41 = vld [vmem:[%s3001_s0 + $0x24] sm:$0xf0]  ;;  %v1539_v42 = vld [vmem:[%s3001_s0 + $0x110] sm:$0xf] }
   0xd   :  { %v1748_v43 = vld [vmem:[%s3001_s0 + $0x114] sm:$0xf0]  ;;  %v1717_v44 = vld [vmem:[%s3001_s0 + $0x24] sm:$0xf]  ;;  %v1421_v45 = vld [vmem:[%s3001_s0 + $0x28] sm:$0xf0]  ;;  %v1420_v46 = vor.u32 %v1718_v41, %v1419_v40 }
   0xe   :  { %391 = vmatpush.bf16.msra.mxu0 %v1755_v9  ;;  %v1540_v47 = vor.u32 %v1748_v43, %v1539_v42  ;;  %v1424_v48 = vor.u32 %v1717_v44, %v1421_v45  ;;  %v1771_v49 = vld [vmem:[%s3000_s2 + $0x20] sm:$0xff]  ;;  %v1427_v50 = vld [vmem:[%s3001_s0 + $0x30] sm:$0xf]  ;;  %v1720_v51 = vld [vmem:[%s3001_s0 + $0x34] sm:$0xf0] }
   0xf   :  { %1902 = vmatpush.bf16.msra.mxu3 %v1755_v9  ;;  %499 = vmatpush.bf16.msra.mxu1 %v1763_v10  ;;  %v1547_v52 = vld [vmem:[%s3001_s0 + $0x120] sm:$0xf]  ;;  %v1750_v53 = vld [vmem:[%s3001_s0 + $0x124] sm:$0xf0]  ;;  %v1719_v54 = vld [vmem:[%s3001_s0 + $0x34] sm:$0xf]  ;;  %v1428_v56 = vor.u32 %v1720_v51, %v1427_v50 }
  0x10   :  { %v1429_v55 = vld [vmem:[%s3001_s0 + $0x38] sm:$0xf0]  ;;  %v1548_v57 = vor.u32 %v1750_v53, %v1547_v52  ;;  %v1772_v59 = vld [vmem:[%s3000_s2 + $0x28] sm:$0xff]  ;;  %v2115_v60 = vld [vmem:[%s3001_s0 + $0x130] sm:$0x11] }
  0x11   :  { %v1432_v58 = vor.u32 %v1719_v54, %v1429_v55  ;;  %v1435_v61 = vld [vmem:[%s3001_s0 + $0x40] sm:$0xf]  ;;  %v1722_v62 = vld [vmem:[%s3001_s0 + $0x44] sm:$0xf0]  ;;  %v210_v63 = vunpack.c.l.b16 %v2115_v60  ;;  %v1721_v0 = vld [vmem:[%s3001_s0 + $0x44] sm:$0xf] }
  0x12   :  { %392 = vmatpush.bf16.msra.mxu0 %v1754_v11  ;;  %v1437_v1 = vld [vmem:[%s3001_s0 + $0x48] sm:$0xf0]  ;;  %v1773_v5 = vld [vmem:[%s3000_s2 + $0x30] sm:$0xff]  ;;  %v1724_v7 = vld [vmem:[%s3001_s0 + $0x54] sm:$0xf0] }
  0x13   :  { %1903 = vmatpush.bf16.msra.mxu3 %v1754_v11  ;;  %500 = vmatpush.bf16.msra.mxu1 %v1762_v12  ;;  %v1440_v4 = vor.u32 %v1721_v0, %v1437_v1  ;;  %v1445_v9 = vld [vmem:[%s3001_s0 + $0x58] sm:$0xf0]  ;;  %v1745_v20 = vld [vmem:[%s3001_s0 + $0x104] sm:$0xf]  ;;  %v1533_v21 = vld [vmem:[%s3001_s0 + $0x108] sm:$0xf0] }
  0x14   :  { %v1525_v11 = vld [vmem:[%s3001_s0 + $0xf8] sm:$0xf0]  ;;  %v1536_v24 = vor.u32 %v1745_v20, %v1533_v21  ;;  %v1775_v25 = vld [vmem:[%s3000_s2 + $0x40] sm:$0xff]  ;;  %v1747_v31 = vld [vmem:[%s3001_s0 + $0x114] sm:$0xf] }
  0x15   :  { %v1461_v30 = vld [vmem:[%s3001_s0 + $0x78] sm:$0xf0]  ;;  %v1730_v40 = vld [vmem:[%s3001_s0 + $0x84] sm:$0xf0]  ;;  %v1729_v41 = vld [vmem:[%s3001_s0 + $0x84] sm:$0xf] }
  0x16   :  { %1694 = vmatmul.msk.bf16.gmra.mxu2 %vm742_vm1, %v1768_v13  ;;  %393 = vmatpush.bf16.msra.mxu0 %v1753_v14  ;;  %v1541_v32 = vld [vmem:[%s3001_s0 + $0x118] sm:$0xf0]  ;;  %v1469_v42 = vld [vmem:[%s3001_s0 + $0x88] sm:$0xf0]  ;;  %v1749_v43 = vld [vmem:[%s3001_s0 + $0x124] sm:$0xf] }
  0x17   :  { %1904 = vmatpush.bf16.msra.mxu3 %v1753_v14  ;;  %501 = vmatpush.bf16.msra.mxu1 %v1761_v15  ;;  %v1544_v35 = vor.u32 %v1747_v31, %v1541_v32  ;;  %v1549_v44 = vld [vmem:[%s3001_s0 + $0x128] sm:$0xf0]  ;;  %v1777_v52 = vld [vmem:[%s3000_s2 + $0x50] sm:$0xff] }
  0x18   :  { %v1784_v21 = vld [vmem:[%s3000_s2 + $0x88] sm:$0xff]  ;;  %v1491_v32 = vld [vmem:[%s3001_s0 + $0xb0] sm:$0xf] }
  0x1a   :  { %394 = vmatpush.bf16.msra.mxu0 %v1752_v16 }
  0x1b   :  { %1905 = vmatpush.bf16.msra.mxu3 %v1752_v16  ;;  %502 = vmatpush.bf16.msra.mxu1 %v1760_v17  ;;  %v1451_v16 = vld [vmem:[%s3001_s0 + $0x60] sm:$0xf] }
  0x1e   :  { %395 = vmatpush.bf16.msra.mxu0 %v1751_v18 }
  0x1f   :  { %1906 = vmatpush.bf16.msra.mxu3 %v1751_v18  ;;  %503 = vmatpush.bf16.msra.mxu1 %v1759_v19  ;;  %v1725_v18 = vld [vmem:[%s3001_s0 + $0x64] sm:$0xf] }
  0x21   :  { %396 = vmatmul.bf16.vlgmr.msra.gmra.mxu0 %v1404_v26 }
  0x22   :  { %471 = vmatmul.bf16.vlgmr.msra.gmra.mxu3 %v1524_v27  ;;  %504 = vmatmul.bf16.vlgmr.msra.gmra.mxu1 %v1408_v28  ;;  %v1459_v27 = vld [vmem:[%s3001_s0 + $0x70] sm:$0xf]  ;;  %v1728_v28 = vld [vmem:[%s3001_s0 + $0x74] sm:$0xf0] }
  0x23   :  { %1907 = vmatpush.bf16.msrb.mxu3 %v1766_v2  ;;  %v1436_v2 = vor.u32 %v1722_v62, %v1435_v61  ;;  %v1460_v33 = vor.u32 %v1728_v28, %v1459_v27  ;;  %v211_v61 = vunpack.c.h.b16 %v2115_v60  ;;  %v1731_v62 = vld [vmem:[%s3001_s0 + $0x94] sm:$0xf]  ;;  %v1778_v60 = vld [vmem:[%s3000_s2 + $0x58] sm:$0xff] }
  0x26   :  { %1695 = vmatmul.msk.bf16.gmra.mxu2 %vm742_vm1, %v1769_v29  ;;  %v1727_v29 = vld [vmem:[%s3001_s0 + $0x74] sm:$0xf] }
  0x27   :  { %1908 = vmatpush.bf16.msrb.mxu3 %v1765_v6  ;;  %v1443_v6 = vld [vmem:[%s3001_s0 + $0x50] sm:$0xf]  ;;  %v1464_v34 = vor.u32 %v1727_v29, %v1461_v30 }
  0x2b   :  { %1909 = vmatpush.bf16.msrb.mxu3 %v1764_v8  ;;  %v1723_v8 = vld [vmem:[%s3001_s0 + $0x54] sm:$0xf] }
  0x2c   :  { %v1448_v13 = vor.u32 %v1723_v8, %v1445_v9 }
  0x2f   :  { %1910 = vmatpush.bf16.msrb.mxu3 %v1763_v10  ;;  %v1743_v10 = vld [vmem:[%s3001_s0 + $0xf4] sm:$0xf] }
  0x30   :  { %v1528_v14 = vor.u32 %v1743_v10, %v1525_v11 }
  0x31   :  { %401 = vmatmul.bf16.gmra.mxu0 %v1412_v36 }
  0x32   :  { %476 = vmatmul.bf16.gmra.mxu3 %v1532_v37  ;;  %509 = vmatmul.bf16.gmra.mxu1 %v1416_v38  ;;  %v1776_v37 = vld [vmem:[%s3000_s2 + $0x48] sm:$0xff] }
  0x33   :  { %1911 = vmatpush.bf16.msrb.mxu3 %v1762_v12  ;;  %v1444_v12 = vor.u32 %v1724_v7, %v1443_v6 }
  0x36   :  { %1696 = vmatmul.msk.bf16.gmra.mxu2 %vm742_vm1, %v1770_v39  ;;  %v1467_v39 = vld [vmem:[%s3001_s0 + $0x80] sm:$0xf] }
  0x37   :  { %1912 = vmatpush.bf16.msrb.mxu3 %v1761_v15  ;;  %v1774_v15 = vld [vmem:[%s3000_s2 + $0x38] sm:$0xff]  ;;  %v1468_v45 = vor.u32 %v1730_v40, %v1467_v39 }
  0x3b   :  { %1913 = vmatpush.bf16.msrb.mxu3 %v1760_v17  ;;  %v1726_v17 = vld [vmem:[%s3001_s0 + $0x64] sm:$0xf0] }
  0x3c   :  { %v1452_v22 = vor.u32 %v1726_v17, %v1451_v16  ;;  %v1485_v16 = vld [vmem:[%s3001_s0 + $0xa8] sm:$0xf0] }
  0x3f   :  { %1914 = vmatpush.bf16.msrb.mxu3 %v1759_v19  ;;  %v1453_v19 = vld [vmem:[%s3001_s0 + $0x68] sm:$0xf0] }
  0x40   :  { %v1456_v23 = vor.u32 %v1725_v18, %v1453_v19 }
  0x41   :  { %406 = vmatmul.bf16.gmra.mxu0 %v1420_v46 }
  0x42   :  { %481 = vmatmul.bf16.gmra.mxu3 %v1540_v47  ;;  %514 = vmatmul.bf16.gmra.mxu1 %v1424_v48  ;;  %v1472_v47 = vor.u32 %v1729_v41, %v1469_v42  ;;  %v1552_v48 = vor.u32 %v1749_v43, %v1549_v44  ;;  %v1785_v42 = vld [vmem:[%s3000_s2 + $0x90] sm:$0xff] }
  0x43   :  { %1915 = vmatpush.bf16.msra.mxu3 %v1970_v3  ;;  %v250_v3 = vpack.c.b16 %v210_v63, %v210_v63  ;;  %v1477_v63 = vld [vmem:[%s3001_s0 + $0x98] sm:$0xf0] }
  0x46   :  { %1697 = vmatmul.msk.bf16.gmra.mxu2 %vm742_vm1, %v1771_v49 }
  0x51   :  { %411 = vmatmul.bf16.gmra.mxu0 %v1428_v56 }
  0x52   :  { %486 = vmatmul.bf16.gmra.mxu3 %v1548_v57  ;;  %519 = vmatmul.bf16.gmra.mxu1 %v1432_v58  ;;  %v1475_v58 = vld [vmem:[%s3001_s0 + $0x90] sm:$0xf] }
  0x56   :  { %1698 = vmatmul.msk.bf16.gmra.mxu2 %vm742_vm1, %v1772_v59  ;;  %v1732_v59 = vld [vmem:[%s3001_s0 + $0x94] sm:$0xf0] }
  0x57   :  { %v1476_v1 = vor.u32 %v1732_v59, %v1475_v58  ;;  %v1499_v58 = vld [vmem:[%s3001_s0 + $0xc0] sm:$0xf]  ;;  %v1738_v59 = vld [vmem:[%s3001_s0 + $0xc4] sm:$0xf0] }
  0x61   :  { %416 = vmatmul.bf16.gmra.mxu0 %v1436_v2 }
  0x62   :  { %491 = vmatmul.bf16.gmra.mxu3 %v250_v3  ;;  %524 = vmatmul.bf16.gmra.mxu1 %v1440_v4  ;;  %v1480_v3 = vor.u32 %v1731_v62, %v1477_v63  ;;  %v251_v4 = vpack.c.b16 %v211_v61, %v211_v61  ;;  %v1737_v62 = vld [vmem:[%s3001_s0 + $0xc4] sm:$0xf]  ;;  %v1501_v63 = vld [vmem:[%s3001_s0 + $0xc8] sm:$0xf0] }
  0x66   :  { %1699 = vmatmul.msk.bf16.gmra.mxu2 %vm742_vm1, %v1773_v5 }
  0x71   :  { %421 = vmatmul.bf16.gmra.mxu0 %v1444_v12 }
  0x72   :  { %529 = vmatmul.bf16.gmra.mxu1 %v1448_v13  ;;  %579 = vmatmul.bf16.vlgmr.msrb.gmra.mxu3 %v1528_v14  ;;  %v1483_v13 = vld [vmem:[%s3001_s0 + $0xa0] sm:$0xf]  ;;  %v1734_v14 = vld [vmem:[%s3001_s0 + $0xa4] sm:$0xf0] }
  0x73   :  { %v1484_v18 = vor.u32 %v1734_v14, %v1483_v13  ;;  %v1781_v13 = vld [vmem:[%s3000_s2 + $0x70] sm:$0xff] }
  0x76   :  { %1700 = vmatmul.msk.bf16.gmra.mxu2 %vm742_vm1, %v1774_v15  ;;  %v1733_v15 = vld [vmem:[%s3001_s0 + $0xa4] sm:$0xf] }
  0x77   :  { %v1488_v20 = vor.u32 %v1733_v15, %v1485_v16 }
  0x81   :  { %426 = vmatmul.bf16.gmra.mxu0 %v1452_v22 }
  0x82   :  { %534 = vmatmul.bf16.gmra.mxu1 %v1456_v23  ;;  %584 = vmatmul.bf16.gmra.mxu3 %v1536_v24 }
  0x86   :  { %1701 = vmatmul.msk.bf16.gmra.mxu2 %vm742_vm1, %v1775_v25  ;;  %v1779_v25 = vld [vmem:[%s3000_s2 + $0x60] sm:$0xff] }
  0x89   :  { %v2178_v26 = vpop.f32.mrf.mxu2 }
  0x8a   :  { %3046 = vst [vmem:[#allocation2_spill] sm:$0xff] %v2178_v26 }
  0x91   :  { %v2198_v36 = vpop.f32.mrf.mxu2  ;;  %431 = vmatmul.bf16.gmra.mxu0 %v1460_v33  ;;  %v1736_v33 = vld [vmem:[%s3001_s0 + $0xb4] sm:$0xf0] }
  0x92   :  { %3047 = vst [vmem:[#allocation3_spill] sm:$0xff] %v2198_v36  ;;  %539 = vmatmul.bf16.gmra.mxu1 %v1464_v34  ;;  %589 = vmatmul.bf16.gmra.mxu3 %v1544_v35  ;;  %v1735_v34 = vld [vmem:[%s3001_s0 + $0xb4] sm:$0xf]  ;;  %v1493_v35 = vld [vmem:[%s3001_s0 + $0xb8] sm:$0xf0]  ;;  %v1492_v39 = vor.u32 %v1736_v33, %v1491_v32 }
  0x93   :  { %v1496_v41 = vor.u32 %v1735_v34, %v1493_v35 }
  0x96   :  { %1702 = vmatmul.msk.bf16.gmra.mxu2 %vm742_vm1, %v1776_v37 }
  0x99   :  { %v2204_v38 = vpop.f32.mrf.mxu2 }
  0x9a   :  { %3048 = vst [vmem:[#allocation4_spill] sm:$0xff] %v2204_v38 }
  0x9e   :  { %v397_v46 = vpop.f32.mrf.mxu0 }
  0x9f   :  { %v505_v49 = vpop.f32.mrf.mxu1 }
  0xa0   :  { %v2224_v50 = vadd.f32 %v505_v49, %v397_v46  ;;  %v1780_v46 = vld [vmem:[%s3000_s2 + $0x68] sm:$0xff] }
  0xa1   :  { %v2226_v51 = vpop.f32.mrf.mxu2  ;;  %436 = vmatmul.bf16.gmra.mxu0 %v1468_v45 }
  0xa2   :  { %3049 = vst [vmem:[#allocation5_spill] sm:$0xff] %v2224_v50  ;;  %544 = vmatmul.bf16.gmra.mxu1 %v1472_v47  ;;  %594 = vmatmul.bf16.gmra.mxu3 %v1552_v48 }
  0xa3   :  { %3050 = vst [vmem:[#allocation6_spill] sm:$0xff] %v2226_v51 }
  0xa5   :  { %v2231_v53 = vpop.f32.mrf.mxu3 }
  0xa6   :  { %3051 = vst [vmem:[#allocation7_spill] sm:$0xff] %v2231_v53  ;;  %1703 = vmatmul.msk.bf16.gmra.mxu2 %vm742_vm1, %v1777_v52  ;;  %v399_v54 = vpop.f32.mrf.mxu0  ;;  %v642_v52 = vld [vmem:[%s3000_s2 + $0x98] sm:$0x1] }
  0xa7   :  { %v507_v55 = vpop.f32.mrf.mxu1  ;;  %v721_v61 = vunpack.c.l.b16 %v642_v52  ;;  %v1742_v52 = vld [vmem:[%s3001_s0 + $0xe4] sm:$0xf0] }
  0xa8   :  { %v2234_v56 = vadd.f32 %v507_v55, %v399_v54 }
  0xa9   :  { %v2236_v57 = vpop.f32.mrf.mxu2 }
  0xaa   :  { %3052 = vst [vmem:[#allocation8_spill] sm:$0xff] %v2234_v56 }
  0xab   :  { %3053 = vst [vmem:[#allocation9_spill] sm:$0xff] %v2236_v57 }
  0xad   :  { %v2251_v0 = vpop.f32.mrf.mxu3 }
  0xae   :  { %3054 = vst [vmem:[#allocation10_spill] sm:$0xff] %v2251_v0  ;;  %v402_v2 = vpop.f32.mrf.mxu0 }
  0xaf   :  { %v510_v5 = vpop.f32.mrf.mxu1 }
  0xb0   :  { %v2253_v6 = vadd.f32 %v510_v5, %v402_v2  ;;  %v1500_v2 = vor.u32 %v1738_v59, %v1499_v58  ;;  %v741_v5 = vpack.c.b16 %v721_v61, %v721_v61  ;;  %v1741_v58 = vld [vmem:[%s3001_s0 + $0xe4] sm:$0xf]  ;;  %v1517_v59 = vld [vmem:[%s3001_s0 + $0xe8] sm:$0xf0] }
  0xb1   :  { %v2255_v7 = vpop.f32.mrf.mxu2  ;;  %441 = vmatmul.bf16.gmra.mxu0 %v1476_v1 }
  0xb2   :  { %3055 = vst [vmem:[#allocation11_spill] sm:$0xff] %v2253_v6  ;;  %549 = vmatmul.bf16.gmra.mxu1 %v1480_v3  ;;  %599 = vmatmul.bf16.gmra.mxu3 %v251_v4  ;;  %v1504_v4 = vor.u32 %v1737_v62, %v1501_v63 }
  0xb3   :  { %3056 = vst [vmem:[#allocation12_spill] sm:$0xff] %v2255_v7 }
  0xb5   :  { %v2260_v8 = vpop.f32.mrf.mxu3 }
  0xb6   :  { %3057 = vst [vmem:[#allocation13_spill] sm:$0xff] %v2260_v8  ;;  %1704 = vmatmul.msk.bf16.gmra.mxu2 %vm742_vm1, %v1778_v60  ;;  %v404_v9 = vpop.f32.mrf.mxu0 }
  0xb7   :  { %v512_v10 = vpop.f32.mrf.mxu1 }
  0xb8   :  { %v2263_v11 = vadd.f32 %v512_v10, %v404_v9 }
  0xb9   :  { %v2265_v12 = vpop.f32.mrf.mxu2 }
  0xba   :  { %3058 = vst [vmem:[#allocation14_spill] sm:$0xff] %v2265_v12 }
  0xbd   :  { %v2279_v17 = vpop.f32.mrf.mxu3 }
  0xbe   :  { %3059 = vst [vmem:[#allocation15_spill] sm:$0xff] %v2279_v17  ;;  %v407_v19 = vpop.f32.mrf.mxu0 }
  0xbf   :  { %v515_v22 = vpop.f32.mrf.mxu1 }
  0xc0   :  { %v2284_v23 = vadd.f32 %v515_v22, %v407_v19  ;;  %v1739_v22 = vld [vmem:[%s3001_s0 + $0xd4] sm:$0xf] }
  0xc1   :  { %v2286_v24 = vpop.f32.mrf.mxu2  ;;  %446 = vmatmul.bf16.gmra.mxu0 %v1484_v18 }
  0xc2   :  { %3060 = vst [vmem:[#allocation16_spill] sm:$0xff] %v2284_v23  ;;  %554 = vmatmul.bf16.gmra.mxu1 %v1488_v20  ;;  %1710 = vmatmul.msk.bf16.vlgmr.msra.gmra.mxu3 %vm742_vm1, %v1784_v21  ;;  %v1507_v20 = vld [vmem:[%s3001_s0 + $0xd0] sm:$0xf]  ;;  %v1740_v21 = vld [vmem:[%s3001_s0 + $0xd4] sm:$0xf0]  ;;  %v919_v8 = vmul.f32 %v2236_v57, %v2284_v23 }
  0xc3   :  { %3061 = vst [vmem:[#allocation17_spill] sm:$0xff] %v2286_v24 }
  0xc5   :  { %v2292_v27 = vpop.f32.mrf.mxu3 }
  0xc6   :  { %3062 = vst [vmem:[#allocation18_spill] sm:$0xff] %v2292_v27  ;;  %1705 = vmatmul.msk.bf16.gmra.mxu2 %vm742_vm1, %v1779_v25  ;;  %v409_v28 = vpop.f32.mrf.mxu0  ;;  %v1509_v25 = vld [vmem:[%s3001_s0 + $0xd8] sm:$0xf0]  ;;  %v917_v27 = vmul.f32 %v2204_v38, %v2253_v6 }
  0xc7   :  { %v517_v29 = vpop.f32.mrf.mxu1  ;;  %v1512_v33 = vor.u32 %v1739_v22, %v1509_v25 }
  0xc8   :  { %v2295_v30 = vadd.f32 %v517_v29, %v409_v28  ;;  %v1508_v29 = vor.u32 %v1740_v21, %v1507_v20 }
  0xc9   :  { %v2297_v31 = vpop.f32.mrf.mxu2 }
  0xca   :  { %3063 = vst [vmem:[#allocation19_spill] sm:$0xff] %v2297_v31  ;;  %v920_v0 = vmul.f32 %v2255_v7, %v2295_v30 }
  0xcd   :  { %v2311_v37 = vpop.f32.mrf.mxu3 }
  0xce   :  { %3064 = vst [vmem:[#allocation20_spill] sm:$0xff] %v2311_v37  ;;  %v412_v40 = vpop.f32.mrf.mxu0 }
  0xcf   :  { %v520_v43 = vpop.f32.mrf.mxu1 }
  0xd0   :  { %v2316_v44 = vadd.f32 %v520_v43, %v412_v40  ;;  %v1782_v40 = vld [vmem:[%s3000_s2 + $0x78] sm:$0xff] }
  0xd1   :  { %v2318_v45 = vpop.f32.mrf.mxu2  ;;  %451 = vmatmul.bf16.gmra.mxu0 %v1492_v39 }
  0xd2   :  { %3065 = vst [vmem:[#allocation21_spill] sm:$0xff] %v2318_v45  ;;  %559 = vmatmul.bf16.gmra.mxu1 %v1496_v41  ;;  %1711 = vmatmul.msk.bf16.gmra.mxu3 %vm742_vm1, %v1785_v42 }
  0xd5   :  { %v2324_v47 = vpop.f32.mrf.mxu3 }
  0xd6   :  { %3066 = vst [vmem:[#allocation22_spill] sm:$0xff] %v2324_v47  ;;  %1706 = vmatmul.msk.bf16.gmra.mxu2 %vm742_vm1, %v1780_v46  ;;  %v414_v48 = vpop.f32.mrf.mxu0 }
  0xd7   :  { %v522_v49 = vpop.f32.mrf.mxu1 }
  0xd8   :  { %v2330_v54 = vadd.f32 %v522_v49, %v414_v48  ;;  %v1515_v49 = vld [vmem:[%s3001_s0 + $0xe0] sm:$0xf]  ;;  %s1922_s0 = smov 32  }
  0xd9   :  { %v2332_v55 = vpop.f32.mrf.mxu2  ;;  %v1516_v62 = vor.u32 %v1742_v52, %v1515_v49 }
  0xda   :  { %3067 = vst [vmem:[#allocation23_spill] sm:$0xff] %v2332_v55  ;;  %v922_v7 = vmul.f32 %v2286_v24, %v2330_v54 }
  0xdd   :  { %v2346_v1 = vpop.f32.mrf.mxu3 }
  0xde   :  { %3068 = vst [vmem:[#allocation24_spill] sm:$0xff] %v2346_v1  ;;  %v417_v3 = vpop.f32.mrf.mxu0 }
  0xdf   :  { %v525_v60 = vpop.f32.mrf.mxu1 }
  0xe0   :  { %v2348_v9 = vadd.f32 %v525_v60, %v417_v3  ;;  %v1783_v60 = vld [vmem:[%s3000_s2 + $0x80] sm:$0xff]  ;;  %s1923_s2 = smov 64  }
  0xe1   :  { %v2350_v10 = vpop.f32.mrf.mxu2  ;;  %456 = vmatmul.bf16.gmra.mxu0 %v1500_v2  ;;  %v1520_v2 = vor.u32 %v1741_v58, %v1517_v59 }
  0xe2   :  { %564 = vmatmul.bf16.gmra.mxu1 %v1504_v4  ;;  %1712 = vmatmul.msk.bf16.gmra.mxu3 %vm742_vm1, %v741_v5 }
  0xe5   :  { %v2356_v14 = vpop.f32.mrf.mxu3 }
  0xe6   :  { %3069 = vst [vmem:[#allocation25_spill] sm:$0xff] %v2356_v14  ;;  %1707 = vmatmul.msk.bf16.gmra.mxu2 %vm742_vm1, %v1781_v13  ;;  %v419_v15 = vpop.f32.mrf.mxu0 }
  0xe7   :  { %v527_v16 = vpop.f32.mrf.mxu1 }
  0xe8   :  { %v2359_v18 = vadd.f32 %v527_v16, %v419_v15 }
  0xe9   :  { %v2361_v19 = vpop.f32.mrf.mxu2 }
  0xea   :  { %3070 = vst [vmem:[#allocation26_spill] sm:$0xff] %v2359_v18 }
  0xeb   :  { %3071 = vst [vmem:[#allocation27_spill] sm:$0xff] %v2361_v19 }
  0xed   :  { %v494_v28 = vpop.f32.mrf.mxu3 }
  0xee   :  { %v422_v32 = vpop.f32.mrf.mxu0 }
  0xef   :  { %v530_v34 = vpop.f32.mrf.mxu1 }
  0xf0   :  { %v2375_v35 = vadd.f32 %v530_v34, %v422_v32 }
  0xf1   :  { %v2377_v39 = vpop.f32.mrf.mxu2  ;;  %461 = vmatmul.bf16.gmra.mxu0 %v1508_v29 }
  0xf2   :  { %3072 = vst [vmem:[#allocation28_spill] sm:$0xff] %v2377_v39  ;;  %569 = vmatmul.bf16.gmra.mxu1 %v1512_v33 }
  0xf5   :  { %v2382_v41 = vpop.f32.mrf.mxu3 }
  0xf6   :  { %3073 = vst [vmem:[#allocation29_spill] sm:$0xff] %v2382_v41  ;;  %1708 = vmatmul.msk.bf16.gmra.mxu2 %vm742_vm1, %v1782_v40  ;;  %v424_v42 = vpop.f32.mrf.mxu0 }
  0xf7   :  { %v532_v43 = vpop.f32.mrf.mxu1 }
  0xf8   :  { %v2385_v46 = vadd.f32 %v532_v43, %v424_v42 }
  0xf9   :  { %v2387_v48 = vpop.f32.mrf.mxu2 }
  0xfa   :  { %3074 = vst [vmem:[#allocation30_spill] sm:$0xff] %v2387_v48 }
  0xfd   :  { %v2401_v61 = vpop.f32.mrf.mxu3 }
  0xfe   :  { %3075 = vst [vmem:[#allocation31_spill] sm:$0xff] %v2401_v61  ;;  %v427_v63 = vpop.f32.mrf.mxu0 }
  0xff   :  { %v535_v3 = vpop.f32.mrf.mxu1 }
 0x100   :  { %v2403_v4 = vadd.f32 %v535_v3, %v427_v63 }
 0x101   :  { %v2405_v5 = vpop.f32.mrf.mxu2  ;;  %466 = vmatmul.bf16.gmra.mxu0 %v1516_v62 }
 0x102   :  { %574 = vmatmul.bf16.gmra.mxu1 %v1520_v2 }
 0x105   :  { %v2410_v13 = vpop.f32.mrf.mxu3 }
 0x106   :  { %3076 = vst [vmem:[#allocation32_spill] sm:$0xff] %v2410_v13  ;;  %1709 = vmatmul.msk.bf16.gmra.mxu2 %vm742_vm1, %v1783_v60  ;;  %v429_v15 = vpop.f32.mrf.mxu0  ;;  %v918_v13 = vmul.f32 %v2226_v51, %v2263_v11 }
 0x107   :  { %v537_v16 = vpop.f32.mrf.mxu1 }
 0x108   :  { %v2413_v20 = vadd.f32 %v537_v16, %v429_v15  ;;  %v1002_v38 = vmul.f32 %v918_v13, %v2263_v11 }
 0x109   :  { %v2415_v21 = vpop.f32.mrf.mxu2 }
 0x10d   :  { %v2417_v22 = vpop.f32.mrf.mxu3 }
 0x10e   :  { %3077 = vst [vmem:[#allocation33_spill] sm:$0xff] %v2417_v22  ;;  %v432_v25 = vpop.f32.mrf.mxu0 }
 0x10f   :  { %v540_v28 = vpop.f32.mrf.mxu1 }
 0x110   :  { %v2419_v29 = vadd.f32 %v540_v28, %v432_v25 }
 0x111   :  { %v2421_v32 = vpop.f32.mrf.mxu2 }
 0x112   :  { %3078 = vst [vmem:[#allocation34_spill] sm:$0xff] %v2421_v32 }
 0x115   :  { %v2423_v33 = vpop.f32.mrf.mxu3 }
 0x116   :  { %3079 = vst [vmem:[#allocation35_spill] sm:$0xff] %v2423_v33  ;;  %v434_v34 = vpop.f32.mrf.mxu0  ;;  %v915_v33 = vmul.f32 %v2178_v26, %v2224_v50 }
 0x117   :  { %v542_v40 = vpop.f32.mrf.mxu1 }
 0x118   :  { %v2425_v42 = vadd.f32 %v542_v40, %v434_v34 }
 0x119   :  { %v2427_v43 = vpop.f32.mrf.mxu2 }
 0x11a   :  { %3080 = vst [vmem:[#allocation36_spill] sm:$0xff] %v2427_v43 }
 0x11d   :  { %v2429_v49 = vpop.f32.mrf.mxu3 }
 0x11e   :  { %3081 = vst [vmem:[#allocation37_spill] sm:$0xff] %v2429_v49  ;;  %v437_v52 = vpop.f32.mrf.mxu0  ;;  %v916_v49 = vmul.f32 %v2198_v36, %v2234_v56  ;;  %v999_v36 = vmul.f32 %v915_v33, %v2224_v50  ;;  %v1003_v50 = vmul.f32 %v919_v8, %v2284_v23  ;;  %v1006_v23 = vmul.f32 %v922_v7, %v2330_v54 }
 0x11f   :  { %v545_v58 = vpop.f32.mrf.mxu1 }
 0x120   :  { %v2431_v59 = vadd.f32 %v545_v58, %v437_v52  ;;  %v1000_v17 = vmul.f32 %v916_v49, %v2234_v56  ;;  %v954_v26 = vadd.f32 %v916_v49, %v915_v33  ;;  %v1004_v49 = vmul.f32 %v920_v0, %v2295_v30 }
 0x121   :  { %v2433_v62 = vpop.f32.mrf.mxu2 }
 0x122   :  { %3082 = vst [vmem:[#allocation38_spill] sm:$0xff] %v2433_v62  ;;  %v1038_v61 = vadd.f32 %v1000_v17, %v999_v36  ;;  %v955_v56 = vadd.f32 %v954_v26, %v917_v27 }
 0x124   :  { %v956_v33 = vadd.f32 %v955_v56, %v918_v13  ;;  %v924_v56 = vmul.f32 %v2318_v45, %v2359_v18 }
 0x125   :  { %v2435_v63 = vpop.f32.mrf.mxu3 }
 0x126   :  { %3083 = vst [vmem:[#allocation39_spill] sm:$0xff] %v2435_v63  ;;  %v439_v2 = vpop.f32.mrf.mxu0  ;;  %v957_v26 = vadd.f32 %v956_v33, %v919_v8  ;;  %v925_v8 = vmul.f32 %v2332_v55, %v2375_v35 }
 0x127   :  { %v547_v3 = vpop.f32.mrf.mxu1 }
 0x128   :  { %v2437_v60 = vadd.f32 %v547_v3, %v439_v2  ;;  %v958_v57 = vadd.f32 %v957_v26, %v920_v0  ;;  %v1008_v26 = vmul.f32 %v924_v56, %v2359_v18 }
 0x129   :  { %v2439_v15 = vpop.f32.mrf.mxu2 }
 0x12a   :  { %3084 = vst [vmem:[#allocation40_spill] sm:$0xff] %v2439_v15 }
 0x12d   :  { %v2441_v16 = vpop.f32.mrf.mxu3 }
 0x12e   :  { %3085 = vst [vmem:[#allocation41_spill] sm:$0xff] %v2441_v16  ;;  %v442_v25 = vpop.f32.mrf.mxu0 }
 0x12f   :  { %v550_v28 = vpop.f32.mrf.mxu1 }
 0x130   :  { %v2443_v34 = vadd.f32 %v550_v28, %v442_v25 }
 0x131   :  { %v2445_v40 = vpop.f32.mrf.mxu2 }
 0x132   :  { %3086 = vst [vmem:[#allocation42_spill] sm:$0xff] %v2445_v40 }
 0x135   :  { %v2447_v52 = vpop.f32.mrf.mxu3 }
 0x136   :  { %3087 = vst [vmem:[#allocation43_spill] sm:$0xff] %v2447_v52  ;;  %v2449_v58 = vpop.f32.mrf.mxu0 }
 0x137   :  { %v2451_v14 = vpop.f32.mrf.mxu1 }
 0x139   :  { %v2453_v1 = vpop.f32.mrf.mxu2 }
 0x13a   :  { %3088 = vst [vmem:[#allocation44_spill] sm:$0xff] %v2453_v1 }
 0x13d   :  { %v602_v2 = vpop.f32.mrf.mxu3 }
 0x13e   :  { %v2455_v3 = vpop.f32.mrf.mxu0 }
 0x13f   :  { %v2457_v63 = vpop.f32.mrf.mxu1 }
 0x141   :  { %v2459_v16 = vpop.f32.mrf.mxu2 }
 0x142   :  { %3089 = vst [vmem:[#allocation45_spill] sm:$0xff] %v2459_v16 }
 0x145   :  { %v2461_v47 = vpop.f32.mrf.mxu3 }
 0x146   :  { %3090 = vst [vmem:[#allocation46_spill] sm:$0xff] %v2461_v47  ;;  %v2463_v25 = vpop.f32.mrf.mxu0 }
 0x147   :  { %v2465_v28 = vpop.f32.mrf.mxu1 }
 0x149   :  { %v2467_v52 = vpop.f32.mrf.mxu2 }
 0x14a   :  { %3091 = vst [vmem:[#allocation47_spill] sm:$0xff] %v2467_v52 }
 0x14d   :  { %v2471_v37 = vpop.f32.mrf.mxu3 }
 0x14e   :  { %3092 = vst [vmem:[#allocation48_spill] sm:$0xff] %v2471_v37  ;;  %v2473_v2 = vpop.f32.mrf.mxu0  ;;  %v1001_v37 = vmul.f32 %v917_v27, %v2253_v6  ;;  %v921_v6 = vmul.f32 %v2265_v12, %v2316_v44 }
 0x14f   :  { %v2479_v47 = vpop.f32.mrf.mxu1 }
 0x150   :  { %v1039_v51 = vadd.f32 %v1038_v61, %v1001_v37  ;;  %v1005_v37 = vmul.f32 %v921_v6, %v2316_v44  ;;  %v923_v61 = vmul.f32 %v2297_v31, %v2348_v9 }
 0x151   :  { %v2481_v22 = vpop.f32.mrf.mxu2 }
 0x152   :  { %3093 = vst [vmem:[#allocation49_spill] sm:$0xff] %v2481_v22  ;;  %v1040_v17 = vadd.f32 %v1039_v51, %v1002_v38  ;;  %v959_v51 = vadd.f32 %v958_v57, %v921_v6 }
 0x154   :  { %v1041_v27 = vadd.f32 %v1040_v17, %v1003_v50  ;;  %v1007_v50 = vmul.f32 %v923_v61, %v2348_v9  ;;  %v960_v0 = vadd.f32 %v959_v51, %v922_v7  ;;  %v928_v7 = vmul.f32 %v2377_v39, %v2413_v20 }
 0x155   :  { %v2493_v41 = vpop.f32.mrf.mxu3 }
 0x156   :  { %3094 = vst [vmem:[#allocation50_spill] sm:$0xff] %v2493_v41  ;;  %v2495_v53 = vpop.f32.mrf.mxu0  ;;  %v1042_v12 = vadd.f32 %v1041_v27, %v1004_v49  ;;  %v926_v27 = vmul.f32 %v2350_v10, %v2385_v46  ;;  %v961_v57 = vadd.f32 %v960_v0, %v923_v61 }
 0x157   :  { %v2500_v22 = vpop.f32.mrf.mxu1 }
 0x158   :  { %v1043_v24 = vadd.f32 %v1042_v12, %v1005_v37  ;;  %v1009_v12 = vmul.f32 %v925_v8, %v2375_v35  ;;  %v927_v37 = vmul.f32 %v2361_v19, %v2403_v4  ;;  %v962_v45 = vadd.f32 %v961_v57, %v924_v56 }
 0x159   :  { %v2502_v36 = vpop.f32.mrf.mxu2  ;;  %v1010_v31 = vmul.f32 %v926_v27, %v2385_v46  ;;  %v930_v57 = vmul.f32 %v2405_v5, %v2425_v42 }
 0x15a   :  { %3095 = vst [vmem:[#allocation51_spill] sm:$0xff] %v2502_v36  ;;  %v1044_v49 = vadd.f32 %v1043_v24, %v1006_v23  ;;  %v963_v24 = vadd.f32 %v962_v45, %v925_v8  ;;  %v1011_v61 = vmul.f32 %v927_v37, %v2403_v4 }
 0x15c   :  { %v1045_v6 = vadd.f32 %v1044_v49, %v1007_v50  ;;  %v929_v50 = vmul.f32 %v2387_v48, %v2419_v29  ;;  %v964_v49 = vadd.f32 %v963_v24, %v926_v27  ;;  %v1014_v48 = vmul.f32 %v930_v57, %v2425_v42 }
 0x15d   :  { %v2513_v38 = vpop.f32.mrf.mxu3  ;;  %v932_v27 = vmul.f32 %v2421_v32, %v2437_v60 }
 0x15e   :  { %3096 = vst [vmem:[#allocation52_spill] sm:$0xff] %v2513_v38  ;;  %v2515_v13 = vpop.f32.mrf.mxu0  ;;  %v1046_v55 = vadd.f32 %v1045_v6, %v1008_v26  ;;  %v1012_v26 = vmul.f32 %v928_v7, %v2413_v20  ;;  %v965_v6 = vadd.f32 %v964_v49, %v927_v37  ;;  %v1013_v45 = vmul.f32 %v929_v50, %v2419_v29 }
 0x15f   :  { %v2520_v33 = vpop.f32.mrf.mxu1 }
 0x160   :  { %v1047_v18 = vadd.f32 %v1046_v55, %v1009_v12  ;;  %v931_v55 = vmul.f32 %v2415_v21, %v2431_v59  ;;  %v966_v8 = vadd.f32 %v965_v6, %v928_v7 }
 0x161   :  { %v2522_v17 = vpop.f32.mrf.mxu2 }
 0x162   :  { %3097 = vst [vmem:[#allocation53_spill] sm:$0xff] %v2522_v17  ;;  %v1048_v56 = vadd.f32 %v1047_v18, %v1010_v31  ;;  %v2551_v31 = vadd.f32 %v2451_v14, %v2449_v58  ;;  %v967_v24 = vadd.f32 %v966_v8, %v929_v50  ;;  %v1015_v49 = vmul.f32 %v931_v55, %v2431_v59 }
 0x163   :  { %v1016_v14 = vmul.f32 %v932_v27, %v2437_v60  ;;  %v2567_v50 = vadd.f32 %v2465_v28, %v2463_v25 }
 0x164   :  { %v1049_v39 = vadd.f32 %v1048_v56, %v1011_v61  ;;  %v933_v56 = vmul.f32 %v2427_v43, %v2443_v34  ;;  %v934_v58 = vmul.f32 %v2433_v62, %v2551_v31 }
 0x165   :  { %v2533_v23 = vpop.f32.mrf.mxu3 }
 0x166   :  { %3098 = vst [vmem:[#allocation54_spill] sm:$0xff] %v2533_v23  ;;  %v459_v51 = vpop.f32.mrf.mxu0  ;;  %v1050_v12 = vadd.f32 %v1049_v39, %v1012_v26  ;;  %v2558_v39 = vadd.f32 %v2457_v63, %v2455_v3  ;;  %v968_v26 = vadd.f32 %v967_v24, %v930_v57  ;;  %v2574_v3 = vadd.f32 %v2479_v47, %v2473_v2 }
 0x167   :  { %v567_v0 = vpop.f32.mrf.mxu1  ;;  %v936_v24 = vmul.f32 %v2445_v40, %v2567_v50 }
 0x168   :  { %v1051_v61 = vadd.f32 %v1050_v12, %v1013_v45  ;;  %v969_v45 = vadd.f32 %v968_v26, %v931_v55  ;;  %v1017_v12 = vmul.f32 %v933_v56, %v2443_v34  ;;  %v935_v63 = vmul.f32 %v2439_v15, %v2558_v39 }
 0x169   :  { %v2538_v19 = vpop.f32.mrf.mxu2  ;;  %v937_v47 = vmul.f32 %v2453_v1, %v2574_v3 }
 0x16a   :  { %3099 = vst [vmem:[#allocation55_spill] sm:$0xff] %v2538_v19  ;;  %v1052_v32 = vadd.f32 %v1051_v61, %v1014_v48  ;;  %v970_v48 = vadd.f32 %v969_v45, %v932_v27  ;;  %v1019_v61 = vmul.f32 %v935_v63, %v2558_v39  ;;  %v2595_v45 = vadd.f32 %v567_v0, %v459_v51 }
 0x16c   :  { %v1053_v8 = vadd.f32 %v1052_v32, %v1015_v49  ;;  %v971_v25 = vadd.f32 %v970_v48, %v933_v56  ;;  %v2581_v32 = vadd.f32 %v2500_v22, %v2495_v53  ;;  %v2588_v49 = vadd.f32 %v2520_v33, %v2515_v13 }
 0x16d   :  { %v913_v18 = vpop.f32.mrf.mxu3 }
 0x16e   :  { %v462_v37 = vpop.f32.mrf.mxu0  ;;  %v1054_v57 = vadd.f32 %v1053_v8, %v1016_v14  ;;  %v1018_v18 = vmul.f32 %v934_v58, %v2551_v31  ;;  %v972_v27 = vadd.f32 %v971_v25, %v934_v58  ;;  %v1020_v14 = vmul.f32 %v936_v24, %v2567_v50 }
 0x16f   :  { %v570_v7 = vpop.f32.mrf.mxu1  ;;  %v938_v22 = vmul.f32 %v2459_v16, %v2581_v32  ;;  %v939_v58 = vmul.f32 %v2467_v52, %v2588_v49 }
 0x170   :  { %v1055_v55 = vadd.f32 %v1054_v57, %v1017_v12  ;;  %v973_v53 = vadd.f32 %v972_v27, %v935_v63  ;;  %v1021_v12 = vmul.f32 %v937_v47, %v2574_v3  ;;  %v2600_v13 = vadd.f32 %v570_v7, %v462_v37  ;;  %v3102_v63 = vld [vmem:[#allocation49_spill] sm:$0xff] }
 0x171   :  { %v2560_v6 = vpop.f32.mrf.mxu2  ;;  %v940_v25 = vmul.f32 %v3102_v63, %v2595_v45  ;;  %v3122_v63 = vld [vmem:[#allocation24_spill] sm:$0xff] }
 0x172   :  { %3100 = vst [vmem:[#allocation56_spill] sm:$0xff] %v2560_v6  ;;  %v1056_v56 = vadd.f32 %v1055_v55, %v1018_v18  ;;  %v974_v48 = vadd.f32 %v973_v53, %v936_v24  ;;  %v1022_v18 = vmul.f32 %v938_v22, %v2581_v32  ;;  %v1023_v24 = vmul.f32 %v939_v58, %v2588_v49 }
 0x173   :  { %v1024_v53 = vmul.f32 %v940_v25, %v2595_v45 }
 0x174   :  { %v1057_v8 = vadd.f32 %v1056_v56, %v1019_v61  ;;  %v975_v57 = vadd.f32 %v974_v48, %v937_v47  ;;  %v941_v56 = vmul.f32 %v2502_v36, %v2600_v13 }
 0x176   :  { %v464_v28 = vpop.f32.mrf.mxu0  ;;  %v1058_v33 = vadd.f32 %v1057_v8, %v1020_v14  ;;  %v976_v27 = vadd.f32 %v975_v57, %v938_v22  ;;  %v1025_v22 = vmul.f32 %v941_v56, %v2600_v13 }
 0x177   :  { %v572_v2 = vpop.f32.mrf.mxu1 }
 0x178   :  { %v2605_v55 = vadd.f32 %v572_v2, %v464_v28  ;;  %v1059_v0 = vadd.f32 %v1058_v33, %v1021_v12  ;;  %v977_v14 = vadd.f32 %v976_v27, %v939_v58 }
 0x179   :  { %v2590_v26 = vpop.f32.mrf.mxu2 }
 0x17a   :  { %3101 = vst [vmem:[#allocation57_spill] sm:$0xff] %v2590_v26  ;;  %v1060_v47 = vadd.f32 %v1059_v0, %v1022_v18  ;;  %v942_v28 = vmul.f32 %v2522_v17, %v2605_v55  ;;  %v978_v8 = vadd.f32 %v977_v14, %v940_v25  ;;  %v3105_v18 = vld [vmem:[#allocation29_spill] sm:$0xff]  ;;  %v3107_v14 = vld [vmem:[#allocation10_spill] sm:$0xff] }
 0x17c   :  { %v1061_v2 = vadd.f32 %v1060_v47, %v1023_v24  ;;  %v979_v33 = vadd.f32 %v978_v8, %v941_v56  ;;  %v1026_v57 = vmul.f32 %v942_v28, %v2605_v55 }
 0x17e   :  { %v467_v51 = vpop.f32.mrf.mxu0  ;;  %v1062_v48 = vadd.f32 %v1061_v2, %v1024_v53  ;;  %v980_v36 = vadd.f32 %v979_v33, %v942_v28  ;;  %v3110_v28 = vld [vmem:[#allocation32_spill] sm:$0xff] }
 0x17f   :  { %v575_v61 = vpop.f32.mrf.mxu1 }
 0x180   :  { %v2610_v37 = vadd.f32 %v575_v61, %v467_v51  ;;  %v3104_v61 = vld [vmem:[#allocation7_spill] sm:$0xff]  ;;  %v1063_v27 = vadd.f32 %v1062_v48, %v1025_v22  ;;  %v3109_v22 = vld [vmem:[#allocation13_spill] sm:$0xff] }
 0x181   :  { %v2612_v7 = vpop.f32.mrf.mxu2  ;;  %v2623_v58 = vadd.f32 %v3105_v18, %v3104_v61  ;;  %v2640_v48 = vadd.f32 %v3110_v28, %v3109_v22  ;;  %v3113_v22 = vld [vmem:[#allocation18_spill] sm:$0xff]  ;;  %v3114_v28 = vld [vmem:[#allocation35_spill] sm:$0xff] }
 0x182   :  { %3103 = vst [vmem:[#allocation58_spill] sm:$0xff] %v2612_v7  ;;  %v943_v12 = vmul.f32 %v2538_v19, %v2610_v37  ;;  %v3108_v19 = vld [vmem:[#allocation31_spill] sm:$0xff]  ;;  %v1064_v56 = vadd.f32 %v1063_v27, %v1026_v57 }
 0x183   :  { %v2632_v53 = vadd.f32 %v3108_v19, %v3107_v14  ;;  %v945_v2 = vmul.f32 %v2590_v26, %v2623_v58  ;;  %v3111_v27 = vld [vmem:[#allocation15_spill] sm:$0xff]  ;;  %v3112_v14 = vld [vmem:[#allocation33_spill] sm:$0xff] }
 0x184   :  { %v1027_v24 = vmul.f32 %v943_v12, %v2610_v37  ;;  %v981_v8 = vadd.f32 %v980_v36, %v943_v12  ;;  %v2650_v26 = vadd.f32 %v3112_v14, %v3111_v27 }
 0x185   :  { %v1029_v57 = vmul.f32 %v945_v2, %v2623_v58 }
 0x186   :  { %v469_v51 = vpop.f32.mrf.mxu0  ;;  %v1065_v33 = vadd.f32 %v1064_v56, %v1027_v24  ;;  %v2654_v24 = vadd.f32 %v3114_v28, %v3113_v22 }
 0x187   :  { %v577_v0 = vpop.f32.mrf.mxu1 }
 0x188   :  { %v2626_v25 = vadd.f32 %v577_v0, %v469_v51  ;;  %v946_v51 = vmul.f32 %v2612_v7, %v2632_v53 }
 0x189   :  { %v2628_v47 = vpop.f32.mrf.mxu2 }
 0x18a   :  { %3106 = vst [vmem:[#allocation7_spill] sm:$0xff] %v2628_v47  ;;  %v944_v61 = vmul.f32 %v2560_v6, %v2626_v25  ;;  %v947_v36 = vmul.f32 %v2628_v47, %v2640_v48  ;;  %v1030_v56 = vmul.f32 %v946_v51, %v2632_v53  ;;  %v3116_v6 = vld [vmem:[#allocation20_spill] sm:$0xff] }
 0x18c   :  { %v982_v18 = vadd.f32 %v981_v8, %v944_v61  ;;  %v1028_v19 = vmul.f32 %v944_v61, %v2626_v25  ;;  %v1031_v22 = vmul.f32 %v947_v36, %v2640_v48 }
 0x18e   :  { %v1066_v0 = vadd.f32 %v1065_v33, %v1028_v19  ;;  %v983_v12 = vadd.f32 %v982_v18, %v945_v2  ;;  %v3117_v33 = vld [vmem:[#allocation37_spill] sm:$0xff]  ;;  %v3118_v18 = vld [vmem:[#allocation46_spill] sm:$0xff] }
 0x18f   :  { %v2661_v19 = vadd.f32 %v3117_v33, %v3116_v6  ;;  %v949_v27 = vmul.f32 %v3118_v18, %v2654_v24  ;;  %v3124_v18 = vld [vmem:[#allocation25_spill] sm:$0xff] }
 0x190   :  { %v1067_v8 = vadd.f32 %v1066_v0, %v1029_v57  ;;  %v984_v7 = vadd.f32 %v983_v12, %v946_v51  ;;  %v3119_v57 = vld [vmem:[#allocation22_spill] sm:$0xff]  ;;  %v3120_v51 = vld [vmem:[#allocation39_spill] sm:$0xff]  ;;  %v3121_v12 = vld [vmem:[#allocation48_spill] sm:$0xff] }
 0x191   :  { %v2657_v61 = vpop.f32.mrf.mxu2  ;;  %v2671_v0 = vadd.f32 %v3120_v51, %v3119_v57  ;;  %v950_v6 = vmul.f32 %v3121_v12, %v2661_v19 }
 0x192   :  { %3115 = vst [vmem:[#allocation29_spill] sm:$0xff] %v2657_v61  ;;  %v948_v2 = vmul.f32 %v2657_v61, %v2650_v26  ;;  %v985_v14 = vadd.f32 %v984_v7, %v947_v36  ;;  %v1068_v28 = vadd.f32 %v1067_v8, %v1030_v56  ;;  %v3123_v61 = vld [vmem:[#allocation41_spill] sm:$0xff]  ;;  %v3125_v7 = vld [vmem:[#allocation43_spill] sm:$0xff]  ;;  %v1033_v36 = vmul.f32 %v949_v27, %v2654_v24 }
 0x193   :  { %v2677_v52 = vadd.f32 %v3123_v61, %v3122_v63  ;;  %v2681_v16 = vadd.f32 %v3125_v7, %v3124_v18  ;;  %v951_v56 = vmul.f32 %v2493_v41, %v2671_v0 }
 0x194   :  { %v1032_v47 = vmul.f32 %v948_v2, %v2650_v26  ;;  %v1069_v33 = vadd.f32 %v1068_v28, %v1031_v22  ;;  %v986_v17 = vadd.f32 %v985_v14, %v948_v2  ;;  %v1034_v2 = vmul.f32 %v950_v6, %v2661_v19 }
 0x195   :  { %v953_v51 = vmul.f32 %v2533_v23, %v2681_v16  ;;  %v952_v63 = vmul.f32 %v2513_v38, %v2677_v52  ;;  %v1035_v18 = vmul.f32 %v951_v56, %v2671_v0 }
 0x196   :  { %v987_v8 = vadd.f32 %v986_v17, %v949_v27  ;;  %v1070_v57 = vadd.f32 %v1069_v33, %v1032_v47 }
 0x197   :  { %v1037_v7 = vmul.f32 %v953_v51, %v2681_v16  ;;  %v1036_v41 = vmul.f32 %v952_v63, %v2677_v52  ;;  %v991_v27 = vsel %vm803_vm0, %v953_v51, 0.0 }
 0x198   :  { %v988_v61 = vadd.f32 %v987_v8, %v950_v6  ;;  %v1071_v14 = vadd.f32 %v1070_v57, %v1033_v36 }
 0x199   :  { %v1075_v12 = vsel %vm803_vm0, %v1037_v7, 0.0 }
 0x19a   :  { %v989_v22 = vadd.f32 %v988_v61, %v951_v56  ;;  %v1072_v28 = vadd.f32 %v1071_v14, %v1034_v2 }
 0x19c   :  { %v990_v17 = vadd.f32 %v989_v22, %v952_v63  ;;  %v1073_v47 = vadd.f32 %v1072_v28, %v1035_v18 }
 0x19e   :  { %v992_v33 = vadd.f32 %v991_v27, %v990_v17  ;;  %v1074_v23 = vadd.f32 %v1073_v47, %v1036_v41 }
 0x1a0   :  { %v993_v1 = vrot.slane %v992_v33, 4  ;;  %v1076_v38 = vadd.f32 %v1075_v12, %v1074_v23 }
 0x1a2   :  { %v994_v6 = vadd.f32 %v993_v1, %v992_v33  ;;  %v1077_v36 = vrot.slane %v1076_v38, 4 }
 0x1a4   :  { %v995_v8 = vrot.slane %v994_v6, 2  ;;  %v1078_v57 = vadd.f32 %v1077_v36, %v1076_v38 }
 0x1a6   :  { %v996_v56 = vadd.f32 %v995_v8, %v994_v6  ;;  %v1079_v2 = vrot.slane %v1078_v57, 2 }
 0x1a8   :  { %v997_v61 = vrot.slane %v996_v56, 1  ;;  %v1080_v14 = vadd.f32 %v1079_v2, %v1078_v57 }
 0x1aa   :  { %v998_v40 = vadd.f32 %v997_v61, %v996_v56  ;;  %v1081_v15 = vrot.slane %v1080_v14, 1 }
 0x1ac   :  { %1083 = vrot.lane.b32.xlu0 %v998_v40, %s1922_s0  ;;  %v1082_v63 = vadd.f32 %v1081_v15, %v1080_v14 }
 0x1ae   :  { %1095 = vrot.lane.b32.xlu2 %v1082_v63, %s1923_s2  ;;  %1092 = vrot.lane.b32.xlu1 %v1082_v63, %s1922_s0 }
 0x1b4   :  { %1086 = vrot.lane.b32.xlu0 %v998_v40, %s1923_s2 }
 0x1b6   :  { %1098 = vrot.lane.b32.xlu2 %v1082_v63, %s1924_s1  ;;  %1089 = vrot.lane.b32.xlu1 %v998_v40, %s1924_s1 }
 0x208   :  { %v1096_v1 = vpop.permute.xlu2 %1095 }
 0x210   :  { %v1099_v28 = vpop.permute.xlu2 %1098 }
 0x21e   :  { %v1084_v41 = vpop.permute.xlu0 %1083 }
 0x21f   :  { %v1085_v12 = vadd.f32 %v1084_v41, %v998_v40  ;;  %v3126_v41 = vld [vmem:[#allocation5_spill] sm:$0xff] }
 0x220   :  { %v1093_v23 = vpop.permute.xlu1 %1092 }
 0x221   :  { %v1094_v38 = vadd.f32 %v1093_v23, %v1082_v63  ;;  %v1116_v63 = vld [vmem:[%s3003_s4] sm:$0x1] }
 0x223   :  { %v1097_v51 = vadd.f32 %v1096_v1, %v1094_v38  ;;  %v3127_v38 = vld [vmem:[#allocation8_spill] sm:$0xff] }
 0x225   :  { %v1100_v17 = vadd.f32 %v1099_v28, %v1097_v51  ;;  %v3128_v51 = vld [vmem:[#allocation11_spill] sm:$0xff]  ;;  %v3129_v28 = vld [vmem:[#allocation16_spill] sm:$0xff] }
 0x226   :  { %v1087_v18 = vpop.permute.xlu0 %1086 }
 0x227   :  { %v1088_v22 = vadd.f32 %v1087_v18, %v1085_v12  ;;  %v1102_v27 = vmul.f32 0.0009765625, %v1100_v17 }
 0x228   :  { %v1090_v7 = vpop.permute.xlu1 %1089 }
 0x229   :  { %v1091_v47 = vadd.f32 %v1090_v7, %v1088_v22 }
 0x22b   :  { %v1101_v15 = vmul.f32 0.0009765625, %v1091_v47 }
 0x22d   :  { %v1103_v33 = vmul.f32 %v1101_v15, %v1101_v15  ;;  %v2696_v40 = vperm.slane %v1101_v15, 0 }
 0x22f   :  { %v1104_v6 = vsub.f32 %v1102_v27, %v1103_v33  ;;  %v1119_v23 = vsub.f32 %v3126_v41, %v2696_v40  ;;  %v1120_v12 = vsub.f32 %v3127_v38, %v2696_v40  ;;  %v1121_v18 = vsub.f32 %v3128_v51, %v2696_v40 }
 0x230   :  { %v1122_v22 = vsub.f32 %v2263_v11, %v2696_v40  ;;  %v1123_v7 = vsub.f32 %v3129_v28, %v2696_v40  ;;  %v1124_v17 = vsub.f32 %v2295_v30, %v2696_v40  ;;  %v1125_v15 = vsub.f32 %v2316_v44, %v2696_v40 }
 0x231   :  { %v1105_v36 = vadd.f32 1e-05, %v1104_v6  ;;  %v1126_v27 = vsub.f32 %v2330_v54, %v2696_v40  ;;  %v1127_v33 = vsub.f32 %v2348_v9, %v2696_v40  ;;  %v3130_v6 = vld [vmem:[#allocation26_spill] sm:$0xff]  ;;  %v1129_v11 = vsub.f32 %v2375_v35, %v2696_v40 }
 0x232   :  { %v1131_v30 = vsub.f32 %v2403_v4, %v2696_v40  ;;  %v1132_v44 = vsub.f32 %v2413_v20, %v2696_v40  ;;  %v1133_v54 = vsub.f32 %v2419_v29, %v2696_v40  ;;  %v1134_v9 = vsub.f32 %v2425_v42, %v2696_v40 }
 0x233   :  { %1920 = vrsqrt.f32 %v1105_v36  ;;  %vm1112_vm3 = vweird.f32 %v1105_v36  ;;  %v1136_v35 = vsub.f32 %v2437_v60, %v2696_v40  ;;  %v1138_v4 = vsub.f32 %v2551_v31, %v2696_v40 }
 0x234   :  { %v1139_v20 = vsub.f32 %v2558_v39, %v2696_v40  ;;  %v1140_v29 = vsub.f32 %v2567_v50, %v2696_v40  ;;  %v1141_v42 = vsub.f32 %v2574_v3, %v2696_v40  ;;  %v1143_v60 = vsub.f32 %v2588_v49, %v2696_v40 }
 0x235   :  { %v1145_v31 = vsub.f32 %v2600_v13, %v2696_v40  ;;  %v1146_v39 = vsub.f32 %v2605_v55, %v2696_v40  ;;  %v1147_v50 = vsub.f32 %v2610_v37, %v2696_v40  ;;  %v1148_v3 = vsub.f32 %v2626_v25, %v2696_v40 }
 0x236   :  { %v1150_v49 = vsub.f32 %v2632_v53, %v2696_v40  ;;  %v1152_v13 = vsub.f32 %v2650_v26, %v2696_v40  ;;  %v1153_v55 = vsub.f32 %v2654_v24, %v2696_v40  ;;  %v1154_v37 = vsub.f32 %v2661_v19, %v2696_v40 }
 0x237   :  { %v1155_v25 = vsub.f32 %v2671_v0, %v2696_v40  ;;  %v1157_v53 = vsub.f32 %v2681_v16, %v2696_v40 }
 0x239   :  { %v1921_v8 = vpop.eup %1920 }
 0x23a   :  { %v1107_v57 = vmul.f32 %v1921_v8, %v1105_v36  ;;  %vm1113_vm2 = vweird.f32 %v1921_v8  ;;  %v1128_v36 = vsub.f32 %v3130_v6, %v2696_v40 }
 0x23b   :  { %vm1114_vm4 = vmor %vm1112_vm3, %vm1113_vm2 }
 0x23c   :  { %v1108_v56 = vmul.f32 %v1921_v8, %v1107_v57  ;;  %v1135_v57 = vsub.f32 %v2431_v59, %v2696_v40  ;;  %v1142_v59 = vsub.f32 %v2581_v32, %v2696_v40  ;;  %v1149_v32 = vsub.f32 %v2623_v58, %v2696_v40 }
 0x23d   :  { %v1156_v58 = vsub.f32 %v2677_v52, %v2696_v40 }
 0x23e   :  { %v1109_v2 = vmul.f32 0.5, %v1108_v56 }
 0x240   :  { %v1110_v61 = vsub.f32 1.5, %v1109_v2 }
 0x242   :  { %v1111_v14 = vmul.f32 %v1921_v8, %v1110_v61 }
 0x244   :  { %v1115_v1 = vsel %vm1114_vm4, %v1921_v8, %v1111_v14  ;;  %v1130_v8 = vsub.f32 %v2385_v46, %v2696_v40  ;;  %v1137_v46 = vsub.f32 %v2443_v34, %v2696_v40  ;;  %v1144_v34 = vsub.f32 %v2595_v45, %v2696_v40 }
 0x245   :  { %v1117_v47 = vmul.f32 %v1116_v63, %v1115_v1  ;;  %v1151_v45 = vsub.f32 %v2640_v48, %v2696_v40 }
 0x247   :  { %v1158_v56 = vperm.slane %v1117_v47, 0 }
 0x249   :  { %v1159_v2 = vmul.f32 %v1158_v56, %v1119_v23  ;;  %v1160_v48 = vmul.f32 %v1158_v56, %v1120_v12  ;;  %v1161_v61 = vmul.f32 %v1158_v56, %v1121_v18  ;;  %v1162_v14 = vmul.f32 %v1158_v56, %v1122_v22  ;;  %v1919_v23 = vld [vmem:[%s3002_s5] ss:$0 sm:$0xff] }
 0x24a   :  { %v1163_v26 = vmul.f32 %v1158_v56, %v1123_v7  ;;  %v1164_v63 = vmul.f32 %v1158_v56, %v1124_v17  ;;  %v1165_v1 = vmul.f32 %v1158_v56, %v1125_v15  ;;  %v1166_v24 = vmul.f32 %v1158_v56, %v1126_v27 }
 0x24b   :  { %v1167_v41 = vmul.f32 %v1158_v56, %v1127_v33  ;;  %v1168_v38 = vmul.f32 %v1158_v56, %v1128_v36  ;;  %v1169_v19 = vmul.f32 %v1158_v56, %v1129_v11  ;;  %v1170_v51 = vmul.f32 %v1158_v56, %v1130_v8 }
 0x24c   :  { %v1171_v28 = vmul.f32 %v1158_v56, %v1131_v30  ;;  %v1172_v0 = vmul.f32 %v1158_v56, %v1132_v44  ;;  %v1173_v47 = vmul.f32 %v1158_v56, %v1133_v54  ;;  %v1174_v6 = vmul.f32 %v1158_v56, %v1134_v9 }
 0x24d   :  { %v1175_v52 = vmul.f32 %v1158_v56, %v1135_v57  ;;  %v1176_v62 = vmul.f32 %v1158_v56, %v1136_v35  ;;  %v1177_v43 = vmul.f32 %v1158_v56, %v1137_v46  ;;  %v1178_v16 = vmul.f32 %v1158_v56, %v1138_v4 }
 0x24e   :  { %v1179_v40 = vmul.f32 %v1158_v56, %v1139_v20  ;;  %v1180_v12 = vmul.f32 %v1158_v56, %v1140_v29  ;;  %v1181_v18 = vmul.f32 %v1158_v56, %v1141_v42  ;;  %v1182_v22 = vmul.f32 %v1158_v56, %v1142_v59 }
 0x24f   :  { %v1183_v7 = vmul.f32 %v1158_v56, %v1143_v60  ;;  %v1184_v17 = vmul.f32 %v1158_v56, %v1144_v34  ;;  %v1185_v15 = vmul.f32 %v1158_v56, %v1145_v31  ;;  %v1186_v27 = vmul.f32 %v1158_v56, %v1146_v39 }
 0x250   :  { %v1187_v33 = vmul.f32 %v1158_v56, %v1147_v50  ;;  %v1188_v36 = vmul.f32 %v1158_v56, %v1148_v3  ;;  %v1189_v11 = vmul.f32 %v1158_v56, %v1149_v32  ;;  %v1190_v8 = vmul.f32 %v1158_v56, %v1150_v49 }
 0x251   :  { %v1191_v30 = vmul.f32 %v1158_v56, %v1151_v45  ;;  %v1192_v44 = vmul.f32 %v1158_v56, %v1152_v13  ;;  %v1193_v54 = vmul.f32 %v1158_v56, %v1153_v55  ;;  %v1194_v9 = vmul.f32 %v1158_v56, %v1154_v37 }
 0x252   :  { %v1195_v57 = vmul.f32 %v1158_v56, %v1155_v25  ;;  %v1196_v35 = vmul.f32 %v1158_v56, %v1156_v58  ;;  %v1197_v46 = vmul.f32 %v1158_v56, %v1157_v53  ;;  %v2782_v4 = vadd.f32 %v1919_v23, %v1159_v2 }
 0x253   :  { %v2784_v20 = vadd.f32 %v1919_v23, %v1160_v48  ;;  %v2786_v29 = vadd.f32 %v1919_v23, %v1161_v61  ;;  %v2788_v42 = vadd.f32 %v1919_v23, %v1162_v14  ;;  %v2790_v59 = vadd.f32 %v1919_v23, %v1163_v26 }
 0x254   :  { %v2792_v60 = vadd.f32 %v1919_v23, %v1164_v63  ;;  %v2794_v34 = vadd.f32 %v1919_v23, %v1165_v1  ;;  %v2796_v31 = vadd.f32 %v1919_v23, %v1166_v24  ;;  %v2798_v39 = vadd.f32 %v1919_v23, %v1167_v41 }
 0x255   :  { %v2800_v50 = vadd.f32 %v1919_v23, %v1168_v38  ;;  %v2802_v56 = vadd.f32 %v1919_v23, %v1169_v19  ;;  %v2804_v3 = vadd.f32 %v1919_v23, %v1170_v51  ;;  %v2806_v32 = vadd.f32 %v1919_v23, %v1171_v28 }
 0x256   :  { %v2808_v49 = vadd.f32 %v1919_v23, %v1172_v0  ;;  %v2810_v45 = vadd.f32 %v1919_v23, %v1173_v47  ;;  %v2812_v13 = vadd.f32 %v1919_v23, %v1174_v6  ;;  %v2814_v55 = vadd.f32 %v1919_v23, %v1175_v52 }
 0x257   :  { %v2816_v37 = vadd.f32 %v1919_v23, %v1176_v62  ;;  %v2818_v25 = vadd.f32 %v1919_v23, %v1177_v43  ;;  %v2820_v58 = vadd.f32 %v1919_v23, %v1178_v16  ;;  %v2822_v53 = vadd.f32 %v1919_v23, %v1179_v40 }
 0x258   :  { %v2824_v2 = vadd.f32 %v1919_v23, %v1180_v12  ;;  %v2826_v48 = vadd.f32 %v1919_v23, %v1181_v18  ;;  %v2828_v61 = vadd.f32 %v1919_v23, %v1182_v22  ;;  %v2830_v14 = vadd.f32 %v1919_v23, %v1183_v7 }
 0x259   :  { %v2832_v26 = vadd.f32 %v1919_v23, %v1184_v17  ;;  %v2834_v63 = vadd.f32 %v1919_v23, %v1185_v15  ;;  %v2836_v62 = vadd.f32 %v1919_v23, %v1186_v27  ;;  %v2838_v43 = vadd.f32 %v1919_v23, %v1187_v33 }
 0x25a   :  { %v2840_v1 = vadd.f32 %v1919_v23, %v1188_v36  ;;  %v2842_v24 = vadd.f32 %v1919_v23, %v1189_v11  ;;  %v2844_v41 = vadd.f32 %v1919_v23, %v1190_v8  ;;  %v2846_v38 = vadd.f32 %v1919_v23, %v1191_v30 }
 0x25b   :  { %v2848_v19 = vadd.f32 %v1919_v23, %v1192_v44  ;;  %v2850_v51 = vadd.f32 %v1919_v23, %v1193_v54  ;;  %v2852_v28 = vadd.f32 %v1919_v23, %v1194_v9  ;;  %v2854_v0 = vadd.f32 %v1919_v23, %v1195_v57 }
 0x25c   :  { %v2856_v47 = vadd.f32 %v1919_v23, %v1196_v35  ;;  %v2858_v6 = vadd.f32 %v1919_v23, %v1197_v46  ;;  %v1241_v52 = vmax.f32 %v2782_v4, 0.0  ;;  %v1242_v16 = vmax.f32 %v2784_v20, 0.0 }
 0x25d   :  { %v1243_v40 = vmax.f32 %v2786_v29, 0.0  ;;  %v1244_v12 = vmax.f32 %v2788_v42, 0.0  ;;  %v1245_v18 = vmax.f32 %v2790_v59, 0.0  ;;  %v1246_v22 = vmax.f32 %v2792_v60, 0.0  ;;  %v3131_v42 = vld [vmem:[#allocation2_spill] sm:$0xff]  ;;  %v3132_v60 = vld [vmem:[#allocation3_spill] sm:$0xff] }
 0x25e   :  { %v1247_v7 = vmax.f32 %v2794_v34, 0.0  ;;  %v1248_v17 = vmax.f32 %v2796_v31, 0.0  ;;  %v1249_v15 = vmax.f32 %v2798_v39, 0.0  ;;  %v1250_v23 = vmax.f32 %v2800_v50, 0.0  ;;  %v3133_v31 = vld [vmem:[#allocation4_spill] sm:$0xff]  ;;  %v3134_v50 = vld [vmem:[#allocation6_spill] sm:$0xff] }
 0x25f   :  { %v1251_v27 = vmax.f32 %v2802_v56, 0.0  ;;  %v1252_v33 = vmax.f32 %v2804_v3, 0.0  ;;  %v1253_v36 = vmax.f32 %v2806_v32, 0.0  ;;  %v1254_v11 = vmax.f32 %v2808_v49, 0.0  ;;  %v3135_v3 = vld [vmem:[#allocation9_spill] sm:$0xff]  ;;  %v3136_v49 = vld [vmem:[#allocation12_spill] sm:$0xff] }
 0x260   :  { %v1255_v8 = vmax.f32 %v2810_v45, 0.0  ;;  %v1256_v30 = vmax.f32 %v2812_v13, 0.0  ;;  %v1257_v44 = vmax.f32 %v2814_v55, 0.0  ;;  %v1258_v54 = vmax.f32 %v2816_v37, 0.0  ;;  %v3137_v37 = vld [vmem:[#allocation14_spill] sm:$0xff] }
 0x261   :  { %v1259_v9 = vmax.f32 %v2818_v25, 0.0  ;;  %v1260_v57 = vmax.f32 %v2820_v58, 0.0  ;;  %v1261_v35 = vmax.f32 %v2822_v53, 0.0  ;;  %v1262_v46 = vmax.f32 %v2824_v2, 0.0  ;;  %v3138_v58 = vld [vmem:[#allocation17_spill] sm:$0xff] }
 0x262   :  { %v1263_v4 = vmax.f32 %v2826_v48, 0.0  ;;  %v1264_v20 = vmax.f32 %v2828_v61, 0.0  ;;  %v1265_v29 = vmax.f32 %v2830_v14, 0.0  ;;  %v1280_v59 = vmul.f32 %v1241_v52, %v3131_v42  ;;  %v3139_v61 = vld [vmem:[#allocation19_spill] sm:$0xff]  ;;  %v3140_v52 = vld [vmem:[#allocation21_spill] sm:$0xff]  ;;  %v3143_v42 = vld [vmem:[#allocation28_spill] sm:$0xff] }
 0x263   :  { %v1281_v34 = vmul.f32 %v1242_v16, %v3132_v60  ;;  %v1282_v39 = vmul.f32 %v1243_v40, %v3133_v31  ;;  %v1283_v56 = vmul.f32 %v1244_v12, %v3134_v50  ;;  %v1284_v32 = vmul.f32 %v1245_v18, %v3135_v3  ;;  %v3141_v12 = vld [vmem:[#allocation23_spill] sm:$0xff]  ;;  %v3145_v3 = vld [vmem:[#allocation34_spill] sm:$0xff] }
 0x264   :  { %v1285_v45 = vmul.f32 %v1246_v22, %v3136_v49  ;;  %v1266_v13 = vmax.f32 %v2832_v26, 0.0  ;;  %v1267_v55 = vmax.f32 %v2834_v63, 0.0  ;;  %v1286_v25 = vmul.f32 %v1247_v7, %v3137_v37  ;;  %v3142_v22 = vld [vmem:[#allocation27_spill] sm:$0xff]  ;;  %v3153_v49 = vld [vmem:[#allocation49_spill] sm:$0xff] }
 0x265   :  { %v1287_v53 = vmul.f32 %v1248_v17, %v3138_v58  ;;  %v1268_v2 = vmax.f32 %v2836_v62, 0.0  ;;  %v1269_v48 = vmax.f32 %v2838_v43, 0.0  ;;  %v1288_v14 = vmul.f32 %v1249_v15, %v3139_v61  ;;  %v3144_v43 = vld [vmem:[#allocation30_spill] sm:$0xff]  ;;  %v3154_v37 = vld [vmem:[#allocation51_spill] sm:$0xff]  ;;  %v3157_v61 = vld [vmem:[#allocation56_spill] sm:$0xff] }
 0x266   :  { %v1289_v16 = vmul.f32 %v1250_v23, %v3140_v52  ;;  %v1270_v40 = vmax.f32 %v2840_v1, 0.0  ;;  %v1290_v18 = vmul.f32 %v1251_v27, %v3141_v12  ;;  %v1291_v26 = vmul.f32 %v1252_v33, %v2350_v10  ;;  %v3158_v52 = vld [vmem:[#allocation57_spill] sm:$0xff] }
 0x267   :  { %v1292_v63 = vmul.f32 %v1253_v36, %v3142_v22  ;;  %v1293_v7 = vmul.f32 %v1254_v11, %v3143_v42  ;;  %v1789_v60 = vpack.c.bf16 %v1281_v34, %v1280_v59  ;;  %v1794_v17 = vpack.c.bf16 %v1283_v56, %v1282_v39  ;;  %v3146_v11 = vld [vmem:[#allocation36_spill] sm:$0xff]  ;;  %v3147_v59 = vld [vmem:[#allocation38_spill] sm:$0xff]  ;;  %v3151_v39 = vld [vmem:[#allocation45_spill] sm:$0xff] }
 0x268   :  { %v1799_v31 = vpack.c.bf16 %v1285_v45, %v1284_v32  ;;  %v1271_v62 = vmax.f32 %v2842_v24, 0.0  ;;  %v1294_v50 = vmul.f32 %v1255_v8, %v3144_v43  ;;  %v1295_v15 = vmul.f32 %v1256_v30, %v2405_v5  ;;  %v3150_v34 = vld [vmem:[#allocation44_spill] sm:$0xff]  ;;  %v3152_v32 = vld [vmem:[#allocation47_spill] sm:$0xff] }
 0x269   :  { %v1804_v23 = vpack.c.bf16 %v1287_v53, %v1286_v25  ;;  %v1272_v1 = vmax.f32 %v2844_v41, 0.0  ;;  %v1296_v27 = vmul.f32 %v1257_v44, %v2415_v21  ;;  %v1297_v10 = vmul.f32 %v1258_v54, %v3145_v3  ;;  %1790 = vst [vmem:[%s3004_s6] sm:$0xff] %v1789_v60   ;;  %v3148_v41 = vld [vmem:[#allocation40_spill] sm:$0xff]  ;;  %v3149_v44 = vld [vmem:[#allocation42_spill] sm:$0xff]  ;;  %v3155_v25 = vld [vmem:[#allocation53_spill] sm:$0xff] }
 0x26a   :  { %v1809_v33 = vpack.c.bf16 %v1289_v16, %v1288_v14  ;;  %v1273_v36 = vmax.f32 %v2846_v38, 0.0  ;;  %v1298_v24 = vmul.f32 %v1259_v9, %v3146_v11  ;;  %v1299_v8 = vmul.f32 %v1260_v57, %v3147_v59  ;;  %1881 = vst [vmem:[%s3004_s6 + $0x8] sm:$0xff] %v1794_v17   ;;  %v3156_v53 = vld [vmem:[#allocation55_spill] sm:$0xff]  ;;  %v3159_v16 = vld [vmem:[#allocation58_spill] sm:$0xff]  ;;  %v3163_v42 = vld [vmem:[#allocation48_spill] sm:$0xff] }
 0x26b   :  { %v1814_v5 = vpack.c.bf16 %v1291_v26, %v1290_v18  ;;  %v1274_v21 = vmax.f32 %v2848_v19, 0.0  ;;  %v1300_v30 = vmul.f32 %v1261_v35, %v3148_v41  ;;  %v1301_v54 = vmul.f32 %v1262_v46, %v3149_v44  ;;  %1882 = vst [vmem:[%s3004_s6 + $0x10] sm:$0xff] %v1799_v31   ;;  %v3160_v18 = vld [vmem:[#allocation7_spill] sm:$0xff]  ;;  %v3161_v26 = vld [vmem:[#allocation29_spill] sm:$0xff]  ;;  %v3164_v17 = vld [vmem:[#allocation50_spill] sm:$0xff] }
 0x26c   :  { %v1819_v38 = vpack.c.bf16 %v1293_v7, %v1292_v63  ;;  %v1275_v9 = vmax.f32 %v2850_v51, 0.0  ;;  %v1302_v57 = vmul.f32 %v1263_v4, %v3150_v34  ;;  %v1303_v56 = vmul.f32 %v1264_v20, %v3151_v39  ;;  %1883 = vst [vmem:[%s3004_s6 + $0x18] sm:$0xff] %v1804_v23   ;;  %v3162_v63 = vld [vmem:[#allocation46_spill] sm:$0xff] }
 0x26d   :  { %v1824_v19 = vpack.c.bf16 %v1295_v15, %v1294_v50  ;;  %v1276_v35 = vmax.f32 %v2852_v28, 0.0  ;;  %v1304_v46 = vmul.f32 %v1265_v29, %v3152_v32  ;;  %v1305_v45 = vmul.f32 %v1266_v13, %v3153_v49  ;;  %1884 = vst [vmem:[%s3004_s6 + $0x20] sm:$0xff] %v1809_v33   ;;  %v3166_v15 = vld [vmem:[#allocation54_spill] sm:$0xff] }
 0x26e   :  { %v1829_v51 = vpack.c.bf16 %v1297_v10, %v1296_v27  ;;  %v1277_v4 = vmax.f32 %v2854_v0, 0.0  ;;  %v1306_v20 = vmul.f32 %v1267_v55, %v3154_v37  ;;  %v1307_v58 = vmul.f32 %v1268_v2, %v3155_v25  ;;  %1885 = vst [vmem:[%s3004_s6 + $0x28] sm:$0xff] %v1814_v5  }
 0x26f   :  { %v1834_v28 = vpack.c.bf16 %v1299_v8, %v1298_v24  ;;  %v1278_v29 = vmax.f32 %v2856_v47, 0.0  ;;  %v1308_v13 = vmul.f32 %v1269_v48, %v3156_v53  ;;  %v1309_v14 = vmul.f32 %v1270_v40, %v3157_v61  ;;  %1886 = vst [vmem:[%s3004_s6 + $0x30] sm:$0xff] %v1819_v38  }
 0x270   :  { %v1839_v0 = vpack.c.bf16 %v1301_v54, %v1300_v30  ;;  %v1279_v55 = vmax.f32 %v2858_v6, 0.0  ;;  %v1310_v2 = vmul.f32 %v1271_v62, %v3158_v52  ;;  %v1311_v12 = vmul.f32 %v1272_v1, %v3159_v16  ;;  %1887 = vst [vmem:[%s3004_s6 + $0x38] sm:$0xff] %v1824_v19   ;;  %v3165_v62 = vld [vmem:[#allocation52_spill] sm:$0xff] }
 0x271   :  { %v1844_v47 = vpack.c.bf16 %v1303_v56, %v1302_v57  ;;  %v1312_v48 = vmul.f32 %v1273_v36, %v3160_v18  ;;  %v1313_v40 = vmul.f32 %v1274_v21, %v3161_v26  ;;  %1888 = vst [vmem:[%s3004_s6 + $0x40] sm:$0xff] %v1829_v51   ;;  %v1849_v22 = vpack.c.bf16 %v1305_v45, %v1304_v46 }
 0x272   :  { %v1314_v6 = vmul.f32 %v1275_v9, %v3162_v63  ;;  %v1315_v7 = vmul.f32 %v1276_v35, %v3163_v42  ;;  %1889 = vst [vmem:[%s3004_s6 + $0x48] sm:$0xff] %v1834_v28   ;;  %v1854_v60 = vpack.c.bf16 %v1307_v58, %v1306_v20  ;;  %v1316_v31 = vmul.f32 %v1277_v4, %v3164_v17 }
 0x273   :  { %v1317_v43 = vmul.f32 %v1278_v29, %v3165_v62  ;;  %1890 = vst [vmem:[%s3004_s6 + $0x50] sm:$0xff] %v1839_v0   ;;  %v1859_v50 = vpack.c.bf16 %v1309_v14, %v1308_v13  ;;  %v1318_v23 = vmul.f32 %v1279_v55, %v3166_v15  ;;  %v1864_v1 = vpack.c.bf16 %v1311_v12, %v1310_v2 }
 0x274   :  { %1891 = vst [vmem:[%s3004_s6 + $0x58] sm:$0xff] %v1844_v47   ;;  %v1869_v27 = vpack.c.bf16 %v1313_v40, %v1312_v48  ;;  %v1874_v3 = vpack.c.bf16 %v1315_v7, %v1314_v6 }
 0x275   :  { %1892 = vst [vmem:[%s3004_s6 + $0x60] sm:$0xff] %v1849_v22   ;;  %v1879_v10 = vpack.c.bf16 %v1317_v43, %v1316_v31  ;;  %v1357_v33 = vpack.c.bf16 %v1318_v23, %v1318_v23 }
 0x276   :  { %1893 = vst [vmem:[%s3004_s6 + $0x68] sm:$0xff] %v1854_v60  }
 0x277   :  { %1894 = vst [vmem:[%s3004_s6 + $0x70] sm:$0xff] %v1859_v50  }
 0x278   :  { %1895 = vst [vmem:[%s3004_s6 + $0x78] sm:$0xff] %v1864_v1  }
 0x279   :  { %1896 = vst [vmem:[%s3004_s6 + $0x80] sm:$0xff] %v1869_v27  }
 0x27a   :  { %1897 = vst [vmem:[%s3004_s6 + $0x88] sm:$0xff] %v1874_v3  }
 0x27b   :  { %1898 = vst [vmem:[%s3004_s6 + $0x90] sm:$0xff] %v1879_v10  }
 0x27c   :  { %1396 = vst [vmem:[%s3004_s6 + $0x98] sm:$0x1] %v1357_v33 }

// kernel: decoder_forward.9
= control target key start
LH: loop header
LB: loop body
LE: loop exit
PB: predicated region body
PF: predicated region fallthrough
CT: control target
= control target key end

     0   :  { %s3955_s0 = inlined_call_operand.vmem [shape: bf16[128,1122], index: 0, kind: input, shape index: {}]   ;;  %s3956_s1 = inlined_call_operand.vmem [shape: bf16[12,128], index: 1, kind: input, shape index: {}]   ;;  %s3957_s2 = inlined_call_operand.vmem [shape: bf16[12,4], index: 2, kind: input, shape index: {}]   ;;  %s3958_s3 = inlined_call_operand.vmem [shape: bf16[4,1122], index: 3, kind: input, shape index: {}]   ;;  %s3959_s4 = inlined_call_operand.vmem [shape: f32[12,1122], index: 4, kind: input, shape index: {}]   ;;  %s3960_s5 = inlined_call_operand.vmem [shape: f32[1122,2], index: 5, kind: input, shape index: {}]   ;;  %s3961_s6 = inlined_call_operand.vmem [shape: f32[12,1122], index: 6, kind: output, shape index: {0}]   ;;  %s3962_s7 = inlined_call_operand.hbm [shape: f32[1,2], index: 7, kind: output, shape index: {1}]  }
   0x1   :  { %v1953_v0 = vld [vmem:[%s3955_s0 + $0x1f8] sm:$0xf]  ;;  %v2070_v1 = vld [vmem:[%s3955_s0 + $0x218] sm:$0xf0]  ;;  %v1955_v4 = vld [vmem:[%s3955_s0 + $0x21c] sm:$0xf0] }
   0x2   :  { %v2066_v2 = vld [vmem:[%s3955_s0 + $0x1fc] sm:$0xf]  ;;  %v1954_v3 = vor.u32 %v2070_v1, %v1953_v0  ;;  %v1961_v5 = vld [vmem:[%s3955_s0 + $0x200] sm:$0xf]  ;;  %v2071_v6 = vld [vmem:[%s3955_s0 + $0x220] sm:$0xf0] }
   0x3   :  { %v1958_v7 = vor.u32 %v2066_v2, %v1955_v4  ;;  %v1962_v8 = vor.u32 %v2071_v6, %v1961_v5  ;;  %v2067_v9 = vld [vmem:[%s3955_s0 + $0x204] sm:$0xf]  ;;  %v1963_v10 = vld [vmem:[%s3955_s0 + $0x224] sm:$0xf0]  ;;  %v1917_v11 = vld [vmem:[%s3955_s0 + $0x1b0] sm:$0xf] }
   0x4   :  { %483 = vmatpush.bf16.msra.mxu0 %v1954_v3  ;;  %v1966_v12 = vor.u32 %v2067_v9, %v1963_v10  ;;  %v2061_v13 = vld [vmem:[%s3955_s0 + $0x1d0] sm:$0xf0]  ;;  %v1919_v15 = vld [vmem:[%s3955_s0 + $0x1d4] sm:$0xf0]  ;;  %v2062_v19 = vld [vmem:[%s3955_s0 + $0x1d8] sm:$0xf0] }
   0x5   :  { %v2057_v14 = vld [vmem:[%s3955_s0 + $0x1b4] sm:$0xf]  ;;  %497 = vmatpush.bf16.msra.mxu1 %v1958_v7  ;;  %511 = vmatpush.bf16.msra.mxu2 %v1962_v8  ;;  %v1918_v16 = vor.u32 %v2061_v13, %v1917_v11  ;;  %v1925_v18 = vld [vmem:[%s3955_s0 + $0x1b8] sm:$0xf]  ;;  %v2058_v20 = vld [vmem:[%s3955_s0 + $0x1bc] sm:$0xf] }
   0x6   :  { %v1922_v17 = vor.u32 %v2057_v14, %v1919_v15  ;;  %525 = vmatpush.bf16.msra.mxu3 %v1966_v12  ;;  %v1926_v21 = vor.u32 %v2062_v19, %v1925_v18  ;;  %v1927_v22 = vld [vmem:[%s3955_s0 + $0x1dc] sm:$0xf0]  ;;  %v1881_v23 = vld [vmem:[%s3955_s0 + $0x168] sm:$0xf]  ;;  %v2052_v24 = vld [vmem:[%s3955_s0 + $0x188] sm:$0xf0] }
   0x7   :  { %v1930_v25 = vor.u32 %v2058_v20, %v1927_v22  ;;  %v2048_v26 = vld [vmem:[%s3955_s0 + $0x16c] sm:$0xf]  ;;  %v1883_v27 = vld [vmem:[%s3955_s0 + $0x18c] sm:$0xf0]  ;;  %v1882_v29 = vor.u32 %v2052_v24, %v1881_v23  ;;  %v2053_v30 = vld [vmem:[%s3955_s0 + $0x190] sm:$0xf0] }
   0x8   :  { %v1889_v28 = vld [vmem:[%s3955_s0 + $0x170] sm:$0xf]  ;;  %484 = vmatpush.bf16.msra.mxu0 %v1918_v16  ;;  %v2049_v31 = vld [vmem:[%s3955_s0 + $0x174] sm:$0xf]  ;;  %v1891_v32 = vld [vmem:[%s3955_s0 + $0x194] sm:$0xf0]  ;;  %v1886_v33 = vor.u32 %v2048_v26, %v1883_v27 }
   0x9   :  { %498 = vmatpush.bf16.msra.mxu1 %v1922_v17  ;;  %512 = vmatpush.bf16.msra.mxu2 %v1926_v21  ;;  %v1890_v34 = vor.u32 %v2053_v30, %v1889_v28  ;;  %v1845_v35 = vld [vmem:[%s3955_s0 + $0x120] sm:$0xf]  ;;  %v2043_v36 = vld [vmem:[%s3955_s0 + $0x140] sm:$0xf0]  ;;  %v1894_v38 = vor.u32 %v2049_v31, %v1891_v32  ;;  %v1847_v39 = vld [vmem:[%s3955_s0 + $0x144] sm:$0xf0] }
   0xa   :  { %v2039_v37 = vld [vmem:[%s3955_s0 + $0x124] sm:$0xf]  ;;  %526 = vmatpush.bf16.msra.mxu3 %v1930_v25  ;;  %v1853_v40 = vld [vmem:[%s3955_s0 + $0x128] sm:$0xf]  ;;  %v2044_v41 = vld [vmem:[%s3955_s0 + $0x148] sm:$0xf0]  ;;  %v1846_v44 = vor.u32 %v2043_v36, %v1845_v35 }
   0xb   :  { %v2040_v42 = vld [vmem:[%s3955_s0 + $0x12c] sm:$0xf]  ;;  %v1855_v43 = vld [vmem:[%s3955_s0 + $0x14c] sm:$0xf0]  ;;  %v1850_v45 = vor.u32 %v2039_v37, %v1847_v39  ;;  %v1854_v46 = vor.u32 %v2044_v41, %v1853_v40  ;;  %v1809_v47 = vld [vmem:[%s3955_s0 + $0xd8] sm:$0xf] }
   0xc   :  { %485 = vmatpush.bf16.msra.mxu0 %v1882_v29  ;;  %v2034_v48 = vld [vmem:[%s3955_s0 + $0xf8] sm:$0xf0]  ;;  %v1858_v50 = vor.u32 %v2040_v42, %v1855_v43  ;;  %v1811_v51 = vld [vmem:[%s3955_s0 + $0xfc] sm:$0xf0]  ;;  %v2035_v53 = vld [vmem:[%s3955_s0 + $0x100] sm:$0xf0] }
   0xd   :  { %499 = vmatpush.bf16.msra.mxu1 %v1886_v33  ;;  %513 = vmatpush.bf16.msra.mxu2 %v1890_v34  ;;  %v2030_v49 = vld [vmem:[%s3955_s0 + $0xdc] sm:$0xf]  ;;  %v1817_v52 = vld [vmem:[%s3955_s0 + $0xe0] sm:$0xf]  ;;  %v2031_v54 = vld [vmem:[%s3955_s0 + $0xe4] sm:$0xf]  ;;  %v1810_v56 = vor.u32 %v2034_v48, %v1809_v47 }
   0xe   :  { %527 = vmatpush.bf16.msra.mxu3 %v1894_v38  ;;  %v1819_v55 = vld [vmem:[%s3955_s0 + $0x104] sm:$0xf0]  ;;  %v1814_v57 = vor.u32 %v2030_v49, %v1811_v51  ;;  %v1818_v58 = vor.u32 %v2035_v53, %v1817_v52  ;;  %v1773_v59 = vld [vmem:[%s3955_s0 + $0x90] sm:$0xf]  ;;  %v2025_v60 = vld [vmem:[%s3955_s0 + $0xb0] sm:$0xf0] }
   0xf   :  { %v2021_v61 = vld [vmem:[%s3955_s0 + $0x94] sm:$0xf]  ;;  %v1822_v62 = vor.u32 %v2031_v54, %v1819_v55  ;;  %v1775_v63 = vld [vmem:[%s3955_s0 + $0xb4] sm:$0xf0]  ;;  %v2026_v1 = vld [vmem:[%s3955_s0 + $0xb8] sm:$0xf0]  ;;  %v1774_v4 = vor.u32 %v2025_v60, %v1773_v59 }
  0x10   :  { %486 = vmatpush.bf16.msra.mxu0 %v1846_v44  ;;  %v1781_v0 = vld [vmem:[%s3955_s0 + $0x98] sm:$0xf]  ;;  %v2022_v2 = vld [vmem:[%s3955_s0 + $0x9c] sm:$0xf]  ;;  %v1783_v3 = vld [vmem:[%s3955_s0 + $0xbc] sm:$0xf0]  ;;  %v1778_v5 = vor.u32 %v2021_v61, %v1775_v63 }
  0x11   :  { %500 = vmatpush.bf16.msra.mxu1 %v1850_v45  ;;  %514 = vmatpush.bf16.msra.mxu2 %v1854_v46  ;;  %v1782_v6 = vor.u32 %v2026_v1, %v1781_v0  ;;  %v1737_v7 = vld [vmem:[%s3955_s0 + $0x48] sm:$0xf]  ;;  %v2016_v8 = vld [vmem:[%s3955_s0 + $0x68] sm:$0xf0]  ;;  %v1786_v10 = vor.u32 %v2022_v2, %v1783_v3  ;;  %v1739_v11 = vld [vmem:[%s3955_s0 + $0x6c] sm:$0xf0] }
  0x12   :  { %528 = vmatpush.bf16.msra.mxu3 %v1858_v50  ;;  %v2012_v9 = vld [vmem:[%s3955_s0 + $0x4c] sm:$0xf]  ;;  %v1745_v12 = vld [vmem:[%s3955_s0 + $0x50] sm:$0xf]  ;;  %v2017_v13 = vld [vmem:[%s3955_s0 + $0x70] sm:$0xf0]  ;;  %v1738_v16 = vor.u32 %v2016_v8, %v1737_v7 }
  0x13   :  { %v2013_v14 = vld [vmem:[%s3955_s0 + $0x54] sm:$0xf]  ;;  %v1747_v15 = vld [vmem:[%s3955_s0 + $0x74] sm:$0xf0]  ;;  %v1701_v17 = vld [vmem:[%s3955_s0] sm:$0xf]  ;;  %v1742_v20 = vor.u32 %v2012_v9, %v1739_v11  ;;  %v1746_v21 = vor.u32 %v2017_v13, %v1745_v12 }
  0x14   :  { %487 = vmatpush.bf16.msra.mxu0 %v1810_v56  ;;  %v2007_v18 = vld [vmem:[%s3955_s0 + $0x20] sm:$0xf0]  ;;  %v1703_v22 = vld [vmem:[%s3955_s0 + $0x24] sm:$0xf0]  ;;  %v2008_v24 = vld [vmem:[%s3955_s0 + $0x28] sm:$0xf0]  ;;  %v1750_v25 = vor.u32 %v2013_v14, %v1747_v15 }
  0x15   :  { %501 = vmatpush.bf16.msra.mxu1 %v1814_v57  ;;  %515 = vmatpush.bf16.msra.mxu2 %v1818_v58  ;;  %v2003_v19 = vld [vmem:[%s3955_s0 + $0x4] sm:$0xf]  ;;  %v1709_v23 = vld [vmem:[%s3955_s0 + $0x8] sm:$0xf]  ;;  %v2004_v26 = vld [vmem:[%s3955_s0 + $0xc] sm:$0xf]  ;;  %v1702_v32 = vor.u32 %v2007_v18, %v1701_v17 }
  0x16   :  { %529 = vmatpush.bf16.msra.mxu3 %v1822_v62  ;;  %v1711_v27 = vld [vmem:[%s3955_s0 + $0x2c] sm:$0xf0]  ;;  %v1969_v28 = vld [vmem:[%s3955_s0 + $0x208] sm:$0xf]  ;;  %v2072_v29 = vld [vmem:[%s3955_s0 + $0x228] sm:$0xf0]  ;;  %v1706_v36 = vor.u32 %v2003_v19, %v1703_v22  ;;  %v1710_v37 = vor.u32 %v2008_v24, %v1709_v23 }
  0x17   :  { %v2068_v30 = vld [vmem:[%s3955_s0 + $0x20c] sm:$0xf]  ;;  %v1971_v31 = vld [vmem:[%s3955_s0 + $0x22c] sm:$0xf0]  ;;  %v2073_v34 = vld [vmem:[%s3955_s0 + $0x230] sm:$0xf0]  ;;  %v1714_v41 = vor.u32 %v2004_v26, %v1711_v27  ;;  %v1970_v42 = vor.u32 %v2072_v29, %v1969_v28 }
  0x18   :  { %488 = vmatpush.bf16.msra.mxu0 %v1774_v4  ;;  %v1977_v33 = vld [vmem:[%s3955_s0 + $0x210] sm:$0xf]  ;;  %v2069_v35 = vld [vmem:[%s3955_s0 + $0x214] sm:$0xf]  ;;  %v1979_v38 = vld [vmem:[%s3955_s0 + $0x234] sm:$0xf0]  ;;  %v1974_v43 = vor.u32 %v2068_v30, %v1971_v31 }
  0x19   :  { %502 = vmatpush.bf16.msra.mxu1 %v1778_v5  ;;  %516 = vmatpush.bf16.msra.mxu2 %v1782_v6  ;;  %v1697_v39 = vld [vmem:[%s3956_s1] sm:$0xf]  ;;  %v2002_v40 = vld [vmem:[%s3956_s1] sm:$0x30]  ;;  %v1978_v44 = vor.u32 %v2073_v34, %v1977_v33  ;;  %v1982_v48 = vor.u32 %v2069_v35, %v1979_v38  ;;  %v1935_v50 = vld [vmem:[%s3955_s0 + $0x1e4] sm:$0xf0] }
  0x1a   :  { %530 = vmatpush.bf16.msra.mxu3 %v1786_v10  ;;  %v1933_v45 = vld [vmem:[%s3955_s0 + $0x1c0] sm:$0xf]  ;;  %v2063_v46 = vld [vmem:[%s3955_s0 + $0x1e0] sm:$0xf0]  ;;  %v2483_v49 = vor.u32 %v2002_v40, %v1697_v39  ;;  %v1941_v51 = vld [vmem:[%s3955_s0 + $0x1c8] sm:$0xf] }
  0x1b   :  { %v2059_v47 = vld [vmem:[%s3955_s0 + $0x1c4] sm:$0xf]  ;;  %v2064_v52 = vld [vmem:[%s3955_s0 + $0x1e8] sm:$0xf0]  ;;  %v1943_v54 = vld [vmem:[%s3955_s0 + $0x1ec] sm:$0xf0]  ;;  %v1934_v55 = vor.u32 %v2063_v46, %v1933_v45 }
  0x1c   :  { %489 = vmatpush.bf16.msra.mxu0 %v1738_v16  ;;  %v2060_v53 = vld [vmem:[%s3955_s0 + $0x1cc] sm:$0xf]  ;;  %v1938_v56 = vor.u32 %v2059_v47, %v1935_v50  ;;  %v1942_v57 = vor.u32 %v2064_v52, %v1941_v51  ;;  %v1897_v58 = vld [vmem:[%s3955_s0 + $0x178] sm:$0xf]  ;;  %v2054_v59 = vld [vmem:[%s3955_s0 + $0x198] sm:$0xf0] }
  0x1d   :  { %503 = vmatpush.bf16.msra.mxu1 %v1742_v20  ;;  %517 = vmatpush.bf16.msra.mxu2 %v1746_v21  ;;  %v2050_v60 = vld [vmem:[%s3955_s0 + $0x17c] sm:$0xf]  ;;  %v1946_v61 = vor.u32 %v2060_v53, %v1943_v54  ;;  %v1899_v62 = vld [vmem:[%s3955_s0 + $0x19c] sm:$0xf0]  ;;  %v2055_v0 = vld [vmem:[%s3955_s0 + $0x1a0] sm:$0xf0]  ;;  %v1898_v3 = vor.u32 %v2054_v59, %v1897_v58 }
  0x1e   :  { %531 = vmatpush.bf16.msra.mxu3 %v1750_v25  ;;  %v1905_v63 = vld [vmem:[%s3955_s0 + $0x180] sm:$0xf]  ;;  %v2051_v1 = vld [vmem:[%s3955_s0 + $0x184] sm:$0xf]  ;;  %v1907_v2 = vld [vmem:[%s3955_s0 + $0x1a4] sm:$0xf0]  ;;  %v1902_v4 = vor.u32 %v2050_v60, %v1899_v62 }
  0x1f   :  { %v1906_v5 = vor.u32 %v2055_v0, %v1905_v63  ;;  %v1861_v6 = vld [vmem:[%s3955_s0 + $0x130] sm:$0xf]  ;;  %v2045_v7 = vld [vmem:[%s3955_s0 + $0x150] sm:$0xf0]  ;;  %v1910_v9 = vor.u32 %v2051_v1, %v1907_v2  ;;  %v1863_v10 = vld [vmem:[%s3955_s0 + $0x154] sm:$0xf0] }
  0x20   :  { %490 = vmatpush.bf16.msra.mxu0 %v1702_v32  ;;  %v2041_v8 = vld [vmem:[%s3955_s0 + $0x134] sm:$0xf]  ;;  %v1869_v11 = vld [vmem:[%s3955_s0 + $0x138] sm:$0xf]  ;;  %v2046_v12 = vld [vmem:[%s3955_s0 + $0x158] sm:$0xf0]  ;;  %v1862_v15 = vor.u32 %v2045_v7, %v1861_v6 }
  0x21   :  { %504 = vmatpush.bf16.msra.mxu1 %v1706_v36  ;;  %518 = vmatpush.bf16.msra.mxu2 %v1710_v37  ;;  %v2042_v13 = vld [vmem:[%s3955_s0 + $0x13c] sm:$0xf]  ;;  %v1871_v14 = vld [vmem:[%s3955_s0 + $0x15c] sm:$0xf0]  ;;  %v1866_v16 = vor.u32 %v2041_v8, %v1863_v10  ;;  %v1870_v17 = vor.u32 %v2046_v12, %v1869_v11  ;;  %v1825_v18 = vld [vmem:[%s3955_s0 + $0xe8] sm:$0xf] }
  0x22   :  { %532 = vmatpush.bf16.msra.mxu3 %v1714_v41  ;;  %v2036_v19 = vld [vmem:[%s3955_s0 + $0x108] sm:$0xf0]  ;;  %v1874_v21 = vor.u32 %v2042_v13, %v1871_v14  ;;  %v1827_v22 = vld [vmem:[%s3955_s0 + $0x10c] sm:$0xf0]  ;;  %v2037_v24 = vld [vmem:[%s3955_s0 + $0x110] sm:$0xf0] }
  0x23   :  { %491 = vmatmul.bf16.vlgmr.msra.gmra.mxu0 %v2483_v49  ;;  %v2032_v20 = vld [vmem:[%s3955_s0 + $0xec] sm:$0xf]  ;;  %v1833_v23 = vld [vmem:[%s3955_s0 + $0xf0] sm:$0xf]  ;;  %v2033_v25 = vld [vmem:[%s3955_s0 + $0xf4] sm:$0xf]  ;;  %v1826_v28 = vor.u32 %v2036_v19, %v1825_v18 }
  0x24   :  { %539 = vmatpush.bf16.msrb.mxu0 %v1970_v42  ;;  %505 = vmatmul.bf16.vlgmr.msra.gmra.mxu1 %v2483_v49  ;;  %v1835_v26 = vld [vmem:[%s3955_s0 + $0x114] sm:$0xf0]  ;;  %v1081_v27 = vld [vmem:[%s3958_s3] sm:$0xff]  ;;  %v1830_v30 = vor.u32 %v2032_v20, %v1827_v22  ;;  %v1834_v31 = vor.u32 %v2037_v24, %v1833_v23  ;;  %v1791_v34 = vld [vmem:[%s3955_s0 + $0xc4] sm:$0xf0] }
  0x25   :  { %553 = vmatpush.bf16.msrb.mxu1 %v1974_v43  ;;  %567 = vmatpush.bf16.msrb.mxu2 %v1978_v44  ;;  %v1789_v29 = vld [vmem:[%s3955_s0 + $0xa0] sm:$0xf]  ;;  %1090 = vst [vmem:[#allocation1] ss:$4 sm:$0xff] %v1081_v27  ;;  %v2027_v32 = vld [vmem:[%s3955_s0 + $0xc0] sm:$0xf0]  ;;  %v1838_v35 = vor.u32 %v2033_v25, %v1835_v26 }
  0x26   :  { %581 = vmatpush.bf16.msrb.mxu3 %v1982_v48  ;;  %519 = vmatmul.bf16.vlgmr.msra.gmra.mxu2 %v2483_v49  ;;  %v2023_v33 = vld [vmem:[%s3955_s0 + $0xa4] sm:$0xf]  ;;  %v1797_v36 = vld [vmem:[%s3955_s0 + $0xa8] sm:$0xf]  ;;  %v2028_v37 = vld [vmem:[%s3955_s0 + $0xc8] sm:$0xf0] }
  0x27   :  { %533 = vmatmul.bf16.vlgmr.msra.gmra.mxu3 %v2483_v49  ;;  %v2024_v38 = vld [vmem:[%s3955_s0 + $0xac] sm:$0xf]  ;;  %v1799_v39 = vld [vmem:[%s3955_s0 + $0xcc] sm:$0xf0]  ;;  %v1753_v40 = vld [vmem:[%s3955_s0 + $0x58] sm:$0xf] }
  0x28   :  { %540 = vmatpush.bf16.msrb.mxu0 %v1934_v55 }
  0x29   :  { %554 = vmatpush.bf16.msrb.mxu1 %v1938_v56  ;;  %568 = vmatpush.bf16.msrb.mxu2 %v1942_v57 }
  0x2a   :  { %582 = vmatpush.bf16.msrb.mxu3 %v1946_v61 }
  0x2c   :  { %541 = vmatpush.bf16.msrb.mxu0 %v1898_v3 }
  0x2d   :  { %555 = vmatpush.bf16.msrb.mxu1 %v1902_v4  ;;  %569 = vmatpush.bf16.msrb.mxu2 %v1906_v5 }
  0x2e   :  { %583 = vmatpush.bf16.msrb.mxu3 %v1910_v9 }
  0x30   :  { %542 = vmatpush.bf16.msrb.mxu0 %v1862_v15 }
  0x31   :  { %556 = vmatpush.bf16.msrb.mxu1 %v1866_v16  ;;  %570 = vmatpush.bf16.msrb.mxu2 %v1870_v17 }
  0x32   :  { %584 = vmatpush.bf16.msrb.mxu3 %v1874_v21 }
  0x33   :  { %13 = vsyncpa [#allocation3], 0  ;;  %v1790_v41 = vor.u32 %v2027_v32, %v1789_v29  ;;  %v2018_v42 = vld [vmem:[%s3955_s0 + $0x78] sm:$0xf0]  ;;  %v1755_v44 = vld [vmem:[%s3955_s0 + $0x7c] sm:$0xf0]  ;;  %v1794_v45 = vor.u32 %v2023_v33, %v1791_v34  ;;  %v1798_v46 = vor.u32 %v2028_v37, %v1797_v36  ;;  %v1802_v51 = vor.u32 %v2024_v38, %v1799_v39 }
  0x34   :  { %543 = vmatpush.bf16.msrb.mxu0 %v1826_v28  ;;  %v2014_v43 = vld [vmem:[%s3955_s0 + $0x5c] sm:$0xf]  ;;  %v1761_v47 = vld [vmem:[%s3955_s0 + $0x60] sm:$0xf]  ;;  %v2019_v48 = vld [vmem:[%s3955_s0 + $0x80] sm:$0xf0]  ;;  %v1754_v57 = vor.u32 %v2018_v42, %v1753_v40 }
  0x35   :  { %557 = vmatpush.bf16.msrb.mxu1 %v1830_v30  ;;  %571 = vmatpush.bf16.msrb.mxu2 %v1834_v31  ;;  %v1082_v50 = vld [vmem:[%s3958_s3 + $0x8] sm:$0xff]  ;;  %v2015_v52 = vld [vmem:[%s3955_s0 + $0x64] sm:$0xf]  ;;  %v1717_v54 = vld [vmem:[%s3955_s0 + $0x10] sm:$0xf]  ;;  %v1758_v63 = vor.u32 %v2014_v43, %v1755_v44  ;;  %v1762_v0 = vor.u32 %v2019_v48, %v1761_v47  ;;  %vm1109_vm0 = vcmask 1041408  }
  0x36   :  { %585 = vmatpush.bf16.msrb.mxu3 %v1838_v35  ;;  %v1763_v53 = vld [vmem:[%s3955_s0 + $0x84] sm:$0xf0]  ;;  %1093 = vst [vmem:[#allocation1 + $0x20] ss:$4 sm:$0xff] %v1082_v50  ;;  %v2009_v55 = vld [vmem:[%s3955_s0 + $0x30] sm:$0xf0] }
  0x37   :  { %v1083_v56 = vld [vmem:[%s3958_s3 + $0x10] sm:$0x3]  ;;  %v2005_v58 = vld [vmem:[%s3955_s0 + $0x14] sm:$0xf]  ;;  %v1719_v59 = vld [vmem:[%s3955_s0 + $0x34] sm:$0xf0]  ;;  %v1766_v3 = vor.u32 %v2015_v52, %v1763_v53  ;;  %v1718_v9 = vor.u32 %v2009_v55, %v1717_v54 }
  0x38   :  { %544 = vmatpush.bf16.msrb.mxu0 %v1790_v41  ;;  %v1725_v60 = vld [vmem:[%s3955_s0 + $0x18] sm:$0xf]  ;;  %v1095_v61 = vld.sshfl [vmem:[#allocation1 + $0x8] sm:$0xff pattern:$0x73625140]  ;;  %v1722_v10 = vor.u32 %v2005_v58, %v1719_v59  ;;  %vm1105_vm1 = vcmask 31744  }
  0x39   :  { %v1094_v62 = vld.sshfl [vmem:[#allocation1] sm:$0xff pattern:$0x73625140]  ;;  %558 = vmatpush.bf16.msrb.mxu1 %v1794_v45  ;;  %572 = vmatpush.bf16.msrb.mxu2 %v1798_v46  ;;  %v1096_v1 = vld.sshfl [vmem:[#allocation1 + $0x10] sm:$0xff pattern:$0x73625140] }
  0x3a   :  { %v1097_v2 = vld.sshfl [vmem:[#allocation1 + $0x18] sm:$0xff pattern:$0x73625140]  ;;  %586 = vmatpush.bf16.msrb.mxu3 %v1802_v51  ;;  %v1727_v6 = vld [vmem:[%s3955_s0 + $0x3c] sm:$0xf0]  ;;  %v1112_v16 = vsel %vm1109_vm0, %v1095_v61, 0 }
  0x3b   :  { %v2010_v4 = vld [vmem:[%s3955_s0 + $0x38] sm:$0xf0]  ;;  %1103 = vst [vmem:[#allocation1] ss:$4 sm:$0xff] %v1083_v56  ;;  %v1985_v7 = vld [vmem:[%s3955_s0 + $0x218] sm:$0xf] }
  0x3c   :  { %v2006_v5 = vld [vmem:[%s3955_s0 + $0x1c] sm:$0xf]  ;;  %545 = vmatpush.bf16.msrb.mxu0 %v1754_v57  ;;  %v1726_v11 = vor.u32 %v2010_v4, %v1725_v60  ;;  %v1949_v14 = vld [vmem:[%s3955_s0 + $0x1d0] sm:$0xf]  ;;  %v2065_v15 = vld [vmem:[%s3955_s0 + $0x1f0] sm:$0xf0] }
  0x3d   :  { %v2074_v8 = vld [vmem:[%s3955_s0 + $0x238] sm:$0xf0]  ;;  %559 = vmatpush.bf16.msrb.mxu1 %v1758_v63  ;;  %573 = vmatpush.bf16.msrb.mxu2 %v1762_v0  ;;  %v1730_v12 = vor.u32 %v2006_v5, %v1727_v6  ;;  %v1098_v17 = vld.sshfl [vmem:[#allocation1 + $0x20] sm:$0xff pattern:$0x73625140]  ;;  %v1950_v18 = vor.u32 %v2065_v15, %v1949_v14  ;;  %v1110_v19 = vsel %vm1109_vm0, %v1094_v62, 0 }
  0x3e   :  { %587 = vmatpush.bf16.msrb.mxu3 %v1766_v3  ;;  %v1986_v13 = vor.u32 %v2074_v8, %v1985_v7  ;;  %v1099_v20 = vld.sshfl [vmem:[#allocation1 + $0x28] sm:$0xff pattern:$0x73625140]  ;;  %v1114_v23 = vsel %vm1109_vm0, %v1096_v1, 0  ;;  %v1118_v24 = vsel %vm1109_vm0, %v1098_v17, 0  ;;  %v1116_v25 = vsel %vm1109_vm0, %v1097_v2, 0 }
  0x3f   :  { %v1913_v21 = vld [vmem:[%s3955_s0 + $0x188] sm:$0xf]  ;;  %v2056_v22 = vld [vmem:[%s3955_s0 + $0x1a8] sm:$0xf0]  ;;  %v1120_v26 = vsel %vm1109_vm0, %v1099_v20, 0  ;;  %v1361_v53 = vld [vmem:[%s3960_s5 + $0x78] sm:$0xff] }
  0x40   :  { %546 = vmatpush.bf16.msrb.mxu0 %v1718_v9  ;;  %v1914_v27 = vor.u32 %v2056_v22, %v1913_v21  ;;  %v1877_v28 = vld [vmem:[%s3955_s0 + $0x140] sm:$0xf]  ;;  %v2047_v29 = vld [vmem:[%s3955_s0 + $0x160] sm:$0xf0]  ;;  %v1841_v31 = vld [vmem:[%s3955_s0 + $0xf8] sm:$0xf] }
  0x41   :  { %560 = vmatpush.bf16.msrb.mxu1 %v1722_v10  ;;  %574 = vmatpush.bf16.msrb.mxu2 %v1726_v11  ;;  %v1878_v30 = vor.u32 %v2047_v29, %v1877_v28  ;;  %v2038_v32 = vld [vmem:[%s3955_s0 + $0x118] sm:$0xf0]  ;;  %v1989_v33 = vld [vmem:[%s3957_s2] sm:$0xf]  ;;  %v2075_v34 = vld [vmem:[%s3957_s2] sm:$0x30] }
  0x42   :  { %588 = vmatpush.bf16.msrb.mxu3 %v1730_v12  ;;  %v1842_v35 = vor.u32 %v2038_v32, %v1841_v31  ;;  %v1805_v36 = vld [vmem:[%s3955_s0 + $0xb0] sm:$0xf]  ;;  %v2029_v37 = vld [vmem:[%s3955_s0 + $0xd0] sm:$0xf0]  ;;  %v1990_v39 = vor.u32 %v2075_v34, %v1989_v33  ;;  %v1769_v43 = vld [vmem:[%s3955_s0 + $0x68] sm:$0xf] }
  0x43   :  { %547 = vmatmul.bf16.vlgmr.msrb.gmra.mxu0 %v2483_v49  ;;  %v1104_v38 = vld.sshfl [vmem:[#allocation1] sm:$0xff pattern:$0x73625140]  ;;  %v1101_v40 = vld.sshfl [vmem:[#allocation1 + $0x38] sm:$0xff pattern:$0x73625140]  ;;  %v1806_v41 = vor.u32 %v2029_v37, %v1805_v36 }
  0x44   :  { %595 = vmatpush.bf16.msra.mxu0 %v1986_v13  ;;  %561 = vmatmul.bf16.vlgmr.msrb.gmra.mxu1 %v2483_v49  ;;  %v1126_v42 = vsel %vm1109_vm0, %v1104_v38, 0  ;;  %v2020_v44 = vld [vmem:[%s3955_s0 + $0x88] sm:$0xf0]  ;;  %v1124_v45 = vsel %vm1109_vm0, %v1101_v40, 0  ;;  %v1733_v47 = vld [vmem:[%s3955_s0 + $0x20] sm:$0xf] }
  0x45   :  { %1149 = vmatpush.bf16.msra.mxu2 %v1112_v16  ;;  %589 = vmatmul.bf16.vlgmr.msrb.gmra.mxu3 %v2483_v49  ;;  %v1770_v46 = vor.u32 %v2020_v44, %v1769_v43  ;;  %v2011_v48 = vld [vmem:[%s3955_s0 + $0x40] sm:$0xf0]  ;;  %v1100_v50 = vld.sshfl [vmem:[#allocation1 + $0x30] sm:$0xff pattern:$0x73625140]  ;;  %v1359_v55 = vld [vmem:[%s3960_s5 + $0x68] sm:$0xff] }
  0x46   :  { %575 = vmatmul.bf16.vlgmr.msrb.gmra.mxu2 %v2483_v49  ;;  %1135 = vmatpush.bf16.msra.mxu1 %v1110_v19  ;;  %v1734_v51 = vor.u32 %v2011_v48, %v1733_v47  ;;  %v1122_v52 = vsel %vm1109_vm0, %v1100_v50, 0  ;;  %v1358_v59 = vld [vmem:[%s3960_s5 + $0x60] sm:$0xff]  ;;  %v972_v62 = vld [vmem:[%s3959_s4 + $0x8] sm:$0xff]  ;;  %v973_v4 = vld [vmem:[%s3959_s4 + $0x10] sm:$0xff]  ;;  %s1684_s19 = sshll.u32 %s3962_s7, 4  ;;  %s1685_s19 = int_to_ptr.hbm [resolvable:$true] %s1684_s19 }
  0x47   :  { %1163 = vmatpush.bf16.msra.mxu3 %v1114_v23  ;;  %v971_v0 = vld [vmem:[%s3959_s4] sm:$0xff]  ;;  %v981_v8 = vld [vmem:[%s3959_s4 + $0x50] sm:$0xf]  ;;  %v2761_v9 = vld [vmem:[%s3959_s4 + $0x58] sm:$0xf]  ;;  %v990_v11 = vsub.f32 1.0, %v972_v62 }
  0x48   :  { %596 = vmatpush.bf16.msra.mxu0 %v1950_v18  ;;  %v1357_v10 = vld [vmem:[%s3960_s5 + $0x58] sm:$0xff]  ;;  %v989_v17 = vsub.f32 1.0, %v971_v0  ;;  %v980_v19 = vld [vmem:[%s3959_s4 + $0x48] sm:$0xf]  ;;  %v1356_v20 = vld [vmem:[%s3960_s5 + $0x50] sm:$0xff]  ;;  %v991_v23 = vsub.f32 1.0, %v973_v4 }
  0x49   :  { %1191 = vmatpush.bf16.msrb.mxu2 %v1118_v24  ;;  %v974_v13 = vld [vmem:[%s3959_s4 + $0x18] sm:$0xff]  ;;  %v1355_v29 = vld [vmem:[%s3960_s5 + $0x48] sm:$0xff]  ;;  %v999_v31 = vsub.f32 1.0, %v981_v8  ;;  %v1000_v32 = vsub.f32 1.0, %v2761_v9  ;;  %v983_v38 = vld [vmem:[%s3959_s4 + $0x60] sm:$0xf] }
  0x4a   :  { %1177 = vmatpush.bf16.msrb.mxu1 %v1116_v25  ;;  %v1377_v15 = vld [vmem:[%s3960_s5 + $0xf8] sm:$0xff]  ;;  %v1376_v25 = vld [vmem:[%s3960_s5 + $0xf0] sm:$0xff]  ;;  %v1375_v33 = vld [vmem:[%s3960_s5 + $0xe8] sm:$0xff] }
  0x4b   :  { %1205 = vmatpush.bf16.msrb.mxu3 %v1120_v26  ;;  %v2810_v44 = vld [vmem:[%s3959_s4 + $0x28] sm:$0xff]  ;;  %v1393_v4 = vld [vmem:[%s3960_s5 + $0x178] sm:$0xff] }
  0x4c   :  { %597 = vmatpush.bf16.msra.mxu0 %v1914_v27  ;;  %v992_v27 = vsub.f32 1.0, %v974_v13  ;;  %v1373_v9 = vld [vmem:[%s3960_s5 + $0xd8] sm:$0xff]  ;;  %v2875_v13 = vld [vmem:[%s3959_s4 + $0x20] sm:$0xff] }
  0x50   :  { %598 = vmatpush.bf16.msra.mxu0 %v1878_v30  ;;  %v998_v30 = vsub.f32 1.0, %v980_v19  ;;  %v1409_v19 = vld [vmem:[%s3960_s5 + $0x1f8] sm:$0xff] }
  0x54   :  { %599 = vmatpush.bf16.msra.mxu0 %v1842_v35  ;;  %1991 = vmatmul.msk.bf16.vlgmr.msra.gmra.mxu1 %vm1105_vm1, %v1990_v39 }
  0x55   :  { %1993 = vmatmul.msk.bf16.vlgmr.msra.gmra.mxu3 %vm1105_vm1, %v1990_v39  ;;  %1233 = vmatpush.bf16.msra.mxu1 %v1124_v45 }
  0x56   :  { %1992 = vmatmul.msk.bf16.vlgmr.msra.gmra.mxu2 %vm1105_vm1, %v1990_v39  ;;  %1493 = vmatpush.msra.mxu3 %v1361_v53 }
  0x57   :  { %1247 = vmatpush.bf16.msra.mxu2 %v1126_v42 }
  0x58   :  { %600 = vmatpush.bf16.msra.mxu0 %v1806_v41 }
  0x5c   :  { %601 = vmatpush.bf16.msra.mxu0 %v1770_v46 }
  0x60   :  { %602 = vmatpush.bf16.msra.mxu0 %v1734_v51 }
  0x63   :  { %603 = vmatmul.bf16.vlgmr.msra.gmra.mxu0 %v2483_v49  ;;  %v1360_v49 = vld [vmem:[%s3960_s5 + $0x70] sm:$0xff] }
  0x64   :  { %1219 = vmatpush.bf16.msrb.mxu0 %v1122_v52  ;;  %1994 = vmatmul.msk.bf16.vlgmr.msrb.gmra.mxu1 %vm1105_vm1, %v1990_v39 }
  0x65   :  { %1996 = vmatmul.msk.bf16.vlgmr.msrb.gmra.mxu3 %vm1105_vm1, %v1990_v39  ;;  %1533 = vmatpush.msrb.mxu1 %v1393_v4 }
  0x66   :  { %1995 = vmatmul.msk.bf16.vlgmr.msrb.gmra.mxu2 %vm1105_vm1, %v1990_v39  ;;  %1494 = vmatpush.msra.mxu3 %v1360_v49 }
  0x67   :  { %1553 = vmatpush.msrb.mxu2 %v1409_v19 }
  0x68   :  { %1495 = vmatpush.msra.mxu3 %v1359_v55  ;;  %1513 = vmatpush.msra.mxu0 %v1377_v15  ;;  %v1001_v55 = vsub.f32 1.0, %v983_v38  ;;  %v1392_v15 = vld [vmem:[%s3960_s5 + $0x170] sm:$0xff] }
  0x69   :  { %1534 = vmatpush.msrb.mxu1 %v1392_v15 }
  0x6a   :  { %1496 = vmatpush.msra.mxu3 %v1358_v59  ;;  %1514 = vmatpush.msra.mxu0 %v1376_v25  ;;  %v1351_v25 = vld [vmem:[%s3960_s5 + $0x28] sm:$0xff] }
  0x6c   :  { %1497 = vmatpush.msra.mxu3 %v1357_v10  ;;  %1515 = vmatpush.msra.mxu0 %v1375_v33 }
  0x6e   :  { %1498 = vmatpush.msra.mxu3 %v1356_v20 }
  0x70   :  { %1499 = vmatpush.msra.mxu3 %v1355_v29 }
  0x73   :  { %1997 = vmatmul.msk.bf16.vlgmr.msrb.gmra.mxu0 %vm1105_vm1, %v1990_v39 }
  0x74   :  { %1998 = vmatmul.msk.bf16.vlgmr.msra.gmra.mxu1 %vm1105_vm1, %v1990_v39 }
  0x76   :  { %1999 = vmatmul.msk.bf16.vlgmr.msra.gmra.mxu2 %vm1105_vm1, %v1990_v39  ;;  %v1354_v39 = vld [vmem:[%s3960_s5 + $0x40] sm:$0xff] }
  0x77   :  { %1500 = vmatpush.msra.mxu3 %v1354_v39 }
  0xa0   :  { %v492_v54 = vpop.f32.mrf.mxu0 }
  0xa1   :  { %v609_v56 = vsub.f32 0.0, %v492_v54  ;;  %v506_v57 = vpop.f32.mrf.mxu1  ;;  %v2794_v35 = vmul.f32 %v989_v17, %v492_v54 }
  0xa2   :  { %v610_v58 = vsub.f32 0.0, %v506_v57  ;;  %v2797_v36 = vmul.f32 %v990_v11, %v506_v57 }
  0xa3   :  { %v627_v60 = vmul.f32 1.442695, %v609_v56  ;;  %v994_v56 = vsub.f32 1.0, %v2810_v44 }
  0xa4   :  { %v629_v61 = vmul.f32 1.442695, %v610_v58 }
  0xa5   :  { %2077 = vpow2.f32 %v627_v60 }
  0xa6   :  { %2079 = vpow2.f32 %v629_v61  ;;  %v1374_v61 = vld [vmem:[%s3960_s5 + $0xe0] sm:$0xff] }
  0xa7   :  { %1516 = vmatpush.msra.mxu0 %v1374_v61 }
  0xa8   :  { %v494_v3 = vpop.f32.mrf.mxu0 }
  0xa9   :  { %v520_v63 = vpop.f32.mrf.mxu2  ;;  %v618_v6 = vsub.f32 0.0, %v494_v3  ;;  %v508_v7 = vpop.f32.mrf.mxu1  ;;  %v2817_v50 = vmul.f32 %v998_v30, %v494_v3  ;;  %v1353_v3 = vld [vmem:[%s3960_s5 + $0x38] sm:$0xff]  ;;  %1517 = vmatpush.msra.mxu0 %v1373_v9 }
  0xaa   :  { %v611_v1 = vsub.f32 0.0, %v520_v63  ;;  %v534_v2 = vpop.f32.mrf.mxu3  ;;  %v619_v14 = vsub.f32 0.0, %v508_v7  ;;  %v2813_v46 = vmul.f32 %v991_v23, %v520_v63  ;;  %v2819_v51 = vmul.f32 %v999_v31, %v508_v7  ;;  %1501 = vmatpush.msra.mxu3 %v1353_v3 }
  0xab   :  { %v612_v5 = vsub.f32 0.0, %v534_v2  ;;  %v2078_v16 = vpop.eup %2077  ;;  %v645_v24 = vmul.f32 1.442695, %v618_v6  ;;  %v2815_v47 = vmul.f32 %v992_v27, %v534_v2  ;;  %v2853_v2 = vld [vmem:[%s3959_s4 + $0x30] sm:$0xff]  ;;  %v1391_v27 = vld [vmem:[%s3960_s5 + $0x168] sm:$0xff]  ;;  %v993_v31 = vsub.f32 1.0, %v2875_v13 }
  0xac   :  { %v631_v12 = vmul.f32 1.442695, %v611_v1  ;;  %v2080_v21 = vpop.eup %2079  ;;  %v2778_v22 = vadd.f32 1.0, %v2078_v16  ;;  %v647_v28 = vmul.f32 1.442695, %v619_v14  ;;  %v1352_v14 = vld [vmem:[%s3960_s5 + $0x30] sm:$0xff]  ;;  %1535 = vmatpush.msrb.mxu1 %v1391_v27 }
  0xad   :  { %v633_v18 = vmul.f32 1.442695, %v612_v5  ;;  %v2783_v26 = vadd.f32 1.0, %v2080_v21  ;;  %v995_v17 = vsub.f32 1.0, %v2853_v2  ;;  %1502 = vmatpush.msra.mxu3 %v1352_v14 }
  0xae   :  { %2081 = vpow2.f32 %v631_v12  ;;  %v690_v34 = vand.u32 2147483647, %v2778_v22  ;;  %v692_v40 = vand.u32 2147483648, %v2778_v22  ;;  %vm686_vm2 = vweird.f32 %v2778_v22 }
  0xaf   :  { %2083 = vpow2.f32 %v633_v18  ;;  %v705_v41 = vand.u32 2147483647, %v2783_v26  ;;  %v707_v45 = vand.u32 2147483648, %v2783_v26  ;;  %vm701_vm4 = vweird.f32 %v2783_v26  ;;  %v1372_v18 = vld [vmem:[%s3960_s5 + $0xd0] sm:$0xff]  ;;  %1503 = vmatpush.msra.mxu3 %v1351_v25 }
  0xb0   :  { %2085 = vrcp.f32 %v2778_v22  ;;  %vm2827_vm3 = vcmp.eq.f32.partialorder %v690_v34, 8.507059e+37  ;;  %v2831_v59 = vor.u32 1.1754944e-38, %v692_v40  ;;  %1518 = vmatpush.msra.mxu0 %v1372_v18 }
  0xb1   :  { %2087 = vrcp.f32 %v2783_v26  ;;  %v522_v37 = vpop.f32.mrf.mxu2  ;;  %vm2834_vm5 = vcmp.eq.f32.partialorder %v705_v41, 8.507059e+37  ;;  %v2845_v0 = vor.u32 1.1754944e-38, %v707_v45 }
  0xb2   :  { %2089 = vpow2.f32 %v645_v24  ;;  %v620_v42 = vsub.f32 0.0, %v522_v37  ;;  %v536_v43 = vpop.f32.mrf.mxu3  ;;  %v2863_v7 = vmul.f32 %v1000_v32, %v522_v37 }
  0xb3   :  { %2091 = vpow2.f32 %v647_v28  ;;  %v621_v53 = vsub.f32 0.0, %v536_v43  ;;  %v2870_v12 = vmul.f32 %v1001_v55, %v536_v43 }
  0xb4   :  { %v2082_v48 = vpop.eup %2081  ;;  %v649_v52 = vmul.f32 1.442695, %v620_v42 }
  0xb5   :  { %v2084_v49 = vpop.eup %2083  ;;  %v2822_v54 = vadd.f32 1.0, %v2082_v48  ;;  %v651_v8 = vmul.f32 1.442695, %v621_v53 }
  0xb6   :  { %v2825_v57 = vpop.eup %2085  ;;  %v2848_v1 = vadd.f32 1.0, %v2084_v49 }
  0xb7   :  { %v2841_v62 = vpop.eup %2087  ;;  %v682_v63 = vmul.f32 %v2825_v57, %v2778_v22  ;;  %2093 = vrcp.f32 %v2822_v54  ;;  %vm687_vm6 = vweird.f32 %v2825_v57  ;;  %v720_v21 = vand.u32 2147483647, %v2822_v54 }
  0xb8   :  { %v2090_v5 = vpop.eup %2089  ;;  %v697_v6 = vmul.f32 %v2841_v62, %v2783_v26  ;;  %2095 = vpow2.f32 %v649_v52  ;;  %vm702_vm7 = vweird.f32 %v2841_v62  ;;  %vm2908_vm8 = vmor %vm686_vm2, %vm687_vm6  ;;  %v722_v30 = vand.u32 2147483648, %v2822_v54 }
  0xb9   :  { %v2092_v10 = vpop.eup %2091  ;;  %v683_v11 = vsub.f32 1.0, %v682_v63  ;;  %2097 = vrcp.f32 %v2848_v1  ;;  %v2894_v23 = vadd.f32 1.0, %v2090_v5  ;;  %vm2920_vm9 = vmor %vm701_vm4, %vm702_vm7  ;;  %v735_v34 = vand.u32 2147483647, %v2848_v1 }
  0xba   :  { %v698_v16 = vsub.f32 1.0, %v697_v6  ;;  %2099 = vlog2.f32 %v2778_v22  ;;  %v2896_v24 = vadd.f32 1.0, %v2092_v10  ;;  %v737_v37 = vand.u32 2147483648, %v2848_v1 }
  0xbb   :  { %v684_v20 = vmul.f32 %v2825_v57, %v683_v11  ;;  %2101 = vpow2.f32 %v651_v8  ;;  %vm716_vm10 = vweird.f32 %v2822_v54  ;;  %vm731_vm11 = vweird.f32 %v2848_v1 }
  0xbc   :  { %v699_v29 = vmul.f32 %v2841_v62, %v698_v16  ;;  %2103 = vrcp.f32 %v2894_v23  ;;  %vm2934_vm13 = vcmp.eq.f32.partialorder %v720_v21, 8.507059e+37  ;;  %vm2954_vm14 = vcmp.eq.f32.partialorder %v735_v34, 8.507059e+37  ;;  %v2983_v16 = vld [vmem:[%s3959_s4 + $0x68] sm:$0xf] }
  0xbd   :  { %v2094_v32 = vpop.eup %2093  ;;  %v685_v33 = vadd.f32 %v2825_v57, %v684_v20  ;;  %2105 = vrcp.f32 %v2896_v24  ;;  %v738_v58 = vor.u32 1.1754944e-38, %v737_v37  ;;  %vm821_vm2 = vweird.f32 %v2894_v23 }
  0xbe   :  { %v2096_v38 = vpop.eup %2095  ;;  %v700_v39 = vadd.f32 %v2841_v62, %v699_v29  ;;  %v712_v40 = vmul.f32 %v2094_v32, %v2822_v54  ;;  %vm717_vm12 = vweird.f32 %v2094_v32  ;;  %v825_v5 = vand.u32 2147483647, %v2894_v23 }
  0xbf   :  { %v2098_v41 = vpop.eup %2097  ;;  %v689_v42 = vsel %vm2908_vm8, %v2825_v57, %v685_v33  ;;  %v723_v57 = vor.u32 1.1754944e-38, %v722_v30  ;;  %v2961_v3 = vadd.f32 1.0, %v2096_v38  ;;  %vm2968_vm1 = vmor %vm716_vm10, %vm717_vm12  ;;  %v827_v6 = vand.u32 2147483648, %v2894_v23 }
  0xc0   :  { %v2939_v45 = vpop.eup %2099  ;;  %v694_v48 = vsel %vm2827_vm3, %v2831_v59, %v689_v42  ;;  %v704_v52 = vsel %vm2920_vm9, %v2841_v62, %v700_v39  ;;  %v713_v53 = vsub.f32 1.0, %v712_v40  ;;  %v727_v49 = vmul.f32 %v2098_v41, %v2848_v1  ;;  %v2963_v4 = vpop.f32.mrf.mxu0  ;;  %v1371_v39 = vld [vmem:[%s3960_s5 + $0xc8] sm:$0xff]  ;;  %v1408_v40 = vld [vmem:[%s3960_s5 + $0x1f0] sm:$0xff] }
  0xc1   :  { %951 = vst [vmem:[%s3961_s6] sm:$0xff] %v694_v48  ;;  %v709_v55 = vsel %vm2834_vm5, %v2845_v0, %v704_v52  ;;  %v2102_v59 = vpop.eup %2101  ;;  %vm732_vm15 = vweird.f32 %v2098_v41  ;;  %v840_v8 = vand.u32 2147483647, %v2896_v24  ;;  %v842_v14 = vand.u32 2147483648, %v2896_v24  ;;  %v2978_v15 = vpop.f32.mrf.mxu1  ;;  %1519 = vmatpush.msra.mxu0 %v1371_v39  ;;  %1554 = vmatpush.msrb.mxu2 %v1408_v40 }
  0xc2   :  { %952 = vst [vmem:[%s3961_s6 + $0x8] sm:$0xff] %v709_v55  ;;  %v714_v62 = vmul.f32 %v2094_v32, %v713_v53  ;;  %v728_v63 = vsub.f32 1.0, %v727_v49  ;;  %v2104_v60 = vpop.eup %2103  ;;  %vm2990_vm3 = vmor %vm731_vm11, %vm732_vm15  ;;  %2107 = vrcp.f32 %v2961_v3  ;;  %v2995_v20 = vadd.f32 1.0, %v2102_v59  ;;  %v1350_v53 = vld [vmem:[%s3960_s5 + $0x20] sm:$0xff] }
  0xc3   :  { %v817_v11 = vmul.f32 %v2104_v60, %v2894_v23  ;;  %v2985_v18 = vpop.eup %2105  ;;  %vm822_vm4 = vweird.f32 %v2104_v60  ;;  %v613_v21 = vsub.f32 0.0, %v2963_v4  ;;  %vm3006_vm5 = vcmp.eq.f32.partialorder %v825_v5, 8.507059e+37  ;;  %v1390_v49 = vld [vmem:[%s3960_s5 + $0x160] sm:$0xff]  ;;  %1504 = vmatpush.msra.mxu3 %v1350_v53 }
  0xc4   :  { %v715_v9 = vadd.f32 %v2094_v32, %v714_v62  ;;  %v729_v10 = vmul.f32 %v2098_v41, %v728_v63  ;;  %v832_v29 = vmul.f32 %v2985_v18, %v2896_v24  ;;  %vm836_vm6 = vweird.f32 %v2896_v24  ;;  %vm3029_vm7 = vmor %vm821_vm2, %vm822_vm4  ;;  %1536 = vmatpush.msrb.mxu1 %v1390_v49 }
  0xc5   :  { %v818_v28 = vsub.f32 1.0, %v817_v11  ;;  %v1002_v34 = vsub.f32 1.0, %v2983_v16  ;;  %2109 = vrcp.f32 %v2995_v20  ;;  %v828_v43 = vor.u32 1.1754944e-38, %v827_v6 }
  0xc6   :  { %v719_v25 = vsel %vm2968_vm1, %v2094_v32, %v715_v9  ;;  %v730_v27 = vadd.f32 %v2098_v41, %v729_v10  ;;  %v833_v38 = vsub.f32 1.0, %v832_v29  ;;  %vm3033_vm8 = vcmp.eq.f32.partialorder %v840_v8, 8.507059e+37 }
  0xc7   :  { %v724_v33 = vsel %vm2934_vm13, %v723_v57, %v719_v25  ;;  %v819_v37 = vmul.f32 %v2104_v60, %v818_v28  ;;  %v843_v52 = vor.u32 1.1754944e-38, %v842_v14  ;;  %vm837_vm9 = vweird.f32 %v2985_v18 }
  0xc8   :  { %953 = vst [vmem:[%s3961_s6 + $0x10] sm:$0xff] %v724_v33  ;;  %v734_v32 = vsel %vm2990_vm3, %v2098_v41, %v730_v27  ;;  %v834_v57 = vmul.f32 %v2985_v18, %v833_v38  ;;  %v635_v61 = vmul.f32 1.442695, %v613_v21  ;;  %vm851_vm10 = vweird.f32 %v2961_v3  ;;  %vm838_vm11 = vmor %vm836_vm6, %vm837_vm9  ;;  %v3062_v14 = vpop.f32.mrf.mxu3  ;;  %v550_v27 = vpop.f32.mrf.mxu0 }
  0xc9   :  { %v3002_v30 = vpop.f32.mrf.mxu2  ;;  %v739_v42 = vsel %vm2954_vm14, %v738_v58, %v734_v32  ;;  %v820_v55 = vadd.f32 %v2104_v60, %v819_v37  ;;  %v2108_v58 = vpop.eup %2107  ;;  %v855_v59 = vand.u32 2147483647, %v2961_v3  ;;  %v614_v62 = vsub.f32 0.0, %v2978_v15 }
  0xca   :  { %954 = vst [vmem:[%s3961_s6 + $0x18] sm:$0xff] %v739_v42  ;;  %v615_v63 = vsub.f32 0.0, %v3002_v30  ;;  %v835_v5 = vadd.f32 %v2985_v18, %v834_v57  ;;  %v847_v6 = vmul.f32 %v2108_v58, %v2961_v3  ;;  %v857_v8 = vand.u32 2147483648, %v2961_v3  ;;  %v564_v28 = vpop.f32.mrf.mxu1 }
  0xcb   :  { %v824_v0 = vsel %vm3029_vm7, %v2104_v60, %v820_v55  ;;  %v870_v10 = vand.u32 2147483647, %v2995_v20  ;;  %2111 = vpow2.f32 %v635_v61  ;;  %v637_v11 = vmul.f32 1.442695, %v614_v62  ;;  %v2110_v19 = vpop.eup %2109  ;;  %v978_v55 = vld [vmem:[%s3959_s4 + $0x38] sm:$0xff] }
  0xcc   :  { %v829_v9 = vsel %vm3006_vm5, %v828_v43, %v824_v0  ;;  %v839_v60 = vsel %vm838_vm11, %v2985_v18, %v835_v5  ;;  %v848_v21 = vsub.f32 1.0, %v847_v6  ;;  %vm866_vm12 = vweird.f32 %v2995_v20 }
  0xcd   :  { %961 = vst [vmem:[%s3961_s6 + $0x48] sm:$0xf] %v829_v9  ;;  %v639_v25 = vmul.f32 1.442695, %v615_v63  ;;  %v844_v29 = vsel %vm3033_vm8, %v843_v52, %v839_v60  ;;  %v862_v33 = vmul.f32 %v2110_v19, %v2995_v20  ;;  %v872_v22 = vand.u32 2147483648, %v2995_v20  ;;  %v1369_v63 = vld [vmem:[%s3960_s5 + $0xb8] sm:$0xff] }
  0xce   :  { %2113 = vpow2.f32 %v637_v11  ;;  %962 = vst [vmem:[%s3961_s6 + $0x50] sm:$0xf] %v844_v29  ;;  %v849_v32 = vmul.f32 %v2108_v58, %v848_v21  ;;  %vm852_vm13 = vweird.f32 %v2108_v58  ;;  %v616_v18 = vsub.f32 0.0, %v3062_v14  ;;  %v985_v52 = vld [vmem:[%s3959_s4 + $0x70] sm:$0xf] }
  0xcf   :  { %2115 = vpow2.f32 %v639_v25  ;;  %v863_v38 = vsub.f32 1.0, %v862_v33  ;;  %vm867_vm14 = vweird.f32 %v2110_v19  ;;  %v622_v39 = vsub.f32 0.0, %v550_v27  ;;  %vm853_vm1 = vmor %vm851_vm10, %vm852_vm13 }
  0xd0   :  { %v623_v40 = vsub.f32 0.0, %v564_v28  ;;  %v850_v42 = vadd.f32 %v2108_v58, %v849_v32  ;;  %vm3079_vm15 = vcmp.eq.f32.partialorder %v855_v59, 8.507059e+37  ;;  %v858_v43 = vor.u32 1.1754944e-38, %v857_v8  ;;  %vm3095_vm2 = vmor %vm866_vm12, %vm867_vm14 }
  0xd1   :  { %v3077_v37 = vpop.f32.mrf.mxu2  ;;  %v641_v48 = vmul.f32 1.442695, %v616_v18  ;;  %v2112_v53 = vpop.eup %2111  ;;  %v864_v49 = vmul.f32 %v2110_v19, %v863_v38  ;;  %v653_v57 = vmul.f32 1.442695, %v622_v39  ;;  %v873_v0 = vor.u32 1.1754944e-38, %v872_v22 }
  0xd2   :  { %v655_v61 = vmul.f32 1.442695, %v623_v40  ;;  %v624_v59 = vsub.f32 0.0, %v3077_v37  ;;  %v854_v62 = vsel %vm853_vm1, %v2108_v58, %v850_v42  ;;  %v3099_v5 = vadd.f32 1.0, %v2112_v53 }
  0xd3   :  { %2117 = vpow2.f32 %v641_v48  ;;  %v859_v8 = vsel %vm3079_vm15, %v858_v43, %v854_v62  ;;  %v865_v9 = vadd.f32 %v2110_v19, %v864_v49  ;;  %vm871_vm3 = vcmp.eq.f32.partialorder %v870_v10, 8.507059e+37  ;;  %v3170_v43 = vpop.f32.mrf.mxu3  ;;  %v1370_v48 = vld [vmem:[%s3960_s5 + $0xc0] sm:$0xff]  ;;  %v1349_v49 = vld [vmem:[%s3960_s5 + $0x18] sm:$0xff] }
  0xd4   :  { %v2114_v6 = vpop.eup %2113  ;;  %2119 = vpow2.f32 %v653_v57  ;;  %963 = vst [vmem:[%s3961_s6 + $0x58] sm:$0xf] %v859_v8  ;;  %v996_v58 = vsub.f32 1.0, %v978_v55  ;;  %v1003_v60 = vsub.f32 1.0, %v985_v52  ;;  %v657_v21 = vmul.f32 1.442695, %v624_v59  ;;  %1520 = vmatpush.msra.mxu0 %v1370_v48  ;;  %1505 = vmatpush.msra.mxu3 %v1349_v49 }
  0xd5   :  { %v2116_v11 = vpop.eup %2115  ;;  %2121 = vrcp.f32 %v3099_v5  ;;  %v869_v25 = vsel %vm3095_vm2, %v2110_v19, %v865_v9  ;;  %v3109_v29 = vadd.f32 1.0, %v2114_v6  ;;  %v750_v22 = vand.u32 2147483647, %v3099_v5  ;;  %v3127_v19 = vld [vmem:[%s3959_s4 + $0x78] sm:$0xf]  ;;  %v1407_v52 = vld [vmem:[%s3960_s5 + $0x1e8] sm:$0xff] }
  0xd6   :  { %v3111_v33 = vadd.f32 1.0, %v2116_v11  ;;  %2123 = vpow2.f32 %v655_v61  ;;  %v874_v10 = vsel %vm871_vm3, %v873_v0, %v869_v25  ;;  %v3117_v32 = vmul.f32 %v993_v31, %v2963_v4  ;;  %1555 = vmatpush.msrb.mxu2 %v1407_v52  ;;  %v1389_v55 = vld [vmem:[%s3960_s5 + $0x158] sm:$0xff]  ;;  %1521 = vmatpush.msra.mxu0 %v1369_v63 }
  0xd7   :  { %v3122_v18 = vmul.f32 %v994_v56, %v2978_v15  ;;  %964 = vst [vmem:[%s3961_s6 + $0x60] sm:$0xf] %v874_v10  ;;  %v752_v38 = vand.u32 2147483648, %v3099_v5  ;;  %2125 = vrcp.f32 %v3109_v29  ;;  %v3137_v13 = vmul.f32 %v995_v17, %v3002_v30  ;;  %1537 = vmatpush.msrb.mxu1 %v1389_v55 }
  0xd8   :  { %v3141_v44 = vmul.f32 %v1002_v34, %v550_v27  ;;  %v767_v31 = vand.u32 2147483648, %v3109_v29  ;;  %2127 = vrcp.f32 %v3111_v33  ;;  %v3146_v4 = vmul.f32 %v996_v58, %v3062_v14  ;;  %v1406_v58 = vld [vmem:[%s3960_s5 + $0x1e0] sm:$0xff] }
  0xd9   :  { %v2118_v56 = vpop.eup %2117  ;;  %v3148_v15 = vmul.f32 %v1003_v60, %v564_v28  ;;  %v782_v40 = vand.u32 2147483648, %v3111_v33  ;;  %2129 = vpow2.f32 %v657_v21  ;;  %v1004_v17 = vsub.f32 1.0, %v3127_v19  ;;  %v1348_v60 = vld [vmem:[%s3960_s5 + $0x10] sm:$0xff]  ;;  %1556 = vmatpush.msrb.mxu2 %v1406_v58 }
  0xda   :  { %v2120_v39 = vpop.eup %2119  ;;  %v3151_v2 = vadd.f32 1.0, %v2118_v56  ;;  %vm746_vm4 = vweird.f32 %v3099_v5  ;;  %vm3157_vm5 = vcmp.eq.f32.partialorder %v750_v22, 8.507059e+37  ;;  %v765_v34 = vand.u32 2147483647, %v3109_v29  ;;  %v1388_v21 = vld [vmem:[%s3960_s5 + $0x150] sm:$0xff]  ;;  %1506 = vmatpush.msra.mxu3 %v1348_v60 }
  0xdb   :  { %v3154_v16 = vpop.eup %2121  ;;  %v3162_v14 = vadd.f32 1.0, %v2120_v39  ;;  %v3166_v42 = vor.u32 1.1754944e-38, %v752_v38  ;;  %v780_v41 = vand.u32 2147483647, %v3111_v33  ;;  %vm761_vm6 = vweird.f32 %v3109_v29  ;;  %v1405_v39 = vld [vmem:[%s3960_s5 + $0x1d8] sm:$0xff]  ;;  %1538 = vmatpush.msrb.mxu1 %v1388_v21 }
  0xdc   :  { %v2124_v27 = vpop.eup %2123  ;;  %v742_v28 = vmul.f32 %v3154_v16, %v3099_v5  ;;  %2131 = vrcp.f32 %v3151_v2  ;;  %v3179_v53 = vor.u32 1.1754944e-38, %v767_v31  ;;  %vm776_vm7 = vweird.f32 %v3111_v33  ;;  %v1368_v31 = vld [vmem:[%s3960_s5 + $0xb0] sm:$0xff]  ;;  %1557 = vmatpush.msrb.mxu2 %v1405_v39 }
  0xdd   :  { %2133 = vrcp.f32 %v3162_v14  ;;  %v3189_v57 = vpop.eup %2125  ;;  %vm747_vm8 = vweird.f32 %v3154_v16  ;;  %v3192_v59 = vor.u32 1.1754944e-38, %v782_v40  ;;  %v3194_v62 = vadd.f32 1.0, %v2124_v27  ;;  %1522 = vmatpush.msra.mxu0 %v1368_v31 }
  0xde   :  { %v743_v61 = vsub.f32 1.0, %v742_v28  ;;  %v3199_v0 = vpop.eup %2127  ;;  %v757_v6 = vmul.f32 %v3189_v57, %v3109_v29  ;;  %vm3203_vm9 = vcmp.eq.f32.partialorder %v765_v34, 8.507059e+37  ;;  %vm791_vm10 = vweird.f32 %v3151_v2  ;;  %vm3238_vm13 = vmor %vm746_vm4, %vm747_vm8  ;;  %v1347_v28 = vld [vmem:[%s3960_s5 + $0x8] sm:$0xff] }
  0xdf   :  { %v795_v9 = vand.u32 2147483647, %v3151_v2  ;;  %v625_v11 = vsub.f32 0.0, %v3170_v43  ;;  %v2130_v25 = vpop.eup %2129  ;;  %v772_v22 = vmul.f32 %v3199_v0, %v3111_v33  ;;  %vm3222_vm11 = vcmp.eq.f32.partialorder %v780_v41, 8.507059e+37  ;;  %v1387_v41 = vld [vmem:[%s3960_s5 + $0x148] sm:$0xff]  ;;  %1507 = vmatpush.msra.mxu3 %v1347_v28 }
  0xe0   :  { %v744_v10 = vmul.f32 %v3154_v16, %v743_v61  ;;  %v797_v56 = vand.u32 2147483648, %v3151_v2  ;;  %vm881_vm12 = vweird.f32 %v3162_v14  ;;  %v758_v34 = vsub.f32 1.0, %v757_v6  ;;  %1539 = vmatpush.msrb.mxu1 %v1387_v41  ;;  %v3347_v8 = vpop.f32.mrf.mxu0  ;;  %v1383_v41 = vld [vmem:[%s3960_s5 + $0x128] sm:$0xff] }
  0xe1   :  { %vm762_vm14 = vweird.f32 %v3189_v57  ;;  %v885_v27 = vand.u32 2147483647, %v3162_v14  ;;  %2135 = vrcp.f32 %v3194_v62  ;;  %v773_v49 = vsub.f32 1.0, %v772_v22 }
  0xe2   :  { %v3251_v48 = vpop.eup %2131  ;;  %v745_v52 = vadd.f32 %v3154_v16, %v744_v10  ;;  %vm777_vm15 = vweird.f32 %v3199_v0  ;;  %v887_v55 = vand.u32 2147483648, %v3162_v14  ;;  %v759_v63 = vmul.f32 %v3189_v57, %v758_v34  ;;  %vm3271_vm2 = vmor %vm761_vm6, %vm762_vm14  ;;  %v3294_v34 = vpop.f32.mrf.mxu1 }
  0xe3   :  { %v3256_v61 = vpop.eup %2133  ;;  %v787_v6 = vmul.f32 %v3251_v48, %v3151_v2  ;;  %vm792_vm1 = vweird.f32 %v3251_v48  ;;  %v3262_v58 = vadd.f32 1.0, %v2130_v25  ;;  %v774_v10 = vmul.f32 %v3199_v0, %v773_v49  ;;  %vm3290_vm4 = vmor %vm776_vm7, %vm777_vm15 }
  0xe4   :  { %v749_v60 = vsel %vm3238_vm13, %v3154_v16, %v745_v52  ;;  %vm3276_vm3 = vcmp.eq.f32.partialorder %v795_v9, 8.507059e+37  ;;  %v877_v25 = vmul.f32 %v3256_v61, %v3162_v14  ;;  %v760_v31 = vadd.f32 %v3189_v57, %v759_v63 }
  0xe5   :  { %v754_v16 = vsel %vm3157_vm5, %v3166_v42, %v749_v60  ;;  %v788_v9 = vsub.f32 1.0, %v787_v6  ;;  %v798_v40 = vor.u32 1.1754944e-38, %v797_v56  ;;  %v775_v30 = vadd.f32 %v3199_v0, %v774_v10  ;;  %vm3304_vm5 = vmor %vm791_vm10, %vm792_vm1  ;;  %v1404_v6 = vld [vmem:[%s3960_s5 + $0x1d0] sm:$0xff]  ;;  %v1346_v60 = vld [vmem:[%s3960_s5] sm:$0xff] }
  0xe6   :  { %955 = vst [vmem:[%s3961_s6 + $0x20] sm:$0xff] %v754_v16  ;;  %v878_v28 = vsub.f32 1.0, %v877_v25  ;;  %vm3308_vm6 = vcmp.eq.f32.partialorder %v885_v27, 8.507059e+37  ;;  %2137 = vrcp.f32 %v3262_v58  ;;  %v764_v52 = vsel %vm3271_vm2, %v3189_v57, %v760_v31  ;;  %v1367_v27 = vld [vmem:[%s3960_s5 + $0xa8] sm:$0xff]  ;;  %v1386_v25 = vld [vmem:[%s3960_s5 + $0x140] sm:$0xff]  ;;  %1558 = vmatpush.msrb.mxu2 %v1404_v6  ;;  %1508 = vmatpush.msra.mxu3 %v1346_v60  ;;  %v1384_v42 = vld [vmem:[%s3960_s5 + $0x130] sm:$0xff] }
  0xe7   :  { %v3313_v56 = vpop.eup %2135  ;;  %v789_v49 = vmul.f32 %v3251_v48, %v788_v9  ;;  %vm882_vm7 = vweird.f32 %v3256_v61  ;;  %v888_v63 = vor.u32 1.1754944e-38, %v887_v55  ;;  %v769_v57 = vsel %vm3203_vm9, %v3179_v53, %v764_v52  ;;  %1523 = vmatpush.msra.mxu0 %v1367_v27  ;;  %v1366_v16 = vld [vmem:[%s3960_s5 + $0xa0] sm:$0xff]  ;;  %v1403_v53 = vld [vmem:[%s3960_s5 + $0x1c8] sm:$0xff]  ;;  %v1425_v9 = vld [vmem:[%s3960_s5 + $0x278] sm:$0xff]  ;;  %1540 = vmatpush.msrb.mxu1 %v1386_v25 }
  0xe8   :  { %v779_v55 = vsel %vm3290_vm4, %v3199_v0, %v775_v30  ;;  %v879_v21 = vmul.f32 %v3256_v61, %v878_v28  ;;  %v892_v10 = vmul.f32 %v3313_v56, %v3194_v62  ;;  %956 = vst [vmem:[%s3961_s6 + $0x28] sm:$0xff] %v769_v57  ;;  %vm896_vm8 = vweird.f32 %v3194_v62  ;;  %v1385_v30 = vld [vmem:[%s3960_s5 + $0x138] sm:$0xff]  ;;  %v1402_v27 = vld [vmem:[%s3960_s5 + $0x1c0] sm:$0xff]  ;;  %vm3384_vm9 = vmor %vm881_vm12, %vm882_vm7  ;;  %1559 = vmatpush.msrb.mxu2 %v1403_v53  ;;  %v3425_v53 = vpop.f32.mrf.mxu3 }
  0xe9   :  { %v784_v0 = vsel %vm3222_vm11, %v3192_v59, %v779_v55  ;;  %v790_v31 = vadd.f32 %v3251_v48, %v789_v49  ;;  %v900_v39 = vand.u32 2147483647, %v3194_v62  ;;  %v1365_v59 = vld [vmem:[%s3960_s5 + $0x98] sm:$0xff]  ;;  %v902_v52 = vand.u32 2147483648, %v3194_v62  ;;  %1524 = vmatpush.msra.mxu0 %v1366_v16  ;;  %v3391_v55 = vpop.f32.mrf.mxu2  ;;  %1573 = vmatpush.msrb.mxu3 %v1425_v9  ;;  %v1364_v25 = vld [vmem:[%s3960_s5 + $0x90] sm:$0xff]  ;;  %v1363_v9 = vld [vmem:[%s3960_s5 + $0x88] sm:$0xff] }
  0xea   :  { %957 = vst [vmem:[%s3961_s6 + $0x30] sm:$0xff] %v784_v0  ;;  %v880_v38 = vadd.f32 %v3256_v61, %v879_v21  ;;  %v893_v28 = vsub.f32 1.0, %v892_v10  ;;  %v659_v49 = vmul.f32 1.442695, %v625_v11  ;;  %v915_v11 = vand.u32 2147483647, %v3262_v58  ;;  %1541 = vmatpush.msrb.mxu1 %v1385_v30  ;;  %1560 = vmatpush.msrb.mxu2 %v1402_v27 }
  0xeb   :  { %v794_v6 = vsel %vm3304_vm5, %v3251_v48, %v790_v31  ;;  %v1026_v57 = vmul.f32 0.6931472, %v2939_v45  ;;  %2139 = vlog2.f32 %v2783_v26  ;;  %v1424_v48 = vld [vmem:[%s3960_s5 + $0x270] sm:$0xff]  ;;  %vm897_vm10 = vweird.f32 %v3313_v56  ;;  %1525 = vmatpush.msra.mxu0 %v1365_v59  ;;  %v1401_v16 = vld [vmem:[%s3960_s5 + $0x1b8] sm:$0xff]  ;;  %v1423_v0 = vld [vmem:[%s3960_s5 + $0x268] sm:$0xff] }
  0xec   :  { %v3399_v21 = vpop.eup %2137  ;;  %v799_v10 = vsel %vm3276_vm3, %v798_v40, %v794_v6  ;;  %v884_v26 = vsel %vm3384_vm9, %v3256_v61, %v880_v38  ;;  %v894_v45 = vmul.f32 %v3313_v56, %v893_v28  ;;  %vm3419_vm11 = vcmp.eq.f32.partialorder %v900_v39, 8.507059e+37  ;;  %1574 = vmatpush.msrb.mxu3 %v1424_v48  ;;  %1542 = vmatpush.msrb.mxu1 %v1384_v42  ;;  %v1400_v30 = vld [vmem:[%s3960_s5 + $0x1b0] sm:$0xff]  ;;  %vm3451_vm12 = vmor %vm896_vm8, %vm897_vm10  ;;  %v3460_v38 = vpop.f32.mrf.mxu1  ;;  %v3477_v6 = vld [vmem:[%s3959_s4 + $0x80] sm:$0xf] }
  0xed   :  { %958 = vst [vmem:[%s3961_s6 + $0x38] sm:$0xff] %v799_v10  ;;  %v889_v61 = vsel %vm3308_vm6, %v888_v63, %v884_v26  ;;  %v907_v40 = vmul.f32 %v3399_v21, %v3262_v58  ;;  %2141 = vpow2.f32 %v659_v49  ;;  %v903_v31 = vor.u32 1.1754944e-38, %v902_v52  ;;  %1526 = vmatpush.msra.mxu0 %v1364_v25  ;;  %1561 = vmatpush.msrb.mxu2 %v1401_v16  ;;  %v1422_v52 = vld [vmem:[%s3960_s5 + $0x260] sm:$0xff]  ;;  %v1381_v26 = vld [vmem:[%s3960_s5 + $0x118] sm:$0xff] }
  0xee   :  { %965 = vst [vmem:[%s3961_s6 + $0x68] sm:$0xf] %v889_v61  ;;  %v895_v63 = vadd.f32 %v3313_v56, %v894_v45  ;;  %v3438_v39 = vadd.f32 %v1026_v57, %v2794_v35  ;;  %2143 = vlog2.f32 %v2822_v54  ;;  %vm3455_vm13 = vcmp.eq.f32.partialorder %v915_v11, 8.507059e+37  ;;  %v1382_v49 = vld [vmem:[%s3960_s5 + $0x120] sm:$0xff]  ;;  %1575 = vmatpush.msrb.mxu3 %v1423_v0  ;;  %1543 = vmatpush.msrb.mxu1 %v1383_v41  ;;  %v3486_v11 = vpop.f32.mrf.mxu0  ;;  %v1441_v25 = vld [vmem:[%s3960_s5 + $0x2f8] sm:$0xff] }
  0xef   :  { %v908_v35 = vsub.f32 1.0, %v907_v40  ;;  %2145 = vlog2.f32 %v2894_v23  ;;  %v617_v28 = vsub.f32 0.0, %v3347_v8  ;;  %vm912_vm14 = vweird.f32 %v3399_v21  ;;  %v1362_v60 = vld [vmem:[%s3960_s5 + $0x80] sm:$0xff]  ;;  %1527 = vmatpush.msra.mxu0 %v1363_v9  ;;  %1562 = vmatpush.msrb.mxu2 %v1400_v30  ;;  %v1440_v30 = vld [vmem:[%s3960_s5 + $0x2f0] sm:$0xff]  ;;  %v1397_v59 = vld [vmem:[%s3960_s5 + $0x198] sm:$0xff] }
  0xf0   :  { %v899_v27 = vsel %vm3451_vm12, %v3313_v56, %v895_v63  ;;  %v917_v23 = vand.u32 2147483648, %v3262_v58  ;;  %2147 = vlog2.f32 %v2896_v24  ;;  %v1399_v56 = vld [vmem:[%s3960_s5 + $0x1a8] sm:$0xff]  ;;  %v1421_v24 = vld [vmem:[%s3960_s5 + $0x258] sm:$0xff]  ;;  %vm911_vm15 = vweird.f32 %v3262_v58  ;;  %1576 = vmatpush.msrb.mxu3 %v1422_v52  ;;  %1544 = vmatpush.msrb.mxu1 %v1382_v49  ;;  %v1398_v16 = vld [vmem:[%s3960_s5 + $0x1a0] sm:$0xff] }
  0xf1   :  { %v2140_v57 = vpop.eup %2139  ;;  %v904_v48 = vsel %vm3419_vm11, %v903_v31, %v899_v27  ;;  %v909_v42 = vmul.f32 %v3399_v21, %v908_v35  ;;  %v643_v10 = vmul.f32 1.442695, %v617_v28  ;;  %2149 = vlog2.f32 %v2961_v3  ;;  %1528 = vmatpush.msra.mxu0 %v1362_v60  ;;  %1563 = vmatpush.msrb.mxu2 %v1399_v56  ;;  %vm3532_vm1 = vmor %vm911_vm15, %vm912_vm14  ;;  %v3549_v52 = vpop.f32.mrf.mxu2  ;;  %v1379_v27 = vld [vmem:[%s3960_s5 + $0x108] sm:$0xff]  ;;  %v1396_v56 = vld [vmem:[%s3960_s5 + $0x190] sm:$0xff] }
  0xf2   :  { %966 = vst [vmem:[%s3961_s6 + $0x70] sm:$0xf] %v904_v48  ;;  %v3505_v3 = vmul.f32 %v1004_v17, %v3077_v37  ;;  %v1028_v45 = vmul.f32 0.6931472, %v2140_v57  ;;  %2151 = vlog2.f32 %v2848_v1  ;;  %v1005_v19 = vsub.f32 1.0, %v3477_v6  ;;  %v3519_v37 = vld [vmem:[%s3959_s4 + $0x40] sm:$0xff]  ;;  %1577 = vmatpush.msrb.mxu3 %v1421_v24  ;;  %1545 = vmatpush.msrb.mxu1 %v1381_v26  ;;  %v1167_v24 = vpop.f32.mrf.mxu3 }
  0xf3   :  { %v2142_v61 = vpop.eup %2141  ;;  %v910_v22 = vadd.f32 %v3399_v21, %v909_v42  ;;  %2153 = vpow2.f32 %v643_v10  ;;  %v1420_v1 = vld [vmem:[%s3960_s5 + $0x250] sm:$0xff]  ;;  %v626_v40 = vsub.f32 0.0, %v3486_v11  ;;  %v918_v63 = vor.u32 1.1754944e-38, %v917_v23  ;;  %1593 = vmatpush.msrb.mxu0 %v1441_v25  ;;  %1564 = vmatpush.msrb.mxu2 %v1398_v16  ;;  %v1418_v57 = vld [vmem:[%s3960_s5 + $0x240] sm:$0xff] }
  0xf4   :  { %v1380_v17 = vld [vmem:[%s3960_s5 + $0x110] sm:$0xff]  ;;  %v2144_v0 = vpop.eup %2143  ;;  %v3536_v31 = vadd.f32 1.0, %v2142_v61  ;;  %v1062_v9 = vadd.f32 %v1028_v45, %v2797_v36  ;;  %2155 = vlog2.f32 %v3099_v5  ;;  %vm1272_vm2 = vcmask 1043456   ;;  %v1419_v36 = vld [vmem:[%s3960_s5 + $0x248] sm:$0xff]  ;;  %1578 = vmatpush.msrb.mxu3 %v1420_v1  ;;  %v1438_v26 = vld [vmem:[%s3960_s5 + $0x2e0] sm:$0xff]  ;;  %v1179_v1 = vpop.f32.mrf.mxu1 }
  0xf5   :  { %v2146_v35 = vpop.eup %2145  ;;  %v914_v28 = vsel %vm3532_vm1, %v3399_v21, %v910_v22  ;;  %v661_v49 = vmul.f32 1.442695, %v626_v40  ;;  %v1439_v5 = vld [vmem:[%s3960_s5 + $0x2e8] sm:$0xff]  ;;  %2157 = vlog2.f32 %v3109_v29  ;;  %v1030_v6 = vmul.f32 0.6931472, %v2144_v0  ;;  %1546 = vmatpush.msrb.mxu1 %v1380_v17  ;;  %v1378_v29 = vld [vmem:[%s3960_s5 + $0x100] sm:$0xff]  ;;  %1594 = vmatpush.msrb.mxu0 %v1440_v30 }
  0xf6   :  { %v2148_v21 = vpop.eup %2147  ;;  %v919_v23 = vsel %vm3455_vm13, %v918_v63, %v914_v28  ;;  %2159 = vrcp.f32 %v3536_v31  ;;  %v997_v60 = vsub.f32 1.0, %v3519_v37  ;;  %v3578_v48 = vmul.f32 %v1005_v19, %v3170_v43  ;;  %1565 = vmatpush.msrb.mxu2 %v1397_v59  ;;  %v1395_v45 = vld [vmem:[%s3960_s5 + $0x188] sm:$0xff]  ;;  %1579 = vmatpush.msrb.mxu3 %v1419_v36  ;;  %v1417_v17 = vld [vmem:[%s3960_s5 + $0x238] sm:$0xff] }
  0xf7   :  { %v2150_v54 = vpop.eup %2149  ;;  %967 = vst [vmem:[%s3961_s6 + $0x78] sm:$0xf] %v919_v23  ;;  %v1254_v42 = vmul.f32 %v3294_v34, %v3438_v39  ;;  %v1044_v10 = vmul.f32 0.6931472, %v2146_v35  ;;  %v930_v16 = vand.u32 2147483647, %v3536_v31  ;;  %2161 = vpow2.f32 %v661_v49  ;;  %1547 = vmatpush.msrb.mxu1 %v1379_v27  ;;  %1595 = vmatpush.msrb.mxu0 %v1439_v5 }
  0xf8   :  { %v2152_v25 = vpop.eup %2151  ;;  %v1046_v43 = vmul.f32 0.6931472, %v2148_v21  ;;  %v1048_v61 = vmul.f32 0.6931472, %v2150_v54  ;;  %vm926_vm3 = vweird.f32 %v3536_v31  ;;  %v932_v39 = vand.u32 2147483648, %v3536_v31  ;;  %1566 = vmatpush.msrb.mxu2 %v1396_v56  ;;  %v1457_v40 = vld [vmem:[%s3960_s5 + $0x378] sm:$0xff]  ;;  %1580 = vmatpush.msrb.mxu3 %v1418_v57 }
  0xf9   :  { %v2154_v34 = vpop.eup %2153  ;;  %v1070_v22 = vadd.f32 %v1044_v10, %v2817_v50  ;;  %v1032_v19 = vmul.f32 0.6931472, %v2152_v25  ;;  %v1255_v41 = vmul.f32 %v3391_v55, %v1062_v9  ;;  %1548 = vmatpush.msrb.mxu1 %v1378_v29  ;;  %v1437_v59 = vld [vmem:[%s3960_s5 + $0x2d8] sm:$0xff]  ;;  %v1394_v35 = vld [vmem:[%s3960_s5 + $0x180] sm:$0xff]  ;;  %v1063_v36 = vadd.f32 %v1030_v6, %v2813_v46  ;;  %1596 = vmatpush.msrb.mxu0 %v1438_v26  ;;  %v1415_v56 = vld [vmem:[%s3960_s5 + $0x228] sm:$0xff] }
  0xfa   :  { %v2156_v0 = vpop.eup %2155  ;;  %v3599_v63 = vadd.f32 1.0, %v2154_v34  ;;  %v1071_v30 = vadd.f32 %v1046_v43, %v2819_v51  ;;  %v1072_v50 = vadd.f32 %v1048_v61, %v2863_v7  ;;  %2163 = vlog2.f32 %v2995_v20  ;;  %1567 = vmatpush.msrb.mxu2 %v1395_v45  ;;  %v1416_v51 = vld [vmem:[%s3960_s5 + $0x230] sm:$0xff]  ;;  %1581 = vmatpush.msrb.mxu3 %v1417_v17  ;;  %v1473_v27 = vld [vmem:[%s3960_s5 + $0x3f8] sm:$0xff]  ;;  %v1455_v57 = vld [vmem:[%s3960_s5 + $0x368] sm:$0xff]  ;;  %v1193_v43 = vpop.f32.mrf.mxu2 }
  0xfb   :  { %v2158_v28 = vpop.eup %2157  ;;  %v1263_v55 = vmul.f32 %v3460_v38, %v1070_v22  ;;  %v1064_v9 = vadd.f32 %v1032_v19, %v2815_v47  ;;  %v1456_v7 = vld [vmem:[%s3960_s5 + $0x370] sm:$0xff]  ;;  %v1034_v47 = vmul.f32 0.6931472, %v2156_v0  ;;  %1613 = vmatpush.msra.mxu1 %v1457_v40  ;;  %vm3631_vm4 = vcmp.eq.f32.partialorder %v930_v16, 8.507059e+37  ;;  %1597 = vmatpush.msrb.mxu0 %v1437_v59  ;;  %v1414_v61 = vld [vmem:[%s3960_s5 + $0x220] sm:$0xff]  ;;  %v1471_v40 = vld [vmem:[%s3960_s5 + $0x3e8] sm:$0xff] }
  0xfc   :  { %v3619_v49 = vpop.eup %2159  ;;  %2165 = vrcp.f32 %v3599_v63  ;;  %v1264_v46 = vmul.f32 %v3549_v52, %v1071_v30  ;;  %v1265_v38 = vmul.f32 %v1167_v24, %v1072_v50  ;;  %v1436_v20 = vld [vmem:[%s3960_s5 + $0x2d0] sm:$0xff]  ;;  %v3635_v52 = vor.u32 1.1754944e-38, %v932_v39  ;;  %1568 = vmatpush.msrb.mxu2 %v1394_v35  ;;  %1582 = vmatpush.msrb.mxu3 %v1416_v51  ;;  %v1454_v34 = vld [vmem:[%s3960_s5 + $0x360] sm:$0xff]  ;;  %v1453_v59 = vld [vmem:[%s3960_s5 + $0x358] sm:$0xff] }
  0xfd   :  { %v922_v5 = vmul.f32 %v3619_v49, %v3536_v31  ;;  %v1256_v23 = vmul.f32 %v3425_v53, %v1063_v36  ;;  %v1273_v6 = vsel %vm1272_vm2, %v1263_v55, 0.0  ;;  %v2162_v29 = vpop.eup %2161  ;;  %v1036_v26 = vmul.f32 0.6931472, %v2158_v28  ;;  %1614 = vmatpush.msra.mxu1 %v1456_v7  ;;  %v1435_v53 = vld [vmem:[%s3960_s5 + $0x2c8] sm:$0xff]  ;;  %v1472_v45 = vld [vmem:[%s3960_s5 + $0x3f0] sm:$0xff]  ;;  %1598 = vmatpush.msrb.mxu0 %v1436_v20  ;;  %v1434_v17 = vld [vmem:[%s3960_s5 + $0x2c0] sm:$0xff]  ;;  %v3691_v20 = vpop.f32.mrf.mxu0 }
  0xfe   :  { %v1274_v54 = vadd.f32 %v1273_v6, %v1254_v42  ;;  %v1281_v10 = vsel %vm1272_vm2, %v1264_v46, 0.0  ;;  %v1289_v24 = vsel %vm1272_vm2, %v1265_v38, 0.0  ;;  %vm927_vm5 = vweird.f32 %v3619_v49  ;;  %1633 = vmatpush.msra.mxu2 %v1473_v27  ;;  %1583 = vmatpush.msrb.mxu3 %v1415_v56  ;;  %v1470_v51 = vld [vmem:[%s3960_s5 + $0x3e0] sm:$0xff]  ;;  %v1452_v27 = vld [vmem:[%s3960_s5 + $0x350] sm:$0xff]  ;;  %v1481_v37 = vld [vmem:[%s3960_s5 + $0x438] sm:$0xff] }
  0xff   :  { %v923_v25 = vsub.f32 1.0, %v922_v5  ;;  %v1282_v16 = vadd.f32 %v1281_v10, %v1255_v41  ;;  %v1290_v42 = vadd.f32 %v1289_v24, %v1256_v23  ;;  %v3660_v22 = vmul.f32 %v1179_v1, %v1064_v9  ;;  %1615 = vmatpush.msra.mxu1 %v1455_v57  ;;  %1599 = vmatpush.msrb.mxu0 %v1435_v53  ;;  %v1433_v9 = vld [vmem:[%s3960_s5 + $0x2b8] sm:$0xff]  ;;  %vm3704_vm6 = vmor %vm926_vm3, %vm927_vm5  ;;  %v1432_v56 = vld [vmem:[%s3960_s5 + $0x2b0] sm:$0xff] }
 0x100   :  { %v1275_v39 = vrot.slane %v1274_v54, 4  ;;  %v1065_v19 = vadd.f32 %v1034_v47, %v3117_v32  ;;  %2167 = vlog2.f32 %v3111_v33  ;;  %v2164_v0 = vpop.eup %2163  ;;  %v3671_v50 = vadd.f32 1.0, %v2162_v29  ;;  %v1207_v32 = vpop.f32.mrf.mxu3  ;;  %1634 = vmatpush.msra.mxu2 %v1472_v45  ;;  %v1413_v33 = vld [vmem:[%s3960_s5 + $0x218] sm:$0xff]  ;;  %1584 = vmatpush.msrb.mxu3 %v1414_v61  ;;  %v1451_v24 = vld [vmem:[%s3960_s5 + $0x348] sm:$0xff]  ;;  %v1450_v61 = vld [vmem:[%s3960_s5 + $0x340] sm:$0xff] }
 0x101   :  { %v924_v41 = vmul.f32 %v3619_v49, %v923_v25  ;;  %v1283_v30 = vrot.slane %v1282_v16, 4  ;;  %v1291_v1 = vrot.slane %v1290_v42, 4  ;;  %v1050_v55 = vmul.f32 0.6931472, %v2164_v0  ;;  %1616 = vmatpush.msra.mxu1 %v1454_v34  ;;  %v1181_v47 = vpop.f32.mrf.mxu1  ;;  %1600 = vmatpush.msrb.mxu0 %v1434_v17  ;;  %v1469_v57 = vld [vmem:[%s3960_s5 + $0x3d8] sm:$0xff]  ;;  %v1431_v25 = vld [vmem:[%s3960_s5 + $0x2a8] sm:$0xff] }
 0x102   :  { %v3679_v35 = vpop.eup %2165  ;;  %v1276_v28 = vadd.f32 %v1275_v39, %v1274_v54  ;;  %v3681_v36 = vmul.f32 %v1193_v43, %v1065_v19  ;;  %2169 = vlog2.f32 %v3162_v14  ;;  %1635 = vmatpush.msra.mxu2 %v1471_v40  ;;  %v1412_v14 = vld [vmem:[%s3960_s5 + $0x210] sm:$0xff]  ;;  %1585 = vmatpush.msrb.mxu3 %v1413_v33  ;;  %v1410_v43 = vld [vmem:[%s3960_s5 + $0x200] sm:$0xff]  ;;  %vm806_vm8 = vweird.f32 %v3599_v63 }
 0x103   :  { %v925_v7 = vadd.f32 %v3619_v49, %v924_v41  ;;  %v1284_v46 = vadd.f32 %v1283_v30, %v1282_v16  ;;  %v1292_v38 = vadd.f32 %v1291_v1, %v1290_v42  ;;  %2171 = vlog2.f32 %v3194_v62  ;;  %1617 = vmatpush.msra.mxu1 %v1453_v59  ;;  %1601 = vmatpush.msrb.mxu0 %v1433_v9  ;;  %v1468_v16 = vld [vmem:[%s3960_s5 + $0x3d0] sm:$0xff]  ;;  %v1430_v0 = vld [vmem:[%s3960_s5 + $0x2a0] sm:$0xff]  ;;  %v1467_v41 = vld [vmem:[%s3960_s5 + $0x3c8] sm:$0xff] }
 0x104   :  { %v1277_v23 = vrot.slane %v1276_v28, 2  ;;  %v1066_v62 = vadd.f32 %v1036_v26, %v3122_v18  ;;  %v1073_v6 = vadd.f32 %v1050_v55, %v2870_v12  ;;  %v802_v29 = vmul.f32 %v3679_v35, %v3599_v63  ;;  %1636 = vmatpush.msra.mxu2 %v1470_v51  ;;  %v1411_v12 = vld [vmem:[%s3960_s5 + $0x208] sm:$0xff]  ;;  %1586 = vmatpush.msrb.mxu3 %v1412_v14  ;;  %v1449_v59 = vld [vmem:[%s3960_s5 + $0x338] sm:$0xff]  ;;  %v1195_v55 = vpop.f32.mrf.mxu2 }
 0x105   :  { %v929_v54 = vsel %vm3704_vm6, %v3619_v49, %v925_v7  ;;  %v1285_v18 = vrot.slane %v1284_v46, 2  ;;  %v1293_v10 = vrot.slane %v1292_v38, 2  ;;  %2173 = vlog2.f32 %v3262_v58  ;;  %1618 = vmatpush.msra.mxu1 %v1452_v27  ;;  %1602 = vmatpush.msrb.mxu0 %v1432_v56 }
 0x106   :  { %v2168_v26 = vpop.eup %2167  ;;  %v934_v53 = vsel %vm3631_vm4, %v3635_v52, %v929_v54  ;;  %v1278_v49 = vadd.f32 %v1277_v23, %v1276_v28  ;;  %v1266_v45 = vmul.f32 %v1181_v47, %v1073_v6  ;;  %v803_v42 = vsub.f32 1.0, %v802_v29  ;;  %1637 = vmatpush.msra.mxu2 %v1469_v57  ;;  %1587 = vmatpush.msrb.mxu3 %v1411_v12  ;;  %v1429_v6 = vld [vmem:[%s3960_s5 + $0x298] sm:$0xff]  ;;  %v1223_v54 = vpop.f32.mrf.mxu0 }
 0x107   :  { %968 = vst [vmem:[%s3961_s6 + $0x80] sm:$0xf] %v934_v53  ;;  %v1286_v58 = vadd.f32 %v1285_v18, %v1284_v46  ;;  %v1294_v21 = vadd.f32 %v1293_v10, %v1292_v38  ;;  %2175 = vrcp.f32 %v3671_v50  ;;  %v1038_v52 = vmul.f32 0.6931472, %v2168_v26  ;;  %1619 = vmatpush.msra.mxu1 %v1451_v24  ;;  %1603 = vmatpush.msrb.mxu0 %v1431_v25  ;;  %v1448_v18 = vld [vmem:[%s3960_s5 + $0x330] sm:$0xff] }
 0x108   :  { %v2170_v34 = vpop.eup %2169  ;;  %v3747_v39 = vmul.f32 %v1207_v32, %v1066_v62  ;;  %v1297_v19 = vsel %vm1272_vm2, %v1266_v45, 0.0  ;;  %v1279_v17 = vrot.slane %v1278_v49, 1  ;;  %v804_v40 = vmul.f32 %v3679_v35, %v803_v42  ;;  %1638 = vmatpush.msra.mxu2 %v1468_v16  ;;  %1588 = vmatpush.msrb.mxu3 %v1410_v43  ;;  %v1209_v47 = vpop.f32.mrf.mxu3  ;;  %v1428_v53 = vld [vmem:[%s3960_s5 + $0x290] sm:$0xff] }
 0x109   :  { %v2172_v30 = vpop.eup %2171  ;;  %v1298_v1 = vadd.f32 %v1297_v19, %v3660_v22  ;;  %v1052_v32 = vmul.f32 0.6931472, %v2170_v34  ;;  %2177 = vlog2.f32 %v3151_v2  ;;  %v1287_v33 = vrot.slane %v1286_v58, 1  ;;  %1620 = vmatpush.msra.mxu1 %v1450_v61  ;;  %v1486_v22 = vld [vmem:[%s3960_s5 + $0x460] sm:$0x3]  ;;  %1604 = vmatpush.msrb.mxu0 %v1430_v0  ;;  %v1484_v42 = vld [vmem:[%s3960_s5 + $0x450] sm:$0xff]  ;;  %v3819_v43 = vpop.f32.mrf.mxu1 }
 0x10a   :  { %v1280_v28 = vadd.f32 %v1279_v17, %v1278_v49  ;;  %v1054_v9 = vmul.f32 0.6931472, %v2172_v30  ;;  %v1295_v51 = vrot.slane %v1294_v21, 1  ;;  %vm807_vm7 = vweird.f32 %v3679_v35  ;;  %1639 = vmatpush.msra.mxu2 %v1467_v41  ;;  %v1465_v49 = vld [vmem:[%s3960_s5 + $0x3b8] sm:$0xff]  ;;  %v1427_v34 = vld [vmem:[%s3960_s5 + $0x288] sm:$0xff]  ;;  %v1464_v19 = vld [vmem:[%s3960_s5 + $0x3b0] sm:$0xff] }
 0x10b   :  { %v2174_v2 = vpop.eup %2173  ;;  %v1299_v7 = vrot.slane %v1298_v1, 4  ;;  %v1067_v46 = vadd.f32 %v1038_v52, %v3137_v13  ;;  %v1074_v38 = vadd.f32 %v1052_v32, %v3141_v44  ;;  %v3769_v14 = vadd.f32 %v3679_v35, %v804_v40  ;;  %1621 = vmatpush.msra.mxu1 %v1449_v59  ;;  %v1466_v13 = vld [vmem:[%s3960_s5 + $0x3c0] sm:$0xff]  ;;  %vm3792_vm9 = vmor %vm806_vm8, %vm807_vm7  ;;  %1605 = vmatpush.msrb.mxu0 %v1429_v6  ;;  %v1483_v41 = vld [vmem:[%s3960_s5 + $0x448] sm:$0xff] }
 0x10c   :  { %1509 = vmatmul.f32.vlgmr.msra.gmra.mxu3 %v1280_v28  ;;  %v1075_v27 = vadd.f32 %v1054_v9, %v3148_v15  ;;  %v1288_v5 = vadd.f32 %v1287_v33, %v1286_v58  ;;  %v1296_v23 = vadd.f32 %v1295_v51, %v1294_v21  ;;  %v1056_v62 = vmul.f32 0.6931472, %v2174_v2  ;;  %v1485_v15 = vld [vmem:[%s3960_s5 + $0x458] sm:$0xff]  ;;  %1640 = vmatpush.msra.mxu2 %v1466_v13  ;;  %v1447_v58 = vld [vmem:[%s3960_s5 + $0x328] sm:$0xff]  ;;  %v1446_v30 = vld [vmem:[%s3960_s5 + $0x320] sm:$0xff] }
 0x10d   :  { %v3778_v44 = vpop.eup %2175  ;;  %v1300_v56 = vadd.f32 %v1299_v7, %v1298_v1  ;;  %v1260_v57 = vmul.f32 %v3691_v20, %v1067_v46  ;;  %v1267_v29 = vmul.f32 %v1195_v55, %v1074_v38  ;;  %2000 = vmatpush.msk.msra.mxu3 %vm1109_vm0, %v1486_v22  ;;  %v810_v24 = vand.u32 2147483647, %v3599_v63  ;;  %1622 = vmatpush.msra.mxu1 %v1448_v18  ;;  %v1463_v33 = vld [vmem:[%s3960_s5 + $0x3a8] sm:$0xff]  ;;  %v1445_v51 = vld [vmem:[%s3960_s5 + $0x318] sm:$0xff]  ;;  %v1444_v6 = vld [vmem:[%s3960_s5 + $0x310] sm:$0xff] }
 0x10e   :  { %v1268_v10 = vmul.f32 %v1209_v47, %v1075_v27  ;;  %1529 = vmatmul.f32.vlgmr.msra.gmra.mxu0 %v1288_v5  ;;  %1549 = vmatmul.f32.vlgmr.msrb.gmra.mxu1 %v1296_v23  ;;  %v1076_v12 = vadd.f32 %v1056_v62, %v3505_v3  ;;  %v812_v26 = vand.u32 2147483648, %v3599_v63  ;;  %v809_v16 = vsel %vm3792_vm9, %v3679_v35, %v3769_v14  ;;  %v3870_v14 = vpop.f32.mrf.mxu2 }
 0x10f   :  { %v3804_v45 = vpop.eup %2177  ;;  %v1301_v3 = vrot.slane %v1300_v56, 2  ;;  %v1305_v25 = vsel %vm1272_vm2, %v1267_v29, 0.0  ;;  %vm959_vm0 = vcmask 801792   ;;  %vm3821_vm10 = vcmp.eq.f32.partialorder %v810_v24, 8.507059e+37  ;;  %1657 = vmatpush.msra.mxu3 %v1485_v15  ;;  %1606 = vmatpush.msrb.mxu0 %v1428_v53  ;;  %v1480_v15 = vld [vmem:[%s3960_s5 + $0x430] sm:$0xff]  ;;  %v1443_v24 = vld [vmem:[%s3960_s5 + $0x308] sm:$0xff] }
 0x110   :  { %v1306_v21 = vadd.f32 %v1305_v25, %v3681_v36  ;;  %v1313_v52 = vsel %vm1272_vm2, %v1268_v10, 0.0  ;;  %v1269_v61 = vmul.f32 %v1223_v54, %v1076_v12  ;;  %v3834_v36 = vld [vmem:[%s3959_s4 + $0x88] sm:$0xf]  ;;  %v813_v0 = vor.u32 1.1754944e-38, %v812_v26  ;;  %1641 = vmatpush.msra.mxu2 %v1465_v49  ;;  %1623 = vmatpush.msra.mxu1 %v1447_v58  ;;  %v1461_v54 = vld [vmem:[%s3960_s5 + $0x398] sm:$0xff] }
 0x111   :  { %v1302_v17 = vadd.f32 %v1301_v3, %v1300_v56  ;;  %v1314_v40 = vadd.f32 %v1313_v52, %v3747_v39  ;;  %2179 = vlog2.f32 %v3599_v63  ;;  %1658 = vmatpush.msra.mxu3 %v1484_v42  ;;  %v937_v63 = vmul.f32 %v3778_v44, %v3671_v50  ;;  %v1426_v39 = vld [vmem:[%s3960_s5 + $0x280] sm:$0xff]  ;;  %1607 = vmatpush.msrb.mxu0 %v1427_v34  ;;  %v1479_v25 = vld [vmem:[%s3960_s5 + $0x428] sm:$0xff] }
 0x112   :  { %v1307_v1 = vrot.slane %v1306_v21, 4  ;;  %v1321_v32 = vsel %vm1272_vm2, %v1269_v61, 0.0  ;;  %2181 = vlog2.f32 %v3536_v31  ;;  %v814_v55 = vsel %vm3821_vm10, %v813_v0, %v809_v16  ;;  %1642 = vmatpush.msra.mxu2 %v1464_v19  ;;  %v1482_v31 = vld [vmem:[%s3960_s5 + $0x440] sm:$0xff]  ;;  %1624 = vmatpush.msra.mxu1 %v1446_v30  ;;  %v1237_v16 = vpop.f32.mrf.mxu1  ;;  %v1459_v19 = vld [vmem:[%s3960_s5 + $0x388] sm:$0xff] }
 0x113   :  { %v1315_v59 = vrot.slane %v1314_v40, 4  ;;  %v1322_v28 = vadd.f32 %v1321_v32, %v1260_v57  ;;  %v1303_v9 = vrot.slane %v1302_v17, 1  ;;  %v1015_v22 = vmul.f32 %v997_v60, %v3347_v8  ;;  %960 = vst.msk [vmem:[%s3961_s6 + $0x40] sm:$0xff] %vm959_vm0, %v814_v55  ;;  %1659 = vmatpush.msra.mxu3 %v1483_v41  ;;  %1608 = vmatpush.msrb.mxu0 %v1426_v39  ;;  %v1462_v8 = vld [vmem:[%s3960_s5 + $0x3a0] sm:$0xff] }
 0x114   :  { %v1006_v2 = vsub.f32 1.0, %v3834_v36  ;;  %v1308_v7 = vadd.f32 %v1307_v1, %v1306_v21  ;;  %v938_v46 = vsub.f32 1.0, %v937_v63  ;;  %vm942_vm11 = vweird.f32 %v3778_v44  ;;  %1643 = vmatpush.msra.mxu2 %v1463_v33  ;;  %1625 = vmatpush.msra.mxu1 %v1445_v51  ;;  %v1442_v21 = vld [vmem:[%s3960_s5 + $0x300] sm:$0xff]  ;;  %v1477_v33 = vld [vmem:[%s3960_s5 + $0x418] sm:$0xff] }
 0x115   :  { %v1316_v38 = vadd.f32 %v1315_v59, %v1314_v40  ;;  %v1323_v47 = vrot.slane %v1322_v28, 4  ;;  %v1304_v27 = vadd.f32 %v1303_v9, %v1302_v17  ;;  %v945_v23 = vand.u32 2147483647, %v3671_v50  ;;  %1660 = vmatpush.msra.mxu3 %v1482_v31 }
 0x116   :  { %v1309_v60 = vrot.slane %v1308_v7, 2  ;;  %v939_v5 = vmul.f32 %v3778_v44, %v938_v46  ;;  %v947_v62 = vand.u32 2147483648, %v3671_v50  ;;  %v1040_v57 = vmul.f32 0.6931472, %v3804_v45  ;;  %1644 = vmatpush.msra.mxu2 %v1462_v8  ;;  %1626 = vmatpush.msra.mxu1 %v1444_v6 }
 0x117   :  { %v2180_v13 = vpop.eup %2179  ;;  %v1317_v56 = vrot.slane %v1316_v38, 2  ;;  %v1324_v29 = vadd.f32 %v1323_v47, %v1322_v28  ;;  %1569 = vmatmul.f32.vlgmr.msrb.gmra.mxu2 %v1304_v27  ;;  %2183 = vlog2.f32 %v3671_v50  ;;  %vm941_vm12 = vweird.f32 %v3671_v50  ;;  %1661 = vmatpush.msra.mxu3 %v1481_v37  ;;  %v1460_v50 = vld [vmem:[%s3960_s5 + $0x390] sm:$0xff]  ;;  %v1251_v28 = vpop.f32.mrf.mxu2 }
 0x118   :  { %v2182_v18 = vpop.eup %2181  ;;  %v1310_v10 = vadd.f32 %v1309_v60, %v1308_v7  ;;  %v1042_v12 = vmul.f32 0.6931472, %v2180_v13  ;;  %v940_v20 = vadd.f32 %v3778_v44, %v939_v5  ;;  %vm3900_vm13 = vmor %vm941_vm12, %vm942_vm11  ;;  %v948_v3 = vor.u32 1.1754944e-38, %v947_v62  ;;  %1645 = vmatpush.msra.mxu2 %v1461_v54  ;;  %1627 = vmatpush.msra.mxu1 %v1443_v24 }
 0x119   :  { %v1318_v26 = vadd.f32 %v1317_v56, %v1316_v38  ;;  %v1325_v53 = vrot.slane %v1324_v29, 2  ;;  %v1058_v49 = vmul.f32 0.6931472, %v2182_v18  ;;  %vm946_vm14 = vcmp.eq.f32.partialorder %v945_v23, 8.507059e+37  ;;  %1662 = vmatpush.msra.mxu3 %v1480_v15  ;;  %v1474_v38 = vld [vmem:[%s3960_s5 + $0x400] sm:$0xff] }
 0x11a   :  { %v944_v42 = vsel %vm3900_vm13, %v3778_v44, %v940_v20  ;;  %vm969_vm15 = vcmask 797696   ;;  %v1311_v58 = vrot.slane %v1310_v10, 1  ;;  %v1068_v44 = vadd.f32 %v1040_v57, %v3146_v4  ;;  %1646 = vmatpush.msra.mxu2 %v1460_v50  ;;  %1628 = vmatpush.msra.mxu1 %v1442_v21  ;;  %v1458_v4 = vld [vmem:[%s3960_s5 + $0x380] sm:$0xff] }
 0x11b   :  { %v1326_v52 = vadd.f32 %v1325_v53, %v1324_v29  ;;  %v1077_v61 = vadd.f32 %v1058_v49, %v3578_v48  ;;  %v949_v35 = vsel %vm946_vm14, %v948_v3, %v944_v42  ;;  %v1319_v34 = vrot.slane %v1318_v26, 1  ;;  %1663 = vmatpush.msra.mxu3 %v1479_v25  ;;  %v1478_v48 = vld [vmem:[%s3960_s5 + $0x420] sm:$0xff] }
 0x11c   :  { %v1069_v17 = vadd.f32 %v1042_v12, %v1015_v22  ;;  %970 = vst.msk [vmem:[%s3961_s6 + $0x88] sm:$0xf] %vm969_vm15, %v949_v35  ;;  %v1312_v40 = vadd.f32 %v1311_v58, %v1310_v10  ;;  %v1024_v32 = vmul.f32 %v1006_v2, %v3486_v11  ;;  %v1261_v63 = vmul.f32 %v3819_v43, %v1068_v44  ;;  %v1476_v11 = vld [vmem:[%s3960_s5 + $0x410] sm:$0xff]  ;;  %v1475_v22 = vld [vmem:[%s3960_s5 + $0x408] sm:$0xff]  ;;  %s2211_s5 = smov [#allocation2]  }
 0x11d   :  { %v2184_v0 = vpop.eup %2183  ;;  %v1270_v41 = vmul.f32 %v1237_v16, %v1077_v61  ;;  %v1320_v30 = vadd.f32 %v1319_v34, %v1318_v26  ;;  %v1327_v1 = vrot.slane %v1326_v52, 1  ;;  %1647 = vmatpush.msra.mxu2 %v1459_v19  ;;  %1664 = vmatpush.msra.mxu3 %v1478_v48  ;;  %s1682_s0 = sshll.u32 %s2211_s5, 4  ;;  %vm1673_vm1 = vcmask 8192   ;;  %s1683_s0 = int_to_ptr.vmem [resolvable:$true] %s1682_s0 }
 0x11e   :  { %v1060_v39 = vmul.f32 0.6931472, %v2184_v0  ;;  %1589 = vmatmul.f32.vlgmr.msrb.gmra.mxu3 %v1312_v40  ;;  %v1262_v9 = vmul.f32 %v3870_v14, %v1069_v17 }
 0x11f   :  { %v1329_v59 = vsel %vm1272_vm2, %v1270_v41, 0.0  ;;  %1609 = vmatmul.f32.vlgmr.msrb.gmra.mxu0 %v1320_v30  ;;  %v1328_v55 = vadd.f32 %v1327_v1, %v1326_v52  ;;  %1648 = vmatpush.msra.mxu2 %v1458_v4 }
 0x120   :  { %v1330_v31 = vadd.f32 %v1329_v59, %v1261_v63  ;;  %v1078_v36 = vadd.f32 %v1060_v39, %v1024_v32  ;;  %1665 = vmatpush.msra.mxu3 %v1477_v33  ;;  %v1337_v2 = vsel %vm959_vm0, %v1262_v9, 0.0 }
 0x121   :  { %1629 = vmatmul.f32.vlgmr.msra.gmra.mxu1 %v1328_v55 }
 0x122   :  { %v1331_v43 = vrot.slane %v1330_v31, 4  ;;  %v1271_v51 = vmul.f32 %v1251_v28, %v1078_v36  ;;  %1666 = vmatpush.msra.mxu3 %v1476_v11 }
 0x124   :  { %v1332_v7 = vadd.f32 %v1331_v43, %v1330_v31  ;;  %v1338_v46 = vsel %vm969_vm15, %v1271_v51, 0.0  ;;  %1667 = vmatpush.msra.mxu3 %v1475_v22 }
 0x125   :  { %v1339_v47 = vadd.f32 %v1338_v46, %v1337_v2 }
 0x126   :  { %v1333_v14 = vrot.slane %v1332_v7, 2  ;;  %1668 = vmatpush.msra.mxu3 %v1474_v38 }
 0x127   :  { %v1340_v27 = vrot.slane %v1339_v47, 4 }
 0x128   :  { %v1334_v8 = vadd.f32 %v1333_v14, %v1332_v7 }
 0x129   :  { %v1341_v37 = vadd.f32 %v1340_v27, %v1339_v47 }
 0x12a   :  { %v1335_v60 = vrot.slane %v1334_v8, 1 }
 0x12b   :  { %v1342_v5 = vrot.slane %v1341_v37, 2 }
 0x12c   :  { %v1336_v23 = vadd.f32 %v1335_v60, %v1334_v8 }
 0x12d   :  { %v1343_v62 = vadd.f32 %v1342_v5, %v1341_v37 }
 0x12e   :  { %1649 = vmatmul.f32.vlgmr.msra.gmra.mxu2 %v1336_v23 }
 0x12f   :  { %v1344_v6 = vrot.slane %v1343_v62, 1 }
 0x131   :  { %v1345_v13 = vadd.f32 %v1344_v6, %v1343_v62 }
 0x133   :  { %2001 = vmatmul.msk.f32.vlgmr.msra.gmra.mxu3 %vm959_vm0, %v1345_v13 }
 0x18b   :  { %v1530_v57 = vpop.f32.mrf.mxu0  ;;  %v1550_v54 = vpop.f32.mrf.mxu1 }
 0x18f   :  { %v1510_v56 = vpop.f32.mrf.mxu3 }
 0x190   :  { %v1531_v29 = vadd.f32 %v1530_v57, %v1510_v56 }
 0x192   :  { %v1551_v18 = vadd.f32 %v1550_v54, %v1531_v29 }
 0x19a   :  { %v1570_v15 = vpop.f32.mrf.mxu2 }
 0x19b   :  { %v1571_v12 = vadd.f32 %v1570_v15, %v1551_v18 }
 0x19c   :  { %v1610_v24 = vpop.f32.mrf.mxu0 }
 0x19e   :  { %v1630_v53 = vpop.f32.mrf.mxu1 }
 0x1a1   :  { %v1590_v10 = vpop.f32.mrf.mxu3 }
 0x1a2   :  { %v1591_v20 = vadd.f32 %v1590_v10, %v1571_v12 }
 0x1a4   :  { %v1611_v26 = vadd.f32 %v1610_v24, %v1591_v20 }
 0x1a6   :  { %v1631_v45 = vadd.f32 %v1630_v53, %v1611_v26 }
 0x1b1   :  { %v1650_v49 = vpop.f32.mrf.mxu2 }
 0x1b2   :  { %v1651_v3 = vadd.f32 %v1650_v49, %v1631_v45 }
 0x1b6   :  { %v1670_v50 = vpop.f32.mrf.mxu3 }
 0x1b7   :  { %v1671_v25 = vadd.f32 %v1670_v50, %v1651_v3 }
 0x1b9   :  { %1674 = vst.msk [vmem:[#allocation2] sm:$0x1] %vm1673_vm1, %v1671_v25 }
 0x1ba   :  { %1687 = dma.vmem_to_hbm [thread:$0]  %s1683_s0, 16, %s1685_s19, [#allocation3]  }
 0x1bb   :  { %2209 = dma.done.wait [#allocation3], 16  }
 0x1bc   :  { %2210 = vsyncadd [#allocation3], 4294967280 }
 0x1bd   :  { %1694 = vsyncpa [#allocation3], 1 }

</bundles_post_ra>
